<compile_context>
chip_gen: v7x
topology: tpu7x:2x2x1
jax: 0.10.0
libtpu: 0.0.40
codegen_flags: <defaults>
</compile_context>

<pallas_src>
import functools

import jax
import jax.numpy as jnp
from jax.experimental import pallas as pl
from jax.experimental.pallas import tpu as pltpu

BN_EPS = 1e-5
BN_SCALE = 1.0 / (1.0 + BN_EPS) ** 0.5  # gamma=1, beta=0, mean=0, var=1 (eval mode)

CELL_STRIDES = (1, 2, 2, 2)


def _round_up(x, m):
    return (x + m - 1) // m * m


def _tile_m(M):
    """Uniform M tiling: TM=512 for big M, otherwise one 8-aligned block."""
    TM = 512
    if M >= TM:
        return _round_up(M, TM), TM
    m_pad = _round_up(max(M, 8), 8)
    return m_pad, m_pad


# --------------------------- Pallas kernels ---------------------------------

def _mm_kernel(a_ref, w_ref, b_ref, o_ref, *, relu_out):
    # out = act(a @ w + b); a/w in bf16, accumulate + epilogue in f32.
    out = jnp.dot(a_ref[...], w_ref[...], preferred_element_type=jnp.float32)
    out = out + b_ref[...]
    if relu_out:
        out = jnp.maximum(out, 0.0)
    o_ref[...] = out.astype(o_ref.dtype)


def _mm_pre_kernel(a_ref, ps_ref, pb_ref, w_ref, b_ref, o_ref, *, relu_out):
    # Pre-activation BN+ReLU fused on the patches (per-K affine), then matmul.
    a = a_ref[...].astype(jnp.float32)
    a = jnp.maximum(a * ps_ref[...] + pb_ref[...], 0.0)
    out = jnp.dot(a.astype(jnp.bfloat16), w_ref[...],
                  preferred_element_type=jnp.float32)
    out = out + b_ref[...]
    if relu_out:
        out = jnp.maximum(out, 0.0)
    o_ref[...] = out.astype(o_ref.dtype)


def _cell_lstm_kernel(ay_ref, wy_ref, ah_ref, wh_ref, b_ref, c_ref, hc_ref, *, C):
    # gates = patches(y) @ Wy + patches(h) @ Wh + b  (4C = 128 lanes, lane-dense)
    g = jnp.dot(ay_ref[...], wy_ref[...], preferred_element_type=jnp.float32)
    g = g + jnp.dot(ah_ref[...], wh_ref[...], preferred_element_type=jnp.float32)
    g = g + b_ref[...]
    # Full 128-lane transcendentals on the EUP, then pick quarters.
    sig = 1.0 / (1.0 + jnp.exp(-g))
    th = jnp.tanh(g)
    i_g = sig[:, 0:C]
    f_g = sig[:, C:2 * C]
    o_g = sig[:, 3 * C:4 * C]
    g_c = th[:, 2 * C:3 * C]
    c_new = f_g * c_ref[...] + i_g * g_c
    h_new = o_g * jnp.tanh(c_new)
    pad = jnp.zeros((h_new.shape[0], 2 * C), jnp.float32)
    # Single lane-dense packed store: [h | c | zeros].
    hc_ref[...] = jnp.concatenate([h_new, c_new, pad], axis=-1)


# --------------------------- kernel wrappers ---------------------------------

def pallas_conv_matmul(patches, w2d, bias, *, relu_out=False,
                       pre_scale=None, pre_shift=None):
    """out = act( (pre?(patches)) @ w + bias ), bf16 MXU, lane-dense N padding."""
    M, K = patches.shape
    N = w2d.shape[1]
    N_pad = _round_up(N, 128)
    M_pad, TM = _tile_m(M)

    a = patches.astype(jnp.bfloat16)
    if M_pad != M:
        a = jnp.pad(a, ((0, M_pad - M), (0, 0)))
    w_p, b_p = w2d, bias
    if N_pad != N:
        w_p = jnp.pad(w_p, ((0, 0), (0, N_pad - N)))
        b_p = jnp.pad(b_p, (0, N_pad - N))
    w_bf = w_p.astype(jnp.bfloat16)
    b2 = b_p.reshape(1, N_pad).astype(jnp.float32)

    if pre_scale is None:
        kernel = functools.partial(_mm_kernel, relu_out=relu_out)
        in_specs = [
            pl.BlockSpec((TM, K), lambda i: (i, 0)),
            pl.BlockSpec((K, N_pad), lambda i: (0, 0)),
            pl.BlockSpec((1, N_pad), lambda i: (0, 0)),
        ]
        args = (a, w_bf, b2)
    else:
        kernel = functools.partial(_mm_pre_kernel, relu_out=relu_out)
        in_specs = [
            pl.BlockSpec((TM, K), lambda i: (i, 0)),
            pl.BlockSpec((1, K), lambda i: (0, 0)),
            pl.BlockSpec((1, K), lambda i: (0, 0)),
            pl.BlockSpec((K, N_pad), lambda i: (0, 0)),
            pl.BlockSpec((1, N_pad), lambda i: (0, 0)),
        ]
        args = (a,
                pre_scale.reshape(1, K).astype(jnp.float32),
                pre_shift.reshape(1, K).astype(jnp.float32),
                w_bf, b2)

    out = pl.pallas_call(
        kernel,
        out_shape=jax.ShapeDtypeStruct((M_pad, N_pad), jnp.bfloat16),
        grid=(pl.cdiv(M_pad, TM),),
        in_specs=in_specs,
        out_specs=pl.BlockSpec((TM, N_pad), lambda i: (i, 0)),
        compiler_params=pltpu.CompilerParams(dimension_semantics=("parallel",)),
    )(*args)
    return out[:M, :N]


def pallas_cell_lstm(py, wy2d, ph, wh2d, bias, c_prev_flat):
    """Fused ConvLSTM gate conv (dual matmul) + gate nonlinearity + state update.

    py/ph: (M, 9C) bf16 im2col patches of y and h_prev; c_prev_flat: (M, C) f32.
    Returns (h, c) each (M, C) f32.
    """
    M, Ky = py.shape
    Kh = ph.shape[1]
    C = c_prev_flat.shape[1]
    G = 4 * C  # 128 for cout=32 -> lane-dense gates & output
    M_pad, TM = _tile_m(M)
    if M_pad != M:
        py = jnp.pad(py, ((0, M_pad - M), (0, 0)))
        ph = jnp.pad(ph, ((0, M_pad - M), (0, 0)))
        c_prev_flat = jnp.pad(c_prev_flat, ((0, M_pad - M), (0, 0)))

    hc = pl.pallas_call(
        functools.partial(_cell_lstm_kernel, C=C),
        out_shape=jax.ShapeDtypeStruct((M_pad, G), jnp.float32),
        grid=(pl.cdiv(M_pad, TM),),
        in_specs=[
            pl.BlockSpec((TM, Ky), lambda i: (i, 0)),
            pl.BlockSpec((Ky, G), lambda i: (0, 0)),
            pl.BlockSpec((TM, Kh), lambda i: (i, 0)),
            pl.BlockSpec((Kh, G), lambda i: (0, 0)),
            pl.BlockSpec((1, G), lambda i: (0, 0)),
            pl.BlockSpec((TM, C), lambda i: (i, 0)),
        ],
        out_specs=pl.BlockSpec((TM, G), lambda i: (i, 0)),
        compiler_params=pltpu.CompilerParams(dimension_semantics=("parallel",)),
    )(py.astype(jnp.bfloat16), wy2d.astype(jnp.bfloat16),
      ph.astype(jnp.bfloat16), wh2d.astype(jnp.bfloat16),
      bias.reshape(1, G).astype(jnp.float32),
      c_prev_flat.astype(jnp.float32))
    return hc[:M, :C], hc[:M, C:2 * C]


# --------------------------- conv glue (im2col) ------------------------------

def _im2col(x, kh, kw, stride, pad):
    B, H, W, C = x.shape
    xp = jnp.pad(x, ((0, 0), (pad, pad), (pad, pad), (0, 0)))
    Ho = (H + 2 * pad - kh) // stride + 1
    Wo = (W + 2 * pad - kw) // stride + 1
    cols = []
    for i in range(kh):
        for j in range(kw):
            cols.append(xp[:, i:i + stride * Ho:stride, j:j + stride * Wo:stride, :])
    patches = jnp.concatenate(cols, axis=-1)  # (B, Ho, Wo, kh*kw*C)
    return patches.reshape(B * Ho * Wo, kh * kw * C), (B, Ho, Wo)


def conv2d(x, w, bias, stride, pad, *, relu_out=False,
           pre_scale=None, pre_shift=None):
    """NHWC conv via im2col + Pallas bf16 matmul.

    pre_scale/pre_shift (per input channel): fused relu(x*s+b) prologue applied
    to the patches inside the kernel (pre-activation BN+ReLU).
    """
    kh, kw, cin, cout = w.shape
    patches, (B, Ho, Wo) = _im2col(x.astype(jnp.bfloat16), kh, kw, stride, pad)
    ps = pb = None
    if pre_scale is not None:
        ps = jnp.tile(pre_scale.astype(jnp.float32), kh * kw)
        pb = jnp.tile(pre_shift.astype(jnp.float32), kh * kw)
    out = pallas_conv_matmul(patches, w.reshape(kh * kw * cin, cout), bias,
                             relu_out=relu_out, pre_scale=ps, pre_shift=pb)
    return out.reshape(B, Ho, Wo, cout)


# --------------------------- parameters --------------------------------------

def _conv_w(key, kh, kw, cin, cout):
    fan_in = kh * kw * cin
    return jax.random.normal(key, (kh, kw, cin, cout), jnp.float32) / jnp.sqrt(
        jnp.float32(fan_in))


def _fold_post_bn(w, scale):
    # Fold eval-mode BN scale (per output channel) into the conv weights.
    return w * scale.reshape(1, 1, 1, -1)


def _init_preact(key, cin, cout):
    k1, k2, k3 = jax.random.split(key, 3)
    bn2_s = jnp.full((cout,), BN_SCALE, jnp.float32)
    return dict(
        bn1_s=jnp.full((cin,), BN_SCALE, jnp.float32),   # pre-activation BN (prologue)
        bn1_b=jnp.zeros((cin,), jnp.float32),
        conv1_w=_fold_post_bn(_conv_w(k1, 3, 3, cin, cout), bn2_s),  # BN2 folded
        conv1_b=jnp.zeros((cout,), jnp.float32),                      # BN2 shift
        conv2_w=_conv_w(k2, 3, 3, cout, cout),
        conv2_b=jnp.zeros((cout,), jnp.float32),
        sc_w=_conv_w(k3, 1, 1, cin, cout),
        sc_b=jnp.zeros((cout,), jnp.float32),
    )


def _init_cell(key, cin, cout):
    k1, k2 = jax.random.split(key)
    lstm_w = _conv_w(k2, 3, 3, 2 * cout, 4 * cout)
    return dict(
        conv_w=_fold_post_bn(_conv_w(k1, 3, 3, cin, cout),
                             jnp.full((cout,), BN_SCALE, jnp.float32)),
        conv_b=jnp.zeros((cout,), jnp.float32),
        lstm_wy=lstm_w[:, :, :cout, :],   # gate conv split: y part
        lstm_wh=lstm_w[:, :, cout:, :],   # gate conv split: h part
        lstm_b=jnp.zeros((4 * cout,), jnp.float32),
    )


def init_params(key, cin=1, cout=32):
    base = 8
    keys = jax.random.split(key, 7)
    stem = dict(
        conv1_w=_fold_post_bn(_conv_w(keys[0], 7, 7, cin, base * 2),
                              jnp.full((base * 2,), BN_SCALE, jnp.float32)),
        conv1_b=jnp.zeros((base * 2,), jnp.float32),
        block1=_init_preact(keys[1], base * 2, base * 4),
        block2=_init_preact(keys[2], base * 4, base * 8),
    )
    chans = [base * 8, cout, cout, cout, cout]
    cells = [_init_cell(keys[3 + i], chans[i], chans[i + 1]) for i in range(4)]
    return dict(stem=stem, feedback=dict(cells=cells))


# --------------------------- FBN forward --------------------------------------

def _preact_block(p, x, stride):
    # conv1: fused [BN1+ReLU prologue] -> conv -> [BN2(+fold)+ReLU epilogue]
    out = conv2d(x, p["conv1_w"], p["conv1_b"], stride, 1, relu_out=True,
                 pre_scale=p["bn1_s"], pre_shift=p["bn1_b"])
    out = conv2d(out, p["conv2_w"], p["conv2_b"], 1, 1)
    # shortcut: fused [BN1+ReLU prologue] -> 1x1 strided conv
    sc = conv2d(x, p["sc_w"], p["sc_b"], stride, 0,
                pre_scale=p["bn1_s"], pre_shift=p["bn1_b"])
    return out + sc


def _stem_forward(p, x):
    x = conv2d(x, p["conv1_w"], p["conv1_b"], 2, 3, relu_out=True)
    x = _preact_block(p["block1"], x, 2)
    x = _preact_block(p["block2"], x, 2)
    return x


def _feedback_step(cells, x, state):
    outs, new_state, inp = [], [], x
    for i, cell in enumerate(cells):
        # ConvLayer (conv + folded BN + ReLU) at this level's stride.
        y = conv2d(inp, cell["conv_w"], cell["conv_b"], CELL_STRIDES[i], 1,
                   relu_out=True)
        h_prev, c_prev = state[i]
        B, Hh, Ww, C = y.shape
        # Fused ConvLSTM: gates = conv(y)·Wy + conv(h)·Wh + b, state update in-kernel.
        py, _ = _im2col(y, 3, 3, 1, 1)
        ph, _ = _im2col(h_prev.astype(jnp.bfloat16), 3, 3, 1, 1)
        h_flat, c_flat = pallas_cell_lstm(
            py, cell["lstm_wy"].reshape(9 * C, 4 * C),
            ph, cell["lstm_wh"].reshape(9 * C, 4 * C),
            cell["lstm_b"], c_prev.reshape(B * Hh * Ww, C))
        h = h_flat.reshape(B, Hh, Ww, C)
        c = c_flat.reshape(B, Hh, Ww, C)
        new_state.append((h, c))
        outs.append(h)
        inp = h
    return outs, new_state


def fbn_forward(params, x_tnchw):
    # x: (T, N, C, H, W).  SequenceWise == time_to_batch -> stem -> batch_to_time.
    T, N, Ci, H, W = x_tnchw.shape
    x = x_tnchw.reshape(T * N, Ci, H, W).transpose(0, 2, 3, 1)  # NHWC
    x1 = _stem_forward(params["stem"], x)                        # (T*N, H/8, W/8, 64)
    _, Hs, Ws, Cs = x1.shape
    x1 = x1.reshape(T, N, Hs, Ws, Cs)

    cells = params["feedback"]["cells"]
    cout = cells[0]["lstm_b"].shape[0] // 4

    # RNNWise(Feedback): scan over time carrying per-level ConvLSTM state.
    state, hh, ww = [], Hs, Ws
    for s in CELL_STRIDES:
        hh = (hh + 2 - 3) // s + 1
        ww = (ww + 2 - 3) // s + 1
        z = jnp.zeros((N, hh, ww, cout), jnp.float32)
        state.append((z, z))
    state0 = tuple(state)

    def step(carry, xt):
        outs, new_state = _feedback_step(cells, xt, list(carry))
        return tuple(new_state), tuple(outs)

    _, per_level = jax.lax.scan(step, state0, x1)

    results = []
    for o in per_level:  # (T, N, Hl, Wl, C) f32
        Tt, Nn, Hh, Ww, Cc = o.shape
        # outs = [time_to_batch(item)[0] for item in outs]  -> (T*N, C, Hl, Wl) NCHW
        results.append(o.reshape(Tt * Nn, Hh, Ww, Cc)
                        .transpose(0, 3, 1, 2).astype(jnp.float32))
    return results


# --------------------------- main ---------------------------------------------

if __name__ == "__main__":
    key = jax.random.PRNGKey(0)
    kp, kx = jax.random.split(key)
    params = init_params(kp, cin=1, cout=32)

    T, N, C, H, W = 2, 2, 1, 64, 64            # small (T, N, C, H, W) sequence
    x = jax.random.normal(kx, (T, N, C, H, W), jnp.float32)

    fbn = jax.jit(fbn_forward)
    outs = fbn(params, x)
    outs = jax.block_until_ready(outs)

    expected = [(T * N, 32, 8, 8), (T * N, 32, 4, 4), (T * N, 32, 2, 2), (T * N, 32, 1, 1)]
    assert [tuple(o.shape) for o in outs] == expected, [o.shape for o in outs]
    assert all(bool(jnp.all(jnp.isfinite(o))) for o in outs)
    print("KERNEL_OK")
</pallas_src>

<mosaic_0001>
module attributes {stable_mosaic.version = 11 : i64} {
  func.func @_mm_kernel(%arg0: i32, %arg1: memref<512x49xbf16, #tpu.memory_space<vmem>>, %arg2: memref<49x128xbf16, #tpu.memory_space<vmem>>, %arg3: memref<1x128xf32, #tpu.memory_space<vmem>>, %arg4: memref<512x128xbf16, #tpu.memory_space<vmem>>) attributes {dimension_semantics = [#tpu.dimension_semantics<parallel>], iteration_bounds = array<i64: 8>, scalar_prefetch = 0 : i64, scratch_operands = 0 : i64, tpu.core_type = #tpu.core_type<tc>, window_params = [{transform_indices = @transform_0, window_bounds = array<i64: 512, 49>}, {pipeline_mode = #tpu.pipeline_mode<synchronous>, transform_indices = @transform_1, window_bounds = array<i64: 49, 128>}, {pipeline_mode = #tpu.pipeline_mode<synchronous>, transform_indices = @transform_2, window_bounds = array<i64: 1, 128>}, {transform_indices = @transform_3, window_bounds = array<i64: 512, 128>}]} {
    %c0 = arith.constant 0 : index
    %c0_0 = arith.constant 0 : index
    %0 = vector.load %arg1[%c0, %c0_0] : memref<512x49xbf16, #tpu.memory_space<vmem>>, vector<512x49xbf16>
    %c0_1 = arith.constant 0 : index
    %c0_2 = arith.constant 0 : index
    %1 = vector.load %arg2[%c0_1, %c0_2] : memref<49x128xbf16, #tpu.memory_space<vmem>>, vector<49x128xbf16>
    %cst = arith.constant dense<0.000000e+00> : vector<512x128xf32>
    %2 = tpu.matmul %0, %1, %cst {dimension_numbers = #tpu.dot_dimension_numbers<[1], [0], [0], [1], [0, 0, 1, 1], [], []>} : vector<512x49xbf16>, vector<49x128xbf16>, vector<512x128xf32> -> vector<512x128xf32>
    %c0_3 = arith.constant 0 : index
    %c0_4 = arith.constant 0 : index
    %3 = vector.load %arg3[%c0_3, %c0_4] : memref<1x128xf32, #tpu.memory_space<vmem>>, vector<1x128xf32>
    %4 = vector.broadcast %3 : vector<1x128xf32> to vector<512x128xf32>
    %5 = arith.addf %2, %4 : vector<512x128xf32>
    %cst_5 = arith.constant 0.000000e+00 : f32
    %6 = vector.broadcast %cst_5 : f32 to vector<512x128xf32>
    %7 = arith.maximumf %5, %6 : vector<512x128xf32>
    %8 = arith.truncf %7 : vector<512x128xf32> to vector<512x128xbf16>
    %c0_6 = arith.constant 0 : index
    %c0_7 = arith.constant 0 : index
    %9 = vector.load %arg4[%c0_6, %c0_7] : memref<512x128xbf16, #tpu.memory_space<vmem>>, vector<512x128xbf16>
    tpu.vector_store %arg4[%c0_6, %c0_7], %8 {strides = array<i32>} : memref<512x128xbf16, #tpu.memory_space<vmem>>, vector<512x128xbf16>,
    return
  }
  func.func @transform_0(%arg0: i32) -> (i32, i32) {
    %c0_i32 = arith.constant 0 : i32
    %c0_i32_0 = arith.constant 0 : i32
    return %arg0, %c0_i32 : i32, i32
  }
  func.func @transform_1(%arg0: i32) -> (i32, i32) {
    %c0_i32 = arith.constant 0 : i32
    %c0_i32_0 = arith.constant 0 : i32
    %c0_i32_1 = arith.constant 0 : i32
    return %c0_i32, %c0_i32_0 : i32, i32
  }
  func.func @transform_2(%arg0: i32) -> (i32, i32) {
    %c0_i32 = arith.constant 0 : i32
    %c0_i32_0 = arith.constant 0 : i32
    %c0_i32_1 = arith.constant 0 : i32
    return %c0_i32, %c0_i32_0 : i32, i32
  }
  func.func @transform_3(%arg0: i32) -> (i32, i32) {
    %c0_i32 = arith.constant 0 : i32
    %c0_i32_0 = arith.constant 0 : i32
    return %arg0, %c0_i32 : i32, i32
  }
}

module attributes {stable_mosaic.version = 11 : i64} {
  func.func @_mm_pre_kernel(%arg0: i32, %arg1: memref<512x144xbf16, #tpu.memory_space<vmem>>, %arg2: memref<1x144xf32, #tpu.memory_space<vmem>>, %arg3: memref<1x144xf32, #tpu.memory_space<vmem>>, %arg4: memref<144x128xbf16, #tpu.memory_space<vmem>>, %arg5: memref<1x128xf32, #tpu.memory_space<vmem>>, %arg6: memref<512x128xbf16, #tpu.memory_space<vmem>>) attributes {dimension_semantics = [#tpu.dimension_semantics<parallel>], iteration_bounds = array<i64: 2>, scalar_prefetch = 0 : i64, scratch_operands = 0 : i64, tpu.core_type = #tpu.core_type<tc>, window_params = [{transform_indices = @transform_0, window_bounds = array<i64: 512, 144>}, {pipeline_mode = #tpu.pipeline_mode<synchronous>, transform_indices = @transform_1, window_bounds = array<i64: 1, 144>}, {pipeline_mode = #tpu.pipeline_mode<synchronous>, transform_indices = @transform_2, window_bounds = array<i64: 1, 144>}, {pipeline_mode = #tpu.pipeline_mode<synchronous>, transform_indices = @transform_3, window_bounds = array<i64: 144, 128>}, {pipeline_mode = #tpu.pipeline_mode<synchronous>, transform_indices = @transform_4, window_bounds = array<i64: 1, 128>}, {transform_indices = @transform_5, window_bounds = array<i64: 512, 128>}]} {
    %c0 = arith.constant 0 : index
    %c0_0 = arith.constant 0 : index
    %0 = vector.load %arg1[%c0, %c0_0] : memref<512x144xbf16, #tpu.memory_space<vmem>>, vector<512x144xbf16>
    %1 = arith.extf %0 : vector<512x144xbf16> to vector<512x144xf32>
    %c0_1 = arith.constant 0 : index
    %c0_2 = arith.constant 0 : index
    %2 = vector.load %arg2[%c0_1, %c0_2] : memref<1x144xf32, #tpu.memory_space<vmem>>, vector<1x144xf32>
    %3 = vector.broadcast %2 : vector<1x144xf32> to vector<512x144xf32>
    %4 = arith.mulf %1, %3 : vector<512x144xf32>
    %c0_3 = arith.constant 0 : index
    %c0_4 = arith.constant 0 : index
    %5 = vector.load %arg3[%c0_3, %c0_4] : memref<1x144xf32, #tpu.memory_space<vmem>>, vector<1x144xf32>
    %6 = vector.broadcast %5 : vector<1x144xf32> to vector<512x144xf32>
    %7 = arith.addf %4, %6 : vector<512x144xf32>
    %cst = arith.constant 0.000000e+00 : f32
    %8 = vector.broadcast %cst : f32 to vector<512x144xf32>
    %9 = arith.maximumf %7, %8 : vector<512x144xf32>
    %10 = arith.truncf %9 : vector<512x144xf32> to vector<512x144xbf16>
    %c0_5 = arith.constant 0 : index
    %c0_6 = arith.constant 0 : index
    %11 = vector.load %arg4[%c0_5, %c0_6] : memref<144x128xbf16, #tpu.memory_space<vmem>>, vector<144x128xbf16>
    %cst_7 = arith.constant dense<0.000000e+00> : vector<512x128xf32>
    %12 = tpu.matmul %10, %11, %cst_7 {dimension_numbers = #tpu.dot_dimension_numbers<[1], [0], [0], [1], [0, 0, 1, 1], [], []>} : vector<512x144xbf16>, vector<144x128xbf16>, vector<512x128xf32> -> vector<512x128xf32>
    %c0_8 = arith.constant 0 : index
    %c0_9 = arith.constant 0 : index
    %13 = vector.load %arg5[%c0_8, %c0_9] : memref<1x128xf32, #tpu.memory_space<vmem>>, vector<1x128xf32>
    %14 = vector.broadcast %13 : vector<1x128xf32> to vector<512x128xf32>
    %15 = arith.addf %12, %14 : vector<512x128xf32>
    %cst_10 = arith.constant 0.000000e+00 : f32
    %16 = vector.broadcast %cst_10 : f32 to vector<512x128xf32>
    %17 = arith.maximumf %15, %16 : vector<512x128xf32>
    %18 = arith.truncf %17 : vector<512x128xf32> to vector<512x128xbf16>
    %c0_11 = arith.constant 0 : index
    %c0_12 = arith.constant 0 : index
    %19 = vector.load %arg6[%c0_11, %c0_12] : memref<512x128xbf16, #tpu.memory_space<vmem>>, vector<512x128xbf16>
    tpu.vector_store %arg6[%c0_11, %c0_12], %18 {strides = array<i32>} : memref<512x128xbf16, #tpu.memory_space<vmem>>, vector<512x128xbf16>,
    return
  }
  func.func @transform_0(%arg0: i32) -> (i32, i32) {
    %c0_i32 = arith.constant 0 : i32
    %c0_i32_0 = arith.constant 0 : i32
    return %arg0, %c0_i32 : i32, i32
  }
  func.func @transform_1(%arg0: i32) -> (i32, i32) {
    %c0_i32 = arith.constant 0 : i32
    %c0_i32_0 = arith.constant 0 : i32
    %c0_i32_1 = arith.constant 0 : i32
    return %c0_i32, %c0_i32_0 : i32, i32
  }
  func.func @transform_2(%arg0: i32) -> (i32, i32) {
    %c0_i32 = arith.constant 0 : i32
    %c0_i32_0 = arith.constant 0 : i32
    %c0_i32_1 = arith.constant 0 : i32
    return %c0_i32, %c0_i32_0 : i32, i32
  }
  func.func @transform_3(%arg0: i32) -> (i32, i32) {
    %c0_i32 = arith.constant 0 : i32
    %c0_i32_0 = arith.constant 0 : i32
    %c0_i32_1 = arith.constant 0 : i32
    return %c0_i32, %c0_i32_0 : i32, i32
  }
  func.func @transform_4(%arg0: i32) -> (i32, i32) {
    %c0_i32 = arith.constant 0 : i32
    %c0_i32_0 = arith.constant 0 : i32
    %c0_i32_1 = arith.constant 0 : i32
    return %c0_i32, %c0_i32_0 : i32, i32
  }
  func.func @transform_5(%arg0: i32) -> (i32, i32) {
    %c0_i32 = arith.constant 0 : i32
    %c0_i32_0 = arith.constant 0 : i32
    return %arg0, %c0_i32 : i32, i32
  }
}

module attributes {stable_mosaic.version = 11 : i64} {
  func.func @_mm_kernel(%arg0: i32, %arg1: memref<512x288xbf16, #tpu.memory_space<vmem>>, %arg2: memref<288x128xbf16, #tpu.memory_space<vmem>>, %arg3: memref<1x128xf32, #tpu.memory_space<vmem>>, %arg4: memref<512x128xbf16, #tpu.memory_space<vmem>>) attributes {dimension_semantics = [#tpu.dimension_semantics<parallel>], iteration_bounds = array<i64: 2>, scalar_prefetch = 0 : i64, scratch_operands = 0 : i64, tpu.core_type = #tpu.core_type<tc>, window_params = [{transform_indices = @transform_0, window_bounds = array<i64: 512, 288>}, {pipeline_mode = #tpu.pipeline_mode<synchronous>, transform_indices = @transform_1, window_bounds = array<i64: 288, 128>}, {pipeline_mode = #tpu.pipeline_mode<synchronous>, transform_indices = @transform_2, window_bounds = array<i64: 1, 128>}, {transform_indices = @transform_3, window_bounds = array<i64: 512, 128>}]} {
    %c0 = arith.constant 0 : index
    %c0_0 = arith.constant 0 : index
    %0 = vector.load %arg1[%c0, %c0_0] : memref<512x288xbf16, #tpu.memory_space<vmem>>, vector<512x288xbf16>
    %c0_1 = arith.constant 0 : index
    %c0_2 = arith.constant 0 : index
    %1 = vector.load %arg2[%c0_1, %c0_2] : memref<288x128xbf16, #tpu.memory_space<vmem>>, vector<288x128xbf16>
    %cst = arith.constant dense<0.000000e+00> : vector<512x128xf32>
    %2 = tpu.matmul %0, %1, %cst {dimension_numbers = #tpu.dot_dimension_numbers<[1], [0], [0], [1], [0, 0, 1, 1], [], []>} : vector<512x288xbf16>, vector<288x128xbf16>, vector<512x128xf32> -> vector<512x128xf32>
    %c0_3 = arith.constant 0 : index
    %c0_4 = arith.constant 0 : index
    %3 = vector.load %arg3[%c0_3, %c0_4] : memref<1x128xf32, #tpu.memory_space<vmem>>, vector<1x128xf32>
    %4 = vector.broadcast %3 : vector<1x128xf32> to vector<512x128xf32>
    %5 = arith.addf %2, %4 : vector<512x128xf32>
    %6 = arith.truncf %5 : vector<512x128xf32> to vector<512x128xbf16>
    %c0_5 = arith.constant 0 : index
    %c0_6 = arith.constant 0 : index
    %7 = vector.load %arg4[%c0_5, %c0_6] : memref<512x128xbf16, #tpu.memory_space<vmem>>, vector<512x128xbf16>
    tpu.vector_store %arg4[%c0_5, %c0_6], %6 {strides = array<i32>} : memref<512x128xbf16, #tpu.memory_space<vmem>>, vector<512x128xbf16>,
    return
  }
  func.func @transform_0(%arg0: i32) -> (i32, i32) {
    %c0_i32 = arith.constant 0 : i32
    %c0_i32_0 = arith.constant 0 : i32
    return %arg0, %c0_i32 : i32, i32
  }
  func.func @transform_1(%arg0: i32) -> (i32, i32) {
    %c0_i32 = arith.constant 0 : i32
    %c0_i32_0 = arith.constant 0 : i32
    %c0_i32_1 = arith.constant 0 : i32
    return %c0_i32, %c0_i32_0 : i32, i32
  }
  func.func @transform_2(%arg0: i32) -> (i32, i32) {
    %c0_i32 = arith.constant 0 : i32
    %c0_i32_0 = arith.constant 0 : i32
    %c0_i32_1 = arith.constant 0 : i32
    return %c0_i32, %c0_i32_0 : i32, i32
  }
  func.func @transform_3(%arg0: i32) -> (i32, i32) {
    %c0_i32 = arith.constant 0 : i32
    %c0_i32_0 = arith.constant 0 : i32
    return %arg0, %c0_i32 : i32, i32
  }
}

module attributes {stable_mosaic.version = 11 : i64} {
  func.func @_mm_pre_kernel(%arg0: i32, %arg1: memref<512x16xbf16, #tpu.memory_space<vmem>>, %arg2: memref<1x16xf32, #tpu.memory_space<vmem>>, %arg3: memref<1x16xf32, #tpu.memory_space<vmem>>, %arg4: memref<16x128xbf16, #tpu.memory_space<vmem>>, %arg5: memref<1x128xf32, #tpu.memory_space<vmem>>, %arg6: memref<512x128xbf16, #tpu.memory_space<vmem>>) attributes {dimension_semantics = [#tpu.dimension_semantics<parallel>], iteration_bounds = array<i64: 2>, scalar_prefetch = 0 : i64, scratch_operands = 0 : i64, tpu.core_type = #tpu.core_type<tc>, window_params = [{transform_indices = @transform_0, window_bounds = array<i64: 512, 16>}, {pipeline_mode = #tpu.pipeline_mode<synchronous>, transform_indices = @transform_1, window_bounds = array<i64: 1, 16>}, {pipeline_mode = #tpu.pipeline_mode<synchronous>, transform_indices = @transform_2, window_bounds = array<i64: 1, 16>}, {pipeline_mode = #tpu.pipeline_mode<synchronous>, transform_indices = @transform_3, window_bounds = array<i64: 16, 128>}, {pipeline_mode = #tpu.pipeline_mode<synchronous>, transform_indices = @transform_4, window_bounds = array<i64: 1, 128>}, {transform_indices = @transform_5, window_bounds = array<i64: 512, 128>}]} {
    %c0 = arith.constant 0 : index
    %c0_0 = arith.constant 0 : index
    %0 = vector.load %arg1[%c0, %c0_0] : memref<512x16xbf16, #tpu.memory_space<vmem>>, vector<512x16xbf16>
    %1 = arith.extf %0 : vector<512x16xbf16> to vector<512x16xf32>
    %c0_1 = arith.constant 0 : index
    %c0_2 = arith.constant 0 : index
    %2 = vector.load %arg2[%c0_1, %c0_2] : memref<1x16xf32, #tpu.memory_space<vmem>>, vector<1x16xf32>
    %3 = vector.broadcast %2 : vector<1x16xf32> to vector<512x16xf32>
    %4 = arith.mulf %1, %3 : vector<512x16xf32>
    %c0_3 = arith.constant 0 : index
    %c0_4 = arith.constant 0 : index
    %5 = vector.load %arg3[%c0_3, %c0_4] : memref<1x16xf32, #tpu.memory_space<vmem>>, vector<1x16xf32>
    %6 = vector.broadcast %5 : vector<1x16xf32> to vector<512x16xf32>
    %7 = arith.addf %4, %6 : vector<512x16xf32>
    %cst = arith.constant 0.000000e+00 : f32
    %8 = vector.broadcast %cst : f32 to vector<512x16xf32>
    %9 = arith.maximumf %7, %8 : vector<512x16xf32>
    %10 = arith.truncf %9 : vector<512x16xf32> to vector<512x16xbf16>
    %c0_5 = arith.constant 0 : index
    %c0_6 = arith.constant 0 : index
    %11 = vector.load %arg4[%c0_5, %c0_6] : memref<16x128xbf16, #tpu.memory_space<vmem>>, vector<16x128xbf16>
    %cst_7 = arith.constant dense<0.000000e+00> : vector<512x128xf32>
    %12 = tpu.matmul %10, %11, %cst_7 {dimension_numbers = #tpu.dot_dimension_numbers<[1], [0], [0], [1], [0, 0, 1, 1], [], []>} : vector<512x16xbf16>, vector<16x128xbf16>, vector<512x128xf32> -> vector<512x128xf32>
    %c0_8 = arith.constant 0 : index
    %c0_9 = arith.constant 0 : index
    %13 = vector.load %arg5[%c0_8, %c0_9] : memref<1x128xf32, #tpu.memory_space<vmem>>, vector<1x128xf32>
    %14 = vector.broadcast %13 : vector<1x128xf32> to vector<512x128xf32>
    %15 = arith.addf %12, %14 : vector<512x128xf32>
    %16 = arith.truncf %15 : vector<512x128xf32> to vector<512x128xbf16>
    %c0_10 = arith.constant 0 : index
    %c0_11 = arith.constant 0 : index
    %17 = vector.load %arg6[%c0_10, %c0_11] : memref<512x128xbf16, #tpu.memory_space<vmem>>, vector<512x128xbf16>
    tpu.vector_store %arg6[%c0_10, %c0_11], %16 {strides = array<i32>} : memref<512x128xbf16, #tpu.memory_space<vmem>>, vector<512x128xbf16>,
    return
  }
  func.func @transform_0(%arg0: i32) -> (i32, i32) {
    %c0_i32 = arith.constant 0 : i32
    %c0_i32_0 = arith.constant 0 : i32
    return %arg0, %c0_i32 : i32, i32
  }
  func.func @transform_1(%arg0: i32) -> (i32, i32) {
    %c0_i32 = arith.constant 0 : i32
    %c0_i32_0 = arith.constant 0 : i32
    %c0_i32_1 = arith.constant 0 : i32
    return %c0_i32, %c0_i32_0 : i32, i32
  }
  func.func @transform_2(%arg0: i32) -> (i32, i32) {
    %c0_i32 = arith.constant 0 : i32
    %c0_i32_0 = arith.constant 0 : i32
    %c0_i32_1 = arith.constant 0 : i32
    return %c0_i32, %c0_i32_0 : i32, i32
  }
  func.func @transform_3(%arg0: i32) -> (i32, i32) {
    %c0_i32 = arith.constant 0 : i32
    %c0_i32_0 = arith.constant 0 : i32
    %c0_i32_1 = arith.constant 0 : i32
    return %c0_i32, %c0_i32_0 : i32, i32
  }
  func.func @transform_4(%arg0: i32) -> (i32, i32) {
    %c0_i32 = arith.constant 0 : i32
    %c0_i32_0 = arith.constant 0 : i32
    %c0_i32_1 = arith.constant 0 : i32
    return %c0_i32, %c0_i32_0 : i32, i32
  }
  func.func @transform_5(%arg0: i32) -> (i32, i32) {
    %c0_i32 = arith.constant 0 : i32
    %c0_i32_0 = arith.constant 0 : i32
    return %arg0, %c0_i32 : i32, i32
  }
}

module attributes {stable_mosaic.version = 11 : i64} {
  func.func @_mm_pre_kernel(%arg0: i32, %arg1: memref<256x288xbf16, #tpu.memory_space<vmem>>, %arg2: memref<1x288xf32, #tpu.memory_space<vmem>>, %arg3: memref<1x288xf32, #tpu.memory_space<vmem>>, %arg4: memref<288x128xbf16, #tpu.memory_space<vmem>>, %arg5: memref<1x128xf32, #tpu.memory_space<vmem>>, %arg6: memref<256x128xbf16, #tpu.memory_space<vmem>>) attributes {dimension_semantics = [#tpu.dimension_semantics<parallel>], iteration_bounds = array<i64: 1>, scalar_prefetch = 0 : i64, scratch_operands = 0 : i64, tpu.core_type = #tpu.core_type<tc>, window_params = [{transform_indices = @transform_0, window_bounds = array<i64: 256, 288>}, {pipeline_mode = #tpu.pipeline_mode<synchronous>, transform_indices = @transform_1, window_bounds = array<i64: 1, 288>}, {pipeline_mode = #tpu.pipeline_mode<synchronous>, transform_indices = @transform_2, window_bounds = array<i64: 1, 288>}, {pipeline_mode = #tpu.pipeline_mode<synchronous>, transform_indices = @transform_3, window_bounds = array<i64: 288, 128>}, {pipeline_mode = #tpu.pipeline_mode<synchronous>, transform_indices = @transform_4, window_bounds = array<i64: 1, 128>}, {transform_indices = @transform_5, window_bounds = array<i64: 256, 128>}]} {
    %c0 = arith.constant 0 : index
    %c0_0 = arith.constant 0 : index
    %0 = vector.load %arg1[%c0, %c0_0] : memref<256x288xbf16, #tpu.memory_space<vmem>>, vector<256x288xbf16>
    %1 = arith.extf %0 : vector<256x288xbf16> to vector<256x288xf32>
    %c0_1 = arith.constant 0 : index
    %c0_2 = arith.constant 0 : index
    %2 = vector.load %arg2[%c0_1, %c0_2] : memref<1x288xf32, #tpu.memory_space<vmem>>, vector<1x288xf32>
    %3 = vector.broadcast %2 : vector<1x288xf32> to vector<256x288xf32>
    %4 = arith.mulf %1, %3 : vector<256x288xf32>
    %c0_3 = arith.constant 0 : index
    %c0_4 = arith.constant 0 : index
    %5 = vector.load %arg3[%c0_3, %c0_4] : memref<1x288xf32, #tpu.memory_space<vmem>>, vector<1x288xf32>
    %6 = vector.broadcast %5 : vector<1x288xf32> to vector<256x288xf32>
    %7 = arith.addf %4, %6 : vector<256x288xf32>
    %cst = arith.constant 0.000000e+00 : f32
    %8 = vector.broadcast %cst : f32 to vector<256x288xf32>
    %9 = arith.maximumf %7, %8 : vector<256x288xf32>
    %10 = arith.truncf %9 : vector<256x288xf32> to vector<256x288xbf16>
    %c0_5 = arith.constant 0 : index
    %c0_6 = arith.constant 0 : index
    %11 = vector.load %arg4[%c0_5, %c0_6] : memref<288x128xbf16, #tpu.memory_space<vmem>>, vector<288x128xbf16>
    %cst_7 = arith.constant dense<0.000000e+00> : vector<256x128xf32>
    %12 = tpu.matmul %10, %11, %cst_7 {dimension_numbers = #tpu.dot_dimension_numbers<[1], [0], [0], [1], [0, 0, 1, 1], [], []>} : vector<256x288xbf16>, vector<288x128xbf16>, vector<256x128xf32> -> vector<256x128xf32>
    %c0_8 = arith.constant 0 : index
    %c0_9 = arith.constant 0 : index
    %13 = vector.load %arg5[%c0_8, %c0_9] : memref<1x128xf32, #tpu.memory_space<vmem>>, vector<1x128xf32>
    %14 = vector.broadcast %13 : vector<1x128xf32> to vector<256x128xf32>
    %15 = arith.addf %12, %14 : vector<256x128xf32>
    %cst_10 = arith.constant 0.000000e+00 : f32
    %16 = vector.broadcast %cst_10 : f32 to vector<256x128xf32>
    %17 = arith.maximumf %15, %16 : vector<256x128xf32>
    %18 = arith.truncf %17 : vector<256x128xf32> to vector<256x128xbf16>
    %c0_11 = arith.constant 0 : index
    %c0_12 = arith.constant 0 : index
    %19 = vector.load %arg6[%c0_11, %c0_12] : memref<256x128xbf16, #tpu.memory_space<vmem>>, vector<256x128xbf16>
    tpu.vector_store %arg6[%c0_11, %c0_12], %18 {strides = array<i32>} : memref<256x128xbf16, #tpu.memory_space<vmem>>, vector<256x128xbf16>,
    return
  }
  func.func @transform_0(%arg0: i32) -> (i32, i32) {
    %c0_i32 = arith.constant 0 : i32
    %c0_i32_0 = arith.constant 0 : i32
    return %arg0, %c0_i32 : i32, i32
  }
  func.func @transform_1(%arg0: i32) -> (i32, i32) {
    %c0_i32 = arith.constant 0 : i32
    %c0_i32_0 = arith.constant 0 : i32
    %c0_i32_1 = arith.constant 0 : i32
    return %c0_i32, %c0_i32_0 : i32, i32
  }
  func.func @transform_2(%arg0: i32) -> (i32, i32) {
    %c0_i32 = arith.constant 0 : i32
    %c0_i32_0 = arith.constant 0 : i32
    %c0_i32_1 = arith.constant 0 : i32
    return %c0_i32, %c0_i32_0 : i32, i32
  }
  func.func @transform_3(%arg0: i32) -> (i32, i32) {
    %c0_i32 = arith.constant 0 : i32
    %c0_i32_0 = arith.constant 0 : i32
    %c0_i32_1 = arith.constant 0 : i32
    return %c0_i32, %c0_i32_0 : i32, i32
  }
  func.func @transform_4(%arg0: i32) -> (i32, i32) {
    %c0_i32 = arith.constant 0 : i32
    %c0_i32_0 = arith.constant 0 : i32
    %c0_i32_1 = arith.constant 0 : i32
    return %c0_i32, %c0_i32_0 : i32, i32
  }
  func.func @transform_5(%arg0: i32) -> (i32, i32) {
    %c0_i32 = arith.constant 0 : i32
    %c0_i32_0 = arith.constant 0 : i32
    return %arg0, %c0_i32 : i32, i32
  }
}

module attributes {stable_mosaic.version = 11 : i64} {
  func.func @_mm_kernel(%arg0: i32, %arg1: memref<256x576xbf16, #tpu.memory_space<vmem>>, %arg2: memref<576x128xbf16, #tpu.memory_space<vmem>>, %arg3: memref<1x128xf32, #tpu.memory_space<vmem>>, %arg4: memref<256x128xbf16, #tpu.memory_space<vmem>>) attributes {dimension_semantics = [#tpu.dimension_semantics<parallel>], iteration_bounds = array<i64: 1>, scalar_prefetch = 0 : i64, scratch_operands = 0 : i64, tpu.core_type = #tpu.core_type<tc>, window_params = [{transform_indices = @transform_0, window_bounds = array<i64: 256, 576>}, {pipeline_mode = #tpu.pipeline_mode<synchronous>, transform_indices = @transform_1, window_bounds = array<i64: 576, 128>}, {pipeline_mode = #tpu.pipeline_mode<synchronous>, transform_indices = @transform_2, window_bounds = array<i64: 1, 128>}, {transform_indices = @transform_3, window_bounds = array<i64: 256, 128>}]} {
    %c0 = arith.constant 0 : index
    %c0_0 = arith.constant 0 : index
    %0 = vector.load %arg1[%c0, %c0_0] : memref<256x576xbf16, #tpu.memory_space<vmem>>, vector<256x576xbf16>
    %c0_1 = arith.constant 0 : index
    %c0_2 = arith.constant 0 : index
    %1 = vector.load %arg2[%c0_1, %c0_2] : memref<576x128xbf16, #tpu.memory_space<vmem>>, vector<576x128xbf16>
    %cst = arith.constant dense<0.000000e+00> : vector<256x128xf32>
    %2 = tpu.matmul %0, %1, %cst {dimension_numbers = #tpu.dot_dimension_numbers<[1], [0], [0], [1], [0, 0, 1, 1], [], []>} : vector<256x576xbf16>, vector<576x128xbf16>, vector<256x128xf32> -> vector<256x128xf32>
    %c0_3 = arith.constant 0 : index
    %c0_4 = arith.constant 0 : index
    %3 = vector.load %arg3[%c0_3, %c0_4] : memref<1x128xf32, #tpu.memory_space<vmem>>, vector<1x128xf32>
    %4 = vector.broadcast %3 : vector<1x128xf32> to vector<256x128xf32>
    %5 = arith.addf %2, %4 : vector<256x128xf32>
    %6 = arith.truncf %5 : vector<256x128xf32> to vector<256x128xbf16>
    %c0_5 = arith.constant 0 : index
    %c0_6 = arith.constant 0 : index
    %7 = vector.load %arg4[%c0_5, %c0_6] : memref<256x128xbf16, #tpu.memory_space<vmem>>, vector<256x128xbf16>
    tpu.vector_store %arg4[%c0_5, %c0_6], %6 {strides = array<i32>} : memref<256x128xbf16, #tpu.memory_space<vmem>>, vector<256x128xbf16>,
    return
  }
  func.func @transform_0(%arg0: i32) -> (i32, i32) {
    %c0_i32 = arith.constant 0 : i32
    %c0_i32_0 = arith.constant 0 : i32
    return %arg0, %c0_i32 : i32, i32
  }
  func.func @transform_1(%arg0: i32) -> (i32, i32) {
    %c0_i32 = arith.constant 0 : i32
    %c0_i32_0 = arith.constant 0 : i32
    %c0_i32_1 = arith.constant 0 : i32
    return %c0_i32, %c0_i32_0 : i32, i32
  }
  func.func @transform_2(%arg0: i32) -> (i32, i32) {
    %c0_i32 = arith.constant 0 : i32
    %c0_i32_0 = arith.constant 0 : i32
    %c0_i32_1 = arith.constant 0 : i32
    return %c0_i32, %c0_i32_0 : i32, i32
  }
  func.func @transform_3(%arg0: i32) -> (i32, i32) {
    %c0_i32 = arith.constant 0 : i32
    %c0_i32_0 = arith.constant 0 : i32
    return %arg0, %c0_i32 : i32, i32
  }
}

module attributes {stable_mosaic.version = 11 : i64} {
  func.func @_mm_pre_kernel(%arg0: i32, %arg1: memref<256x32xbf16, #tpu.memory_space<vmem>>, %arg2: memref<1x32xf32, #tpu.memory_space<vmem>>, %arg3: memref<1x32xf32, #tpu.memory_space<vmem>>, %arg4: memref<32x128xbf16, #tpu.memory_space<vmem>>, %arg5: memref<1x128xf32, #tpu.memory_space<vmem>>, %arg6: memref<256x128xbf16, #tpu.memory_space<vmem>>) attributes {dimension_semantics = [#tpu.dimension_semantics<parallel>], iteration_bounds = array<i64: 1>, scalar_prefetch = 0 : i64, scratch_operands = 0 : i64, tpu.core_type = #tpu.core_type<tc>, window_params = [{transform_indices = @transform_0, window_bounds = array<i64: 256, 32>}, {pipeline_mode = #tpu.pipeline_mode<synchronous>, transform_indices = @transform_1, window_bounds = array<i64: 1, 32>}, {pipeline_mode = #tpu.pipeline_mode<synchronous>, transform_indices = @transform_2, window_bounds = array<i64: 1, 32>}, {pipeline_mode = #tpu.pipeline_mode<synchronous>, transform_indices = @transform_3, window_bounds = array<i64: 32, 128>}, {pipeline_mode = #tpu.pipeline_mode<synchronous>, transform_indices = @transform_4, window_bounds = array<i64: 1, 128>}, {transform_indices = @transform_5, window_bounds = array<i64: 256, 128>}]} {
    %c0 = arith.constant 0 : index
    %c0_0 = arith.constant 0 : index
    %0 = vector.load %arg1[%c0, %c0_0] : memref<256x32xbf16, #tpu.memory_space<vmem>>, vector<256x32xbf16>
    %1 = arith.extf %0 : vector<256x32xbf16> to vector<256x32xf32>
    %c0_1 = arith.constant 0 : index
    %c0_2 = arith.constant 0 : index
    %2 = vector.load %arg2[%c0_1, %c0_2] : memref<1x32xf32, #tpu.memory_space<vmem>>, vector<1x32xf32>
    %3 = vector.broadcast %2 : vector<1x32xf32> to vector<256x32xf32>
    %4 = arith.mulf %1, %3 : vector<256x32xf32>
    %c0_3 = arith.constant 0 : index
    %c0_4 = arith.constant 0 : index
    %5 = vector.load %arg3[%c0_3, %c0_4] : memref<1x32xf32, #tpu.memory_space<vmem>>, vector<1x32xf32>
    %6 = vector.broadcast %5 : vector<1x32xf32> to vector<256x32xf32>
    %7 = arith.addf %4, %6 : vector<256x32xf32>
    %cst = arith.constant 0.000000e+00 : f32
    %8 = vector.broadcast %cst : f32 to vector<256x32xf32>
    %9 = arith.maximumf %7, %8 : vector<256x32xf32>
    %10 = arith.truncf %9 : vector<256x32xf32> to vector<256x32xbf16>
    %c0_5 = arith.constant 0 : index
    %c0_6 = arith.constant 0 : index
    %11 = vector.load %arg4[%c0_5, %c0_6] : memref<32x128xbf16, #tpu.memory_space<vmem>>, vector<32x128xbf16>
    %cst_7 = arith.constant dense<0.000000e+00> : vector<256x128xf32>
    %12 = tpu.matmul %10, %11, %cst_7 {dimension_numbers = #tpu.dot_dimension_numbers<[1], [0], [0], [1], [0, 0, 1, 1], [], []>} : vector<256x32xbf16>, vector<32x128xbf16>, vector<256x128xf32> -> vector<256x128xf32>
    %c0_8 = arith.constant 0 : index
    %c0_9 = arith.constant 0 : index
    %13 = vector.load %arg5[%c0_8, %c0_9] : memref<1x128xf32, #tpu.memory_space<vmem>>, vector<1x128xf32>
    %14 = vector.broadcast %13 : vector<1x128xf32> to vector<256x128xf32>
    %15 = arith.addf %12, %14 : vector<256x128xf32>
    %16 = arith.truncf %15 : vector<256x128xf32> to vector<256x128xbf16>
    %c0_10 = arith.constant 0 : index
    %c0_11 = arith.constant 0 : index
    %17 = vector.load %arg6[%c0_10, %c0_11] : memref<256x128xbf16, #tpu.memory_space<vmem>>, vector<256x128xbf16>
    tpu.vector_store %arg6[%c0_10, %c0_11], %16 {strides = array<i32>} : memref<256x128xbf16, #tpu.memory_space<vmem>>, vector<256x128xbf16>,
    return
  }
  func.func @transform_0(%arg0: i32) -> (i32, i32) {
    %c0_i32 = arith.constant 0 : i32
    %c0_i32_0 = arith.constant 0 : i32
    return %arg0, %c0_i32 : i32, i32
  }
  func.func @transform_1(%arg0: i32) -> (i32, i32) {
    %c0_i32 = arith.constant 0 : i32
    %c0_i32_0 = arith.constant 0 : i32
    %c0_i32_1 = arith.constant 0 : i32
    return %c0_i32, %c0_i32_0 : i32, i32
  }
  func.func @transform_2(%arg0: i32) -> (i32, i32) {
    %c0_i32 = arith.constant 0 : i32
    %c0_i32_0 = arith.constant 0 : i32
    %c0_i32_1 = arith.constant 0 : i32
    return %c0_i32, %c0_i32_0 : i32, i32
  }
  func.func @transform_3(%arg0: i32) -> (i32, i32) {
    %c0_i32 = arith.constant 0 : i32
    %c0_i32_0 = arith.constant 0 : i32
    %c0_i32_1 = arith.constant 0 : i32
    return %c0_i32, %c0_i32_0 : i32, i32
  }
  func.func @transform_4(%arg0: i32) -> (i32, i32) {
    %c0_i32 = arith.constant 0 : i32
    %c0_i32_0 = arith.constant 0 : i32
    %c0_i32_1 = arith.constant 0 : i32
    return %c0_i32, %c0_i32_0 : i32, i32
  }
  func.func @transform_5(%arg0: i32) -> (i32, i32) {
    %c0_i32 = arith.constant 0 : i32
    %c0_i32_0 = arith.constant 0 : i32
    return %arg0, %c0_i32 : i32, i32
  }
}

module attributes {stable_mosaic.version = 11 : i64} {
  func.func @_mm_kernel(%arg0: i32, %arg1: memref<128x576xbf16, #tpu.memory_space<vmem>>, %arg2: memref<576x128xbf16, #tpu.memory_space<vmem>>, %arg3: memref<1x128xf32, #tpu.memory_space<vmem>>, %arg4: memref<128x128xbf16, #tpu.memory_space<vmem>>) attributes {dimension_semantics = [#tpu.dimension_semantics<parallel>], iteration_bounds = array<i64: 1>, scalar_prefetch = 0 : i64, scratch_operands = 0 : i64, tpu.core_type = #tpu.core_type<tc>, window_params = [{transform_indices = @transform_0, window_bounds = array<i64: 128, 576>}, {pipeline_mode = #tpu.pipeline_mode<synchronous>, transform_indices = @transform_1, window_bounds = array<i64: 576, 128>}, {pipeline_mode = #tpu.pipeline_mode<synchronous>, transform_indices = @transform_2, window_bounds = array<i64: 1, 128>}, {transform_indices = @transform_3, window_bounds = array<i64: 128, 128>}]} {
    %c0 = arith.constant 0 : index
    %c0_0 = arith.constant 0 : index
    %0 = vector.load %arg1[%c0, %c0_0] : memref<128x576xbf16, #tpu.memory_space<vmem>>, vector<128x576xbf16>
    %c0_1 = arith.constant 0 : index
    %c0_2 = arith.constant 0 : index
    %1 = vector.load %arg2[%c0_1, %c0_2] : memref<576x128xbf16, #tpu.memory_space<vmem>>, vector<576x128xbf16>
    %cst = arith.constant dense<0.000000e+00> : vector<128x128xf32>
    %2 = tpu.matmul %0, %1, %cst {dimension_numbers = #tpu.dot_dimension_numbers<[1], [0], [0], [1], [0, 0, 1, 1], [], []>} : vector<128x576xbf16>, vector<576x128xbf16>, vector<128x128xf32> -> vector<128x128xf32>
    %c0_3 = arith.constant 0 : index
    %c0_4 = arith.constant 0 : index
    %3 = vector.load %arg3[%c0_3, %c0_4] : memref<1x128xf32, #tpu.memory_space<vmem>>, vector<1x128xf32>
    %4 = vector.broadcast %3 : vector<1x128xf32> to vector<128x128xf32>
    %5 = arith.addf %2, %4 : vector<128x128xf32>
    %cst_5 = arith.constant 0.000000e+00 : f32
    %6 = vector.broadcast %cst_5 : f32 to vector<128x128xf32>
    %7 = arith.maximumf %5, %6 : vector<128x128xf32>
    %8 = arith.truncf %7 : vector<128x128xf32> to vector<128x128xbf16>
    %c0_6 = arith.constant 0 : index
    %c0_7 = arith.constant 0 : index
    %9 = vector.load %arg4[%c0_6, %c0_7] : memref<128x128xbf16, #tpu.memory_space<vmem>>, vector<128x128xbf16>
    tpu.vector_store %arg4[%c0_6, %c0_7], %8 {strides = array<i32>} : memref<128x128xbf16, #tpu.memory_space<vmem>>, vector<128x128xbf16>,
    return
  }
  func.func @transform_0(%arg0: i32) -> (i32, i32) {
    %c0_i32 = arith.constant 0 : i32
    %c0_i32_0 = arith.constant 0 : i32
    return %arg0, %c0_i32 : i32, i32
  }
  func.func @transform_1(%arg0: i32) -> (i32, i32) {
    %c0_i32 = arith.constant 0 : i32
    %c0_i32_0 = arith.constant 0 : i32
    %c0_i32_1 = arith.constant 0 : i32
    return %c0_i32, %c0_i32_0 : i32, i32
  }
  func.func @transform_2(%arg0: i32) -> (i32, i32) {
    %c0_i32 = arith.constant 0 : i32
    %c0_i32_0 = arith.constant 0 : i32
    %c0_i32_1 = arith.constant 0 : i32
    return %c0_i32, %c0_i32_0 : i32, i32
  }
  func.func @transform_3(%arg0: i32) -> (i32, i32) {
    %c0_i32 = arith.constant 0 : i32
    %c0_i32_0 = arith.constant 0 : i32
    return %arg0, %c0_i32 : i32, i32
  }
}

module attributes {stable_mosaic.version = 11 : i64} {
  func.func @_cell_lstm_kernel(%arg0: i32, %arg1: memref<128x288xbf16, #tpu.memory_space<vmem>>, %arg2: memref<288x128xbf16, #tpu.memory_space<vmem>>, %arg3: memref<128x288xbf16, #tpu.memory_space<vmem>>, %arg4: memref<288x128xbf16, #tpu.memory_space<vmem>>, %arg5: memref<1x128xf32, #tpu.memory_space<vmem>>, %arg6: memref<128x32xf32, #tpu.memory_space<vmem>>, %arg7: memref<128x128xf32, #tpu.memory_space<vmem>>) attributes {dimension_semantics = [#tpu.dimension_semantics<parallel>], iteration_bounds = array<i64: 1>, scalar_prefetch = 0 : i64, scratch_operands = 0 : i64, tpu.core_type = #tpu.core_type<tc>, window_params = [{transform_indices = @transform_0, window_bounds = array<i64: 128, 288>}, {pipeline_mode = #tpu.pipeline_mode<synchronous>, transform_indices = @transform_1, window_bounds = array<i64: 288, 128>}, {transform_indices = @transform_2, window_bounds = array<i64: 128, 288>}, {pipeline_mode = #tpu.pipeline_mode<synchronous>, transform_indices = @transform_3, window_bounds = array<i64: 288, 128>}, {pipeline_mode = #tpu.pipeline_mode<synchronous>, transform_indices = @transform_4, window_bounds = array<i64: 1, 128>}, {transform_indices = @transform_5, window_bounds = array<i64: 128, 32>}, {transform_indices = @transform_6, window_bounds = array<i64: 128, 128>}]} {
    %c0 = arith.constant 0 : index
    %c0_0 = arith.constant 0 : index
    %0 = vector.load %arg1[%c0, %c0_0] : memref<128x288xbf16, #tpu.memory_space<vmem>>, vector<128x288xbf16>
    %c0_1 = arith.constant 0 : index
    %c0_2 = arith.constant 0 : index
    %1 = vector.load %arg2[%c0_1, %c0_2] : memref<288x128xbf16, #tpu.memory_space<vmem>>, vector<288x128xbf16>
    %cst = arith.constant dense<0.000000e+00> : vector<128x128xf32>
    %2 = tpu.matmul %0, %1, %cst {dimension_numbers = #tpu.dot_dimension_numbers<[1], [0], [0], [1], [0, 0, 1, 1], [], []>} : vector<128x288xbf16>, vector<288x128xbf16>, vector<128x128xf32> -> vector<128x128xf32>
    %c0_3 = arith.constant 0 : index
    %c0_4 = arith.constant 0 : index
    %3 = vector.load %arg3[%c0_3, %c0_4] : memref<128x288xbf16, #tpu.memory_space<vmem>>, vector<128x288xbf16>
    %c0_5 = arith.constant 0 : index
    %c0_6 = arith.constant 0 : index
    %4 = vector.load %arg4[%c0_5, %c0_6] : memref<288x128xbf16, #tpu.memory_space<vmem>>, vector<288x128xbf16>
    %cst_7 = arith.constant dense<0.000000e+00> : vector<128x128xf32>
    %5 = tpu.matmul %3, %4, %cst_7 {dimension_numbers = #tpu.dot_dimension_numbers<[1], [0], [0], [1], [0, 0, 1, 1], [], []>} : vector<128x288xbf16>, vector<288x128xbf16>, vector<128x128xf32> -> vector<128x128xf32>
    %6 = arith.addf %2, %5 : vector<128x128xf32>
    %c0_8 = arith.constant 0 : index
    %c0_9 = arith.constant 0 : index
    %7 = vector.load %arg5[%c0_8, %c0_9] : memref<1x128xf32, #tpu.memory_space<vmem>>, vector<1x128xf32>
    %8 = vector.broadcast %7 : vector<1x128xf32> to vector<128x128xf32>
    %9 = arith.addf %6, %8 : vector<128x128xf32>
    %cst_10 = arith.constant 0.000000e+00 : f32
    %10 = vector.broadcast %cst_10 : f32 to vector<128x128xf32>
    %11 = arith.subf %10, %9 : vector<128x128xf32>
    %12 = math.exp %11 : vector<128x128xf32>
    %cst_11 = arith.constant 1.000000e+00 : f32
    %13 = vector.broadcast %cst_11 : f32 to vector<128x128xf32>
    %14 = arith.addf %13, %12 : vector<128x128xf32>
    %cst_12 = arith.constant 1.000000e+00 : f32
    %15 = vector.broadcast %cst_12 : f32 to vector<128x128xf32>
    %16 = arith.divf %15, %14 : vector<128x128xf32>
    %17 = math.tanh %9 : vector<128x128xf32>
    %18 = vector.extract_strided_slice %16 {offsets = [0, 0], sizes = [128, 32], strides = [1, 1]} : vector<128x128xf32> to vector<128x32xf32>
    %19 = vector.extract_strided_slice %16 {offsets = [0, 32], sizes = [128, 32], strides = [1, 1]} : vector<128x128xf32> to vector<128x32xf32>
    %20 = vector.extract_strided_slice %16 {offsets = [0, 96], sizes = [128, 32], strides = [1, 1]} : vector<128x128xf32> to vector<128x32xf32>
    %21 = vector.extract_strided_slice %17 {offsets = [0, 64], sizes = [128, 32], strides = [1, 1]} : vector<128x128xf32> to vector<128x32xf32>
    %c0_13 = arith.constant 0 : index
    %c0_14 = arith.constant 0 : index
    %22 = vector.load %arg6[%c0_13, %c0_14] : memref<128x32xf32, #tpu.memory_space<vmem>>, vector<128x32xf32>
    %23 = arith.mulf %19, %22 : vector<128x32xf32>
    %24 = arith.mulf %18, %21 : vector<128x32xf32>
    %25 = arith.addf %23, %24 : vector<128x32xf32>
    %26 = math.tanh %25 : vector<128x32xf32>
    %27 = arith.mulf %20, %26 : vector<128x32xf32>
    %cst_15 = arith.constant 0.000000e+00 : f32
    %28 = vector.broadcast %cst_15 : f32 to vector<128x64xf32>
    %29 = tpu.concatenate %27, %25, %28 in 1 : vector<128x32xf32>, vector<128x32xf32>, vector<128x64xf32> -> vector<128x128xf32>
    %c0_16 = arith.constant 0 : index
    %c0_17 = arith.constant 0 : index
    %30 = vector.load %arg7[%c0_16, %c0_17] : memref<128x128xf32, #tpu.memory_space<vmem>>, vector<128x128xf32>
    tpu.vector_store %arg7[%c0_16, %c0_17], %29 {strides = array<i32>} : memref<128x128xf32, #tpu.memory_space<vmem>>, vector<128x128xf32>,
    return
  }
  func.func @transform_0(%arg0: i32) -> (i32, i32) {
    %c0_i32 = arith.constant 0 : i32
    %c0_i32_0 = arith.constant 0 : i32
    return %arg0, %c0_i32 : i32, i32
  }
  func.func @transform_1(%arg0: i32) -> (i32, i32) {
    %c0_i32 = arith.constant 0 : i32
    %c0_i32_0 = arith.constant 0 : i32
    %c0_i32_1 = arith.constant 0 : i32
    return %c0_i32, %c0_i32_0 : i32, i32
  }
  func.func @transform_2(%arg0: i32) -> (i32, i32) {
    %c0_i32 = arith.constant 0 : i32
    %c0_i32_0 = arith.constant 0 : i32
    return %arg0, %c0_i32 : i32, i32
  }
  func.func @transform_3(%arg0: i32) -> (i32, i32) {
    %c0_i32 = arith.constant 0 : i32
    %c0_i32_0 = arith.constant 0 : i32
    %c0_i32_1 = arith.constant 0 : i32
    return %c0_i32, %c0_i32_0 : i32, i32
  }
  func.func @transform_4(%arg0: i32) -> (i32, i32) {
    %c0_i32 = arith.constant 0 : i32
    %c0_i32_0 = arith.constant 0 : i32
    %c0_i32_1 = arith.constant 0 : i32
    return %c0_i32, %c0_i32_0 : i32, i32
  }
  func.func @transform_5(%arg0: i32) -> (i32, i32) {
    %c0_i32 = arith.constant 0 : i32
    %c0_i32_0 = arith.constant 0 : i32
    return %arg0, %c0_i32 : i32, i32
  }
  func.func @transform_6(%arg0: i32) -> (i32, i32) {
    %c0_i32 = arith.constant 0 : i32
    %c0_i32_0 = arith.constant 0 : i32
    return %arg0, %c0_i32 : i32, i32
  }
}

module attributes {stable_mosaic.version = 11 : i64} {
  func.func @_mm_kernel(%arg0: i32, %arg1: memref<32x288xbf16, #tpu.memory_space<vmem>>, %arg2: memref<288x128xbf16, #tpu.memory_space<vmem>>, %arg3: memref<1x128xf32, #tpu.memory_space<vmem>>, %arg4: memref<32x128xbf16, #tpu.memory_space<vmem>>) attributes {dimension_semantics = [#tpu.dimension_semantics<parallel>], iteration_bounds = array<i64: 1>, scalar_prefetch = 0 : i64, scratch_operands = 0 : i64, tpu.core_type = #tpu.core_type<tc>, window_params = [{transform_indices = @transform_0, window_bounds = array<i64: 32, 288>}, {pipeline_mode = #tpu.pipeline_mode<synchronous>, transform_indices = @transform_1, window_bounds = array<i64: 288, 128>}, {pipeline_mode = #tpu.pipeline_mode<synchronous>, transform_indices = @transform_2, window_bounds = array<i64: 1, 128>}, {transform_indices = @transform_3, window_bounds = array<i64: 32, 128>}]} {
    %c0 = arith.constant 0 : index
    %c0_0 = arith.constant 0 : index
    %0 = vector.load %arg1[%c0, %c0_0] : memref<32x288xbf16, #tpu.memory_space<vmem>>, vector<32x288xbf16>
    %c0_1 = arith.constant 0 : index
    %c0_2 = arith.constant 0 : index
    %1 = vector.load %arg2[%c0_1, %c0_2] : memref<288x128xbf16, #tpu.memory_space<vmem>>, vector<288x128xbf16>
    %cst = arith.constant dense<0.000000e+00> : vector<32x128xf32>
    %2 = tpu.matmul %0, %1, %cst {dimension_numbers = #tpu.dot_dimension_numbers<[1], [0], [0], [1], [0, 0, 1, 1], [], []>} : vector<32x288xbf16>, vector<288x128xbf16>, vector<32x128xf32> -> vector<32x128xf32>
    %c0_3 = arith.constant 0 : index
    %c0_4 = arith.constant 0 : index
    %3 = vector.load %arg3[%c0_3, %c0_4] : memref<1x128xf32, #tpu.memory_space<vmem>>, vector<1x128xf32>
    %4 = vector.broadcast %3 : vector<1x128xf32> to vector<32x128xf32>
    %5 = arith.addf %2, %4 : vector<32x128xf32>
    %cst_5 = arith.constant 0.000000e+00 : f32
    %6 = vector.broadcast %cst_5 : f32 to vector<32x128xf32>
    %7 = arith.maximumf %5, %6 : vector<32x128xf32>
    %8 = arith.truncf %7 : vector<32x128xf32> to vector<32x128xbf16>
    %c0_6 = arith.constant 0 : index
    %c0_7 = arith.constant 0 : index
    %9 = vector.load %arg4[%c0_6, %c0_7] : memref<32x128xbf16, #tpu.memory_space<vmem>>, vector<32x128xbf16>
    tpu.vector_store %arg4[%c0_6, %c0_7], %8 {strides = array<i32>} : memref<32x128xbf16, #tpu.memory_space<vmem>>, vector<32x128xbf16>,
    return
  }
  func.func @transform_0(%arg0: i32) -> (i32, i32) {
    %c0_i32 = arith.constant 0 : i32
    %c0_i32_0 = arith.constant 0 : i32
    return %arg0, %c0_i32 : i32, i32
  }
  func.func @transform_1(%arg0: i32) -> (i32, i32) {
    %c0_i32 = arith.constant 0 : i32
    %c0_i32_0 = arith.constant 0 : i32
    %c0_i32_1 = arith.constant 0 : i32
    return %c0_i32, %c0_i32_0 : i32, i32
  }
  func.func @transform_2(%arg0: i32) -> (i32, i32) {
    %c0_i32 = arith.constant 0 : i32
    %c0_i32_0 = arith.constant 0 : i32
    %c0_i32_1 = arith.constant 0 : i32
    return %c0_i32, %c0_i32_0 : i32, i32
  }
  func.func @transform_3(%arg0: i32) -> (i32, i32) {
    %c0_i32 = arith.constant 0 : i32
    %c0_i32_0 = arith.constant 0 : i32
    return %arg0, %c0_i32 : i32, i32
  }
}

module attributes {stable_mosaic.version = 11 : i64} {
  func.func @_cell_lstm_kernel(%arg0: i32, %arg1: memref<32x288xbf16, #tpu.memory_space<vmem>>, %arg2: memref<288x128xbf16, #tpu.memory_space<vmem>>, %arg3: memref<32x288xbf16, #tpu.memory_space<vmem>>, %arg4: memref<288x128xbf16, #tpu.memory_space<vmem>>, %arg5: memref<1x128xf32, #tpu.memory_space<vmem>>, %arg6: memref<32x32xf32, #tpu.memory_space<vmem>>, %arg7: memref<32x128xf32, #tpu.memory_space<vmem>>) attributes {dimension_semantics = [#tpu.dimension_semantics<parallel>], iteration_bounds = array<i64: 1>, scalar_prefetch = 0 : i64, scratch_operands = 0 : i64, tpu.core_type = #tpu.core_type<tc>, window_params = [{transform_indices = @transform_0, window_bounds = array<i64: 32, 288>}, {pipeline_mode = #tpu.pipeline_mode<synchronous>, transform_indices = @transform_1, window_bounds = array<i64: 288, 128>}, {transform_indices = @transform_2, window_bounds = array<i64: 32, 288>}, {pipeline_mode = #tpu.pipeline_mode<synchronous>, transform_indices = @transform_3, window_bounds = array<i64: 288, 128>}, {pipeline_mode = #tpu.pipeline_mode<synchronous>, transform_indices = @transform_4, window_bounds = array<i64: 1, 128>}, {transform_indices = @transform_5, window_bounds = array<i64: 32, 32>}, {transform_indices = @transform_6, window_bounds = array<i64: 32, 128>}]} {
    %c0 = arith.constant 0 : index
    %c0_0 = arith.constant 0 : index
    %0 = vector.load %arg1[%c0, %c0_0] : memref<32x288xbf16, #tpu.memory_space<vmem>>, vector<32x288xbf16>
    %c0_1 = arith.constant 0 : index
    %c0_2 = arith.constant 0 : index
    %1 = vector.load %arg2[%c0_1, %c0_2] : memref<288x128xbf16, #tpu.memory_space<vmem>>, vector<288x128xbf16>
    %cst = arith.constant dense<0.000000e+00> : vector<32x128xf32>
    %2 = tpu.matmul %0, %1, %cst {dimension_numbers = #tpu.dot_dimension_numbers<[1], [0], [0], [1], [0, 0, 1, 1], [], []>} : vector<32x288xbf16>, vector<288x128xbf16>, vector<32x128xf32> -> vector<32x128xf32>
    %c0_3 = arith.constant 0 : index
    %c0_4 = arith.constant 0 : index
    %3 = vector.load %arg3[%c0_3, %c0_4] : memref<32x288xbf16, #tpu.memory_space<vmem>>, vector<32x288xbf16>
    %c0_5 = arith.constant 0 : index
    %c0_6 = arith.constant 0 : index
    %4 = vector.load %arg4[%c0_5, %c0_6] : memref<288x128xbf16, #tpu.memory_space<vmem>>, vector<288x128xbf16>
    %cst_7 = arith.constant dense<0.000000e+00> : vector<32x128xf32>
    %5 = tpu.matmul %3, %4, %cst_7 {dimension_numbers = #tpu.dot_dimension_numbers<[1], [0], [0], [1], [0, 0, 1, 1], [], []>} : vector<32x288xbf16>, vector<288x128xbf16>, vector<32x128xf32> -> vector<32x128xf32>
    %6 = arith.addf %2, %5 : vector<32x128xf32>
    %c0_8 = arith.constant 0 : index
    %c0_9 = arith.constant 0 : index
    %7 = vector.load %arg5[%c0_8, %c0_9] : memref<1x128xf32, #tpu.memory_space<vmem>>, vector<1x128xf32>
    %8 = vector.broadcast %7 : vector<1x128xf32> to vector<32x128xf32>
    %9 = arith.addf %6, %8 : vector<32x128xf32>
    %cst_10 = arith.constant 0.000000e+00 : f32
    %10 = vector.broadcast %cst_10 : f32 to vector<32x128xf32>
    %11 = arith.subf %10, %9 : vector<32x128xf32>
    %12 = math.exp %11 : vector<32x128xf32>
    %cst_11 = arith.constant 1.000000e+00 : f32
    %13 = vector.broadcast %cst_11 : f32 to vector<32x128xf32>
    %14 = arith.addf %13, %12 : vector<32x128xf32>
    %cst_12 = arith.constant 1.000000e+00 : f32
    %15 = vector.broadcast %cst_12 : f32 to vector<32x128xf32>
    %16 = arith.divf %15, %14 : vector<32x128xf32>
    %17 = math.tanh %9 : vector<32x128xf32>
    %18 = vector.extract_strided_slice %16 {offsets = [0, 0], sizes = [32, 32], strides = [1, 1]} : vector<32x128xf32> to vector<32x32xf32>
    %19 = vector.extract_strided_slice %16 {offsets = [0, 32], sizes = [32, 32], strides = [1, 1]} : vector<32x128xf32> to vector<32x32xf32>
    %20 = vector.extract_strided_slice %16 {offsets = [0, 96], sizes = [32, 32], strides = [1, 1]} : vector<32x128xf32> to vector<32x32xf32>
    %21 = vector.extract_strided_slice %17 {offsets = [0, 64], sizes = [32, 32], strides = [1, 1]} : vector<32x128xf32> to vector<32x32xf32>
    %c0_13 = arith.constant 0 : index
    %c0_14 = arith.constant 0 : index
    %22 = vector.load %arg6[%c0_13, %c0_14] : memref<32x32xf32, #tpu.memory_space<vmem>>, vector<32x32xf32>
    %23 = arith.mulf %19, %22 : vector<32x32xf32>
    %24 = arith.mulf %18, %21 : vector<32x32xf32>
    %25 = arith.addf %23, %24 : vector<32x32xf32>
    %26 = math.tanh %25 : vector<32x32xf32>
    %27 = arith.mulf %20, %26 : vector<32x32xf32>
    %cst_15 = arith.constant 0.000000e+00 : f32
    %28 = vector.broadcast %cst_15 : f32 to vector<32x64xf32>
    %29 = tpu.concatenate %27, %25, %28 in 1 : vector<32x32xf32>, vector<32x32xf32>, vector<32x64xf32> -> vector<32x128xf32>
    %c0_16 = arith.constant 0 : index
    %c0_17 = arith.constant 0 : index
    %30 = vector.load %arg7[%c0_16, %c0_17] : memref<32x128xf32, #tpu.memory_space<vmem>>, vector<32x128xf32>
    tpu.vector_store %arg7[%c0_16, %c0_17], %29 {strides = array<i32>} : memref<32x128xf32, #tpu.memory_space<vmem>>, vector<32x128xf32>,
    return
  }
  func.func @transform_0(%arg0: i32) -> (i32, i32) {
    %c0_i32 = arith.constant 0 : i32
    %c0_i32_0 = arith.constant 0 : i32
    return %arg0, %c0_i32 : i32, i32
  }
  func.func @transform_1(%arg0: i32) -> (i32, i32) {
    %c0_i32 = arith.constant 0 : i32
    %c0_i32_0 = arith.constant 0 : i32
    %c0_i32_1 = arith.constant 0 : i32
    return %c0_i32, %c0_i32_0 : i32, i32
  }
  func.func @transform_2(%arg0: i32) -> (i32, i32) {
    %c0_i32 = arith.constant 0 : i32
    %c0_i32_0 = arith.constant 0 : i32
    return %arg0, %c0_i32 : i32, i32
  }
  func.func @transform_3(%arg0: i32) -> (i32, i32) {
    %c0_i32 = arith.constant 0 : i32
    %c0_i32_0 = arith.constant 0 : i32
    %c0_i32_1 = arith.constant 0 : i32
    return %c0_i32, %c0_i32_0 : i32, i32
  }
  func.func @transform_4(%arg0: i32) -> (i32, i32) {
    %c0_i32 = arith.constant 0 : i32
    %c0_i32_0 = arith.constant 0 : i32
    %c0_i32_1 = arith.constant 0 : i32
    return %c0_i32, %c0_i32_0 : i32, i32
  }
  func.func @transform_5(%arg0: i32) -> (i32, i32) {
    %c0_i32 = arith.constant 0 : i32
    %c0_i32_0 = arith.constant 0 : i32
    return %arg0, %c0_i32 : i32, i32
  }
  func.func @transform_6(%arg0: i32) -> (i32, i32) {
    %c0_i32 = arith.constant 0 : i32
    %c0_i32_0 = arith.constant 0 : i32
    return %arg0, %c0_i32 : i32, i32
  }
}

module attributes {stable_mosaic.version = 11 : i64} {
  func.func @_mm_kernel(%arg0: i32, %arg1: memref<8x288xbf16, #tpu.memory_space<vmem>>, %arg2: memref<288x128xbf16, #tpu.memory_space<vmem>>, %arg3: memref<1x128xf32, #tpu.memory_space<vmem>>, %arg4: memref<8x128xbf16, #tpu.memory_space<vmem>>) attributes {dimension_semantics = [#tpu.dimension_semantics<parallel>], iteration_bounds = array<i64: 1>, scalar_prefetch = 0 : i64, scratch_operands = 0 : i64, tpu.core_type = #tpu.core_type<tc>, window_params = [{transform_indices = @transform_0, window_bounds = array<i64: 8, 288>}, {pipeline_mode = #tpu.pipeline_mode<synchronous>, transform_indices = @transform_1, window_bounds = array<i64: 288, 128>}, {pipeline_mode = #tpu.pipeline_mode<synchronous>, transform_indices = @transform_2, window_bounds = array<i64: 1, 128>}, {transform_indices = @transform_3, window_bounds = array<i64: 8, 128>}]} {
    %c0 = arith.constant 0 : index
    %c0_0 = arith.constant 0 : index
    %0 = vector.load %arg1[%c0, %c0_0] : memref<8x288xbf16, #tpu.memory_space<vmem>>, vector<8x288xbf16>
    %c0_1 = arith.constant 0 : index
    %c0_2 = arith.constant 0 : index
    %1 = vector.load %arg2[%c0_1, %c0_2] : memref<288x128xbf16, #tpu.memory_space<vmem>>, vector<288x128xbf16>
    %cst = arith.constant dense<0.000000e+00> : vector<8x128xf32>
    %2 = tpu.matmul %0, %1, %cst {dimension_numbers = #tpu.dot_dimension_numbers<[1], [0], [0], [1], [0, 0, 1, 1], [], []>} : vector<8x288xbf16>, vector<288x128xbf16>, vector<8x128xf32> -> vector<8x128xf32>
    %c0_3 = arith.constant 0 : index
    %c0_4 = arith.constant 0 : index
    %3 = vector.load %arg3[%c0_3, %c0_4] : memref<1x128xf32, #tpu.memory_space<vmem>>, vector<1x128xf32>
    %4 = vector.broadcast %3 : vector<1x128xf32> to vector<8x128xf32>
    %5 = arith.addf %2, %4 : vector<8x128xf32>
    %cst_5 = arith.constant 0.000000e+00 : f32
    %6 = vector.broadcast %cst_5 : f32 to vector<8x128xf32>
    %7 = arith.maximumf %5, %6 : vector<8x128xf32>
    %8 = arith.truncf %7 : vector<8x128xf32> to vector<8x128xbf16>
    %c0_6 = arith.constant 0 : index
    %c0_7 = arith.constant 0 : index
    %9 = vector.load %arg4[%c0_6, %c0_7] : memref<8x128xbf16, #tpu.memory_space<vmem>>, vector<8x128xbf16>
    tpu.vector_store %arg4[%c0_6, %c0_7], %8 {strides = array<i32>} : memref<8x128xbf16, #tpu.memory_space<vmem>>, vector<8x128xbf16>,
    return
  }
  func.func @transform_0(%arg0: i32) -> (i32, i32) {
    %c0_i32 = arith.constant 0 : i32
    %c0_i32_0 = arith.constant 0 : i32
    return %arg0, %c0_i32 : i32, i32
  }
  func.func @transform_1(%arg0: i32) -> (i32, i32) {
    %c0_i32 = arith.constant 0 : i32
    %c0_i32_0 = arith.constant 0 : i32
    %c0_i32_1 = arith.constant 0 : i32
    return %c0_i32, %c0_i32_0 : i32, i32
  }
  func.func @transform_2(%arg0: i32) -> (i32, i32) {
    %c0_i32 = arith.constant 0 : i32
    %c0_i32_0 = arith.constant 0 : i32
    %c0_i32_1 = arith.constant 0 : i32
    return %c0_i32, %c0_i32_0 : i32, i32
  }
  func.func @transform_3(%arg0: i32) -> (i32, i32) {
    %c0_i32 = arith.constant 0 : i32
    %c0_i32_0 = arith.constant 0 : i32
    return %arg0, %c0_i32 : i32, i32
  }
}

module attributes {stable_mosaic.version = 11 : i64} {
  func.func @_cell_lstm_kernel(%arg0: i32, %arg1: memref<8x288xbf16, #tpu.memory_space<vmem>>, %arg2: memref<288x128xbf16, #tpu.memory_space<vmem>>, %arg3: memref<8x288xbf16, #tpu.memory_space<vmem>>, %arg4: memref<288x128xbf16, #tpu.memory_space<vmem>>, %arg5: memref<1x128xf32, #tpu.memory_space<vmem>>, %arg6: memref<8x32xf32, #tpu.memory_space<vmem>>, %arg7: memref<8x128xf32, #tpu.memory_space<vmem>>) attributes {dimension_semantics = [#tpu.dimension_semantics<parallel>], iteration_bounds = array<i64: 1>, scalar_prefetch = 0 : i64, scratch_operands = 0 : i64, tpu.core_type = #tpu.core_type<tc>, window_params = [{transform_indices = @transform_0, window_bounds = array<i64: 8, 288>}, {pipeline_mode = #tpu.pipeline_mode<synchronous>, transform_indices = @transform_1, window_bounds = array<i64: 288, 128>}, {transform_indices = @transform_2, window_bounds = array<i64: 8, 288>}, {pipeline_mode = #tpu.pipeline_mode<synchronous>, transform_indices = @transform_3, window_bounds = array<i64: 288, 128>}, {pipeline_mode = #tpu.pipeline_mode<synchronous>, transform_indices = @transform_4, window_bounds = array<i64: 1, 128>}, {transform_indices = @transform_5, window_bounds = array<i64: 8, 32>}, {transform_indices = @transform_6, window_bounds = array<i64: 8, 128>}]} {
    %c0 = arith.constant 0 : index
    %c0_0 = arith.constant 0 : index
    %0 = vector.load %arg1[%c0, %c0_0] : memref<8x288xbf16, #tpu.memory_space<vmem>>, vector<8x288xbf16>
    %c0_1 = arith.constant 0 : index
    %c0_2 = arith.constant 0 : index
    %1 = vector.load %arg2[%c0_1, %c0_2] : memref<288x128xbf16, #tpu.memory_space<vmem>>, vector<288x128xbf16>
    %cst = arith.constant dense<0.000000e+00> : vector<8x128xf32>
    %2 = tpu.matmul %0, %1, %cst {dimension_numbers = #tpu.dot_dimension_numbers<[1], [0], [0], [1], [0, 0, 1, 1], [], []>} : vector<8x288xbf16>, vector<288x128xbf16>, vector<8x128xf32> -> vector<8x128xf32>
    %c0_3 = arith.constant 0 : index
    %c0_4 = arith.constant 0 : index
    %3 = vector.load %arg3[%c0_3, %c0_4] : memref<8x288xbf16, #tpu.memory_space<vmem>>, vector<8x288xbf16>
    %c0_5 = arith.constant 0 : index
    %c0_6 = arith.constant 0 : index
    %4 = vector.load %arg4[%c0_5, %c0_6] : memref<288x128xbf16, #tpu.memory_space<vmem>>, vector<288x128xbf16>
    %cst_7 = arith.constant dense<0.000000e+00> : vector<8x128xf32>
    %5 = tpu.matmul %3, %4, %cst_7 {dimension_numbers = #tpu.dot_dimension_numbers<[1], [0], [0], [1], [0, 0, 1, 1], [], []>} : vector<8x288xbf16>, vector<288x128xbf16>, vector<8x128xf32> -> vector<8x128xf32>
    %6 = arith.addf %2, %5 : vector<8x128xf32>
    %c0_8 = arith.constant 0 : index
    %c0_9 = arith.constant 0 : index
    %7 = vector.load %arg5[%c0_8, %c0_9] : memref<1x128xf32, #tpu.memory_space<vmem>>, vector<1x128xf32>
    %8 = vector.broadcast %7 : vector<1x128xf32> to vector<8x128xf32>
    %9 = arith.addf %6, %8 : vector<8x128xf32>
    %cst_10 = arith.constant 0.000000e+00 : f32
    %10 = vector.broadcast %cst_10 : f32 to vector<8x128xf32>
    %11 = arith.subf %10, %9 : vector<8x128xf32>
    %12 = math.exp %11 : vector<8x128xf32>
    %cst_11 = arith.constant 1.000000e+00 : f32
    %13 = vector.broadcast %cst_11 : f32 to vector<8x128xf32>
    %14 = arith.addf %13, %12 : vector<8x128xf32>
    %cst_12 = arith.constant 1.000000e+00 : f32
    %15 = vector.broadcast %cst_12 : f32 to vector<8x128xf32>
    %16 = arith.divf %15, %14 : vector<8x128xf32>
    %17 = math.tanh %9 : vector<8x128xf32>
    %18 = vector.extract_strided_slice %16 {offsets = [0, 0], sizes = [8, 32], strides = [1, 1]} : vector<8x128xf32> to vector<8x32xf32>
    %19 = vector.extract_strided_slice %16 {offsets = [0, 32], sizes = [8, 32], strides = [1, 1]} : vector<8x128xf32> to vector<8x32xf32>
    %20 = vector.extract_strided_slice %16 {offsets = [0, 96], sizes = [8, 32], strides = [1, 1]} : vector<8x128xf32> to vector<8x32xf32>
    %21 = vector.extract_strided_slice %17 {offsets = [0, 64], sizes = [8, 32], strides = [1, 1]} : vector<8x128xf32> to vector<8x32xf32>
    %c0_13 = arith.constant 0 : index
    %c0_14 = arith.constant 0 : index
    %22 = vector.load %arg6[%c0_13, %c0_14] : memref<8x32xf32, #tpu.memory_space<vmem>>, vector<8x32xf32>
    %23 = arith.mulf %19, %22 : vector<8x32xf32>
    %24 = arith.mulf %18, %21 : vector<8x32xf32>
    %25 = arith.addf %23, %24 : vector<8x32xf32>
    %26 = math.tanh %25 : vector<8x32xf32>
    %27 = arith.mulf %20, %26 : vector<8x32xf32>
    %cst_15 = arith.constant 0.000000e+00 : f32
    %28 = vector.broadcast %cst_15 : f32 to vector<8x64xf32>
    %29 = tpu.concatenate %27, %25, %28 in 1 : vector<8x32xf32>, vector<8x32xf32>, vector<8x64xf32> -> vector<8x128xf32>
    %c0_16 = arith.constant 0 : index
    %c0_17 = arith.constant 0 : index
    %30 = vector.load %arg7[%c0_16, %c0_17] : memref<8x128xf32, #tpu.memory_space<vmem>>, vector<8x128xf32>
    tpu.vector_store %arg7[%c0_16, %c0_17], %29 {strides = array<i32>} : memref<8x128xf32, #tpu.memory_space<vmem>>, vector<8x128xf32>,
    return
  }
  func.func @transform_0(%arg0: i32) -> (i32, i32) {
    %c0_i32 = arith.constant 0 : i32
    %c0_i32_0 = arith.constant 0 : i32
    return %arg0, %c0_i32 : i32, i32
  }
  func.func @transform_1(%arg0: i32) -> (i32, i32) {
    %c0_i32 = arith.constant 0 : i32
    %c0_i32_0 = arith.constant 0 : i32
    %c0_i32_1 = arith.constant 0 : i32
    return %c0_i32, %c0_i32_0 : i32, i32
  }
  func.func @transform_2(%arg0: i32) -> (i32, i32) {
    %c0_i32 = arith.constant 0 : i32
    %c0_i32_0 = arith.constant 0 : i32
    return %arg0, %c0_i32 : i32, i32
  }
  func.func @transform_3(%arg0: i32) -> (i32, i32) {
    %c0_i32 = arith.constant 0 : i32
    %c0_i32_0 = arith.constant 0 : i32
    %c0_i32_1 = arith.constant 0 : i32
    return %c0_i32, %c0_i32_0 : i32, i32
  }
  func.func @transform_4(%arg0: i32) -> (i32, i32) {
    %c0_i32 = arith.constant 0 : i32
    %c0_i32_0 = arith.constant 0 : i32
    %c0_i32_1 = arith.constant 0 : i32
    return %c0_i32, %c0_i32_0 : i32, i32
  }
  func.func @transform_5(%arg0: i32) -> (i32, i32) {
    %c0_i32 = arith.constant 0 : i32
    %c0_i32_0 = arith.constant 0 : i32
    return %arg0, %c0_i32 : i32, i32
  }
  func.func @transform_6(%arg0: i32) -> (i32, i32) {
    %c0_i32 = arith.constant 0 : i32
    %c0_i32_0 = arith.constant 0 : i32
    return %arg0, %c0_i32 : i32, i32
  }
}

</mosaic_0001>

<bundles_post_ra>
// kernel: fbn_forward.7
= control target key start
LH: loop header
LB: loop body
LE: loop exit
PB: predicated region body
PF: predicated region fallthrough
CT: control target
= control target key end

     0   :  { %s1855_s12 = smov 0   ;;  %s2060_s0 = inlined_call_operand.vmem [shape: bf16[4096,49], index: 0, kind: input, shape index: {}]   ;;  %s2061_s1 = inlined_call_operand.vmem [shape: bf16[49,128], index: 1, kind: input, shape index: {}]   ;;  %s2062_s2 = inlined_call_operand.vmem [shape: f32[1,128], index: 2, kind: input, shape index: {}]   ;;  %s2063_s3 = inlined_call_operand.vmem [shape: bf16[4096,128], index: 3, kind: output, shape index: {}]  }
   0x1 LB: > { %s1266_s13 = sadd.s32 4294967295, %s1832_s12   ;;  %p1270_p0 = scmp.ge.s32.totalorder %s1832_s12, 1  ;;  %s1832_s12 = sphi %s1855_s12, %s13_s12  }
   0x2   : > { %p138_p1 = scmp.lt.s32.totalorder %s1832_s12, 9 }
   0x4   : > { %p139_p2 = pnand %p1270_p0, %p138_p1 }
   0x5   : > { %v1790_v0 = vld [vmem:[%s2061_s1] sm:$0xff] (!%p139_p2)   ;;  %v1791_v1 = vld [vmem:[%s2061_s1 + $0x8] sm:$0xff] (!%p139_p2)   ;;  %vm531_vm0 = vcmask (!%p139_p2), 1040384   ;;  %s1271_s18 = sshll.u32 (!%p139_p2), %s1266_s13, 6  ;;  %v1792_v2 = vld [vmem:[%s2061_s1 + $0x10] sm:$0xff] (!%p139_p2)   ;;  %v1834_v4 = vmov (!%p139_p2), 0  }
   0x6   : > { %142 = sbr.rel (%p139_p2) target bundleno = 300 (0x12c), region = 32  ;;  %1701 = vmatprep.subr.bf16.mxu0 (!%p139_p2), %v1790_v0  ;;  %1773 = vmatprep.subr.bf16.mxu1 (!%p139_p2), %v1790_v0  ;;  %v1793_v3 = vld [vmem:[%s2061_s1 + $0x18] ss:$0 sps:$4 sm:$0x11] (!%p139_p2)   ;;  %p163_p3 = scmp.lt.s32.totalorder (!%p139_p2), %s1271_s18, 511  ;;  %v533_v5 = vsel (!%p139_p2), %vm531_vm0, 65535, %v1834_v4 }
   0x7   : > { %1702 = vmatpush3.bf16.msra.mxu0 (!%p139_p2), %v1790_v0  ;;  %1777 = vmatpush3.bf16.msra.mxu1 (!%p139_p2), %v1790_v0  ;;  %v535_v6 = vand.u32 (!%p139_p2), %v1793_v3, %v533_v5  ;;  %vm434_vm1 = vcmask (!%p139_p2), 400384   ;;  %v1952_v39 = vld [vmem:[%s2062_s2] ss:$0 sm:$0xff] (!%p139_p2) }
   0x8   : > { %1703 = vmatprep.subr.bf16.mxu0 (!%p139_p2), %v1791_v1  ;;  %1774 = vmatprep.subr.bf16.mxu1 (!%p139_p2), %v1791_v1 }
   0xb   : > { %1704 = vmatpush3.bf16.msra.mxu0 (!%p139_p2), %v1791_v1  ;;  %1778 = vmatpush3.bf16.msra.mxu1 (!%p139_p2), %v1791_v1 }
   0xc   : > { %1705 = vmatprep.subr.bf16.mxu0 (!%p139_p2), %v1792_v2  ;;  %1775 = vmatprep.subr.bf16.mxu1 (!%p139_p2), %v1792_v2 }
   0xd   : > { %s2065_s18 = smov (!%p163_p3, %s1271_s18), 511 }
   0xe   : > { %s1272_s23 = sshll.u32 %s2065_s18, 2 }
   0xf   : > { %s1883_s26 = scalar_lea.vmem %s2060_s0, %s1272_s23  ;;  %1706 = vmatpush3.bf16.msra.mxu0 %v1792_v2  ;;  %1779 = vmatpush3.bf16.msra.mxu1 %v1792_v2  ;;  %s1967_s4 = scalar_lea.vmem %s2063_s3, %s1272_s23 }
  0x10   : > { %v1794_v7 = vld [vmem:[%s1883_s26] sm:$0xff]   ;;  %1707 = vmatprep.subr.bf16.mxu0 %v535_v6  ;;  %1776 = vmatprep.subr.bf16.mxu1 %v535_v6  ;;  %v1796_v9 = vld [vmem:[%s1883_s26 + $0x8] sm:$0xff]   ;;  %v1798_v11 = vld [vmem:[%s1883_s26 + $0x10] sm:$0xff]  }
  0x11   : > { %v1795_v8 = vld [vmem:[%s1883_s26 + $0x80] sm:$0xff]   ;;  %1709 = vmatprep.mubr.msk.bf16.mxu0 %vm434_vm1, %v1794_v7  ;;  %v1797_v10 = vld [vmem:[%s1883_s26 + $0x88] sm:$0xff]   ;;  %v1799_v12 = vld [vmem:[%s1883_s26 + $0x90] sm:$0xff]  }
  0x12   : > { %1741 = vmatprep.mubr.msk.bf16.mxu1 %vm434_vm1, %v1795_v8  ;;  %v1800_v13 = vld [vmem:[%s1883_s26 + $0x18] sm:$0xff]   ;;  %v1802_v15 = vld [vmem:[%s1883_s26 + $0x20] sm:$0xff]   ;;  %v1804_v17 = vld [vmem:[%s1883_s26 + $0x28] sm:$0xff]  }
  0x13   : > { %1708 = vmatpush3.bf16.msra.mxu0 %v535_v6  ;;  %1780 = vmatpush3.bf16.msra.mxu1 %v535_v6  ;;  %v1801_v14 = vld [vmem:[%s1883_s26 + $0x98] sm:$0xff]   ;;  %v1803_v16 = vld [vmem:[%s1883_s26 + $0xa0] sm:$0xff]   ;;  %v1805_v18 = vld [vmem:[%s1883_s26 + $0xa8] sm:$0xff]  }
  0x14   : > { %v1806_v19 = vld [vmem:[%s1883_s26 + $0x30] sm:$0xff]   ;;  %v1808_v21 = vld [vmem:[%s1883_s26 + $0x38] sm:$0xff]   ;;  %v1810_v23 = vld [vmem:[%s1883_s26 + $0x40] sm:$0xff]  }
  0x15   : > { %v1807_v20 = vld [vmem:[%s1883_s26 + $0xb0] sm:$0xff]   ;;  %v1809_v22 = vld [vmem:[%s1883_s26 + $0xb8] sm:$0xff]   ;;  %v1811_v24 = vld [vmem:[%s1883_s26 + $0xc0] sm:$0xff]  }
  0x16   : > { %1710 = vmatmul.mubr.msk.bf16.vlgmr.msra.gmra.mrb[0].mxu0 %vm434_vm1, %v1796_v9  ;;  %1742 = vmatmul.mubr.msk.bf16.vlgmr.msra.gmra.mrb[0].mxu1 %vm434_vm1, %v1797_v10  ;;  %v1812_v25 = vld [vmem:[%s1883_s26 + $0x48] sm:$0xff]   ;;  %v1814_v27 = vld [vmem:[%s1883_s26 + $0x50] sm:$0xff]   ;;  %v1816_v29 = vld [vmem:[%s1883_s26 + $0x58] sm:$0xff]  }
  0x17   : > { %1713 = vmatprep.mubr.msk.bf16.mxu0 %vm434_vm1, %v1798_v11  ;;  %1745 = vmatprep.mubr.msk.bf16.mxu1 %vm434_vm1, %v1799_v12  ;;  %v1813_v26 = vld [vmem:[%s1883_s26 + $0xc8] sm:$0xff]   ;;  %v1815_v28 = vld [vmem:[%s1883_s26 + $0xd0] sm:$0xff]   ;;  %v1817_v30 = vld [vmem:[%s1883_s26 + $0xd8] sm:$0xff]  }
  0x18   : > { %v1818_v31 = vld [vmem:[%s1883_s26 + $0x60] sm:$0xff]   ;;  %v1820_v33 = vld [vmem:[%s1883_s26 + $0x68] sm:$0xff]   ;;  %v1822_v35 = vld [vmem:[%s1883_s26 + $0x70] sm:$0xff]  }
  0x19   : > { %v1819_v32 = vld [vmem:[%s1883_s26 + $0xe0] sm:$0xff]   ;;  %v1821_v34 = vld [vmem:[%s1883_s26 + $0xe8] sm:$0xff]   ;;  %v1823_v36 = vld [vmem:[%s1883_s26 + $0xf0] sm:$0xff]  }
  0x1a   : > { %v1824_v37 = vld [vmem:[%s1883_s26 + $0x78] sm:$0xff]  }
  0x1b   : > { %v1825_v38 = vld [vmem:[%s1883_s26 + $0xf8] sm:$0xff]  }
  0x1e   : > { %1714 = vmatmul.mubr.msk.bf16.gmra.mrb[4].mxu0 %vm434_vm1, %v1800_v13  ;;  %1746 = vmatmul.mubr.msk.bf16.gmra.mrb[4].mxu1 %vm434_vm1, %v1801_v14 }
  0x1f   : > { %1717 = vmatprep.mubr.msk.bf16.mxu0 %vm434_vm1, %v1802_v15  ;;  %1749 = vmatprep.mubr.msk.bf16.mxu1 %vm434_vm1, %v1803_v16 }
  0x26   : > { %1718 = vmatmul.mubr.msk.bf16.gmra.mrb[8].mxu0 %vm434_vm1, %v1804_v17  ;;  %1750 = vmatmul.mubr.msk.bf16.gmra.mrb[8].mxu1 %vm434_vm1, %v1805_v18 }
  0x27   : > { %1721 = vmatprep.mubr.msk.bf16.mxu0 %vm434_vm1, %v1806_v19  ;;  %1753 = vmatprep.mubr.msk.bf16.mxu1 %vm434_vm1, %v1807_v20 }
  0x2e   : > { %1722 = vmatmul.mubr.msk.bf16.gmra.mrb[12].mxu0 %vm434_vm1, %v1808_v21  ;;  %1754 = vmatmul.mubr.msk.bf16.gmra.mrb[12].mxu1 %vm434_vm1, %v1809_v22 }
  0x2f   : > { %1725 = vmatprep.mubr.msk.bf16.mxu0 %vm434_vm1, %v1810_v23  ;;  %1757 = vmatprep.mubr.msk.bf16.mxu1 %vm434_vm1, %v1811_v24 }
  0x36   : > { %1726 = vmatmul.mubr.msk.bf16.gmra.mrb[16].mxu0 %vm434_vm1, %v1812_v25  ;;  %1758 = vmatmul.mubr.msk.bf16.gmra.mrb[16].mxu1 %vm434_vm1, %v1813_v26 }
  0x37   : > { %1729 = vmatprep.mubr.msk.bf16.mxu0 %vm434_vm1, %v1814_v27  ;;  %1761 = vmatprep.mubr.msk.bf16.mxu1 %vm434_vm1, %v1815_v28 }
  0x3e   : > { %1730 = vmatmul.mubr.msk.bf16.gmra.mrb[20].mxu0 %vm434_vm1, %v1816_v29  ;;  %1762 = vmatmul.mubr.msk.bf16.gmra.mrb[20].mxu1 %vm434_vm1, %v1817_v30 }
  0x3f   : > { %1733 = vmatprep.mubr.msk.bf16.mxu0 %vm434_vm1, %v1818_v31  ;;  %1765 = vmatprep.mubr.msk.bf16.mxu1 %vm434_vm1, %v1819_v32 }
  0x46   : > { %1734 = vmatmul.mubr.msk.bf16.gmra.mrb[24].mxu0 %vm434_vm1, %v1820_v33  ;;  %1766 = vmatmul.mubr.msk.bf16.gmra.mrb[24].mxu1 %vm434_vm1, %v1821_v34 }
  0x47   : > { %1737 = vmatprep.mubr.msk.bf16.mxu0 %vm434_vm1, %v1822_v35  ;;  %1769 = vmatprep.mubr.msk.bf16.mxu1 %vm434_vm1, %v1823_v36 }
  0x4e   : > { %1738 = vmatmul.mubr.msk.bf16.gmra.mrb[28].mxu0 %vm434_vm1, %v1824_v37  ;;  %1770 = vmatmul.mubr.msk.bf16.gmra.mrb[28].mxu1 %vm434_vm1, %v1825_v38 }
  0xe9   : > { %v1711_v40 = vpop.f32.mrb[0].mxu0  ;;  %v1743_v41 = vpop.f32.mrb[0].mxu1 }
  0xea   : > { %v580_v42 = vadd.f32 %v1711_v40, %v1952_v39  ;;  %v708_v43 = vadd.f32 %v1743_v41, %v1952_v39  ;;  %v571_v44 = vpop.f32.mrb[1].mxu0  ;;  %v699_v45 = vpop.f32.mrb[1].mxu1 }
  0xeb   : > { %v572_v46 = vadd.f32 %v1952_v39, %v571_v44  ;;  %v700_v47 = vadd.f32 %v1952_v39, %v699_v45  ;;  %v1712_v48 = vpop.f32.mrb[2].mxu0  ;;  %v1744_v49 = vpop.f32.mrb[2].mxu1 }
  0xec   : > { %v583_v50 = vadd.f32 %v1712_v48, %v1952_v39  ;;  %v711_v51 = vadd.f32 %v1744_v49, %v1952_v39  ;;  %v574_v52 = vpop.f32.mrb[3].mxu0  ;;  %v702_v53 = vpop.f32.mrb[3].mxu1  ;;  %v828_v56 = vmax.f32 %v580_v42, 0.0  ;;  %v860_v57 = vmax.f32 %v708_v43, 0.0 }
  0xed   : > { %v575_v54 = vadd.f32 %v1952_v39, %v574_v52  ;;  %v703_v55 = vadd.f32 %v1952_v39, %v702_v53  ;;  %v826_v60 = vmax.f32 %v572_v46, 0.0  ;;  %v858_v61 = vmax.f32 %v700_v47, 0.0 }
  0xee   : > { %v829_v58 = vmax.f32 %v583_v50, 0.0  ;;  %v861_v59 = vmax.f32 %v711_v51, 0.0 }
  0xef   : > { %v827_v62 = vmax.f32 %v575_v54, 0.0  ;;  %v859_v63 = vmax.f32 %v703_v55, 0.0 }
  0xf0   : > { %v1482_v0 = vpack.c.bf16 %v829_v58, %v828_v56  ;;  %v1562_v1 = vpack.c.bf16 %v861_v59, %v860_v57 }
  0xf1   : > { %v1477_v2 = vpack.c.bf16 %v827_v62, %v826_v60  ;;  %v1557_v3 = vpack.c.bf16 %v859_v63, %v858_v61  ;;  %v1715_v4 = vpop.f32.mrb[4].mxu0  ;;  %v1747_v5 = vpop.f32.mrb[4].mxu1 }
  0xf2   : > { %1634 = vst [vmem:[%s1967_s4 + $0x8] sm:$0xff] %v1482_v0   ;;  %1650 = vst [vmem:[%s1967_s4 + $0x88] sm:$0xff] %v1562_v1   ;;  %v596_v6 = vadd.f32 %v1715_v4, %v1952_v39  ;;  %v724_v7 = vadd.f32 %v1747_v5, %v1952_v39  ;;  %v587_v8 = vpop.f32.mrb[5].mxu0  ;;  %v715_v9 = vpop.f32.mrb[5].mxu1 }
  0xf3   : > { %1478 = vst [vmem:[%s1967_s4] sm:$0xff] %v1477_v2   ;;  %1649 = vst [vmem:[%s1967_s4 + $0x80] sm:$0xff] %v1557_v3   ;;  %v588_v10 = vadd.f32 %v1952_v39, %v587_v8  ;;  %v716_v11 = vadd.f32 %v1952_v39, %v715_v9  ;;  %v1716_v12 = vpop.f32.mrb[6].mxu0  ;;  %v1748_v13 = vpop.f32.mrb[6].mxu1 }
  0xf4   : > { %v599_v14 = vadd.f32 %v1716_v12, %v1952_v39  ;;  %v727_v15 = vadd.f32 %v1748_v13, %v1952_v39  ;;  %v590_v16 = vpop.f32.mrb[7].mxu0  ;;  %v718_v17 = vpop.f32.mrb[7].mxu1  ;;  %v832_v20 = vmax.f32 %v596_v6, 0.0  ;;  %v864_v21 = vmax.f32 %v724_v7, 0.0 }
  0xf5   : > { %v591_v18 = vadd.f32 %v1952_v39, %v590_v16  ;;  %v719_v19 = vadd.f32 %v1952_v39, %v718_v17  ;;  %v830_v24 = vmax.f32 %v588_v10, 0.0  ;;  %v862_v25 = vmax.f32 %v716_v11, 0.0 }
  0xf6   : > { %v833_v22 = vmax.f32 %v599_v14, 0.0  ;;  %v865_v23 = vmax.f32 %v727_v15, 0.0 }
  0xf7   : > { %v831_v26 = vmax.f32 %v591_v18, 0.0  ;;  %v863_v27 = vmax.f32 %v719_v19, 0.0 }
  0xf8   : > { %v1492_v28 = vpack.c.bf16 %v833_v22, %v832_v20  ;;  %v1572_v29 = vpack.c.bf16 %v865_v23, %v864_v21 }
  0xf9   : > { %v1487_v30 = vpack.c.bf16 %v831_v26, %v830_v24  ;;  %v1567_v31 = vpack.c.bf16 %v863_v27, %v862_v25  ;;  %v1719_v32 = vpop.f32.mrb[8].mxu0  ;;  %v1751_v33 = vpop.f32.mrb[8].mxu1 }
  0xfa   : > { %1636 = vst [vmem:[%s1967_s4 + $0x18] sm:$0xff] %v1492_v28   ;;  %1652 = vst [vmem:[%s1967_s4 + $0x98] sm:$0xff] %v1572_v29   ;;  %v612_v34 = vadd.f32 %v1719_v32, %v1952_v39  ;;  %v740_v35 = vadd.f32 %v1751_v33, %v1952_v39  ;;  %v603_v36 = vpop.f32.mrb[9].mxu0  ;;  %v731_v37 = vpop.f32.mrb[9].mxu1 }
  0xfb   : > { %1635 = vst [vmem:[%s1967_s4 + $0x10] sm:$0xff] %v1487_v30   ;;  %1651 = vst [vmem:[%s1967_s4 + $0x90] sm:$0xff] %v1567_v31   ;;  %v604_v38 = vadd.f32 %v1952_v39, %v603_v36  ;;  %v732_v40 = vadd.f32 %v1952_v39, %v731_v37  ;;  %v1720_v41 = vpop.f32.mrb[10].mxu0  ;;  %v1752_v42 = vpop.f32.mrb[10].mxu1 }
  0xfc   : > { %v615_v43 = vadd.f32 %v1720_v41, %v1952_v39  ;;  %v743_v44 = vadd.f32 %v1752_v42, %v1952_v39  ;;  %v606_v45 = vpop.f32.mrb[11].mxu0  ;;  %v734_v46 = vpop.f32.mrb[11].mxu1  ;;  %v836_v49 = vmax.f32 %v612_v34, 0.0  ;;  %v868_v50 = vmax.f32 %v740_v35, 0.0 }
  0xfd   : > { %v607_v47 = vadd.f32 %v1952_v39, %v606_v45  ;;  %v735_v48 = vadd.f32 %v1952_v39, %v734_v46  ;;  %v834_v53 = vmax.f32 %v604_v38, 0.0  ;;  %v866_v54 = vmax.f32 %v732_v40, 0.0 }
  0xfe   : > { %v837_v51 = vmax.f32 %v615_v43, 0.0  ;;  %v869_v52 = vmax.f32 %v743_v44, 0.0 }
  0xff   : > { %v835_v55 = vmax.f32 %v607_v47, 0.0  ;;  %v867_v56 = vmax.f32 %v735_v48, 0.0 }
 0x100   : > { %v1502_v57 = vpack.c.bf16 %v837_v51, %v836_v49  ;;  %v1582_v58 = vpack.c.bf16 %v869_v52, %v868_v50 }
 0x101   : > { %v1497_v59 = vpack.c.bf16 %v835_v55, %v834_v53  ;;  %v1577_v60 = vpack.c.bf16 %v867_v56, %v866_v54  ;;  %v1723_v61 = vpop.f32.mrb[12].mxu0  ;;  %v1755_v62 = vpop.f32.mrb[12].mxu1 }
 0x102   : > { %1638 = vst [vmem:[%s1967_s4 + $0x28] sm:$0xff] %v1502_v57   ;;  %1654 = vst [vmem:[%s1967_s4 + $0xa8] sm:$0xff] %v1582_v58   ;;  %v628_v63 = vadd.f32 %v1723_v61, %v1952_v39  ;;  %v756_v0 = vadd.f32 %v1755_v62, %v1952_v39  ;;  %v619_v1 = vpop.f32.mrb[13].mxu0  ;;  %v747_v2 = vpop.f32.mrb[13].mxu1 }
 0x103   : > { %1637 = vst [vmem:[%s1967_s4 + $0x20] sm:$0xff] %v1497_v59   ;;  %1653 = vst [vmem:[%s1967_s4 + $0xa0] sm:$0xff] %v1577_v60   ;;  %v620_v3 = vadd.f32 %v1952_v39, %v619_v1  ;;  %v748_v4 = vadd.f32 %v1952_v39, %v747_v2  ;;  %v1724_v5 = vpop.f32.mrb[14].mxu0  ;;  %v1756_v6 = vpop.f32.mrb[14].mxu1 }
 0x104   : > { %v631_v7 = vadd.f32 %v1724_v5, %v1952_v39  ;;  %v759_v8 = vadd.f32 %v1756_v6, %v1952_v39  ;;  %v622_v9 = vpop.f32.mrb[15].mxu0  ;;  %v750_v10 = vpop.f32.mrb[15].mxu1  ;;  %v840_v13 = vmax.f32 %v628_v63, 0.0  ;;  %v872_v14 = vmax.f32 %v756_v0, 0.0 }
 0x105   : > { %v623_v11 = vadd.f32 %v1952_v39, %v622_v9  ;;  %v751_v12 = vadd.f32 %v1952_v39, %v750_v10  ;;  %v838_v17 = vmax.f32 %v620_v3, 0.0  ;;  %v870_v18 = vmax.f32 %v748_v4, 0.0 }
 0x106   : > { %v841_v15 = vmax.f32 %v631_v7, 0.0  ;;  %v873_v16 = vmax.f32 %v759_v8, 0.0 }
 0x107   : > { %v839_v19 = vmax.f32 %v623_v11, 0.0  ;;  %v871_v20 = vmax.f32 %v751_v12, 0.0 }
 0x108   : > { %v1512_v21 = vpack.c.bf16 %v841_v15, %v840_v13  ;;  %v1592_v22 = vpack.c.bf16 %v873_v16, %v872_v14 }
 0x109   : > { %v1507_v23 = vpack.c.bf16 %v839_v19, %v838_v17  ;;  %v1587_v24 = vpack.c.bf16 %v871_v20, %v870_v18  ;;  %v1727_v25 = vpop.f32.mrb[16].mxu0  ;;  %v1759_v26 = vpop.f32.mrb[16].mxu1 }
 0x10a   : > { %1640 = vst [vmem:[%s1967_s4 + $0x38] sm:$0xff] %v1512_v21   ;;  %1656 = vst [vmem:[%s1967_s4 + $0xb8] sm:$0xff] %v1592_v22   ;;  %v644_v27 = vadd.f32 %v1727_v25, %v1952_v39  ;;  %v772_v28 = vadd.f32 %v1759_v26, %v1952_v39  ;;  %v635_v29 = vpop.f32.mrb[17].mxu0  ;;  %v763_v30 = vpop.f32.mrb[17].mxu1 }
 0x10b   : > { %1639 = vst [vmem:[%s1967_s4 + $0x30] sm:$0xff] %v1507_v23   ;;  %1655 = vst [vmem:[%s1967_s4 + $0xb0] sm:$0xff] %v1587_v24   ;;  %v636_v31 = vadd.f32 %v1952_v39, %v635_v29  ;;  %v764_v32 = vadd.f32 %v1952_v39, %v763_v30  ;;  %v1728_v33 = vpop.f32.mrb[18].mxu0  ;;  %v1760_v34 = vpop.f32.mrb[18].mxu1 }
 0x10c   : > { %v647_v35 = vadd.f32 %v1728_v33, %v1952_v39  ;;  %v775_v36 = vadd.f32 %v1760_v34, %v1952_v39  ;;  %v638_v37 = vpop.f32.mrb[19].mxu0  ;;  %v766_v38 = vpop.f32.mrb[19].mxu1  ;;  %v844_v42 = vmax.f32 %v644_v27, 0.0  ;;  %v876_v43 = vmax.f32 %v772_v28, 0.0 }
 0x10d   : > { %v639_v40 = vadd.f32 %v1952_v39, %v638_v37  ;;  %v767_v41 = vadd.f32 %v1952_v39, %v766_v38  ;;  %v842_v46 = vmax.f32 %v636_v31, 0.0  ;;  %v874_v47 = vmax.f32 %v764_v32, 0.0 }
 0x10e   : > { %v845_v44 = vmax.f32 %v647_v35, 0.0  ;;  %v877_v45 = vmax.f32 %v775_v36, 0.0 }
 0x10f   : > { %v843_v48 = vmax.f32 %v639_v40, 0.0  ;;  %v875_v49 = vmax.f32 %v767_v41, 0.0 }
 0x110   : > { %v1522_v50 = vpack.c.bf16 %v845_v44, %v844_v42  ;;  %v1602_v51 = vpack.c.bf16 %v877_v45, %v876_v43 }
 0x111   : > { %v1517_v52 = vpack.c.bf16 %v843_v48, %v842_v46  ;;  %v1597_v53 = vpack.c.bf16 %v875_v49, %v874_v47  ;;  %v1731_v54 = vpop.f32.mrb[20].mxu0  ;;  %v1763_v55 = vpop.f32.mrb[20].mxu1 }
 0x112   : > { %1642 = vst [vmem:[%s1967_s4 + $0x48] sm:$0xff] %v1522_v50   ;;  %1658 = vst [vmem:[%s1967_s4 + $0xc8] sm:$0xff] %v1602_v51   ;;  %v660_v56 = vadd.f32 %v1731_v54, %v1952_v39  ;;  %v788_v57 = vadd.f32 %v1763_v55, %v1952_v39  ;;  %v651_v58 = vpop.f32.mrb[21].mxu0  ;;  %v779_v59 = vpop.f32.mrb[21].mxu1 }
 0x113   : > { %1641 = vst [vmem:[%s1967_s4 + $0x40] sm:$0xff] %v1517_v52   ;;  %1657 = vst [vmem:[%s1967_s4 + $0xc0] sm:$0xff] %v1597_v53   ;;  %v652_v60 = vadd.f32 %v1952_v39, %v651_v58  ;;  %v780_v61 = vadd.f32 %v1952_v39, %v779_v59  ;;  %v1732_v62 = vpop.f32.mrb[22].mxu0  ;;  %v1764_v63 = vpop.f32.mrb[22].mxu1 }
 0x114   : > { %v663_v0 = vadd.f32 %v1732_v62, %v1952_v39  ;;  %v791_v1 = vadd.f32 %v1764_v63, %v1952_v39  ;;  %v654_v2 = vpop.f32.mrb[23].mxu0  ;;  %v782_v3 = vpop.f32.mrb[23].mxu1  ;;  %v848_v6 = vmax.f32 %v660_v56, 0.0  ;;  %v880_v7 = vmax.f32 %v788_v57, 0.0 }
 0x115   : > { %v655_v4 = vadd.f32 %v1952_v39, %v654_v2  ;;  %v783_v5 = vadd.f32 %v1952_v39, %v782_v3  ;;  %v846_v10 = vmax.f32 %v652_v60, 0.0  ;;  %v878_v11 = vmax.f32 %v780_v61, 0.0 }
 0x116   : > { %v849_v8 = vmax.f32 %v663_v0, 0.0  ;;  %v881_v9 = vmax.f32 %v791_v1, 0.0 }
 0x117   : > { %v847_v12 = vmax.f32 %v655_v4, 0.0  ;;  %v879_v13 = vmax.f32 %v783_v5, 0.0 }
 0x118   : > { %v1532_v14 = vpack.c.bf16 %v849_v8, %v848_v6  ;;  %v1612_v15 = vpack.c.bf16 %v881_v9, %v880_v7 }
 0x119   : > { %v1527_v16 = vpack.c.bf16 %v847_v12, %v846_v10  ;;  %v1607_v17 = vpack.c.bf16 %v879_v13, %v878_v11  ;;  %v1735_v18 = vpop.f32.mrb[24].mxu0  ;;  %v1767_v19 = vpop.f32.mrb[24].mxu1 }
 0x11a   : > { %1644 = vst [vmem:[%s1967_s4 + $0x58] sm:$0xff] %v1532_v14   ;;  %1660 = vst [vmem:[%s1967_s4 + $0xd8] sm:$0xff] %v1612_v15   ;;  %v676_v20 = vadd.f32 %v1735_v18, %v1952_v39  ;;  %v804_v21 = vadd.f32 %v1767_v19, %v1952_v39  ;;  %v667_v22 = vpop.f32.mrb[25].mxu0  ;;  %v795_v23 = vpop.f32.mrb[25].mxu1 }
 0x11b   : > { %1643 = vst [vmem:[%s1967_s4 + $0x50] sm:$0xff] %v1527_v16   ;;  %1659 = vst [vmem:[%s1967_s4 + $0xd0] sm:$0xff] %v1607_v17   ;;  %v668_v24 = vadd.f32 %v1952_v39, %v667_v22  ;;  %v796_v25 = vadd.f32 %v1952_v39, %v795_v23  ;;  %v1736_v26 = vpop.f32.mrb[26].mxu0  ;;  %v1768_v27 = vpop.f32.mrb[26].mxu1 }
 0x11c   : > { %v679_v28 = vadd.f32 %v1736_v26, %v1952_v39  ;;  %v807_v29 = vadd.f32 %v1768_v27, %v1952_v39  ;;  %v670_v30 = vpop.f32.mrb[27].mxu0  ;;  %v798_v31 = vpop.f32.mrb[27].mxu1  ;;  %v852_v34 = vmax.f32 %v676_v20, 0.0  ;;  %v884_v35 = vmax.f32 %v804_v21, 0.0 }
 0x11d   : > { %v671_v32 = vadd.f32 %v1952_v39, %v670_v30  ;;  %v799_v33 = vadd.f32 %v1952_v39, %v798_v31  ;;  %v850_v38 = vmax.f32 %v668_v24, 0.0  ;;  %v882_v40 = vmax.f32 %v796_v25, 0.0 }
 0x11e   : > { %v853_v36 = vmax.f32 %v679_v28, 0.0  ;;  %v885_v37 = vmax.f32 %v807_v29, 0.0 }
 0x11f   : > { %v851_v41 = vmax.f32 %v671_v32, 0.0  ;;  %v883_v42 = vmax.f32 %v799_v33, 0.0 }
 0x120   : > { %v1542_v43 = vpack.c.bf16 %v853_v36, %v852_v34  ;;  %v1622_v44 = vpack.c.bf16 %v885_v37, %v884_v35 }
 0x121   : > { %v1537_v45 = vpack.c.bf16 %v851_v41, %v850_v38  ;;  %v1617_v46 = vpack.c.bf16 %v883_v42, %v882_v40  ;;  %v1739_v47 = vpop.f32.mrb[28].mxu0  ;;  %v1771_v48 = vpop.f32.mrb[28].mxu1 }
 0x122   : > { %1646 = vst [vmem:[%s1967_s4 + $0x68] sm:$0xff] %v1542_v43   ;;  %1662 = vst [vmem:[%s1967_s4 + $0xe8] sm:$0xff] %v1622_v44   ;;  %v692_v49 = vadd.f32 %v1739_v47, %v1952_v39  ;;  %v820_v50 = vadd.f32 %v1771_v48, %v1952_v39  ;;  %v683_v51 = vpop.f32.mrb[29].mxu0  ;;  %v811_v52 = vpop.f32.mrb[29].mxu1 }
 0x123   : > { %1645 = vst [vmem:[%s1967_s4 + $0x60] sm:$0xff] %v1537_v45   ;;  %1661 = vst [vmem:[%s1967_s4 + $0xe0] sm:$0xff] %v1617_v46   ;;  %v684_v53 = vadd.f32 %v1952_v39, %v683_v51  ;;  %v812_v54 = vadd.f32 %v1952_v39, %v811_v52  ;;  %v1740_v55 = vpop.f32.mrb[30].mxu0  ;;  %v1772_v56 = vpop.f32.mrb[30].mxu1 }
 0x124   : > { %v695_v57 = vadd.f32 %v1740_v55, %v1952_v39  ;;  %v823_v58 = vadd.f32 %v1772_v56, %v1952_v39  ;;  %v686_v59 = vpop.f32.mrb[31].mxu0  ;;  %v814_v60 = vpop.f32.mrb[31].mxu1  ;;  %v856_v63 = vmax.f32 %v692_v49, 0.0  ;;  %v888_v0 = vmax.f32 %v820_v50, 0.0 }
 0x125   : > { %v687_v61 = vadd.f32 %v1952_v39, %v686_v59  ;;  %v815_v62 = vadd.f32 %v1952_v39, %v814_v60  ;;  %v854_v3 = vmax.f32 %v684_v53, 0.0  ;;  %v886_v4 = vmax.f32 %v812_v54, 0.0 }
 0x126   : > { %v857_v1 = vmax.f32 %v695_v57, 0.0  ;;  %v889_v2 = vmax.f32 %v823_v58, 0.0 }
 0x127   : > { %v855_v5 = vmax.f32 %v687_v61, 0.0  ;;  %v887_v6 = vmax.f32 %v815_v62, 0.0 }
 0x128   : > { %v1552_v7 = vpack.c.bf16 %v857_v1, %v856_v63  ;;  %v1632_v8 = vpack.c.bf16 %v889_v2, %v888_v0 }
 0x129   : > { %v1547_v9 = vpack.c.bf16 %v855_v5, %v854_v3  ;;  %v1627_v10 = vpack.c.bf16 %v887_v6, %v886_v4 }
 0x12a   : > { %1648 = vst [vmem:[%s1967_s4 + $0x78] sm:$0xff] %v1552_v7   ;;  %1664 = vst [vmem:[%s1967_s4 + $0xf8] sm:$0xff] %v1632_v8  }
 0x12b   : > { %1647 = vst [vmem:[%s1967_s4 + $0x70] sm:$0xff] %v1547_v9   ;;  %1663 = vst [vmem:[%s1967_s4 + $0xf0] sm:$0xff] %v1627_v10  }
 0x12c PF: > { %s13_s12 = sadd.s32 1, %s1832_s12  }
 0x12d   : > { %p10_p4 = scmp.ge.s32.totalorder %s13_s12, 10  }
 0x12f   :  { %12 = sbr.rel (!%p10_p4) target bundleno = 1 (0x1), region = 62 }

// kernel: tile.27
= control target key start
LH: loop header
LB: loop body
LE: loop exit
PB: predicated region body
PF: predicated region fallthrough
CT: control target
= control target key end

     0   :  { %s28_s0 = inlined_call_operand.vmem [shape: f32[16], index: 0, kind: input, shape index: {}]   ;;  %s29_s1 = inlined_call_operand.vmem [shape: f32[9,16], index: 1, kind: output, shape index: {}]  }
   0x1   :  { %v4_v0 = vld [vmem:[%s28_s0] ss:$0 sm:$0xff] }
   0x2   :  { %5 = vst [vmem:[%s29_s1] sm:$0xff] %v4_v0  ;;  %8 = vst [vmem:[%s29_s1 + $0x8] sm:$0xff] %v4_v0 }

// kernel: tile.32
= control target key start
LH: loop header
LB: loop body
LE: loop exit
PB: predicated region body
PF: predicated region fallthrough
CT: control target
= control target key end

     0   :  { %s74_s10 = smov 112   ;;  %s75_s11 = smov 80   ;;  %vm4_vm0 = vcmask 130048   ;;  %vm10_vm1 = vcmask 1048448   ;;  %vm16_vm2 = vcmask 917248   ;;  %vm22_vm3 = vcmask 786048   ;;  %s121_s0 = inlined_call_operand.vmem [shape: f32[9,16], index: 0, kind: input, shape index: {}]   ;;  %s122_s1 = inlined_call_operand.vmem [shape: f32[1,144], index: 1, kind: output, shape index: {}]  }
   0x1   :  { %v59_v0 = vld [vmem:[%s121_s0 + $0x7] sm:$0x1]   ;;  %v61_v1 = vld [vmem:[%s121_s0 + $0x5] sm:$0x1]   ;;  %v60_v2 = vld [vmem:[%s121_s0 + $0x6] sm:$0x1]  }
   0x2   :  { %8 = vrot.lane.b32.xlu0 %v59_v0, %s74_s10  ;;  %20 = vrot.lane.b32.xlu1 %v61_v1, %s75_s11  ;;  %v62_v3 = vld [vmem:[%s121_s0 + $0x4] sm:$0x1]   ;;  %s2_s16 = smov 3  ;;  %s76_s19 = smov 96   ;;  %v63_v5 = vld [vmem:[%s121_s0 + $0x3] sm:$0x1]  }
   0x3   :  { %v3_v4 = vld [vmem:[%s121_s0] ss:$8 sm:%s2_s16]   ;;  %s77_s20 = smov 64   ;;  %v64_v6 = vld [vmem:[%s121_s0 + $0x2] sm:$0x1]   ;;  %s78_s25 = smov 48  }
   0x4   :  { %5 = vst.msk [vmem:[#allocation0] ss:$8 sm:$0x3] %vm4_vm0, %v3_v4   ;;  %s79_s26 = smov 32   ;;  %v65_v7 = vld [vmem:[%s121_s0 + $0x1] sm:$0x1]  }
   0x5   :  { %s80_s0 = smov 16   ;;  %vm28_vm4 = vcmask 654848   ;;  %vm34_vm5 = vcmask 523648   ;;  %vm40_vm6 = vcmask 392448   ;;  %vm46_vm7 = vcmask 261248  }
   0x6   :  { %14 = vrot.lane.b32.xlu0 %v60_v2, %s76_s19  ;;  %26 = vrot.lane.b32.xlu1 %v62_v3, %s77_s20 }
   0xa   :  { %32 = vrot.lane.b32.xlu0 %v63_v5, %s78_s25  ;;  %38 = vrot.lane.b32.xlu1 %v64_v6, %s79_s26 }
   0xb   :  { %v55_v8 = vld [vmem:[#allocation0 + $0x8] sm:$0x1] }
   0xc   :  { %66 = vst [vmem:[%s122_s1 + $0x1] sm:$0x1] %v55_v8 }
   0xe   :  { %44 = vrot.lane.b32.xlu0 %v65_v7, %s80_s0 }
  0x74   :  { %v9_v9 = vpop.permute.xlu0 %8   ;;  %v21_v10 = vpop.permute.xlu1 %20  }
  0x75   :  { %11 = vst.msk [vmem:[#allocation0] sm:$0x1] %vm10_vm1, %v9_v9  }
  0x78   :  { %v15_v11 = vpop.permute.xlu0 %14   ;;  %v27_v12 = vpop.permute.xlu1 %26  }
  0x79   :  { %17 = vst.msk [vmem:[#allocation0] sm:$0x1] %vm16_vm2, %v15_v11  }
  0x7a   :  { %23 = vst.msk [vmem:[#allocation0] sm:$0x1] %vm22_vm3, %v21_v10  }
  0x7b   :  { %29 = vst.msk [vmem:[#allocation0] sm:$0x1] %vm28_vm4, %v27_v12  }
  0x7c   :  { %v33_v13 = vpop.permute.xlu0 %32   ;;  %v39_v14 = vpop.permute.xlu1 %38  }
  0x7d   :  { %35 = vst.msk [vmem:[#allocation0] sm:$0x1] %vm34_vm5, %v33_v13  }
  0x7e   :  { %41 = vst.msk [vmem:[#allocation0] sm:$0x1] %vm40_vm6, %v39_v14  }
  0x80   :  { %v45_v15 = vpop.permute.xlu0 %44  }
  0x81   :  { %47 = vst.msk [vmem:[#allocation0] sm:$0x1] %vm46_vm7, %v45_v15  }
  0x88   :  { %v51_v16 = vld [vmem:[#allocation0] sm:$0x1] }
  0x89   :  { %53 = vst [vmem:[%s122_s1] sm:$0x1] %v51_v16 }

// kernel: fbn_forward.8
= control target key start
LH: loop header
LB: loop body
LE: loop exit
PB: predicated region body
PF: predicated region fallthrough
CT: control target
= control target key end

     0   :  { %s2250_s18 = smov 0   ;;  %s2813_s0 = inlined_call_operand.vmem [shape: bf16[1024,144], index: 0, kind: input, shape index: {}]   ;;  %s2814_s1 = inlined_call_operand.vmem [shape: f32[1,144], index: 1, kind: input, shape index: {}]   ;;  %s2815_s2 = inlined_call_operand.vmem [shape: f32[1,144], index: 2, kind: input, shape index: {}]   ;;  %s2816_s3 = inlined_call_operand.vmem [shape: bf16[144,128], index: 3, kind: input, shape index: {}]   ;;  %s2817_s4 = inlined_call_operand.vmem [shape: f32[1,128], index: 4, kind: input, shape index: {}]   ;;  %s2818_s5 = inlined_call_operand.vmem [shape: bf16[1024,128], index: 5, kind: output, shape index: {}]  }
   0x1 LB: > { %s1801_s19 = sadd.s32 4294967295, %s2217_s18   ;;  %p1805_p0 = scmp.ge.s32.totalorder %s2217_s18, 1  ;;  %s2217_s18 = sphi %s2250_s18, %s15_s18  }
   0x2   : > { %p189_p1 = scmp.lt.s32.totalorder %s2217_s18, 3 }
   0x4   : > { %p190_p2 = pnand %p1805_p0, %p189_p1 }
   0x5   : > { %v2202_v0 = vld [vmem:[%s2816_s3] sm:$0xff] (!%p190_p2)   ;;  %v426_v1 = vlaneseq (!%p190_p2)  ;;  %v2219_v2 = vmov (!%p190_p2), 0   ;;  %s1806_s22 = sshll.u32 (!%p190_p2), %s1801_s19, 6  ;;  %v2203_v3 = vld [vmem:[%s2816_s3 + $0x8] sm:$0xff] (!%p190_p2)   ;;  %v2204_v5 = vld [vmem:[%s2816_s3 + $0x10] sm:$0xff] (!%p190_p2)   ;;  %vm975_vm0 = vcmask (!%p190_p2), 130048  }
   0x6   : > { %193 = sbr.rel (%p190_p2) target bundleno = 387 (0x183), region = 40  ;;  %1072 = vmatprep.subr.bf16.mxu0 (!%p190_p2), %v2219_v2  ;;  %2175 = vmatprep.subr.bf16.mxu1 (!%p190_p2), %v2219_v2  ;;  %p219_p3 = scmp.lt.s32.totalorder (!%p190_p2), %s1806_s22, 127  ;;  %v2205_v8 = vld [vmem:[%s2816_s3 + $0x18] sm:$0xff] (!%p190_p2)   ;;  %v424_v11 = vld [vmem:[%s2814_s1] sm:$0x3] (!%p190_p2)  ;;  %v2207_v51 = vld [vmem:[%s2816_s3 + $0x28] sm:$0xff] (!%p190_p2)  }
   0x7   : > { %1073 = vmatpush1.bf16.msra.mxu0 (!%p190_p2), %v2202_v0  ;;  %2184 = vmatpush1.bf16.msra.mxu1 (!%p190_p2), %v2202_v0  ;;  %v427_v4 = vshrl.u32 (!%p190_p2), %v426_v1, 7  ;;  %v564_v16 = vld [vmem:[%s2815_s2] sm:$0x3] (!%p190_p2) }
   0x8   : > { %1074 = vmatprep.subr.bf16.mxu0 (!%p190_p2), %v2219_v2  ;;  %2176 = vmatprep.subr.bf16.mxu1 (!%p190_p2), %v2219_v2  ;;  %v2206_v33 = vld [vmem:[%s2816_s3 + $0x20] sm:$0xff] (!%p190_p2)  }
   0x9   : > { %v428_v6 = vsub.s32 (!%p190_p2), 0, %v427_v4  ;;  %v432_v7 = vsub.s32 (!%p190_p2), 1, %v427_v4 }
   0xb   : > { %1075 = vmatpush1.bf16.msra.mxu0 (!%p190_p2), %v2203_v3  ;;  %2185 = vmatpush1.bf16.msra.mxu1 (!%p190_p2), %v2203_v3  ;;  %v2296_v19 = vrot.slane (!%p190_p2), %v424_v11, %v428_v6  ;;  %v2298_v20 = vrot.slane (!%p190_p2), %v424_v11, %v432_v7  ;;  %v2300_v21 = vrot.slane (!%p190_p2), %v564_v16, %v428_v6  ;;  %v2208_v6 = vld [vmem:[%s2816_s3 + $0x30] sm:$0xff] (!%p190_p2)  }
   0xc   : > { %1076 = vmatprep.subr.bf16.mxu0 (!%p190_p2), %v2219_v2  ;;  %2177 = vmatprep.subr.bf16.mxu1 (!%p190_p2), %v2219_v2  ;;  %v2305_v24 = vrot.slane (!%p190_p2), %v564_v16, %v432_v7 }
   0xd   : > { %s2820_s22 = smov (!%p219_p3, %s1806_s22), 127 }
   0xe   : > { %s1919_s27 = sshll.u32 %s2820_s22, 3  ;;  %s1810_s26 = sshll.u32 %s2820_s22, 2 }
   0xf   : > { %s2279_s30 = scalar_lea.vmem %s2813_s0, %s1919_s27  ;;  %1077 = vmatpush1.bf16.msra.mxu0 %v2204_v5  ;;  %2186 = vmatpush1.bf16.msra.mxu1 %v2204_v5  ;;  %s2716_s29 = scalar_lea.vmem %s2818_s5, %s1810_s26 }
  0x10   : > { %v232_v9 = vld [vmem:[%s2279_s30] sm:$0xff]  ;;  %v233_v10 = vld [vmem:[%s2279_s30 + $0x8] sm:$0xff]  ;;  %1078 = vmatprep.subr.bf16.mxu0 %v2219_v2  ;;  %2178 = vmatprep.subr.bf16.mxu1 %v2219_v2  ;;  %v2303_v23 = vld [vmem:[%s2279_s30 + $0x10] sm:$0xff] }
  0x11   : > { %v296_v12 = vunpack.c.l.bf16 %v232_v9  ;;  %v297_v13 = vunpack.c.h.bf16 %v232_v9  ;;  %v298_v14 = vunpack.c.l.bf16 %v233_v10  ;;  %v299_v15 = vunpack.c.h.bf16 %v233_v10  ;;  %v264_v17 = vld [vmem:[%s2279_s30 + $0x100] sm:$0xff]  ;;  %v265_v18 = vld [vmem:[%s2279_s30 + $0x108] sm:$0xff]  ;;  %v2308_v28 = vld [vmem:[%s2279_s30 + $0x18] sm:$0xff] }
  0x12   : > { %v360_v22 = vunpack.c.l.bf16 %v264_v17  ;;  %v361_v25 = vunpack.c.h.bf16 %v264_v17  ;;  %v362_v26 = vunpack.c.l.bf16 %v265_v18  ;;  %v363_v27 = vunpack.c.h.bf16 %v265_v18  ;;  %v266_v50 = vld [vmem:[%s2279_s30 + $0x110] sm:$0xff]  ;;  %v267_v56 = vld [vmem:[%s2279_s30 + $0x118] sm:$0xff]  ;;  %v236_v11 = vld [vmem:[%s2279_s30 + $0x20] sm:$0xff] }
  0x13   : > { %v437_v29 = vmul.f32 %v2298_v20, %v297_v13  ;;  %v439_v30 = vmul.f32 %v2298_v20, %v299_v15  ;;  %v436_v31 = vmul.f32 %v2296_v19, %v296_v12  ;;  %v438_v32 = vmul.f32 %v2296_v19, %v298_v14  ;;  %1079 = vmatpush1.bf16.msra.mxu0 %v2205_v8 }
  0x14   : > { %2187 = vmatpush1.bf16.msra.mxu1 %v2205_v8  ;;  %v501_v34 = vmul.f32 %v2298_v20, %v361_v25  ;;  %v503_v35 = vmul.f32 %v2298_v20, %v363_v27  ;;  %v500_v36 = vmul.f32 %v2296_v19, %v360_v22  ;;  %v301_v37 = vunpack.c.h.bf16 %v2303_v23  ;;  %1080 = vmatprep.subr.bf16.mxu0 %v2219_v2 }
  0x15   : > { %2179 = vmatprep.subr.bf16.mxu1 %v2219_v2  ;;  %v577_v38 = vadd.f32 %v2305_v24, %v437_v29  ;;  %v579_v39 = vadd.f32 %v2305_v24, %v439_v30  ;;  %v576_v40 = vadd.f32 %v2300_v21, %v436_v31  ;;  %v303_v41 = vunpack.c.h.bf16 %v2308_v28  ;;  %v268_v29 = vld [vmem:[%s2279_s30 + $0x120] sm:$0xff]  ;;  %v2209_v30 = vld [vmem:[%s2816_s3 + $0x38] sm:$0xff]  }
  0x16   : > { %v641_v42 = vadd.f32 %v2305_v24, %v501_v34  ;;  %v643_v43 = vadd.f32 %v2305_v24, %v503_v35  ;;  %v578_v44 = vadd.f32 %v2300_v21, %v438_v32  ;;  %v502_v45 = vmul.f32 %v2296_v19, %v362_v26  ;;  %v269_v35 = vld [vmem:[%s2279_s30 + $0x128] sm:$0xff] }
  0x17   : > { %v705_v46 = vmax.f32 %v577_v38, 0.0  ;;  %v707_v47 = vmax.f32 %v579_v39, 0.0  ;;  %v704_v48 = vmax.f32 %v576_v40, 0.0  ;;  %v640_v49 = vadd.f32 %v2300_v21, %v500_v36  ;;  %1081 = vmatpush1.bf16.msra.mxu0 %v2206_v33 }
  0x18   : > { %2188 = vmatpush1.bf16.msra.mxu1 %v2206_v33  ;;  %v769_v52 = vmax.f32 %v641_v42, 0.0  ;;  %v771_v53 = vmax.f32 %v643_v43, 0.0  ;;  %v706_v54 = vmax.f32 %v578_v44, 0.0  ;;  %v642_v55 = vadd.f32 %v2300_v21, %v502_v45  ;;  %1082 = vmatprep.subr.bf16.mxu0 %v2219_v2 }
  0x19   : > { %2180 = vmatprep.subr.bf16.mxu1 %v2219_v2  ;;  %v833_v57 = vpack.c.bf16 %v707_v47, %v705_v46  ;;  %v768_v58 = vmax.f32 %v640_v49, 0.0  ;;  %v441_v59 = vmul.f32 %v2298_v20, %v301_v37  ;;  %v443_v60 = vmul.f32 %v2298_v20, %v303_v41 }
  0x1a   : > { %v865_v61 = vpack.c.bf16 %v771_v53, %v769_v52  ;;  %v2342_v62 = vpack.c.bf16 %v706_v54, %v704_v48  ;;  %v770_v63 = vmax.f32 %v642_v55, 0.0  ;;  %v365_v0 = vunpack.c.h.bf16 %v266_v50  ;;  %v2210_v48 = vld [vmem:[%s2816_s3 + $0x40] sm:$0xff]  }
  0x1b   : > { %1821 = vmatprep.mubr.msk.bf16.mxu0 %vm975_vm0, %v833_v57  ;;  %v581_v1 = vadd.f32 %v2305_v24, %v441_v59  ;;  %v583_v3 = vadd.f32 %v2305_v24, %v443_v60  ;;  %v367_v4 = vunpack.c.h.bf16 %v267_v56  ;;  %v300_v5 = vunpack.c.l.bf16 %v2303_v23  ;;  %1083 = vmatpush1.bf16.msra.mxu0 %v2207_v51  ;;  %v237_v23 = vld [vmem:[%s2279_s30 + $0x28] sm:$0xff]  ;;  %v238_v57 = vld [vmem:[%s2279_s30 + $0x30] sm:$0xff] }
  0x1c   : > { %2189 = vmatpush1.bf16.msra.mxu1 %v2207_v51  ;;  %v2351_v7 = vpack.c.bf16 %v770_v63, %v768_v58  ;;  %v505_v8 = vmul.f32 %v2298_v20, %v365_v0  ;;  %v302_v9 = vunpack.c.l.bf16 %v2308_v28  ;;  %v364_v10 = vunpack.c.l.bf16 %v266_v50  ;;  %1084 = vmatprep.subr.bf16.mxu0 %v2219_v2 }
  0x1d   : > { %2181 = vmatprep.subr.bf16.mxu1 %v2219_v2  ;;  %v709_v12 = vmax.f32 %v581_v1, 0.0  ;;  %v711_v13 = vmax.f32 %v583_v3, 0.0  ;;  %v507_v14 = vmul.f32 %v2298_v20, %v367_v4  ;;  %v440_v15 = vmul.f32 %v2296_v19, %v300_v5  ;;  %1837 = vmatprep.mubr.msk.bf16.mxu1 %vm975_vm0, %v865_v61  ;;  %v239_v3 = vld [vmem:[%s2279_s30 + $0x38] sm:$0xff] }
  0x1e   : > { %v645_v16 = vadd.f32 %v2305_v24, %v505_v8  ;;  %v442_v17 = vmul.f32 %v2296_v19, %v302_v9  ;;  %v366_v18 = vunpack.c.l.bf16 %v267_v56  ;;  %v504_v22 = vmul.f32 %v2296_v19, %v364_v10  ;;  %v270_v9 = vld [vmem:[%s2279_s30 + $0x130] sm:$0xff] }
  0x1f   : > { %v2365_v25 = vpack.c.bf16 %v711_v13, %v709_v12  ;;  %v647_v26 = vadd.f32 %v2305_v24, %v507_v14  ;;  %v580_v27 = vadd.f32 %v2300_v21, %v440_v15  ;;  %v305_v28 = vunpack.c.h.bf16 %v236_v11  ;;  %1085 = vmatpush1.bf16.msra.mxu0 %v2208_v6  ;;  %v271_v14 = vld [vmem:[%s2279_s30 + $0x138] sm:$0xff] }
  0x20   : > { %2190 = vmatpush1.bf16.msra.mxu1 %v2208_v6  ;;  %v773_v31 = vmax.f32 %v645_v16, 0.0  ;;  %v582_v32 = vadd.f32 %v2300_v21, %v442_v17  ;;  %v506_v33 = vmul.f32 %v2296_v19, %v366_v18  ;;  %v644_v34 = vadd.f32 %v2300_v21, %v504_v22  ;;  %1086 = vmatprep.subr.bf16.mxu0 %v2219_v2 }
  0x21   : > { %2182 = vmatprep.subr.bf16.mxu1 %v2219_v2  ;;  %v775_v36 = vmax.f32 %v647_v26, 0.0  ;;  %v708_v37 = vmax.f32 %v580_v27, 0.0  ;;  %v307_v38 = vunpack.c.h.bf16 %v237_v23  ;;  %v445_v39 = vmul.f32 %v2298_v20, %v305_v28 }
  0x22   : > { %v710_v40 = vmax.f32 %v582_v32, 0.0  ;;  %v646_v41 = vadd.f32 %v2300_v21, %v506_v33  ;;  %v772_v42 = vmax.f32 %v644_v34, 0.0  ;;  %v369_v43 = vunpack.c.h.bf16 %v268_v29 }
  0x23   : > { %v867_v44 = vpack.c.bf16 %v775_v36, %v773_v31  ;;  %v447_v45 = vmul.f32 %v2298_v20, %v307_v38  ;;  %v585_v46 = vadd.f32 %v2305_v24, %v445_v39  ;;  %v371_v47 = vunpack.c.h.bf16 %v269_v35  ;;  %1087 = vmatpush1.bf16.msra.mxu0 %v2209_v30 }
  0x24   : > { %2191 = vmatpush1.bf16.msra.mxu1 %v2209_v30  ;;  %v2386_v49 = vpack.c.bf16 %v710_v40, %v708_v37  ;;  %v774_v50 = vmax.f32 %v646_v41, 0.0  ;;  %v509_v51 = vmul.f32 %v2298_v20, %v369_v43  ;;  %v304_v52 = vunpack.c.l.bf16 %v236_v11  ;;  %1088 = vmatprep.subr.bf16.mxu0 %v2219_v2  ;;  %v240_v37 = vld [vmem:[%s2279_s30 + $0x40] sm:$0xff] }
  0x25   : > { %2183 = vmatprep.subr.bf16.mxu1 %v2219_v2  ;;  %v587_v53 = vadd.f32 %v2305_v24, %v447_v45  ;;  %v713_v54 = vmax.f32 %v585_v46, 0.0  ;;  %v511_v55 = vmul.f32 %v2298_v20, %v371_v47  ;;  %v306_v56 = vunpack.c.l.bf16 %v237_v23  ;;  %v241_v46 = vld [vmem:[%s2279_s30 + $0x48] sm:$0xff] }
  0x26   : > { %v2394_v58 = vpack.c.bf16 %v774_v50, %v772_v42  ;;  %v649_v59 = vadd.f32 %v2305_v24, %v509_v51  ;;  %v444_v60 = vmul.f32 %v2296_v19, %v304_v52  ;;  %v368_v61 = vunpack.c.l.bf16 %v268_v29  ;;  %v272_v52 = vld [vmem:[%s2279_s30 + $0x140] sm:$0xff] }
  0x27   : > { %v715_v63 = vmax.f32 %v587_v53, 0.0  ;;  %v651_v0 = vadd.f32 %v2305_v24, %v511_v55  ;;  %v446_v2 = vmul.f32 %v2296_v19, %v306_v56  ;;  %v370_v1 = vunpack.c.l.bf16 %v269_v35  ;;  %1089 = vmatpush1.bf16.msra.mxu0 %v2210_v48 }
  0x28   : > { %2192 = vmatpush1.bf16.msra.mxu1 %v2210_v48  ;;  %v777_v4 = vmax.f32 %v649_v59, 0.0  ;;  %v584_v5 = vadd.f32 %v2300_v21, %v444_v60  ;;  %v508_v6 = vmul.f32 %v2296_v19, %v368_v61  ;;  %v309_v8 = vunpack.c.h.bf16 %v238_v57 }
  0x29   : > { %v837_v10 = vpack.c.bf16 %v715_v63, %v713_v54  ;;  %v779_v11 = vmax.f32 %v651_v0, 0.0  ;;  %v586_v12 = vadd.f32 %v2300_v21, %v446_v2  ;;  %v510_v13 = vmul.f32 %v2296_v19, %v370_v1 }
  0x2a   : > { %v712_v15 = vmax.f32 %v584_v5, 0.0  ;;  %v648_v16 = vadd.f32 %v2300_v21, %v508_v6  ;;  %v311_v17 = vunpack.c.h.bf16 %v239_v3  ;;  %v449_v18 = vmul.f32 %v2298_v20, %v309_v8  ;;  %1105 = vmatmul.mubr.bf16.vlgmr.msra.gmra.mrb[0].mxu0 %v2342_v62 }
  0x2b   : > { %1233 = vmatmul.mubr.bf16.vlgmr.msra.gmra.mrb[0].mxu1 %v2351_v7  ;;  %v869_v22 = vpack.c.bf16 %v779_v11, %v777_v4  ;;  %v714_v23 = vmax.f32 %v586_v12, 0.0  ;;  %v650_v26 = vadd.f32 %v2300_v21, %v510_v13  ;;  %v373_v27 = vunpack.c.h.bf16 %v270_v9  ;;  %1822 = vmatprep.mubr.msk.bf16.mxu0 %vm975_vm0, %v2365_v25 }
  0x2c   : > { %1838 = vmatprep.mubr.msk.bf16.mxu1 %vm975_vm0, %v867_v44  ;;  %v776_v28 = vmax.f32 %v648_v16, 0.0  ;;  %v451_v29 = vmul.f32 %v2298_v20, %v311_v17  ;;  %v589_v30 = vadd.f32 %v2305_v24, %v449_v18  ;;  %v375_v31 = vunpack.c.h.bf16 %v271_v14 }
  0x2d   : > { %v2417_v62 = vpack.c.bf16 %v714_v23, %v712_v15  ;;  %v778_v7 = vmax.f32 %v650_v26, 0.0  ;;  %v513_v32 = vmul.f32 %v2298_v20, %v373_v27  ;;  %v308_v33 = vunpack.c.l.bf16 %v238_v57  ;;  %v273_v57 = vld [vmem:[%s2279_s30 + $0x148] sm:$0xff]  ;;  %v242_v15 = vld [vmem:[%s2279_s30 + $0x50] sm:$0xff] }
  0x2e   : > { %v591_v34 = vadd.f32 %v2305_v24, %v451_v29  ;;  %v717_v35 = vmax.f32 %v589_v30, 0.0  ;;  %v515_v25 = vmul.f32 %v2298_v20, %v375_v31  ;;  %v310_v36 = vunpack.c.l.bf16 %v239_v3  ;;  %v243_v29 = vld [vmem:[%s2279_s30 + $0x58] sm:$0xff] }
  0x2f   : > { %v868_v38 = vpack.c.bf16 %v778_v7, %v776_v28  ;;  %v653_v39 = vadd.f32 %v2305_v24, %v513_v32  ;;  %v448_v40 = vmul.f32 %v2296_v19, %v308_v33  ;;  %v372_v41 = vunpack.c.l.bf16 %v270_v9  ;;  %v274_v33 = vld [vmem:[%s2279_s30 + $0x150] sm:$0xff] }
  0x30   : > { %v719_v42 = vmax.f32 %v591_v34, 0.0  ;;  %v655_v43 = vadd.f32 %v2305_v24, %v515_v25  ;;  %v450_v44 = vmul.f32 %v2296_v19, %v310_v36  ;;  %v374_v45 = vunpack.c.l.bf16 %v271_v14 }
  0x31   : > { %v781_v47 = vmax.f32 %v653_v39, 0.0  ;;  %v588_v48 = vadd.f32 %v2300_v21, %v448_v40  ;;  %v512_v50 = vmul.f32 %v2296_v19, %v372_v41  ;;  %v313_v51 = vunpack.c.h.bf16 %v240_v37 }
  0x32   : > { %v839_v53 = vpack.c.bf16 %v719_v42, %v717_v35  ;;  %v783_v54 = vmax.f32 %v655_v43, 0.0  ;;  %v590_v55 = vadd.f32 %v2300_v21, %v450_v44  ;;  %v514_v56 = vmul.f32 %v2296_v19, %v374_v45  ;;  %1113 = vmatmul.mubr.bf16.gmra.mrb[4].mxu0 %v2386_v49 }
  0x33   : > { %1241 = vmatmul.mubr.bf16.gmra.mrb[4].mxu1 %v2394_v58  ;;  %v716_v59 = vmax.f32 %v588_v48, 0.0  ;;  %v652_v60 = vadd.f32 %v2300_v21, %v512_v50  ;;  %v315_v61 = vunpack.c.h.bf16 %v241_v46  ;;  %v453_v63 = vmul.f32 %v2298_v20, %v313_v51  ;;  %1823 = vmatprep.mubr.msk.bf16.mxu0 %vm975_vm0, %v837_v10 }
  0x34   : > { %1839 = vmatprep.mubr.msk.bf16.mxu1 %vm975_vm0, %v869_v22  ;;  %v871_v0 = vpack.c.bf16 %v783_v54, %v781_v47  ;;  %v718_v2 = vmax.f32 %v590_v55, 0.0  ;;  %v654_v1 = vadd.f32 %v2300_v21, %v514_v56  ;;  %v377_v3 = vunpack.c.h.bf16 %v272_v52 }
  0x35   : > { %v780_v4 = vmax.f32 %v652_v60, 0.0  ;;  %v455_v49 = vmul.f32 %v2298_v20, %v315_v61  ;;  %v593_v58 = vadd.f32 %v2305_v24, %v453_v63  ;;  %v379_v5 = vunpack.c.h.bf16 %v273_v57 }
  0x36   : > { %v838_v6 = vpack.c.bf16 %v718_v2, %v716_v59  ;;  %v782_v8 = vmax.f32 %v654_v1, 0.0  ;;  %v517_v9 = vmul.f32 %v2298_v20, %v377_v3  ;;  %v312_v10 = vunpack.c.l.bf16 %v240_v37  ;;  %v275_v37 = vld [vmem:[%s2279_s30 + $0x158] sm:$0xff]  ;;  %v244_v59 = vld [vmem:[%s2279_s30 + $0x60] sm:$0xff] }
  0x37   : > { %v595_v11 = vadd.f32 %v2305_v24, %v455_v49  ;;  %v721_v12 = vmax.f32 %v593_v58, 0.0  ;;  %v519_v13 = vmul.f32 %v2298_v20, %v379_v5  ;;  %v314_v14 = vunpack.c.l.bf16 %v241_v46  ;;  %v245_v49 = vld [vmem:[%s2279_s30 + $0x68] sm:$0xff] }
  0x38   : > { %v870_v16 = vpack.c.bf16 %v782_v8, %v780_v4  ;;  %v657_v17 = vadd.f32 %v2305_v24, %v517_v9  ;;  %v452_v18 = vmul.f32 %v2296_v19, %v312_v10  ;;  %v376_v22 = vunpack.c.l.bf16 %v272_v52  ;;  %v276_v10 = vld [vmem:[%s2279_s30 + $0x160] sm:$0xff] }
  0x39   : > { %v723_v23 = vmax.f32 %v595_v11, 0.0  ;;  %v659_v26 = vadd.f32 %v2305_v24, %v519_v13  ;;  %v454_v27 = vmul.f32 %v2296_v19, %v314_v14  ;;  %v378_v28 = vunpack.c.l.bf16 %v273_v57 }
  0x3a   : > { %v785_v30 = vmax.f32 %v657_v17, 0.0  ;;  %v592_v31 = vadd.f32 %v2300_v21, %v452_v18  ;;  %v516_v7 = vmul.f32 %v2296_v19, %v376_v22  ;;  %v317_v32 = vunpack.c.h.bf16 %v242_v15  ;;  %1121 = vmatmul.mubr.bf16.gmra.mrb[8].mxu0 %v2417_v62 }
  0x3b   : > { %1249 = vmatmul.mubr.bf16.gmra.mrb[8].mxu1 %v868_v38  ;;  %v841_v34 = vpack.c.bf16 %v723_v23, %v721_v12  ;;  %v787_v35 = vmax.f32 %v659_v26, 0.0  ;;  %v594_v25 = vadd.f32 %v2300_v21, %v454_v27  ;;  %v518_v36 = vmul.f32 %v2296_v19, %v378_v28  ;;  %1824 = vmatprep.mubr.msk.bf16.mxu0 %vm975_vm0, %v839_v53 }
  0x3c   : > { %1840 = vmatprep.mubr.msk.bf16.mxu1 %vm975_vm0, %v871_v0  ;;  %v720_v39 = vmax.f32 %v592_v31, 0.0  ;;  %v656_v40 = vadd.f32 %v2300_v21, %v516_v7  ;;  %v319_v41 = vunpack.c.h.bf16 %v243_v29  ;;  %v457_v42 = vmul.f32 %v2298_v20, %v317_v32 }
  0x3d   : > { %v873_v43 = vpack.c.bf16 %v787_v35, %v785_v30  ;;  %v722_v62 = vmax.f32 %v594_v25, 0.0  ;;  %v658_v38 = vadd.f32 %v2300_v21, %v518_v36  ;;  %v381_v44 = vunpack.c.h.bf16 %v274_v33 }
  0x3e   : > { %v784_v45 = vmax.f32 %v656_v40, 0.0  ;;  %v459_v46 = vmul.f32 %v2298_v20, %v319_v41  ;;  %v597_v47 = vadd.f32 %v2305_v24, %v457_v42  ;;  %v383_v48 = vunpack.c.h.bf16 %v275_v37 }
  0x3f   : > { %v840_v50 = vpack.c.bf16 %v722_v62, %v720_v39  ;;  %v786_v51 = vmax.f32 %v658_v38, 0.0  ;;  %v521_v52 = vmul.f32 %v2298_v20, %v381_v44  ;;  %v316_v53 = vunpack.c.l.bf16 %v242_v15  ;;  %v277_v15 = vld [vmem:[%s2279_s30 + $0x168] sm:$0xff]  ;;  %v246_v39 = vld [vmem:[%s2279_s30 + $0x70] sm:$0xff] }
  0x40   : > { %v599_v54 = vadd.f32 %v2305_v24, %v459_v46  ;;  %v725_v55 = vmax.f32 %v597_v47, 0.0  ;;  %v523_v56 = vmul.f32 %v2298_v20, %v383_v48  ;;  %v318_v57 = vunpack.c.l.bf16 %v243_v29  ;;  %v247_v46 = vld [vmem:[%s2279_s30 + $0x78] sm:$0xff] }
  0x41   : > { %v872_v60 = vpack.c.bf16 %v786_v51, %v784_v45  ;;  %v661_v61 = vadd.f32 %v2305_v24, %v521_v52  ;;  %v456_v63 = vmul.f32 %v2296_v19, %v316_v53  ;;  %v380_v0 = vunpack.c.l.bf16 %v274_v33 }
  0x42   : > { %v727_v2 = vmax.f32 %v599_v54, 0.0  ;;  %v663_v1 = vadd.f32 %v2305_v24, %v523_v56  ;;  %v458_v3 = vmul.f32 %v2296_v19, %v318_v57  ;;  %v382_v4 = vunpack.c.l.bf16 %v275_v37  ;;  %1129 = vmatmul.mubr.bf16.gmra.mrb[12].mxu0 %v838_v6  ;;  %v279_v57 = vld [vmem:[%s2279_s30 + $0x178] sm:$0xff] }
  0x43   : > { %1257 = vmatmul.mubr.bf16.gmra.mrb[12].mxu1 %v870_v16  ;;  %v789_v58 = vmax.f32 %v661_v61, 0.0  ;;  %v596_v5 = vadd.f32 %v2300_v21, %v456_v63  ;;  %v520_v8 = vmul.f32 %v2296_v19, %v380_v0  ;;  %v321_v9 = vunpack.c.h.bf16 %v244_v59  ;;  %1825 = vmatprep.mubr.msk.bf16.mxu0 %vm975_vm0, %v841_v34 }
  0x44   : > { %1841 = vmatprep.mubr.msk.bf16.mxu1 %vm975_vm0, %v873_v43  ;;  %v843_v11 = vpack.c.bf16 %v727_v2, %v725_v55  ;;  %v791_v12 = vmax.f32 %v663_v1, 0.0  ;;  %v598_v13 = vadd.f32 %v2300_v21, %v458_v3  ;;  %v522_v14 = vmul.f32 %v2296_v19, %v382_v4 }
  0x45   : > { %v724_v6 = vmax.f32 %v596_v5, 0.0  ;;  %v660_v16 = vadd.f32 %v2300_v21, %v520_v8  ;;  %v323_v17 = vunpack.c.h.bf16 %v245_v49  ;;  %v461_v18 = vmul.f32 %v2298_v20, %v321_v9 }
  0x46   : > { %v875_v22 = vpack.c.bf16 %v791_v12, %v789_v58  ;;  %v726_v23 = vmax.f32 %v598_v13, 0.0  ;;  %v662_v26 = vadd.f32 %v2300_v21, %v522_v14  ;;  %v385_v27 = vunpack.c.h.bf16 %v276_v10 }
  0x47   : > { %v788_v28 = vmax.f32 %v660_v16, 0.0  ;;  %v463_v29 = vmul.f32 %v2298_v20, %v323_v17  ;;  %v601_v30 = vadd.f32 %v2305_v24, %v461_v18  ;;  %v387_v31 = vunpack.c.h.bf16 %v277_v15 }
  0x48   : > { %v842_v7 = vpack.c.bf16 %v726_v23, %v724_v6  ;;  %v790_v32 = vmax.f32 %v662_v26, 0.0  ;;  %v525_v33 = vmul.f32 %v2298_v20, %v385_v27  ;;  %v320_v34 = vunpack.c.l.bf16 %v244_v59  ;;  %v248_v6 = vld [vmem:[%s2279_s30 + $0x80] sm:$0xff] }
  0x49   : > { %v603_v35 = vadd.f32 %v2305_v24, %v463_v29  ;;  %v729_v25 = vmax.f32 %v601_v30, 0.0  ;;  %v527_v36 = vmul.f32 %v2298_v20, %v387_v31  ;;  %v322_v37 = vunpack.c.l.bf16 %v245_v49  ;;  %v249_v29 = vld [vmem:[%s2279_s30 + $0x88] sm:$0xff] }
  0x4a   : > { %v874_v40 = vpack.c.bf16 %v790_v32, %v788_v28  ;;  %v665_v41 = vadd.f32 %v2305_v24, %v525_v33  ;;  %v460_v42 = vmul.f32 %v2296_v19, %v320_v34  ;;  %v384_v43 = vunpack.c.l.bf16 %v276_v10  ;;  %1137 = vmatmul.mubr.bf16.gmra.mrb[16].mxu0 %v840_v50  ;;  %v278_v50 = vld [vmem:[%s2279_s30 + $0x170] sm:$0xff]  ;;  %v280_v33 = vld [vmem:[%s2279_s30 + $0x180] sm:$0xff] }
  0x4b   : > { %1265 = vmatmul.mubr.bf16.gmra.mrb[16].mxu1 %v872_v60  ;;  %v731_v62 = vmax.f32 %v603_v35, 0.0  ;;  %v667_v38 = vadd.f32 %v2305_v24, %v527_v36  ;;  %v462_v44 = vmul.f32 %v2296_v19, %v322_v37  ;;  %v386_v45 = vunpack.c.l.bf16 %v277_v15  ;;  %1826 = vmatprep.mubr.msk.bf16.mxu0 %vm975_vm0, %v843_v11  ;;  %v281_v37 = vld [vmem:[%s2279_s30 + $0x188] sm:$0xff] }
  0x4c   : > { %1842 = vmatprep.mubr.msk.bf16.mxu1 %vm975_vm0, %v875_v22  ;;  %v793_v47 = vmax.f32 %v665_v41, 0.0  ;;  %v600_v48 = vadd.f32 %v2300_v21, %v460_v42  ;;  %v524_v51 = vmul.f32 %v2296_v19, %v384_v43  ;;  %v325_v52 = vunpack.c.h.bf16 %v246_v39 }
  0x4d   : > { %v845_v53 = vpack.c.bf16 %v731_v62, %v729_v25  ;;  %v795_v54 = vmax.f32 %v667_v38, 0.0  ;;  %v602_v55 = vadd.f32 %v2300_v21, %v462_v44  ;;  %v526_v56 = vmul.f32 %v2296_v19, %v386_v45 }
  0x4e   : > { %v728_v59 = vmax.f32 %v600_v48, 0.0  ;;  %v664_v60 = vadd.f32 %v2300_v21, %v524_v51  ;;  %v327_v61 = vunpack.c.h.bf16 %v247_v46  ;;  %v465_v63 = vmul.f32 %v2298_v20, %v325_v52 }
  0x4f   : > { %v877_v0 = vpack.c.bf16 %v795_v54, %v793_v47  ;;  %v730_v2 = vmax.f32 %v602_v55, 0.0  ;;  %v666_v1 = vadd.f32 %v2300_v21, %v526_v56  ;;  %v389_v3 = vunpack.c.h.bf16 %v278_v50 }
  0x50   : > { %v792_v4 = vmax.f32 %v664_v60, 0.0  ;;  %v467_v49 = vmul.f32 %v2298_v20, %v327_v61  ;;  %v605_v58 = vadd.f32 %v2305_v24, %v465_v63  ;;  %v391_v5 = vunpack.c.h.bf16 %v279_v57 }
  0x51   : > { %v844_v8 = vpack.c.bf16 %v730_v2, %v728_v59  ;;  %v794_v9 = vmax.f32 %v666_v1, 0.0  ;;  %v529_v10 = vmul.f32 %v2298_v20, %v389_v3  ;;  %v324_v11 = vunpack.c.l.bf16 %v246_v39  ;;  %v250_v59 = vld [vmem:[%s2279_s30 + $0x90] sm:$0xff] }
  0x52   : > { %v607_v12 = vadd.f32 %v2305_v24, %v467_v49  ;;  %v733_v13 = vmax.f32 %v605_v58, 0.0  ;;  %v531_v14 = vmul.f32 %v2298_v20, %v391_v5  ;;  %v326_v15 = vunpack.c.l.bf16 %v247_v46  ;;  %1145 = vmatmul.mubr.bf16.gmra.mrb[20].mxu0 %v842_v7  ;;  %v251_v49 = vld [vmem:[%s2279_s30 + $0x98] sm:$0xff] }
  0x53   : > { %1273 = vmatmul.mubr.bf16.gmra.mrb[20].mxu1 %v874_v40  ;;  %v876_v16 = vpack.c.bf16 %v794_v9, %v792_v4  ;;  %v669_v17 = vadd.f32 %v2305_v24, %v529_v10  ;;  %v464_v18 = vmul.f32 %v2296_v19, %v324_v11  ;;  %v388_v22 = vunpack.c.l.bf16 %v278_v50  ;;  %1827 = vmatprep.mubr.msk.bf16.mxu0 %vm975_vm0, %v845_v53  ;;  %v282_v10 = vld [vmem:[%s2279_s30 + $0x190] sm:$0xff] }
  0x54   : > { %1843 = vmatprep.mubr.msk.bf16.mxu1 %vm975_vm0, %v877_v0  ;;  %v735_v23 = vmax.f32 %v607_v12, 0.0  ;;  %v671_v26 = vadd.f32 %v2305_v24, %v531_v14  ;;  %v466_v27 = vmul.f32 %v2296_v19, %v326_v15  ;;  %v390_v28 = vunpack.c.l.bf16 %v279_v57  ;;  %v283_v15 = vld [vmem:[%s2279_s30 + $0x198] sm:$0xff] }
  0x55   : > { %v797_v30 = vmax.f32 %v669_v17, 0.0  ;;  %v604_v31 = vadd.f32 %v2300_v21, %v464_v18  ;;  %v528_v7 = vmul.f32 %v2296_v19, %v388_v22  ;;  %v329_v32 = vunpack.c.h.bf16 %v248_v6 }
  0x56   : > { %v847_v34 = vpack.c.bf16 %v735_v23, %v733_v13  ;;  %v799_v35 = vmax.f32 %v671_v26, 0.0  ;;  %v606_v25 = vadd.f32 %v2300_v21, %v466_v27  ;;  %v530_v36 = vmul.f32 %v2296_v19, %v390_v28 }
  0x57   : > { %v732_v39 = vmax.f32 %v604_v31, 0.0  ;;  %v668_v40 = vadd.f32 %v2300_v21, %v528_v7  ;;  %v331_v41 = vunpack.c.h.bf16 %v249_v29  ;;  %v469_v42 = vmul.f32 %v2298_v20, %v329_v32 }
  0x58   : > { %v879_v43 = vpack.c.bf16 %v799_v35, %v797_v30  ;;  %v734_v62 = vmax.f32 %v606_v25, 0.0  ;;  %v670_v38 = vadd.f32 %v2300_v21, %v530_v36  ;;  %v393_v44 = vunpack.c.h.bf16 %v280_v33 }
  0x59   : > { %v796_v45 = vmax.f32 %v668_v40, 0.0  ;;  %v471_v46 = vmul.f32 %v2298_v20, %v331_v41  ;;  %v609_v47 = vadd.f32 %v2305_v24, %v469_v42  ;;  %v395_v48 = vunpack.c.h.bf16 %v281_v37 }
  0x5a   : > { %v846_v51 = vpack.c.bf16 %v734_v62, %v732_v39  ;;  %v798_v52 = vmax.f32 %v670_v38, 0.0  ;;  %v533_v50 = vmul.f32 %v2298_v20, %v393_v44  ;;  %v328_v53 = vunpack.c.l.bf16 %v248_v6  ;;  %1153 = vmatmul.mubr.bf16.gmra.mrb[24].mxu0 %v844_v8  ;;  %v252_v39 = vld [vmem:[%s2279_s30 + $0xa0] sm:$0xff] }
  0x5b   : > { %1281 = vmatmul.mubr.bf16.gmra.mrb[24].mxu1 %v876_v16  ;;  %v611_v54 = vadd.f32 %v2305_v24, %v471_v46  ;;  %v737_v55 = vmax.f32 %v609_v47, 0.0  ;;  %v535_v56 = vmul.f32 %v2298_v20, %v395_v48  ;;  %v330_v57 = vunpack.c.l.bf16 %v249_v29  ;;  %1828 = vmatprep.mubr.msk.bf16.mxu0 %vm975_vm0, %v847_v34  ;;  %v253_v46 = vld [vmem:[%s2279_s30 + $0xa8] sm:$0xff] }
  0x5c   : > { %1844 = vmatprep.mubr.msk.bf16.mxu1 %vm975_vm0, %v879_v43  ;;  %v878_v60 = vpack.c.bf16 %v798_v52, %v796_v45  ;;  %v673_v61 = vadd.f32 %v2305_v24, %v533_v50  ;;  %v468_v63 = vmul.f32 %v2296_v19, %v328_v53  ;;  %v392_v0 = vunpack.c.l.bf16 %v280_v33  ;;  %v284_v50 = vld [vmem:[%s2279_s30 + $0x1a0] sm:$0xff] }
  0x5d   : > { %v739_v2 = vmax.f32 %v611_v54, 0.0  ;;  %v675_v1 = vadd.f32 %v2305_v24, %v535_v56  ;;  %v470_v3 = vmul.f32 %v2296_v19, %v330_v57  ;;  %v394_v4 = vunpack.c.l.bf16 %v281_v37  ;;  %v285_v57 = vld [vmem:[%s2279_s30 + $0x1a8] sm:$0xff] }
  0x5e   : > { %v801_v58 = vmax.f32 %v673_v61, 0.0  ;;  %v608_v5 = vadd.f32 %v2300_v21, %v468_v63  ;;  %v532_v8 = vmul.f32 %v2296_v19, %v392_v0  ;;  %v333_v9 = vunpack.c.h.bf16 %v250_v59 }
  0x5f   : > { %v849_v11 = vpack.c.bf16 %v739_v2, %v737_v55  ;;  %v803_v12 = vmax.f32 %v675_v1, 0.0  ;;  %v610_v13 = vadd.f32 %v2300_v21, %v470_v3  ;;  %v534_v14 = vmul.f32 %v2296_v19, %v394_v4 }
  0x60   : > { %v736_v6 = vmax.f32 %v608_v5, 0.0  ;;  %v672_v16 = vadd.f32 %v2300_v21, %v532_v8  ;;  %v335_v17 = vunpack.c.h.bf16 %v251_v49  ;;  %v473_v18 = vmul.f32 %v2298_v20, %v333_v9 }
  0x61   : > { %v881_v22 = vpack.c.bf16 %v803_v12, %v801_v58  ;;  %v738_v23 = vmax.f32 %v610_v13, 0.0  ;;  %v674_v26 = vadd.f32 %v2300_v21, %v534_v14  ;;  %v397_v27 = vunpack.c.h.bf16 %v282_v10 }
  0x62   : > { %v800_v28 = vmax.f32 %v672_v16, 0.0  ;;  %v475_v29 = vmul.f32 %v2298_v20, %v335_v17  ;;  %v613_v30 = vadd.f32 %v2305_v24, %v473_v18  ;;  %v399_v31 = vunpack.c.h.bf16 %v283_v15  ;;  %1161 = vmatmul.mubr.bf16.gmra.mrb[28].mxu0 %v846_v51 }
  0x63   : > { %1289 = vmatmul.mubr.bf16.gmra.mrb[28].mxu1 %v878_v60  ;;  %v848_v7 = vpack.c.bf16 %v738_v23, %v736_v6  ;;  %v802_v32 = vmax.f32 %v674_v26, 0.0  ;;  %v537_v33 = vmul.f32 %v2298_v20, %v397_v27  ;;  %v332_v34 = vunpack.c.l.bf16 %v250_v59  ;;  %1829 = vmatprep.mubr.msk.bf16.mxu0 %vm975_vm0, %v849_v11  ;;  %v254_v6 = vld [vmem:[%s2279_s30 + $0xb0] sm:$0xff] }
  0x64   : > { %1845 = vmatprep.mubr.msk.bf16.mxu1 %vm975_vm0, %v881_v22  ;;  %v615_v35 = vadd.f32 %v2305_v24, %v475_v29  ;;  %v741_v25 = vmax.f32 %v613_v30, 0.0  ;;  %v539_v36 = vmul.f32 %v2298_v20, %v399_v31  ;;  %v334_v37 = vunpack.c.l.bf16 %v251_v49  ;;  %v255_v29 = vld [vmem:[%s2279_s30 + $0xb8] sm:$0xff] }
  0x65   : > { %v880_v40 = vpack.c.bf16 %v802_v32, %v800_v28  ;;  %v677_v41 = vadd.f32 %v2305_v24, %v537_v33  ;;  %v472_v42 = vmul.f32 %v2296_v19, %v332_v34  ;;  %v396_v43 = vunpack.c.l.bf16 %v282_v10  ;;  %v286_v33 = vld [vmem:[%s2279_s30 + $0x1b0] sm:$0xff] }
  0x66   : > { %v743_v62 = vmax.f32 %v615_v35, 0.0  ;;  %v679_v38 = vadd.f32 %v2305_v24, %v539_v36  ;;  %v474_v44 = vmul.f32 %v2296_v19, %v334_v37  ;;  %v398_v45 = vunpack.c.l.bf16 %v283_v15  ;;  %v287_v37 = vld [vmem:[%s2279_s30 + $0x1b8] sm:$0xff] }
  0x67   : > { %v805_v47 = vmax.f32 %v677_v41, 0.0  ;;  %v612_v48 = vadd.f32 %v2300_v21, %v472_v42  ;;  %v536_v51 = vmul.f32 %v2296_v19, %v396_v43  ;;  %v337_v52 = vunpack.c.h.bf16 %v252_v39 }
  0x68   : > { %v851_v53 = vpack.c.bf16 %v743_v62, %v741_v25  ;;  %v807_v54 = vmax.f32 %v679_v38, 0.0  ;;  %v614_v55 = vadd.f32 %v2300_v21, %v474_v44  ;;  %v538_v56 = vmul.f32 %v2296_v19, %v398_v45 }
  0x69   : > { %v740_v59 = vmax.f32 %v612_v48, 0.0  ;;  %v676_v60 = vadd.f32 %v2300_v21, %v536_v51  ;;  %v339_v61 = vunpack.c.h.bf16 %v253_v46  ;;  %v477_v63 = vmul.f32 %v2298_v20, %v337_v52 }
  0x6a   : > { %v883_v0 = vpack.c.bf16 %v807_v54, %v805_v47  ;;  %v742_v2 = vmax.f32 %v614_v55, 0.0  ;;  %v678_v1 = vadd.f32 %v2300_v21, %v538_v56  ;;  %v401_v3 = vunpack.c.h.bf16 %v284_v50  ;;  %1169 = vmatmul.mubr.bf16.gmra.mrb[32].mxu0 %v848_v7 }
  0x6b   : > { %1297 = vmatmul.mubr.bf16.gmra.mrb[32].mxu1 %v880_v40  ;;  %v804_v4 = vmax.f32 %v676_v60, 0.0  ;;  %v479_v49 = vmul.f32 %v2298_v20, %v339_v61  ;;  %v617_v58 = vadd.f32 %v2305_v24, %v477_v63  ;;  %v403_v5 = vunpack.c.h.bf16 %v285_v57  ;;  %1830 = vmatprep.mubr.msk.bf16.mxu0 %vm975_vm0, %v851_v53 }
  0x6c   : > { %1846 = vmatprep.mubr.msk.bf16.mxu1 %vm975_vm0, %v883_v0  ;;  %v850_v8 = vpack.c.bf16 %v742_v2, %v740_v59  ;;  %v806_v9 = vmax.f32 %v678_v1, 0.0  ;;  %v541_v10 = vmul.f32 %v2298_v20, %v401_v3  ;;  %v336_v11 = vunpack.c.l.bf16 %v252_v39  ;;  %v256_v59 = vld [vmem:[%s2279_s30 + $0xc0] sm:$0xff] }
  0x6d   : > { %v619_v12 = vadd.f32 %v2305_v24, %v479_v49  ;;  %v745_v13 = vmax.f32 %v617_v58, 0.0  ;;  %v543_v14 = vmul.f32 %v2298_v20, %v403_v5  ;;  %v338_v15 = vunpack.c.l.bf16 %v253_v46  ;;  %v257_v49 = vld [vmem:[%s2279_s30 + $0xc8] sm:$0xff] }
  0x6e   : > { %v882_v16 = vpack.c.bf16 %v806_v9, %v804_v4  ;;  %v681_v17 = vadd.f32 %v2305_v24, %v541_v10  ;;  %v476_v18 = vmul.f32 %v2296_v19, %v336_v11  ;;  %v400_v22 = vunpack.c.l.bf16 %v284_v50  ;;  %v288_v10 = vld [vmem:[%s2279_s30 + $0x1c0] sm:$0xff] }
  0x6f   : > { %v747_v23 = vmax.f32 %v619_v12, 0.0  ;;  %v683_v26 = vadd.f32 %v2305_v24, %v543_v14  ;;  %v478_v27 = vmul.f32 %v2296_v19, %v338_v15  ;;  %v402_v28 = vunpack.c.l.bf16 %v285_v57  ;;  %v289_v15 = vld [vmem:[%s2279_s30 + $0x1c8] sm:$0xff] }
  0x70   : > { %v809_v30 = vmax.f32 %v681_v17, 0.0  ;;  %v616_v31 = vadd.f32 %v2300_v21, %v476_v18  ;;  %v540_v7 = vmul.f32 %v2296_v19, %v400_v22  ;;  %v341_v32 = vunpack.c.h.bf16 %v254_v6 }
  0x71   : > { %v853_v34 = vpack.c.bf16 %v747_v23, %v745_v13  ;;  %v811_v35 = vmax.f32 %v683_v26, 0.0  ;;  %v618_v25 = vadd.f32 %v2300_v21, %v478_v27  ;;  %v542_v36 = vmul.f32 %v2296_v19, %v402_v28 }
  0x72   : > { %v744_v39 = vmax.f32 %v616_v31, 0.0  ;;  %v680_v40 = vadd.f32 %v2300_v21, %v540_v7  ;;  %v343_v41 = vunpack.c.h.bf16 %v255_v29  ;;  %v481_v42 = vmul.f32 %v2298_v20, %v341_v32  ;;  %1177 = vmatmul.mubr.bf16.gmra.mrb[36].mxu0 %v850_v8 }
  0x73   : > { %1305 = vmatmul.mubr.bf16.gmra.mrb[36].mxu1 %v882_v16  ;;  %v885_v43 = vpack.c.bf16 %v811_v35, %v809_v30  ;;  %v746_v62 = vmax.f32 %v618_v25, 0.0  ;;  %v682_v38 = vadd.f32 %v2300_v21, %v542_v36  ;;  %v405_v44 = vunpack.c.h.bf16 %v286_v33  ;;  %1831 = vmatprep.mubr.msk.bf16.mxu0 %vm975_vm0, %v853_v34 }
  0x74   : > { %v808_v45 = vmax.f32 %v680_v40, 0.0  ;;  %v483_v46 = vmul.f32 %v2298_v20, %v343_v41  ;;  %v621_v47 = vadd.f32 %v2305_v24, %v481_v42  ;;  %v407_v48 = vunpack.c.h.bf16 %v287_v37 }
  0x75   : > { %1847 = vmatprep.mubr.msk.bf16.mxu1 %vm975_vm0, %v885_v43  ;;  %v852_v51 = vpack.c.bf16 %v746_v62, %v744_v39  ;;  %v810_v52 = vmax.f32 %v682_v38, 0.0  ;;  %v545_v50 = vmul.f32 %v2298_v20, %v405_v44  ;;  %v340_v53 = vunpack.c.l.bf16 %v254_v6  ;;  %v258_v39 = vld [vmem:[%s2279_s30 + $0xd0] sm:$0xff] }
  0x76   : > { %v623_v54 = vadd.f32 %v2305_v24, %v483_v46  ;;  %v749_v55 = vmax.f32 %v621_v47, 0.0  ;;  %v547_v56 = vmul.f32 %v2298_v20, %v407_v48  ;;  %v342_v57 = vunpack.c.l.bf16 %v255_v29  ;;  %v259_v46 = vld [vmem:[%s2279_s30 + $0xd8] sm:$0xff] }
  0x77   : > { %v884_v60 = vpack.c.bf16 %v810_v52, %v808_v45  ;;  %v685_v61 = vadd.f32 %v2305_v24, %v545_v50  ;;  %v480_v63 = vmul.f32 %v2296_v19, %v340_v53  ;;  %v404_v0 = vunpack.c.l.bf16 %v286_v33  ;;  %v290_v50 = vld [vmem:[%s2279_s30 + $0x1d0] sm:$0xff] }
  0x78   : > { %v751_v2 = vmax.f32 %v623_v54, 0.0  ;;  %v687_v1 = vadd.f32 %v2305_v24, %v547_v56  ;;  %v482_v3 = vmul.f32 %v2296_v19, %v342_v57  ;;  %v406_v4 = vunpack.c.l.bf16 %v287_v37  ;;  %v291_v57 = vld [vmem:[%s2279_s30 + $0x1d8] sm:$0xff] }
  0x79   : > { %v813_v58 = vmax.f32 %v685_v61, 0.0  ;;  %v620_v5 = vadd.f32 %v2300_v21, %v480_v63  ;;  %v544_v8 = vmul.f32 %v2296_v19, %v404_v0  ;;  %v345_v9 = vunpack.c.h.bf16 %v256_v59 }
  0x7a   : > { %v855_v11 = vpack.c.bf16 %v751_v2, %v749_v55  ;;  %v815_v12 = vmax.f32 %v687_v1, 0.0  ;;  %v622_v13 = vadd.f32 %v2300_v21, %v482_v3  ;;  %v546_v14 = vmul.f32 %v2296_v19, %v406_v4  ;;  %1185 = vmatmul.mubr.bf16.gmra.mrb[40].mxu0 %v852_v51 }
  0x7b   : > { %1313 = vmatmul.mubr.bf16.gmra.mrb[40].mxu1 %v884_v60  ;;  %v748_v6 = vmax.f32 %v620_v5, 0.0  ;;  %v684_v16 = vadd.f32 %v2300_v21, %v544_v8  ;;  %v347_v17 = vunpack.c.h.bf16 %v257_v49  ;;  %v485_v18 = vmul.f32 %v2298_v20, %v345_v9 }
  0x7c   : > { %1832 = vmatprep.mubr.msk.bf16.mxu0 %vm975_vm0, %v855_v11  ;;  %v887_v22 = vpack.c.bf16 %v815_v12, %v813_v58  ;;  %v750_v23 = vmax.f32 %v622_v13, 0.0  ;;  %v686_v26 = vadd.f32 %v2300_v21, %v546_v14  ;;  %v409_v27 = vunpack.c.h.bf16 %v288_v10 }
  0x7d   : > { %v812_v28 = vmax.f32 %v684_v16, 0.0  ;;  %v487_v29 = vmul.f32 %v2298_v20, %v347_v17  ;;  %v625_v30 = vadd.f32 %v2305_v24, %v485_v18  ;;  %v411_v31 = vunpack.c.h.bf16 %v289_v15 }
  0x7e   : > { %1848 = vmatprep.mubr.msk.bf16.mxu1 %vm975_vm0, %v887_v22  ;;  %v854_v7 = vpack.c.bf16 %v750_v23, %v748_v6  ;;  %v814_v32 = vmax.f32 %v686_v26, 0.0  ;;  %v549_v33 = vmul.f32 %v2298_v20, %v409_v27  ;;  %v344_v34 = vunpack.c.l.bf16 %v256_v59  ;;  %v260_v6 = vld [vmem:[%s2279_s30 + $0xe0] sm:$0xff] }
  0x7f   : > { %v627_v35 = vadd.f32 %v2305_v24, %v487_v29  ;;  %v753_v25 = vmax.f32 %v625_v30, 0.0  ;;  %v551_v36 = vmul.f32 %v2298_v20, %v411_v31  ;;  %v346_v37 = vunpack.c.l.bf16 %v257_v49  ;;  %v261_v29 = vld [vmem:[%s2279_s30 + $0xe8] sm:$0xff] }
  0x80   : > { %v886_v40 = vpack.c.bf16 %v814_v32, %v812_v28  ;;  %v689_v41 = vadd.f32 %v2305_v24, %v549_v33  ;;  %v484_v42 = vmul.f32 %v2296_v19, %v344_v34  ;;  %v408_v43 = vunpack.c.l.bf16 %v288_v10  ;;  %v292_v33 = vld [vmem:[%s2279_s30 + $0x1e0] sm:$0xff] }
  0x81   : > { %v755_v62 = vmax.f32 %v627_v35, 0.0  ;;  %v691_v38 = vadd.f32 %v2305_v24, %v551_v36  ;;  %v486_v44 = vmul.f32 %v2296_v19, %v346_v37  ;;  %v410_v45 = vunpack.c.l.bf16 %v289_v15  ;;  %v293_v37 = vld [vmem:[%s2279_s30 + $0x1e8] sm:$0xff] }
  0x82   : > { %v817_v47 = vmax.f32 %v689_v41, 0.0  ;;  %v624_v48 = vadd.f32 %v2300_v21, %v484_v42  ;;  %v548_v51 = vmul.f32 %v2296_v19, %v408_v43  ;;  %v349_v52 = vunpack.c.h.bf16 %v258_v39  ;;  %1193 = vmatmul.mubr.bf16.gmra.mrb[44].mxu0 %v854_v7 }
  0x83   : > { %1321 = vmatmul.mubr.bf16.gmra.mrb[44].mxu1 %v886_v40  ;;  %v857_v53 = vpack.c.bf16 %v755_v62, %v753_v25  ;;  %v819_v54 = vmax.f32 %v691_v38, 0.0  ;;  %v626_v55 = vadd.f32 %v2300_v21, %v486_v44  ;;  %v550_v56 = vmul.f32 %v2296_v19, %v410_v45 }
  0x84   : > { %v752_v59 = vmax.f32 %v624_v48, 0.0  ;;  %v688_v60 = vadd.f32 %v2300_v21, %v548_v51  ;;  %v351_v61 = vunpack.c.h.bf16 %v259_v46  ;;  %v489_v63 = vmul.f32 %v2298_v20, %v349_v52 }
  0x85   : > { %1833 = vmatprep.mubr.msk.bf16.mxu0 %vm975_vm0, %v857_v53  ;;  %v889_v0 = vpack.c.bf16 %v819_v54, %v817_v47  ;;  %v754_v2 = vmax.f32 %v626_v55, 0.0  ;;  %v690_v1 = vadd.f32 %v2300_v21, %v550_v56  ;;  %v413_v3 = vunpack.c.h.bf16 %v290_v50 }
  0x86   : > { %v816_v4 = vmax.f32 %v688_v60, 0.0  ;;  %v491_v49 = vmul.f32 %v2298_v20, %v351_v61  ;;  %v629_v58 = vadd.f32 %v2305_v24, %v489_v63  ;;  %v415_v5 = vunpack.c.h.bf16 %v291_v57 }
  0x87   : > { %1849 = vmatprep.mubr.msk.bf16.mxu1 %vm975_vm0, %v889_v0  ;;  %v856_v8 = vpack.c.bf16 %v754_v2, %v752_v59  ;;  %v818_v9 = vmax.f32 %v690_v1, 0.0  ;;  %v553_v10 = vmul.f32 %v2298_v20, %v413_v3  ;;  %v348_v11 = vunpack.c.l.bf16 %v258_v39  ;;  %v262_v59 = vld [vmem:[%s2279_s30 + $0xf0] sm:$0xff] }
  0x88   : > { %v631_v12 = vadd.f32 %v2305_v24, %v491_v49  ;;  %v757_v13 = vmax.f32 %v629_v58, 0.0  ;;  %v555_v14 = vmul.f32 %v2298_v20, %v415_v5  ;;  %v350_v15 = vunpack.c.l.bf16 %v259_v46  ;;  %v263_v49 = vld [vmem:[%s2279_s30 + $0xf8] sm:$0xff] }
  0x89   : > { %v888_v16 = vpack.c.bf16 %v818_v9, %v816_v4  ;;  %v693_v17 = vadd.f32 %v2305_v24, %v553_v10  ;;  %v488_v18 = vmul.f32 %v2296_v19, %v348_v11  ;;  %v412_v22 = vunpack.c.l.bf16 %v290_v50  ;;  %v294_v10 = vld [vmem:[%s2279_s30 + $0x1f0] sm:$0xff] }
  0x8a   : > { %v759_v23 = vmax.f32 %v631_v12, 0.0  ;;  %v695_v26 = vadd.f32 %v2305_v24, %v555_v14  ;;  %v490_v27 = vmul.f32 %v2296_v19, %v350_v15  ;;  %v414_v28 = vunpack.c.l.bf16 %v291_v57  ;;  %1201 = vmatmul.mubr.bf16.gmra.mrb[48].mxu0 %v856_v8  ;;  %v295_v15 = vld [vmem:[%s2279_s30 + $0x1f8] sm:$0xff] }
  0x8b   : > { %1329 = vmatmul.mubr.bf16.gmra.mrb[48].mxu1 %v888_v16  ;;  %v821_v30 = vmax.f32 %v693_v17, 0.0  ;;  %v628_v31 = vadd.f32 %v2300_v21, %v488_v18  ;;  %v552_v7 = vmul.f32 %v2296_v19, %v412_v22  ;;  %v353_v32 = vunpack.c.h.bf16 %v260_v6 }
  0x8c   : > { %v859_v34 = vpack.c.bf16 %v759_v23, %v757_v13  ;;  %v823_v35 = vmax.f32 %v695_v26, 0.0  ;;  %v630_v25 = vadd.f32 %v2300_v21, %v490_v27  ;;  %v554_v36 = vmul.f32 %v2296_v19, %v414_v28 }
  0x8d   : > { %v756_v39 = vmax.f32 %v628_v31, 0.0  ;;  %v692_v40 = vadd.f32 %v2300_v21, %v552_v7  ;;  %v355_v41 = vunpack.c.h.bf16 %v261_v29  ;;  %v493_v42 = vmul.f32 %v2298_v20, %v353_v32 }
  0x8e   : > { %1834 = vmatprep.mubr.msk.bf16.mxu0 %vm975_vm0, %v859_v34  ;;  %v891_v43 = vpack.c.bf16 %v823_v35, %v821_v30  ;;  %v758_v62 = vmax.f32 %v630_v25, 0.0  ;;  %v694_v38 = vadd.f32 %v2300_v21, %v554_v36  ;;  %v417_v44 = vunpack.c.h.bf16 %v292_v33 }
  0x8f   : > { %v820_v45 = vmax.f32 %v692_v40, 0.0  ;;  %v495_v46 = vmul.f32 %v2298_v20, %v355_v41  ;;  %v633_v47 = vadd.f32 %v2305_v24, %v493_v42  ;;  %v419_v48 = vunpack.c.h.bf16 %v293_v37 }
  0x90   : > { %1850 = vmatprep.mubr.msk.bf16.mxu1 %vm975_vm0, %v891_v43  ;;  %v858_v51 = vpack.c.bf16 %v758_v62, %v756_v39  ;;  %v822_v52 = vmax.f32 %v694_v38, 0.0  ;;  %v557_v50 = vmul.f32 %v2298_v20, %v417_v44  ;;  %v352_v53 = vunpack.c.l.bf16 %v260_v6 }
  0x91   : > { %v635_v54 = vadd.f32 %v2305_v24, %v495_v46  ;;  %v761_v55 = vmax.f32 %v633_v47, 0.0  ;;  %v559_v56 = vmul.f32 %v2298_v20, %v419_v48  ;;  %v354_v57 = vunpack.c.l.bf16 %v261_v29 }
  0x92   : > { %v890_v60 = vpack.c.bf16 %v822_v52, %v820_v45  ;;  %v697_v61 = vadd.f32 %v2305_v24, %v557_v50  ;;  %v492_v63 = vmul.f32 %v2296_v19, %v352_v53  ;;  %v416_v0 = vunpack.c.l.bf16 %v292_v33  ;;  %1209 = vmatmul.mubr.bf16.gmra.mrb[52].mxu0 %v858_v51 }
  0x93   : > { %v763_v2 = vmax.f32 %v635_v54, 0.0  ;;  %v699_v1 = vadd.f32 %v2305_v24, %v559_v56  ;;  %v494_v3 = vmul.f32 %v2296_v19, %v354_v57  ;;  %v418_v4 = vunpack.c.l.bf16 %v293_v37 }
  0x94   : > { %1337 = vmatmul.mubr.bf16.gmra.mrb[52].mxu1 %v890_v60  ;;  %v825_v58 = vmax.f32 %v697_v61, 0.0  ;;  %v632_v5 = vadd.f32 %v2300_v21, %v492_v63  ;;  %v556_v8 = vmul.f32 %v2296_v19, %v416_v0  ;;  %v357_v9 = vunpack.c.h.bf16 %v262_v59 }
  0x95   : > { %v861_v11 = vpack.c.bf16 %v763_v2, %v761_v55  ;;  %v827_v12 = vmax.f32 %v699_v1, 0.0  ;;  %v634_v13 = vadd.f32 %v2300_v21, %v494_v3  ;;  %v558_v14 = vmul.f32 %v2296_v19, %v418_v4 }
  0x96   : > { %v760_v6 = vmax.f32 %v632_v5, 0.0  ;;  %v696_v16 = vadd.f32 %v2300_v21, %v556_v8  ;;  %v359_v17 = vunpack.c.h.bf16 %v263_v49  ;;  %v497_v18 = vmul.f32 %v2298_v20, %v357_v9 }
  0x97   : > { %1835 = vmatprep.mubr.msk.bf16.mxu0 %vm975_vm0, %v861_v11  ;;  %v893_v22 = vpack.c.bf16 %v827_v12, %v825_v58  ;;  %v762_v23 = vmax.f32 %v634_v13, 0.0  ;;  %v698_v26 = vadd.f32 %v2300_v21, %v558_v14  ;;  %v421_v27 = vunpack.c.h.bf16 %v294_v10 }
  0x98   : > { %v824_v28 = vmax.f32 %v696_v16, 0.0  ;;  %v499_v29 = vmul.f32 %v2298_v20, %v359_v17  ;;  %v637_v30 = vadd.f32 %v2305_v24, %v497_v18  ;;  %v423_v31 = vunpack.c.h.bf16 %v295_v15 }
  0x99   : > { %1851 = vmatprep.mubr.msk.bf16.mxu1 %vm975_vm0, %v893_v22  ;;  %v860_v7 = vpack.c.bf16 %v762_v23, %v760_v6  ;;  %v826_v32 = vmax.f32 %v698_v26, 0.0  ;;  %v561_v33 = vmul.f32 %v2298_v20, %v421_v27  ;;  %v356_v34 = vunpack.c.l.bf16 %v262_v59 }
  0x9a   : > { %v639_v35 = vadd.f32 %v2305_v24, %v499_v29  ;;  %v765_v25 = vmax.f32 %v637_v30, 0.0  ;;  %v563_v36 = vmul.f32 %v2298_v20, %v423_v31  ;;  %v358_v37 = vunpack.c.l.bf16 %v263_v49 }
  0x9b   : > { %1217 = vmatmul.mubr.bf16.gmra.mrb[56].mxu0 %v860_v7  ;;  %v892_v39 = vpack.c.bf16 %v826_v32, %v824_v28  ;;  %v701_v40 = vadd.f32 %v2305_v24, %v561_v33  ;;  %v496_v41 = vmul.f32 %v2296_v19, %v356_v34  ;;  %v420_v42 = vunpack.c.l.bf16 %v294_v10 }
  0x9c   : > { %v767_v43 = vmax.f32 %v639_v35, 0.0  ;;  %v703_v62 = vadd.f32 %v2305_v24, %v563_v36  ;;  %v498_v38 = vmul.f32 %v2296_v19, %v358_v37  ;;  %v422_v44 = vunpack.c.l.bf16 %v295_v15 }
  0x9d   : > { %1345 = vmatmul.mubr.bf16.gmra.mrb[56].mxu1 %v892_v39  ;;  %v829_v45 = vmax.f32 %v701_v40, 0.0  ;;  %v636_v46 = vadd.f32 %v2300_v21, %v496_v41  ;;  %v560_v20 = vmul.f32 %v2296_v19, %v420_v42 }
  0x9e   : > { %v863_v47 = vpack.c.bf16 %v767_v43, %v765_v25  ;;  %v831_v48 = vmax.f32 %v703_v62, 0.0  ;;  %v638_v51 = vadd.f32 %v2300_v21, %v498_v38  ;;  %v562_v52 = vmul.f32 %v2296_v19, %v422_v44  ;;  %v2706_v19 = vld [vmem:[%s2817_s4] ss:$0 sm:$0xff] }
  0x9f   : > { %v764_v50 = vmax.f32 %v636_v46, 0.0  ;;  %v700_v53 = vadd.f32 %v2300_v21, %v560_v20 }
  0xa0   : > { %1836 = vmatprep.mubr.msk.bf16.mxu0 %vm975_vm0, %v863_v47  ;;  %v895_v24 = vpack.c.bf16 %v831_v48, %v829_v45  ;;  %v766_v54 = vmax.f32 %v638_v51, 0.0  ;;  %v702_v55 = vadd.f32 %v2300_v21, %v562_v52 }
  0xa1   : > { %v828_v56 = vmax.f32 %v700_v53, 0.0 }
  0xa2   : > { %1852 = vmatprep.mubr.msk.bf16.mxu1 %vm975_vm0, %v895_v24  ;;  %v862_v57 = vpack.c.bf16 %v766_v54, %v764_v50  ;;  %v830_v59 = vmax.f32 %v702_v55, 0.0 }
  0xa4   : > { %1225 = vmatmul.mubr.bf16.gmra.mrb[60].mxu0 %v862_v57  ;;  %v894_v60 = vpack.c.bf16 %v830_v59, %v828_v56 }
  0xa6   : > { %1353 = vmatmul.mubr.bf16.gmra.mrb[60].mxu1 %v894_v60 }
  0xfd   : > { %v1106_v61 = vpop.f32.mrb[0].mxu0 }
  0xfe   : > { %v1234_v63 = vpop.f32.mrb[0].mxu1  ;;  %v1107_v0 = vadd.f32 %v2706_v19, %v1106_v61  ;;  %v1108_v2 = vpop.f32.mrb[1].mxu0 }
  0xff   : > { %v1235_v21 = vadd.f32 %v2706_v19, %v1234_v63  ;;  %v1236_v1 = vpop.f32.mrb[1].mxu1  ;;  %v1109_v3 = vpop.f32.mrb[2].mxu0 }
 0x100   : > { %v1237_v4 = vpop.f32.mrb[2].mxu1  ;;  %v1110_v49 = vadd.f32 %v2706_v19, %v1109_v3  ;;  %v1111_v5 = vpop.f32.mrb[3].mxu0  ;;  %v1361_v9 = vmax.f32 %v1107_v0, 0.0 }
 0x101   : > { %v1238_v58 = vadd.f32 %v2706_v19, %v1237_v4  ;;  %v1239_v8 = vpop.f32.mrb[3].mxu1  ;;  %v1393_v10 = vmax.f32 %v1235_v21, 0.0 }
 0x102   : > { %v1362_v11 = vmax.f32 %v1110_v49, 0.0 }
 0x103   : > { %v1394_v12 = vmax.f32 %v1238_v58, 0.0 }
 0x104   : > { %v1987_v13 = vpack.c.bf16 %v1362_v11, %v1361_v9 }
 0x105   : > { %v2067_v14 = vpack.c.bf16 %v1394_v12, %v1393_v10  ;;  %v1114_v15 = vpop.f32.mrb[4].mxu0 }
 0x106   : > { %v1242_v6 = vpop.f32.mrb[4].mxu1  ;;  %1988 = vst [vmem:[%s2716_s29] sm:$0xff] %v1987_v13   ;;  %v1115_v16 = vadd.f32 %v2706_v19, %v1114_v15  ;;  %v1116_v18 = vpop.f32.mrb[5].mxu0 }
 0x107   : > { %2159 = vst [vmem:[%s2716_s29 + $0x80] sm:$0xff] %v2067_v14   ;;  %v1243_v17 = vadd.f32 %v2706_v19, %v1242_v6  ;;  %v1244_v22 = vpop.f32.mrb[5].mxu1  ;;  %v1117_v23 = vpop.f32.mrb[6].mxu0 }
 0x108   : > { %v1245_v26 = vpop.f32.mrb[6].mxu1  ;;  %v1118_v27 = vadd.f32 %v2706_v19, %v1117_v23  ;;  %v1119_v29 = vpop.f32.mrb[7].mxu0  ;;  %v1363_v31 = vmax.f32 %v1115_v16, 0.0 }
 0x109   : > { %v1246_v28 = vadd.f32 %v2706_v19, %v1245_v26  ;;  %v1247_v30 = vpop.f32.mrb[7].mxu1  ;;  %v1395_v7 = vmax.f32 %v1243_v17, 0.0 }
 0x10a   : > { %v1364_v32 = vmax.f32 %v1118_v27, 0.0 }
 0x10b   : > { %v1396_v33 = vmax.f32 %v1246_v28, 0.0 }
 0x10c   : > { %v1992_v34 = vpack.c.bf16 %v1364_v32, %v1363_v31 }
 0x10d   : > { %v2072_v35 = vpack.c.bf16 %v1396_v33, %v1395_v7  ;;  %v1122_v25 = vpop.f32.mrb[8].mxu0 }
 0x10e   : > { %v1250_v36 = vpop.f32.mrb[8].mxu1  ;;  %2144 = vst [vmem:[%s2716_s29 + $0x8] sm:$0xff] %v1992_v34   ;;  %v1123_v37 = vadd.f32 %v2706_v19, %v1122_v25  ;;  %v1124_v40 = vpop.f32.mrb[9].mxu0 }
 0x10f   : > { %2160 = vst [vmem:[%s2716_s29 + $0x88] sm:$0xff] %v2072_v35   ;;  %v1251_v39 = vadd.f32 %v2706_v19, %v1250_v36  ;;  %v1252_v41 = vpop.f32.mrb[9].mxu1  ;;  %v1125_v42 = vpop.f32.mrb[10].mxu0 }
 0x110   : > { %v1253_v43 = vpop.f32.mrb[10].mxu1  ;;  %v1126_v62 = vadd.f32 %v2706_v19, %v1125_v42  ;;  %v1127_v44 = vpop.f32.mrb[11].mxu0  ;;  %v1365_v46 = vmax.f32 %v1123_v37, 0.0 }
 0x111   : > { %v1254_v38 = vadd.f32 %v2706_v19, %v1253_v43  ;;  %v1255_v45 = vpop.f32.mrb[11].mxu1  ;;  %v1397_v20 = vmax.f32 %v1251_v39, 0.0 }
 0x112   : > { %v1366_v47 = vmax.f32 %v1126_v62, 0.0 }
 0x113   : > { %v1398_v48 = vmax.f32 %v1254_v38, 0.0 }
 0x114   : > { %v1997_v51 = vpack.c.bf16 %v1366_v47, %v1365_v46 }
 0x115   : > { %v2077_v52 = vpack.c.bf16 %v1398_v48, %v1397_v20  ;;  %v1130_v50 = vpop.f32.mrb[12].mxu0 }
 0x116   : > { %v1258_v53 = vpop.f32.mrb[12].mxu1  ;;  %2145 = vst [vmem:[%s2716_s29 + $0x10] sm:$0xff] %v1997_v51   ;;  %v1131_v24 = vadd.f32 %v2706_v19, %v1130_v50  ;;  %v1132_v55 = vpop.f32.mrb[13].mxu0 }
 0x117   : > { %2161 = vst [vmem:[%s2716_s29 + $0x90] sm:$0xff] %v2077_v52   ;;  %v1259_v54 = vadd.f32 %v2706_v19, %v1258_v53  ;;  %v1260_v56 = vpop.f32.mrb[13].mxu1  ;;  %v1133_v57 = vpop.f32.mrb[14].mxu0 }
 0x118   : > { %v1261_v59 = vpop.f32.mrb[14].mxu1  ;;  %v1134_v60 = vadd.f32 %v2706_v19, %v1133_v57  ;;  %v1135_v63 = vpop.f32.mrb[15].mxu0  ;;  %v1367_v21 = vmax.f32 %v1131_v24, 0.0 }
 0x119   : > { %v1262_v61 = vadd.f32 %v2706_v19, %v1261_v59  ;;  %v1263_v0 = vpop.f32.mrb[15].mxu1  ;;  %v1399_v2 = vmax.f32 %v1259_v54, 0.0 }
 0x11a   : > { %v1368_v1 = vmax.f32 %v1134_v60, 0.0 }
 0x11b   : > { %v1400_v3 = vmax.f32 %v1262_v61, 0.0 }
 0x11c   : > { %v2002_v4 = vpack.c.bf16 %v1368_v1, %v1367_v21 }
 0x11d   : > { %v2082_v49 = vpack.c.bf16 %v1400_v3, %v1399_v2  ;;  %v1138_v58 = vpop.f32.mrb[16].mxu0 }
 0x11e   : > { %v1266_v5 = vpop.f32.mrb[16].mxu1  ;;  %2146 = vst [vmem:[%s2716_s29 + $0x18] sm:$0xff] %v2002_v4   ;;  %v1139_v8 = vadd.f32 %v2706_v19, %v1138_v58  ;;  %v1140_v10 = vpop.f32.mrb[17].mxu0 }
 0x11f   : > { %2162 = vst [vmem:[%s2716_s29 + $0x98] sm:$0xff] %v2082_v49   ;;  %v1267_v9 = vadd.f32 %v2706_v19, %v1266_v5  ;;  %v1268_v11 = vpop.f32.mrb[17].mxu1  ;;  %v1141_v12 = vpop.f32.mrb[18].mxu0 }
 0x120   : > { %v1269_v13 = vpop.f32.mrb[18].mxu1  ;;  %v1142_v14 = vadd.f32 %v2706_v19, %v1141_v12  ;;  %v1143_v6 = vpop.f32.mrb[19].mxu0  ;;  %v1369_v17 = vmax.f32 %v1139_v8, 0.0 }
 0x121   : > { %v1270_v15 = vadd.f32 %v2706_v19, %v1269_v13  ;;  %v1271_v16 = vpop.f32.mrb[19].mxu1  ;;  %v1401_v18 = vmax.f32 %v1267_v9, 0.0 }
 0x122   : > { %v1370_v22 = vmax.f32 %v1142_v14, 0.0 }
 0x123   : > { %v1402_v23 = vmax.f32 %v1270_v15, 0.0 }
 0x124   : > { %v2007_v26 = vpack.c.bf16 %v1370_v22, %v1369_v17 }
 0x125   : > { %v2087_v27 = vpack.c.bf16 %v1402_v23, %v1401_v18  ;;  %v1146_v28 = vpop.f32.mrb[20].mxu0 }
 0x126   : > { %v1274_v29 = vpop.f32.mrb[20].mxu1  ;;  %2147 = vst [vmem:[%s2716_s29 + $0x20] sm:$0xff] %v2007_v26   ;;  %v1147_v30 = vadd.f32 %v2706_v19, %v1146_v28  ;;  %v1148_v7 = vpop.f32.mrb[21].mxu0 }
 0x127   : > { %2163 = vst [vmem:[%s2716_s29 + $0xa0] sm:$0xff] %v2087_v27   ;;  %v1275_v31 = vadd.f32 %v2706_v19, %v1274_v29  ;;  %v1276_v32 = vpop.f32.mrb[21].mxu1  ;;  %v1149_v33 = vpop.f32.mrb[22].mxu0 }
 0x128   : > { %v1277_v34 = vpop.f32.mrb[22].mxu1  ;;  %v1150_v35 = vadd.f32 %v2706_v19, %v1149_v33  ;;  %v1151_v36 = vpop.f32.mrb[23].mxu0  ;;  %v1371_v39 = vmax.f32 %v1147_v30, 0.0 }
 0x129   : > { %v1278_v25 = vadd.f32 %v2706_v19, %v1277_v34  ;;  %v1279_v37 = vpop.f32.mrb[23].mxu1  ;;  %v1403_v40 = vmax.f32 %v1275_v31, 0.0 }
 0x12a   : > { %v1372_v41 = vmax.f32 %v1150_v35, 0.0 }
 0x12b   : > { %v1404_v42 = vmax.f32 %v1278_v25, 0.0 }
 0x12c   : > { %v2012_v43 = vpack.c.bf16 %v1372_v41, %v1371_v39 }
 0x12d   : > { %v2092_v62 = vpack.c.bf16 %v1404_v42, %v1403_v40  ;;  %v1154_v38 = vpop.f32.mrb[24].mxu0 }
 0x12e   : > { %v1282_v44 = vpop.f32.mrb[24].mxu1  ;;  %2148 = vst [vmem:[%s2716_s29 + $0x28] sm:$0xff] %v2012_v43   ;;  %v1155_v45 = vadd.f32 %v2706_v19, %v1154_v38  ;;  %v1156_v20 = vpop.f32.mrb[25].mxu0 }
 0x12f   : > { %2164 = vst [vmem:[%s2716_s29 + $0xa8] sm:$0xff] %v2092_v62   ;;  %v1283_v46 = vadd.f32 %v2706_v19, %v1282_v44  ;;  %v1284_v47 = vpop.f32.mrb[25].mxu1  ;;  %v1157_v48 = vpop.f32.mrb[26].mxu0 }
 0x130   : > { %v1285_v51 = vpop.f32.mrb[26].mxu1  ;;  %v1158_v52 = vadd.f32 %v2706_v19, %v1157_v48  ;;  %v1159_v53 = vpop.f32.mrb[27].mxu0  ;;  %v1373_v54 = vmax.f32 %v1155_v45, 0.0 }
 0x131   : > { %v1286_v50 = vadd.f32 %v2706_v19, %v1285_v51  ;;  %v1287_v24 = vpop.f32.mrb[27].mxu1  ;;  %v1405_v55 = vmax.f32 %v1283_v46, 0.0 }
 0x132   : > { %v1374_v56 = vmax.f32 %v1158_v52, 0.0 }
 0x133   : > { %v1406_v57 = vmax.f32 %v1286_v50, 0.0 }
 0x134   : > { %v2017_v59 = vpack.c.bf16 %v1374_v56, %v1373_v54 }
 0x135   : > { %v2097_v60 = vpack.c.bf16 %v1406_v57, %v1405_v55  ;;  %v1162_v61 = vpop.f32.mrb[28].mxu0 }
 0x136   : > { %v1290_v63 = vpop.f32.mrb[28].mxu1  ;;  %2149 = vst [vmem:[%s2716_s29 + $0x30] sm:$0xff] %v2017_v59   ;;  %v1163_v0 = vadd.f32 %v2706_v19, %v1162_v61  ;;  %v1164_v2 = vpop.f32.mrb[29].mxu0 }
 0x137   : > { %2165 = vst [vmem:[%s2716_s29 + $0xb0] sm:$0xff] %v2097_v60   ;;  %v1291_v21 = vadd.f32 %v2706_v19, %v1290_v63  ;;  %v1292_v1 = vpop.f32.mrb[29].mxu1  ;;  %v1165_v3 = vpop.f32.mrb[30].mxu0 }
 0x138   : > { %v1293_v4 = vpop.f32.mrb[30].mxu1  ;;  %v1166_v49 = vadd.f32 %v2706_v19, %v1165_v3  ;;  %v1167_v5 = vpop.f32.mrb[31].mxu0  ;;  %v1375_v9 = vmax.f32 %v1163_v0, 0.0 }
 0x139   : > { %v1294_v58 = vadd.f32 %v2706_v19, %v1293_v4  ;;  %v1295_v8 = vpop.f32.mrb[31].mxu1  ;;  %v1407_v10 = vmax.f32 %v1291_v21, 0.0 }
 0x13a   : > { %v1376_v11 = vmax.f32 %v1166_v49, 0.0 }
 0x13b   : > { %v1408_v12 = vmax.f32 %v1294_v58, 0.0 }
 0x13c   : > { %v2022_v13 = vpack.c.bf16 %v1376_v11, %v1375_v9 }
 0x13d   : > { %v2102_v14 = vpack.c.bf16 %v1408_v12, %v1407_v10  ;;  %v1170_v15 = vpop.f32.mrb[32].mxu0 }
 0x13e   : > { %v1298_v6 = vpop.f32.mrb[32].mxu1  ;;  %2150 = vst [vmem:[%s2716_s29 + $0x38] sm:$0xff] %v2022_v13   ;;  %v1171_v16 = vadd.f32 %v2706_v19, %v1170_v15  ;;  %v1172_v18 = vpop.f32.mrb[33].mxu0 }
 0x13f   : > { %2166 = vst [vmem:[%s2716_s29 + $0xb8] sm:$0xff] %v2102_v14   ;;  %v1299_v17 = vadd.f32 %v2706_v19, %v1298_v6  ;;  %v1300_v22 = vpop.f32.mrb[33].mxu1  ;;  %v1173_v23 = vpop.f32.mrb[34].mxu0 }
 0x140   : > { %v1301_v26 = vpop.f32.mrb[34].mxu1  ;;  %v1174_v27 = vadd.f32 %v2706_v19, %v1173_v23  ;;  %v1175_v29 = vpop.f32.mrb[35].mxu0  ;;  %v1377_v31 = vmax.f32 %v1171_v16, 0.0 }
 0x141   : > { %v1302_v28 = vadd.f32 %v2706_v19, %v1301_v26  ;;  %v1303_v30 = vpop.f32.mrb[35].mxu1  ;;  %v1409_v7 = vmax.f32 %v1299_v17, 0.0 }
 0x142   : > { %v1378_v32 = vmax.f32 %v1174_v27, 0.0 }
 0x143   : > { %v1410_v33 = vmax.f32 %v1302_v28, 0.0 }
 0x144   : > { %v2027_v34 = vpack.c.bf16 %v1378_v32, %v1377_v31 }
 0x145   : > { %v2107_v35 = vpack.c.bf16 %v1410_v33, %v1409_v7  ;;  %v1178_v25 = vpop.f32.mrb[36].mxu0 }
 0x146   : > { %v1306_v36 = vpop.f32.mrb[36].mxu1  ;;  %2151 = vst [vmem:[%s2716_s29 + $0x40] sm:$0xff] %v2027_v34   ;;  %v1179_v37 = vadd.f32 %v2706_v19, %v1178_v25  ;;  %v1180_v40 = vpop.f32.mrb[37].mxu0 }
 0x147   : > { %2167 = vst [vmem:[%s2716_s29 + $0xc0] sm:$0xff] %v2107_v35   ;;  %v1307_v39 = vadd.f32 %v2706_v19, %v1306_v36  ;;  %v1308_v41 = vpop.f32.mrb[37].mxu1  ;;  %v1181_v42 = vpop.f32.mrb[38].mxu0 }
 0x148   : > { %v1309_v43 = vpop.f32.mrb[38].mxu1  ;;  %v1182_v62 = vadd.f32 %v2706_v19, %v1181_v42  ;;  %v1183_v44 = vpop.f32.mrb[39].mxu0  ;;  %v1379_v46 = vmax.f32 %v1179_v37, 0.0 }
 0x149   : > { %v1310_v38 = vadd.f32 %v2706_v19, %v1309_v43  ;;  %v1311_v45 = vpop.f32.mrb[39].mxu1  ;;  %v1411_v20 = vmax.f32 %v1307_v39, 0.0 }
 0x14a   : > { %v1380_v47 = vmax.f32 %v1182_v62, 0.0 }
 0x14b   : > { %v1412_v48 = vmax.f32 %v1310_v38, 0.0 }
 0x14c   : > { %v2032_v51 = vpack.c.bf16 %v1380_v47, %v1379_v46 }
 0x14d   : > { %v2112_v52 = vpack.c.bf16 %v1412_v48, %v1411_v20  ;;  %v1186_v50 = vpop.f32.mrb[40].mxu0 }
 0x14e   : > { %v1314_v53 = vpop.f32.mrb[40].mxu1  ;;  %2152 = vst [vmem:[%s2716_s29 + $0x48] sm:$0xff] %v2032_v51   ;;  %v1187_v24 = vadd.f32 %v2706_v19, %v1186_v50  ;;  %v1188_v55 = vpop.f32.mrb[41].mxu0 }
 0x14f   : > { %2168 = vst [vmem:[%s2716_s29 + $0xc8] sm:$0xff] %v2112_v52   ;;  %v1315_v54 = vadd.f32 %v2706_v19, %v1314_v53  ;;  %v1316_v56 = vpop.f32.mrb[41].mxu1  ;;  %v1189_v57 = vpop.f32.mrb[42].mxu0 }
 0x150   : > { %v1317_v59 = vpop.f32.mrb[42].mxu1  ;;  %v1190_v60 = vadd.f32 %v2706_v19, %v1189_v57  ;;  %v1191_v63 = vpop.f32.mrb[43].mxu0  ;;  %v1381_v21 = vmax.f32 %v1187_v24, 0.0 }
 0x151   : > { %v1318_v61 = vadd.f32 %v2706_v19, %v1317_v59  ;;  %v1319_v0 = vpop.f32.mrb[43].mxu1  ;;  %v1413_v2 = vmax.f32 %v1315_v54, 0.0 }
 0x152   : > { %v1382_v1 = vmax.f32 %v1190_v60, 0.0 }
 0x153   : > { %v1414_v3 = vmax.f32 %v1318_v61, 0.0 }
 0x154   : > { %v2037_v4 = vpack.c.bf16 %v1382_v1, %v1381_v21 }
 0x155   : > { %v2117_v49 = vpack.c.bf16 %v1414_v3, %v1413_v2  ;;  %v1194_v58 = vpop.f32.mrb[44].mxu0 }
 0x156   : > { %v1322_v5 = vpop.f32.mrb[44].mxu1  ;;  %2153 = vst [vmem:[%s2716_s29 + $0x50] sm:$0xff] %v2037_v4   ;;  %v1195_v8 = vadd.f32 %v2706_v19, %v1194_v58  ;;  %v1196_v10 = vpop.f32.mrb[45].mxu0 }
 0x157   : > { %2169 = vst [vmem:[%s2716_s29 + $0xd0] sm:$0xff] %v2117_v49   ;;  %v1323_v9 = vadd.f32 %v2706_v19, %v1322_v5  ;;  %v1324_v11 = vpop.f32.mrb[45].mxu1  ;;  %v1197_v12 = vpop.f32.mrb[46].mxu0 }
 0x158   : > { %v1325_v13 = vpop.f32.mrb[46].mxu1  ;;  %v1198_v14 = vadd.f32 %v2706_v19, %v1197_v12  ;;  %v1199_v6 = vpop.f32.mrb[47].mxu0  ;;  %v1383_v17 = vmax.f32 %v1195_v8, 0.0 }
 0x159   : > { %v1326_v15 = vadd.f32 %v2706_v19, %v1325_v13  ;;  %v1327_v16 = vpop.f32.mrb[47].mxu1  ;;  %v1415_v18 = vmax.f32 %v1323_v9, 0.0 }
 0x15a   : > { %v1384_v22 = vmax.f32 %v1198_v14, 0.0 }
 0x15b   : > { %v1416_v23 = vmax.f32 %v1326_v15, 0.0 }
 0x15c   : > { %v2042_v26 = vpack.c.bf16 %v1384_v22, %v1383_v17 }
 0x15d   : > { %v2122_v27 = vpack.c.bf16 %v1416_v23, %v1415_v18  ;;  %v1202_v28 = vpop.f32.mrb[48].mxu0 }
 0x15e   : > { %v1330_v29 = vpop.f32.mrb[48].mxu1  ;;  %2154 = vst [vmem:[%s2716_s29 + $0x58] sm:$0xff] %v2042_v26   ;;  %v1203_v30 = vadd.f32 %v2706_v19, %v1202_v28  ;;  %v1204_v7 = vpop.f32.mrb[49].mxu0 }
 0x15f   : > { %2170 = vst [vmem:[%s2716_s29 + $0xd8] sm:$0xff] %v2122_v27   ;;  %v1331_v31 = vadd.f32 %v2706_v19, %v1330_v29  ;;  %v1332_v32 = vpop.f32.mrb[49].mxu1  ;;  %v1205_v33 = vpop.f32.mrb[50].mxu0 }
 0x160   : > { %v1333_v34 = vpop.f32.mrb[50].mxu1  ;;  %v1206_v35 = vadd.f32 %v2706_v19, %v1205_v33  ;;  %v1207_v36 = vpop.f32.mrb[51].mxu0  ;;  %v1385_v39 = vmax.f32 %v1203_v30, 0.0 }
 0x161   : > { %v1334_v25 = vadd.f32 %v2706_v19, %v1333_v34  ;;  %v1335_v37 = vpop.f32.mrb[51].mxu1  ;;  %v1417_v40 = vmax.f32 %v1331_v31, 0.0 }
 0x162   : > { %v1386_v41 = vmax.f32 %v1206_v35, 0.0 }
 0x163   : > { %v1418_v42 = vmax.f32 %v1334_v25, 0.0 }
 0x164   : > { %v2047_v43 = vpack.c.bf16 %v1386_v41, %v1385_v39 }
 0x165   : > { %v2127_v62 = vpack.c.bf16 %v1418_v42, %v1417_v40  ;;  %v1210_v38 = vpop.f32.mrb[52].mxu0 }
 0x166   : > { %2155 = vst [vmem:[%s2716_s29 + $0x60] sm:$0xff] %v2047_v43   ;;  %v1211_v44 = vadd.f32 %v2706_v19, %v1210_v38  ;;  %v1212_v46 = vpop.f32.mrb[53].mxu0 }
 0x167   : > { %2171 = vst [vmem:[%s2716_s29 + $0xe0] sm:$0xff] %v2127_v62   ;;  %v1338_v45 = vpop.f32.mrb[52].mxu1  ;;  %v1213_v48 = vpop.f32.mrb[54].mxu0 }
 0x168   : > { %v1339_v20 = vadd.f32 %v2706_v19, %v1338_v45  ;;  %v1340_v47 = vpop.f32.mrb[53].mxu1  ;;  %v1214_v51 = vadd.f32 %v2706_v19, %v1213_v48  ;;  %v1215_v50 = vpop.f32.mrb[55].mxu0  ;;  %v1387_v54 = vmax.f32 %v1211_v44, 0.0 }
 0x169   : > { %v1341_v52 = vpop.f32.mrb[54].mxu1 }
 0x16a   : > { %v1342_v53 = vadd.f32 %v2706_v19, %v1341_v52  ;;  %v1343_v24 = vpop.f32.mrb[55].mxu1  ;;  %v1388_v55 = vmax.f32 %v1214_v51, 0.0  ;;  %v1419_v56 = vmax.f32 %v1339_v20, 0.0 }
 0x16c   : > { %v1420_v57 = vmax.f32 %v1342_v53, 0.0  ;;  %v2052_v59 = vpack.c.bf16 %v1388_v55, %v1387_v54 }
 0x16e   : > { %v2132_v60 = vpack.c.bf16 %v1420_v57, %v1419_v56  ;;  %v1218_v61 = vpop.f32.mrb[56].mxu0  ;;  %2156 = vst [vmem:[%s2716_s29 + $0x68] sm:$0xff] %v2052_v59  }
 0x16f   : > { %v1219_v63 = vadd.f32 %v2706_v19, %v1218_v61  ;;  %v1220_v0 = vpop.f32.mrb[57].mxu0 }
 0x170   : > { %2172 = vst [vmem:[%s2716_s29 + $0xe8] sm:$0xff] %v2132_v60   ;;  %v1346_v21 = vpop.f32.mrb[56].mxu1  ;;  %v1221_v2 = vpop.f32.mrb[58].mxu0 }
 0x171   : > { %v1347_v1 = vadd.f32 %v2706_v19, %v1346_v21  ;;  %v1348_v3 = vpop.f32.mrb[57].mxu1  ;;  %v1222_v4 = vadd.f32 %v2706_v19, %v1221_v2  ;;  %v1223_v49 = vpop.f32.mrb[59].mxu0  ;;  %v1389_v5 = vmax.f32 %v1219_v63, 0.0 }
 0x172   : > { %v1349_v58 = vpop.f32.mrb[58].mxu1 }
 0x173   : > { %v1390_v8 = vmax.f32 %v1222_v4, 0.0  ;;  %v1350_v9 = vadd.f32 %v2706_v19, %v1349_v58  ;;  %v1351_v10 = vpop.f32.mrb[59].mxu1  ;;  %v1421_v11 = vmax.f32 %v1347_v1, 0.0 }
 0x175   : > { %v2057_v12 = vpack.c.bf16 %v1390_v8, %v1389_v5  ;;  %v1422_v13 = vmax.f32 %v1350_v9, 0.0 }
 0x177   : > { %2157 = vst [vmem:[%s2716_s29 + $0x70] sm:$0xff] %v2057_v12   ;;  %v2137_v14 = vpack.c.bf16 %v1422_v13, %v1421_v11  ;;  %v1226_v15 = vpop.f32.mrb[60].mxu0 }
 0x178   : > { %v1227_v6 = vadd.f32 %v2706_v19, %v1226_v15  ;;  %v1228_v16 = vpop.f32.mrb[61].mxu0 }
 0x179   : > { %2173 = vst [vmem:[%s2716_s29 + $0xf0] sm:$0xff] %v2137_v14   ;;  %v1354_v17 = vpop.f32.mrb[60].mxu1  ;;  %v1229_v18 = vpop.f32.mrb[62].mxu0 }
 0x17a   : > { %v1355_v22 = vadd.f32 %v2706_v19, %v1354_v17  ;;  %v1356_v23 = vpop.f32.mrb[61].mxu1  ;;  %v1230_v26 = vadd.f32 %v2706_v19, %v1229_v18  ;;  %v1231_v27 = vpop.f32.mrb[63].mxu0  ;;  %v1391_v29 = vmax.f32 %v1227_v6, 0.0 }
 0x17b   : > { %v1357_v28 = vpop.f32.mrb[62].mxu1 }
 0x17c   : > { %v1392_v30 = vmax.f32 %v1230_v26, 0.0  ;;  %v1358_v31 = vadd.f32 %v2706_v19, %v1357_v28  ;;  %v1359_v7 = vpop.f32.mrb[63].mxu1  ;;  %v1423_v32 = vmax.f32 %v1355_v22, 0.0 }
 0x17e   : > { %v2062_v33 = vpack.c.bf16 %v1392_v30, %v1391_v29  ;;  %v1424_v34 = vmax.f32 %v1358_v31, 0.0 }
 0x180   : > { %2158 = vst [vmem:[%s2716_s29 + $0x78] sm:$0xff] %v2062_v33   ;;  %v2142_v35 = vpack.c.bf16 %v1424_v34, %v1423_v32 }
 0x182   : > { %2174 = vst [vmem:[%s2716_s29 + $0xf8] sm:$0xff] %v2142_v35  }
 0x183 PF: > { %s15_s18 = sadd.s32 1, %s2217_s18  }
 0x184   : > { %p12_p4 = scmp.ge.s32.totalorder %s15_s18, 4  }
 0x186   :  { %14 = sbr.rel (!%p12_p4) target bundleno = 1 (0x1), region = 70 }

// kernel: fbn_forward.9
= control target key start
LH: loop header
LB: loop body
LE: loop exit
PB: predicated region body
PF: predicated region fallthrough
CT: control target
= control target key end

     0   :  { %s2784_s12 = smov 0   ;;  %s3235_s0 = inlined_call_operand.vmem [shape: bf16[1024,288], index: 0, kind: input, shape index: {}]   ;;  %s3236_s1 = inlined_call_operand.vmem [shape: bf16[288,128], index: 1, kind: input, shape index: {}]   ;;  %s3237_s2 = inlined_call_operand.vmem [shape: f32[1,128], index: 2, kind: input, shape index: {}]   ;;  %s3238_s3 = inlined_call_operand.vmem [shape: bf16[1024,128], index: 3, kind: output, shape index: {}]  }
   0x1 LB: > { %s1988_s13 = sadd.s32 4294967295, %s2761_s12   ;;  %p1992_p0 = scmp.ge.s32.totalorder %s2761_s12, 1  ;;  %s2761_s12 = sphi %s2784_s12, %s13_s12  }
   0x2   : > { %p139_p1 = scmp.lt.s32.totalorder %s2761_s12, 3 }
   0x4   : > { %p140_p2 = pnand %p1992_p0, %p139_p1 }
   0x5   : > { %v2609_v0 = vld [vmem:[%s3236_s1] sm:$0xff] (!%p140_p2)   ;;  %v2763_v1 = vmov (!%p140_p2), 0   ;;  %s1993_s16 = sshll.u32 (!%p140_p2), %s1988_s13, 6  ;;  %v2610_v2 = vld [vmem:[%s3236_s1 + $0x8] sm:$0xff] (!%p140_p2)   ;;  %v2611_v3 = vld [vmem:[%s3236_s1 + $0x10] sm:$0xff] (!%p140_p2)   ;;  %vm937_vm0 = vcmask (!%p140_p2), 261120  }
   0x6   : > { %143 = sbr.rel (%p140_p2) target bundleno = 475 (0x1db), region = 32  ;;  %1034 = vmatprep.subr.bf16.mxu0 (!%p140_p2), %v2763_v1  ;;  %2567 = vmatprep.subr.bf16.mxu1 (!%p140_p2), %v2763_v1  ;;  %p165_p3 = scmp.lt.s32.totalorder (!%p140_p2), %s1993_s16, 127  ;;  %v2612_v4 = vld [vmem:[%s3236_s1 + $0x18] sm:$0xff] (!%p140_p2)   ;;  %v2613_v5 = vld [vmem:[%s3236_s1 + $0x20] sm:$0xff] (!%p140_p2)   ;;  %v2614_v7 = vld [vmem:[%s3236_s1 + $0x28] sm:$0xff] (!%p140_p2)  }
   0x7   : > { %1035 = vmatpush1.bf16.msra.mxu0 (!%p140_p2), %v2609_v0  ;;  %2583 = vmatpush1.bf16.msra.mxu1 (!%p140_p2), %v2609_v0  ;;  %v2615_v9 = vld [vmem:[%s3236_s1 + $0x30] sm:$0xff] (!%p140_p2)   ;;  %v2616_v10 = vld [vmem:[%s3236_s1 + $0x38] sm:$0xff] (!%p140_p2)   ;;  %v2617_v11 = vld [vmem:[%s3236_s1 + $0x40] sm:$0xff] (!%p140_p2)  }
   0x8   : > { %1036 = vmatprep.subr.bf16.mxu0 (!%p140_p2), %v2763_v1  ;;  %2568 = vmatprep.subr.bf16.mxu1 (!%p140_p2), %v2763_v1  ;;  %v2618_v12 = vld [vmem:[%s3236_s1 + $0x48] sm:$0xff] (!%p140_p2)   ;;  %v2619_v13 = vld [vmem:[%s3236_s1 + $0x50] sm:$0xff] (!%p140_p2)   ;;  %v2620_v14 = vld [vmem:[%s3236_s1 + $0x58] sm:$0xff] (!%p140_p2)  }
   0x9   : > { %v2621_v15 = vld [vmem:[%s3236_s1 + $0x60] sm:$0xff] (!%p140_p2)   ;;  %v2622_v16 = vld [vmem:[%s3236_s1 + $0x68] sm:$0xff] (!%p140_p2)   ;;  %v2623_v17 = vld [vmem:[%s3236_s1 + $0x70] sm:$0xff] (!%p140_p2)  }
   0xa   : > { %v2624_v18 = vld [vmem:[%s3236_s1 + $0x78] sm:$0xff] (!%p140_p2)   ;;  %v2631_v19 = vld [vmem:[%s3236_s1 + $0x80] sm:$0xff] (!%p140_p2)   ;;  %v2656_v24 = vld [vmem:[%s3236_s1 + $0x88] sm:$0xff] (!%p140_p2)  }
   0xb   : > { %1037 = vmatpush1.bf16.msra.mxu0 (!%p140_p2), %v2610_v2  ;;  %2584 = vmatpush1.bf16.msra.mxu1 (!%p140_p2), %v2610_v2 }
   0xc   : > { %1038 = vmatprep.subr.bf16.mxu0 (!%p140_p2), %v2763_v1  ;;  %2569 = vmatprep.subr.bf16.mxu1 (!%p140_p2), %v2763_v1 }
   0xd   : > { %s3240_s16 = smov (!%p165_p3, %s1993_s16), 127 }
   0xe   : > { %s2599_s23 = smul.u32 12, %s3240_s16  ;;  %s1996_s5 = sshll.u32 %s3240_s16, 2 }
   0xf   : > { %1039 = vmatpush1.bf16.msra.mxu0 %v2611_v3  ;;  %2585 = vmatpush1.bf16.msra.mxu1 %v2611_v3  ;;  %s3091_s8 = scalar_lea.vmem %s3238_s3, %s1996_s5 }
  0x10   : > { %1040 = vmatprep.subr.bf16.mxu0 %v2763_v1  ;;  %2570 = vmatprep.subr.bf16.mxu1 %v2763_v1  ;;  %s2821_s28 = scalar_lea.vmem %s3235_s0, %s2599_s23 }
  0x11   : > { %v2627_v6 = vld [vmem:[%s2821_s28 + $0x4] ss:$12 sps:$4 sm:$0xff]   ;;  %v2625_v20 = vld [vmem:[%s2821_s28] ss:$12 sps:$4 sm:$0xff]   ;;  %v2632_v22 = vld [vmem:[%s2821_s28 + $0x1c] ss:$12 sps:$4 sm:$0xff]  }
  0x12   : > { %v2630_v8 = vld [vmem:[%s2821_s28 + $0x244] ss:$12 sps:$4 sm:$0xff]   ;;  %1066 = vmatprep.mubr.bf16.mxu0 %v2627_v6  ;;  %v2628_v21 = vld [vmem:[%s2821_s28 + $0x240] ss:$12 sps:$4 sm:$0xff]   ;;  %v2634_v23 = vld [vmem:[%s2821_s28 + $0x25c] ss:$12 sps:$4 sm:$0xff]  }
  0x13   : > { %1041 = vmatpush1.bf16.msra.mxu0 %v2612_v4  ;;  %2586 = vmatpush1.bf16.msra.mxu1 %v2612_v4  ;;  %v2636_v25 = vld [vmem:[%s2821_s28 + $0x18] ss:$12 sps:$4 sm:$0xff]   ;;  %v2638_v27 = vld [vmem:[%s2821_s28 + $0x34] ss:$12 sps:$4 sm:$0xff]   ;;  %v2642_v29 = vld [vmem:[%s2821_s28 + $0x30] ss:$12 sps:$4 sm:$0xff]  }
  0x14   : > { %1042 = vmatprep.subr.bf16.mxu0 %v2763_v1  ;;  %2571 = vmatprep.subr.bf16.mxu1 %v2763_v1  ;;  %v2637_v26 = vld [vmem:[%s2821_s28 + $0x258] ss:$12 sps:$4 sm:$0xff]   ;;  %v2640_v28 = vld [vmem:[%s2821_s28 + $0x274] ss:$12 sps:$4 sm:$0xff]   ;;  %v2643_v30 = vld [vmem:[%s2821_s28 + $0x270] ss:$12 sps:$4 sm:$0xff]  }
  0x15   : > { %1258 = vmatprep.mubr.bf16.mxu1 %v2630_v8  ;;  %v2644_v31 = vld [vmem:[%s2821_s28 + $0x4c] ss:$12 sps:$4 sm:$0xff]   ;;  %v2648_v33 = vld [vmem:[%s2821_s28 + $0x48] ss:$12 sps:$4 sm:$0xff]   ;;  %v2650_v35 = vld [vmem:[%s2821_s28 + $0x64] ss:$12 sps:$4 sm:$0xff]  }
  0x16   : > { %v2646_v32 = vld [vmem:[%s2821_s28 + $0x28c] ss:$12 sps:$4 sm:$0xff]   ;;  %v2649_v34 = vld [vmem:[%s2821_s28 + $0x288] ss:$12 sps:$4 sm:$0xff]   ;;  %v2652_v36 = vld [vmem:[%s2821_s28 + $0x2a4] ss:$12 sps:$4 sm:$0xff]  }
  0x17   : > { %1043 = vmatpush1.bf16.msra.mxu0 %v2613_v5  ;;  %2587 = vmatpush1.bf16.msra.mxu1 %v2613_v5  ;;  %v2654_v37 = vld [vmem:[%s2821_s28 + $0x60] ss:$12 sps:$4 sm:$0xff]   ;;  %v2657_v39 = vld [vmem:[%s2821_s28 + $0x7c] ss:$12 sps:$4 sm:$0xff]   ;;  %v2661_v41 = vld [vmem:[%s2821_s28 + $0x78] ss:$12 sps:$4 sm:$0xff]  }
  0x18   : > { %1044 = vmatprep.subr.bf16.mxu0 %v2763_v1  ;;  %2572 = vmatprep.subr.bf16.mxu1 %v2763_v1  ;;  %v2655_v38 = vld [vmem:[%s2821_s28 + $0x2a0] ss:$12 sps:$4 sm:$0xff]   ;;  %v2659_v40 = vld [vmem:[%s2821_s28 + $0x2bc] ss:$12 sps:$4 sm:$0xff]   ;;  %v2662_v42 = vld [vmem:[%s2821_s28 + $0x2b8] ss:$12 sps:$4 sm:$0xff]  }
  0x19   : > { %v2663_v43 = vld [vmem:[%s2821_s28 + $0x94] ss:$12 sps:$4 sm:$0xff]   ;;  %v2667_v45 = vld [vmem:[%s2821_s28 + $0x90] ss:$12 sps:$4 sm:$0xff]   ;;  %v2669_v47 = vld [vmem:[%s2821_s28 + $0xac] ss:$12 sps:$4 sm:$0xff]  }
  0x1a   : > { %v2665_v44 = vld [vmem:[%s2821_s28 + $0x2d4] ss:$12 sps:$4 sm:$0xff]   ;;  %v2668_v46 = vld [vmem:[%s2821_s28 + $0x2d0] ss:$12 sps:$4 sm:$0xff]   ;;  %v2671_v48 = vld [vmem:[%s2821_s28 + $0x2ec] ss:$12 sps:$4 sm:$0xff]  }
  0x1b   : > { %1045 = vmatpush1.bf16.msra.mxu0 %v2614_v7  ;;  %2588 = vmatpush1.bf16.msra.mxu1 %v2614_v7  ;;  %v2673_v49 = vld [vmem:[%s2821_s28 + $0xa8] ss:$12 sps:$4 sm:$0xff]   ;;  %v2675_v51 = vld [vmem:[%s2821_s28 + $0xc4] ss:$12 sps:$4 sm:$0xff]   ;;  %v2678_v53 = vld [vmem:[%s2821_s28 + $0xc0] ss:$12 sps:$4 sm:$0xff]  }
  0x1c   : > { %1046 = vmatprep.subr.bf16.mxu0 %v2763_v1  ;;  %2573 = vmatprep.subr.bf16.mxu1 %v2763_v1  ;;  %v2674_v50 = vld [vmem:[%s2821_s28 + $0x2e8] ss:$12 sps:$4 sm:$0xff]   ;;  %v2679_v54 = vld [vmem:[%s2821_s28 + $0x20] ss:$12 sps:$4 sm:$0xff]   ;;  %v2682_v56 = vld [vmem:[%s2821_s28 + $0x38] ss:$12 sps:$4 sm:$0xff]  }
  0x1d   : > { %v2677_v52 = vld [vmem:[%s2821_s28 + $0x8] ss:$12 sps:$4 sm:$0xff]   ;;  %v2683_v57 = vld [vmem:[%s2821_s28 + $0xd8] ss:$12 sps:$4 sm:$0xff]   ;;  %v2684_v58 = vld [vmem:[%s2821_s28 + $0x50] ss:$12 sps:$4 sm:$0xff]  }
  0x1e   : > { %v2680_v55 = vld [vmem:[%s2821_s28 + $0xdc] ss:$12 sps:$4 sm:$0xff]   ;;  %v2685_v59 = vld [vmem:[%s2821_s28 + $0xf4] ss:$12 sps:$4 sm:$0xff]   ;;  %v2690_v63 = vld [vmem:[%s2821_s28 + $0x10c] ss:$12 sps:$4 sm:$0xff]  }
  0x1f   : > { %1047 = vmatpush1.bf16.msra.mxu0 %v2615_v9  ;;  %2589 = vmatpush1.bf16.msra.mxu1 %v2615_v9  ;;  %v2687_v60 = vld [vmem:[%s2821_s28 + $0x68] ss:$12 sps:$4 sm:$0xff]   ;;  %v2688_v61 = vld [vmem:[%s2821_s28 + $0xf0] ss:$12 sps:$4 sm:$0xff]   ;;  %v2689_v62 = vld [vmem:[%s2821_s28 + $0x80] ss:$12 sps:$4 sm:$0xff]  }
  0x20   : > { %1048 = vmatprep.subr.bf16.mxu0 %v2763_v1  ;;  %2574 = vmatprep.subr.bf16.mxu1 %v2763_v1  ;;  %v2692_v0 = vld [vmem:[%s2821_s28 + $0x98] ss:$12 sps:$4 sm:$0xff]   ;;  %v2694_v2 = vld [vmem:[%s2821_s28 + $0xb0] ss:$12 sps:$4 sm:$0xff]   ;;  %v2697_v4 = vld [vmem:[%s2821_s28 + $0xc8] ss:$12 sps:$4 sm:$0xff]  }
  0x21   : > { %v2695_v3 = vld [vmem:[%s2821_s28 + $0x124] ss:$12 sps:$4 sm:$0xff]   ;;  %v2698_v5 = vld [vmem:[%s2821_s28 + $0x120] ss:$12 sps:$4 sm:$0xff]   ;;  %v2700_v7 = vld [vmem:[%s2821_s28 + $0x13c] ss:$12 sps:$4 sm:$0xff]  }
  0x22   : > { %v2699_v6 = vld [vmem:[%s2821_s28 + $0xe0] ss:$12 sps:$4 sm:$0xff]   ;;  %v2702_v8 = vld [vmem:[%s2821_s28 + $0xf8] ss:$12 sps:$4 sm:$0xff]  }
  0x23   : > { %1049 = vmatpush1.bf16.msra.mxu0 %v2616_v10  ;;  %2590 = vmatpush1.bf16.msra.mxu1 %v2616_v10  ;;  %v2703_v9 = vld [vmem:[%s2821_s28 + $0x138] ss:$12 sps:$4 sm:$0xff]   ;;  %v2704_v10 = vld [vmem:[%s2821_s28 + $0x110] ss:$12 sps:$4 sm:$0xff]  }
  0x24   : > { %1050 = vmatprep.subr.bf16.mxu0 %v2763_v1  ;;  %2575 = vmatprep.subr.bf16.mxu1 %v2763_v1 }
  0x27   : > { %1051 = vmatpush1.bf16.msra.mxu0 %v2617_v11  ;;  %2591 = vmatpush1.bf16.msra.mxu1 %v2617_v11  ;;  %v2705_v11 = vld [vmem:[%s2821_s28 + $0x154] ss:$12 sps:$4 sm:$0xff]  }
  0x28   : > { %1052 = vmatprep.subr.bf16.mxu0 %v2763_v1  ;;  %2576 = vmatprep.subr.bf16.mxu1 %v2763_v1 }
  0x2b   : > { %1053 = vmatpush1.bf16.msra.mxu0 %v2618_v12  ;;  %2592 = vmatpush1.bf16.msra.mxu1 %v2618_v12  ;;  %v2707_v12 = vld [vmem:[%s2821_s28 + $0x128] ss:$12 sps:$4 sm:$0xff]  }
  0x2c   : > { %1054 = vmatprep.subr.bf16.mxu0 %v2763_v1  ;;  %2577 = vmatprep.subr.bf16.mxu1 %v2763_v1 }
  0x2f   : > { %1055 = vmatpush1.bf16.msra.mxu0 %v2619_v13  ;;  %2593 = vmatpush1.bf16.msra.mxu1 %v2619_v13  ;;  %v2708_v13 = vld [vmem:[%s2821_s28 + $0x150] ss:$12 sps:$4 sm:$0xff]  }
  0x30   : > { %1056 = vmatprep.subr.bf16.mxu0 %v2763_v1  ;;  %2578 = vmatprep.subr.bf16.mxu1 %v2763_v1 }
  0x33   : > { %1057 = vmatpush1.bf16.msra.mxu0 %v2620_v14  ;;  %2594 = vmatpush1.bf16.msra.mxu1 %v2620_v14  ;;  %v2709_v14 = vld [vmem:[%s2821_s28 + $0x140] ss:$12 sps:$4 sm:$0xff]  }
  0x34   : > { %1058 = vmatprep.subr.bf16.mxu0 %v2763_v1  ;;  %2579 = vmatprep.subr.bf16.mxu1 %v2763_v1 }
  0x37   : > { %1059 = vmatpush1.bf16.msra.mxu0 %v2621_v15  ;;  %2595 = vmatpush1.bf16.msra.mxu1 %v2621_v15  ;;  %v2710_v15 = vld [vmem:[%s2821_s28 + $0x16c] ss:$12 sps:$4 sm:$0xff]  }
  0x38   : > { %1060 = vmatprep.subr.bf16.mxu0 %v2763_v1  ;;  %2580 = vmatprep.subr.bf16.mxu1 %v2763_v1 }
  0x3b   : > { %1061 = vmatpush1.bf16.msra.mxu0 %v2622_v16  ;;  %2596 = vmatpush1.bf16.msra.mxu1 %v2622_v16  ;;  %v2712_v16 = vld [vmem:[%s2821_s28 + $0x158] ss:$12 sps:$4 sm:$0xff]  }
  0x3c   : > { %1062 = vmatprep.subr.bf16.mxu0 %v2763_v1  ;;  %2581 = vmatprep.subr.bf16.mxu1 %v2763_v1 }
  0x3f   : > { %1063 = vmatpush1.bf16.msra.mxu0 %v2623_v17  ;;  %2597 = vmatpush1.bf16.msra.mxu1 %v2623_v17  ;;  %v2713_v17 = vld [vmem:[%s2821_s28 + $0x168] ss:$12 sps:$4 sm:$0xff]  }
  0x40   : > { %1064 = vmatprep.subr.bf16.mxu0 %v2763_v1  ;;  %2582 = vmatprep.subr.bf16.mxu1 %v2763_v1  ;;  %v2693_v1 = vld [vmem:[%s2821_s28 + $0x108] ss:$12 sps:$4 sm:$0xff]  }
  0x43   : > { %1065 = vmatpush1.bf16.msra.mxu0 %v2624_v18  ;;  %2598 = vmatpush1.bf16.msra.mxu1 %v2624_v18  ;;  %v2714_v18 = vld [vmem:[%s2821_s28 + $0x170] ss:$12 sps:$4 sm:$0xff]  }
  0x44   : > { %2499 = vmatprep.subr.bf16.mxu1 %v2631_v19 }
  0x46   : > { %1067 = vmatmul.mubr.bf16.vlgmr.msra.gmra.mrb[0].mxu0 %v2625_v20  ;;  %1259 = vmatmul.mubr.bf16.vlgmr.msra.gmra.mrb[0].mxu1 %v2628_v21  ;;  %v2717_v20 = vld [vmem:[%s2821_s28 + $0x188] ss:$12 sps:$4 sm:$0xff]   ;;  %v2718_v21 = vld [vmem:[%s2821_s28 + $0x180] ss:$12 sps:$4 sm:$0xff]  }
  0x47   : > { %2500 = vmatpush3.bf16.msra.mxu1 %v2631_v19  ;;  %1074 = vmatprep.mubr.bf16.mxu0 %v2632_v22  ;;  %v2715_v19 = vld [vmem:[%s2821_s28 + $0x184] ss:$12 sps:$4 sm:$0xff]   ;;  %v2719_v22 = vld [vmem:[%s2821_s28 + $0x1a0] ss:$12 sps:$4 sm:$0xff]  }
  0x48   : > { %1266 = vmatprep.mubr.bf16.mxu1 %v2634_v23  ;;  %2501 = vmatprep.subr.bf16.mxu1 %v2656_v24  ;;  %v2720_v23 = vld [vmem:[%s2821_s28 + $0x19c] ss:$12 sps:$4 sm:$0xff]  }
  0x4b   : > { %2502 = vmatpush3.bf16.msra.mxu1 %v2656_v24  ;;  %v2722_v24 = vld [vmem:[%s2821_s28 + $0x1b8] ss:$12 sps:$4 sm:$0xff]  }
  0x4e   : > { %1075 = vmatmul.mubr.bf16.gmra.mrb[4].mxu0 %v2636_v25  ;;  %1267 = vmatmul.mubr.bf16.gmra.mrb[4].mxu1 %v2637_v26  ;;  %v2723_v25 = vld [vmem:[%s2821_s28 + $0x198] ss:$12 sps:$4 sm:$0xff]   ;;  %v2724_v26 = vld [vmem:[%s2821_s28 + $0x1d0] ss:$12 sps:$4 sm:$0xff]  }
  0x4f   : > { %1082 = vmatprep.mubr.bf16.mxu0 %v2638_v27  ;;  %1274 = vmatprep.mubr.bf16.mxu1 %v2640_v28  ;;  %v2725_v27 = vld [vmem:[%s2821_s28 + $0x1b4] ss:$12 sps:$4 sm:$0xff]  }
  0x50   : > { %v2727_v28 = vld [vmem:[%s2821_s28 + $0x1e8] ss:$12 sps:$4 sm:$0xff]  }
  0x56   : > { %1083 = vmatmul.mubr.bf16.gmra.mrb[8].mxu0 %v2642_v29  ;;  %1275 = vmatmul.mubr.bf16.gmra.mrb[8].mxu1 %v2643_v30  ;;  %v2728_v29 = vld [vmem:[%s2821_s28 + $0x1b0] ss:$12 sps:$4 sm:$0xff]   ;;  %v2729_v30 = vld [vmem:[%s2821_s28 + $0x200] ss:$12 sps:$4 sm:$0xff]  }
  0x57   : > { %1090 = vmatprep.mubr.bf16.mxu0 %v2644_v31  ;;  %1282 = vmatprep.mubr.bf16.mxu1 %v2646_v32  ;;  %v2730_v31 = vld [vmem:[%s2821_s28 + $0x1cc] ss:$12 sps:$4 sm:$0xff]  }
  0x58   : > { %v2732_v32 = vld [vmem:[%s2821_s28 + $0x218] ss:$12 sps:$4 sm:$0xff]  }
  0x5e   : > { %1091 = vmatmul.mubr.bf16.gmra.mrb[12].mxu0 %v2648_v33  ;;  %1283 = vmatmul.mubr.bf16.gmra.mrb[12].mxu1 %v2649_v34  ;;  %v2733_v33 = vld [vmem:[%s2821_s28 + $0x1c8] ss:$12 sps:$4 sm:$0xff]   ;;  %v2734_v34 = vld [vmem:[%s2821_s28 + $0x230] ss:$12 sps:$4 sm:$0xff]  }
  0x5f   : > { %1098 = vmatprep.mubr.bf16.mxu0 %v2650_v35  ;;  %1290 = vmatprep.mubr.bf16.mxu1 %v2652_v36  ;;  %v2735_v35 = vld [vmem:[%s2821_s28 + $0x1e4] ss:$12 sps:$4 sm:$0xff]   ;;  %v2737_v36 = vld [vmem:[%s2821_s28 + $0x248] ss:$12 sps:$4 sm:$0xff]  }
  0x66   : > { %1099 = vmatmul.mubr.bf16.gmra.mrb[16].mxu0 %v2654_v37  ;;  %1291 = vmatmul.mubr.bf16.gmra.mrb[16].mxu1 %v2655_v38  ;;  %v2738_v37 = vld [vmem:[%s2821_s28 + $0x1e0] ss:$12 sps:$4 sm:$0xff]  }
  0x67   : > { %1106 = vmatprep.mubr.bf16.mxu0 %v2657_v39  ;;  %1298 = vmatprep.mubr.bf16.mxu1 %v2659_v40  ;;  %v2739_v38 = vld [vmem:[%s2821_s28 + $0x260] ss:$12 sps:$4 sm:$0xff]   ;;  %v2740_v39 = vld [vmem:[%s2821_s28 + $0x1fc] ss:$12 sps:$4 sm:$0xff]   ;;  %v2742_v40 = vld [vmem:[%s2821_s28 + $0x278] ss:$12 sps:$4 sm:$0xff]  }
  0x6e   : > { %1107 = vmatmul.mubr.bf16.gmra.mrb[20].mxu0 %v2661_v41  ;;  %1299 = vmatmul.mubr.bf16.gmra.mrb[20].mxu1 %v2662_v42  ;;  %v2743_v41 = vld [vmem:[%s2821_s28 + $0x1f8] ss:$12 sps:$4 sm:$0xff]   ;;  %v2744_v42 = vld [vmem:[%s2821_s28 + $0x290] ss:$12 sps:$4 sm:$0xff]  }
  0x6f   : > { %1114 = vmatprep.mubr.bf16.mxu0 %v2663_v43  ;;  %1306 = vmatprep.mubr.bf16.mxu1 %v2665_v44  ;;  %v2745_v43 = vld [vmem:[%s2821_s28 + $0x214] ss:$12 sps:$4 sm:$0xff]  }
  0x70   : > { %v2747_v44 = vld [vmem:[%s2821_s28 + $0x2a8] ss:$12 sps:$4 sm:$0xff]  }
  0x76   : > { %1115 = vmatmul.mubr.bf16.gmra.mrb[24].mxu0 %v2667_v45  ;;  %1307 = vmatmul.mubr.bf16.gmra.mrb[24].mxu1 %v2668_v46  ;;  %v2748_v45 = vld [vmem:[%s2821_s28 + $0x210] ss:$12 sps:$4 sm:$0xff]   ;;  %v2749_v46 = vld [vmem:[%s2821_s28 + $0x2c0] ss:$12 sps:$4 sm:$0xff]  }
  0x77   : > { %1122 = vmatprep.mubr.bf16.mxu0 %v2669_v47  ;;  %1314 = vmatprep.mubr.bf16.mxu1 %v2671_v48  ;;  %v2750_v47 = vld [vmem:[%s2821_s28 + $0x22c] ss:$12 sps:$4 sm:$0xff]  }
  0x78   : > { %v2752_v48 = vld [vmem:[%s2821_s28 + $0x2d8] ss:$12 sps:$4 sm:$0xff]  }
  0x7e   : > { %1123 = vmatmul.mubr.bf16.gmra.mrb[28].mxu0 %v2673_v49  ;;  %1315 = vmatmul.mubr.bf16.gmra.mrb[28].mxu1 %v2674_v50  ;;  %v2753_v49 = vld [vmem:[%s2821_s28 + $0x228] ss:$12 sps:$4 sm:$0xff]   ;;  %v2754_v50 = vld [vmem:[%s2821_s28 + $0x2f0] ss:$12 sps:$4 sm:$0xff]  }
  0x7f   : > { %1130 = vmatprep.mubr.bf16.mxu0 %v2675_v51  ;;  %2503 = vmatprep.mubr.msk.bf16.mxu1 %vm937_vm0, %v2677_v52 }
  0x86   : > { %1131 = vmatmul.mubr.bf16.gmra.mrb[32].mxu0 %v2678_v53  ;;  %2504 = vmatmul.mubr.msk.bf16.vlgmr.msra.gmra.mrb[32].mxu1 %vm937_vm0, %v2679_v54 }
  0x87   : > { %1138 = vmatprep.mubr.bf16.mxu0 %v2680_v55  ;;  %2507 = vmatprep.mubr.msk.bf16.mxu1 %vm937_vm0, %v2682_v56 }
  0x8e   : > { %1139 = vmatmul.mubr.bf16.gmra.mrb[36].mxu0 %v2683_v57  ;;  %2508 = vmatmul.mubr.msk.bf16.gmra.mrb[36].mxu1 %vm937_vm0, %v2684_v58 }
  0x8f   : > { %1146 = vmatprep.mubr.bf16.mxu0 %v2685_v59  ;;  %2511 = vmatprep.mubr.msk.bf16.mxu1 %vm937_vm0, %v2687_v60 }
  0x96   : > { %1147 = vmatmul.mubr.bf16.gmra.mrb[40].mxu0 %v2688_v61  ;;  %2512 = vmatmul.mubr.msk.bf16.gmra.mrb[40].mxu1 %vm937_vm0, %v2689_v62 }
  0x97   : > { %1154 = vmatprep.mubr.bf16.mxu0 %v2690_v63  ;;  %2515 = vmatprep.mubr.msk.bf16.mxu1 %vm937_vm0, %v2692_v0 }
  0x9e   : > { %1155 = vmatmul.mubr.bf16.gmra.mrb[44].mxu0 %v2693_v1  ;;  %2516 = vmatmul.mubr.msk.bf16.gmra.mrb[44].mxu1 %vm937_vm0, %v2694_v2 }
  0x9f   : > { %1162 = vmatprep.mubr.bf16.mxu0 %v2695_v3  ;;  %2519 = vmatprep.mubr.msk.bf16.mxu1 %vm937_vm0, %v2697_v4 }
  0xa6   : > { %1163 = vmatmul.mubr.bf16.gmra.mrb[48].mxu0 %v2698_v5  ;;  %2520 = vmatmul.mubr.msk.bf16.gmra.mrb[48].mxu1 %vm937_vm0, %v2699_v6 }
  0xa7   : > { %1170 = vmatprep.mubr.bf16.mxu0 %v2700_v7  ;;  %2523 = vmatprep.mubr.msk.bf16.mxu1 %vm937_vm0, %v2702_v8 }
  0xae   : > { %1171 = vmatmul.mubr.bf16.gmra.mrb[52].mxu0 %v2703_v9  ;;  %2524 = vmatmul.mubr.msk.bf16.gmra.mrb[52].mxu1 %vm937_vm0, %v2704_v10 }
  0xaf   : > { %1178 = vmatprep.mubr.bf16.mxu0 %v2705_v11  ;;  %2527 = vmatprep.mubr.msk.bf16.mxu1 %vm937_vm0, %v2707_v12 }
  0xb6   : > { %1179 = vmatmul.mubr.bf16.gmra.mrb[56].mxu0 %v2708_v13  ;;  %2528 = vmatmul.mubr.msk.bf16.gmra.mrb[56].mxu1 %vm937_vm0, %v2709_v14 }
  0xb7   : > { %1186 = vmatprep.mubr.bf16.mxu0 %v2710_v15  ;;  %2531 = vmatprep.mubr.msk.bf16.mxu1 %vm937_vm0, %v2712_v16 }
  0xbe   : > { %1187 = vmatmul.mubr.bf16.gmra.mrb[60].mxu0 %v2713_v17  ;;  %2532 = vmatmul.mubr.msk.bf16.gmra.mrb[60].mxu1 %vm937_vm0, %v2714_v18 }
  0xbf   : > { %1194 = vmatprep.mubr.bf16.mxu0 %v2715_v19  ;;  %2535 = vmatprep.mubr.msk.bf16.mxu1 %vm937_vm0, %v2717_v20 }
  0xc6   : > { %1195 = vmatmul.mubr.bf16.gmra.mrb[64].mxu0 %v2718_v21  ;;  %2536 = vmatmul.mubr.msk.bf16.gmra.mrb[64].mxu1 %vm937_vm0, %v2719_v22 }
  0xc7   : > { %1202 = vmatprep.mubr.bf16.mxu0 %v2720_v23  ;;  %2539 = vmatprep.mubr.msk.bf16.mxu1 %vm937_vm0, %v2722_v24 }
  0xce   : > { %1203 = vmatmul.mubr.bf16.gmra.mrb[68].mxu0 %v2723_v25  ;;  %2540 = vmatmul.mubr.msk.bf16.gmra.mrb[68].mxu1 %vm937_vm0, %v2724_v26 }
  0xcf   : > { %1210 = vmatprep.mubr.bf16.mxu0 %v2725_v27  ;;  %2543 = vmatprep.mubr.msk.bf16.mxu1 %vm937_vm0, %v2727_v28 }
  0xd6   : > { %1211 = vmatmul.mubr.bf16.gmra.mrb[72].mxu0 %v2728_v29  ;;  %2544 = vmatmul.mubr.msk.bf16.gmra.mrb[72].mxu1 %vm937_vm0, %v2729_v30 }
  0xd7   : > { %1218 = vmatprep.mubr.bf16.mxu0 %v2730_v31  ;;  %2547 = vmatprep.mubr.msk.bf16.mxu1 %vm937_vm0, %v2732_v32 }
  0xde   : > { %1219 = vmatmul.mubr.bf16.gmra.mrb[76].mxu0 %v2733_v33  ;;  %2548 = vmatmul.mubr.msk.bf16.gmra.mrb[76].mxu1 %vm937_vm0, %v2734_v34 }
  0xdf   : > { %1226 = vmatprep.mubr.bf16.mxu0 %v2735_v35  ;;  %2551 = vmatprep.mubr.msk.bf16.mxu1 %vm937_vm0, %v2737_v36 }
  0xe6   : > { %1227 = vmatmul.mubr.bf16.gmra.mrb[80].mxu0 %v2738_v37  ;;  %2552 = vmatmul.mubr.msk.bf16.gmra.mrb[80].mxu1 %vm937_vm0, %v2739_v38 }
  0xe7   : > { %1234 = vmatprep.mubr.bf16.mxu0 %v2740_v39  ;;  %2555 = vmatprep.mubr.msk.bf16.mxu1 %vm937_vm0, %v2742_v40 }
  0xee   : > { %1235 = vmatmul.mubr.bf16.gmra.mrb[84].mxu0 %v2743_v41  ;;  %2556 = vmatmul.mubr.msk.bf16.gmra.mrb[84].mxu1 %vm937_vm0, %v2744_v42 }
  0xef   : > { %1242 = vmatprep.mubr.bf16.mxu0 %v2745_v43  ;;  %2559 = vmatprep.mubr.msk.bf16.mxu1 %vm937_vm0, %v2747_v44 }
  0xf6   : > { %1243 = vmatmul.mubr.bf16.gmra.mrb[88].mxu0 %v2748_v45  ;;  %2560 = vmatmul.mubr.msk.bf16.gmra.mrb[88].mxu1 %vm937_vm0, %v2749_v46 }
  0xf7   : > { %1250 = vmatprep.mubr.bf16.mxu0 %v2750_v47  ;;  %2563 = vmatprep.mubr.msk.bf16.mxu1 %vm937_vm0, %v2752_v48 }
  0xfe   : > { %1251 = vmatmul.mubr.bf16.gmra.mrb[92].mxu0 %v2753_v49  ;;  %2564 = vmatmul.mubr.msk.bf16.gmra.mrb[92].mxu1 %vm937_vm0, %v2754_v50 }
 0x119   : > { %v3014_v51 = vpop.f32.mrb[0].mxu0  ;;  %v3016_v52 = vpop.f32.mrb[0].mxu1 }
 0x11a   : > { %v1070_v53 = vpop.f32.mrb[1].mxu0  ;;  %v1262_v54 = vpop.f32.mrb[1].mxu1 }
 0x11b   : > { %v3018_v55 = vpop.f32.mrb[2].mxu0  ;;  %v3020_v56 = vpop.f32.mrb[2].mxu1  ;;  %v3075_v53 = vld [vmem:[%s3237_s2] ss:$0 sm:$0xff] }
 0x11c   : > { %v1073_v57 = vpop.f32.mrb[3].mxu0  ;;  %v1265_v58 = vpop.f32.mrb[3].mxu1 }
 0x11d   : > { %v1069_v57 = vadd.f32 %v3075_v53, %v3014_v51 }
 0x121   : > { %v1076_v59 = vpop.f32.mrb[4].mxu0  ;;  %v3022_v60 = vpop.f32.mrb[4].mxu1 }
 0x122   : > { %v1078_v61 = vpop.f32.mrb[5].mxu0  ;;  %v1270_v62 = vpop.f32.mrb[5].mxu1  ;;  %v1077_v54 = vadd.f32 %v3075_v53, %v1076_v59 }
 0x123   : > { %v1079_v63 = vpop.f32.mrb[6].mxu0  ;;  %v3024_v0 = vpop.f32.mrb[6].mxu1 }
 0x124   : > { %v1081_v1 = vpop.f32.mrb[7].mxu0  ;;  %v1273_v2 = vpop.f32.mrb[7].mxu1  ;;  %v1080_v62 = vadd.f32 %v3075_v53, %v1079_v63 }
 0x129   : > { %v3026_v3 = vpop.f32.mrb[8].mxu0  ;;  %v3028_v4 = vpop.f32.mrb[8].mxu1 }
 0x12a   : > { %v1086_v5 = vpop.f32.mrb[9].mxu0  ;;  %v1278_v6 = vpop.f32.mrb[9].mxu1 }
 0x12b   : > { %v3030_v7 = vpop.f32.mrb[10].mxu0  ;;  %v3032_v8 = vpop.f32.mrb[10].mxu1  ;;  %v1072_v6 = vadd.f32 %v3075_v53, %v3018_v55  ;;  %v1085_v55 = vadd.f32 %v3075_v53, %v3026_v3 }
 0x12c   : > { %v1089_v9 = vpop.f32.mrb[11].mxu0  ;;  %v1281_v10 = vpop.f32.mrb[11].mxu1 }
 0x131   : > { %v1092_v11 = vpop.f32.mrb[12].mxu0  ;;  %v3034_v12 = vpop.f32.mrb[12].mxu1 }
 0x132   : > { %v1094_v13 = vpop.f32.mrb[13].mxu0  ;;  %v1286_v14 = vpop.f32.mrb[13].mxu1 }
 0x133   : > { %v3036_v15 = vpop.f32.mrb[14].mxu0  ;;  %v3038_v16 = vpop.f32.mrb[14].mxu1 }
 0x134   : > { %v1097_v17 = vpop.f32.mrb[15].mxu0  ;;  %v1289_v18 = vpop.f32.mrb[15].mxu1 }
 0x139   : > { %v3040_v19 = vpop.f32.mrb[16].mxu0  ;;  %v3042_v20 = vpop.f32.mrb[16].mxu1 }
 0x13a   : > { %v1102_v21 = vpop.f32.mrb[17].mxu0  ;;  %v1294_v22 = vpop.f32.mrb[17].mxu1 }
 0x13b   : > { %v3044_v23 = vpop.f32.mrb[18].mxu0  ;;  %v3046_v24 = vpop.f32.mrb[18].mxu1  ;;  %v1093_v21 = vadd.f32 %v3075_v53, %v1092_v11 }
 0x13c   : > { %v1105_v25 = vpop.f32.mrb[19].mxu0  ;;  %v1297_v26 = vpop.f32.mrb[19].mxu1 }
 0x13d   : > { %v1096_v26 = vadd.f32 %v3075_v53, %v3036_v15  ;;  %v1101_v15 = vadd.f32 %v3075_v53, %v3040_v19 }
 0x141   : > { %v3048_v27 = vpop.f32.mrb[20].mxu0  ;;  %v3050_v28 = vpop.f32.mrb[20].mxu1 }
 0x142   : > { %v1110_v29 = vpop.f32.mrb[21].mxu0  ;;  %v1302_v30 = vpop.f32.mrb[21].mxu1 }
 0x143   : > { %v3052_v31 = vpop.f32.mrb[22].mxu0  ;;  %v3054_v32 = vpop.f32.mrb[22].mxu1 }
 0x144   : > { %v1113_v33 = vpop.f32.mrb[23].mxu0  ;;  %v1305_v34 = vpop.f32.mrb[23].mxu1 }
 0x145   : > { %v1088_v34 = vadd.f32 %v3075_v53, %v3030_v7  ;;  %v1112_v7 = vadd.f32 %v3075_v53, %v3052_v31 }
 0x149   : > { %v3056_v35 = vpop.f32.mrb[24].mxu0  ;;  %v3058_v36 = vpop.f32.mrb[24].mxu1 }
 0x14a   : > { %v1118_v37 = vpop.f32.mrb[25].mxu0  ;;  %v1310_v38 = vpop.f32.mrb[25].mxu1  ;;  %v1117_v31 = vadd.f32 %v3075_v53, %v3056_v35 }
 0x14b   : > { %v3060_v39 = vpop.f32.mrb[26].mxu0  ;;  %v3062_v40 = vpop.f32.mrb[26].mxu1 }
 0x14c   : > { %v1121_v41 = vpop.f32.mrb[27].mxu0  ;;  %v1313_v42 = vpop.f32.mrb[27].mxu1 }
 0x151   : > { %v3064_v43 = vpop.f32.mrb[28].mxu0  ;;  %v3066_v44 = vpop.f32.mrb[28].mxu1 }
 0x152   : > { %v1126_v45 = vpop.f32.mrb[29].mxu0  ;;  %v1318_v46 = vpop.f32.mrb[29].mxu1 }
 0x153   : > { %v3068_v47 = vpop.f32.mrb[30].mxu0  ;;  %v3070_v48 = vpop.f32.mrb[30].mxu1 }
 0x154   : > { %v1129_v49 = vpop.f32.mrb[31].mxu0  ;;  %v1321_v50 = vpop.f32.mrb[31].mxu1 }
 0x155   : > { %v1109_v50 = vadd.f32 %v3075_v53, %v3048_v27 }
 0x159   : > { %v3080_v58 = vpop.f32.mrb[32].mxu0  ;;  %v2505_v61 = vpop.f32.mrb[32].mxu1 }
 0x15a   : > { %v1366_v1 = vadd.f32 %v2505_v61, %v1077_v54  ;;  %v1134_v2 = vpop.f32.mrb[33].mxu0  ;;  %v1357_v5 = vpop.f32.mrb[33].mxu1 }
 0x15b   : > { %v1358_v9 = vadd.f32 %v1357_v5, %v1069_v57  ;;  %v3086_v10 = vpop.f32.mrb[34].mxu0  ;;  %v2506_v13 = vpop.f32.mrb[34].mxu1  ;;  %v1104_v2 = vadd.f32 %v3075_v53, %v3044_v23  ;;  %v1128_v23 = vadd.f32 %v3075_v53, %v3068_v47  ;;  %v1133_v47 = vadd.f32 %v3075_v53, %v3080_v58 }
 0x15c   : > { %v1369_v59 = vadd.f32 %v2506_v13, %v1080_v62  ;;  %v1137_v14 = vpop.f32.mrb[35].mxu0  ;;  %v1360_v17 = vpop.f32.mrb[35].mxu1 }
 0x15d   : > { %v1361_v51 = vadd.f32 %v1360_v17, %v1072_v6 }
 0x15e   : > { %v2282_v63 = vpack.c.bf16 %v1369_v59, %v1366_v1 }
 0x15f   : > { %v2277_v18 = vpack.c.bf16 %v1361_v51, %v1358_v9  ;;  %v1125_v51 = vadd.f32 %v3075_v53, %v3064_v43 }
 0x160   : > { %2434 = vst [vmem:[%s3091_s8 + $0x8] sm:$0xff] %v2282_v63  }
 0x161   : > { %2278 = vst [vmem:[%s3091_s8] sm:$0xff] %v2277_v18   ;;  %v1140_v22 = vpop.f32.mrb[36].mxu0  ;;  %v2509_v25 = vpop.f32.mrb[36].mxu1 }
 0x162   : > { %v1382_v29 = vadd.f32 %v2509_v25, %v1093_v21  ;;  %v1142_v30 = vpop.f32.mrb[37].mxu0  ;;  %v1373_v33 = vpop.f32.mrb[37].mxu1 }
 0x163   : > { %v1374_v37 = vadd.f32 %v1373_v33, %v1085_v55  ;;  %v1143_v11 = vpop.f32.mrb[38].mxu0  ;;  %v2510_v38 = vpop.f32.mrb[38].mxu1 }
 0x164   : > { %v1385_v41 = vadd.f32 %v2510_v38, %v1096_v26  ;;  %v1145_v42 = vpop.f32.mrb[39].mxu0  ;;  %v1376_v3 = vpop.f32.mrb[39].mxu1  ;;  %v1120_v26 = vadd.f32 %v3075_v53, %v3060_v39  ;;  %v1144_v39 = vadd.f32 %v3075_v53, %v1143_v11 }
 0x165   : > { %v1377_v45 = vadd.f32 %v1376_v3, %v1088_v34  ;;  %v1141_v42 = vadd.f32 %v3075_v53, %v1140_v22 }
 0x166   : > { %v2292_v46 = vpack.c.bf16 %v1385_v41, %v1382_v29 }
 0x167   : > { %v2287_v49 = vpack.c.bf16 %v1377_v45, %v1374_v37 }
 0x168   : > { %2436 = vst [vmem:[%s3091_s8 + $0x18] sm:$0xff] %v2292_v46  }
 0x169   : > { %2435 = vst [vmem:[%s3091_s8 + $0x10] sm:$0xff] %v2287_v49   ;;  %v1148_v54 = vpop.f32.mrb[40].mxu0  ;;  %v2513_v57 = vpop.f32.mrb[40].mxu1 }
 0x16a   : > { %v1398_v61 = vadd.f32 %v2513_v57, %v1109_v50  ;;  %v1150_v62 = vpop.f32.mrb[41].mxu0  ;;  %v1389_v1 = vpop.f32.mrb[41].mxu1  ;;  %v1149_v11 = vadd.f32 %v3075_v53, %v1148_v54 }
 0x16b   : > { %v1390_v5 = vadd.f32 %v1389_v1, %v1101_v15  ;;  %v1151_v27 = vpop.f32.mrb[42].mxu0  ;;  %v2514_v6 = vpop.f32.mrb[42].mxu1  ;;  %v1136_v15 = vadd.f32 %v3075_v53, %v3086_v10 }
 0x16c   : > { %v1401_v9 = vadd.f32 %v2514_v6, %v1112_v7  ;;  %v1153_v13 = vpop.f32.mrb[43].mxu0  ;;  %v1392_v19 = vpop.f32.mrb[43].mxu1 }
 0x16d   : > { %v1393_v59 = vadd.f32 %v1392_v19, %v1104_v2 }
 0x16e   : > { %v2302_v14 = vpack.c.bf16 %v1401_v9, %v1398_v61 }
 0x16f   : > { %v2297_v17 = vpack.c.bf16 %v1393_v59, %v1390_v5 }
 0x170   : > { %2438 = vst [vmem:[%s3091_s8 + $0x28] sm:$0xff] %v2302_v14  }
 0x171   : > { %2437 = vst [vmem:[%s3091_s8 + $0x20] sm:$0xff] %v2297_v17   ;;  %v1156_v63 = vpop.f32.mrb[44].mxu0  ;;  %v2517_v18 = vpop.f32.mrb[44].mxu1  ;;  %v1152_v17 = vadd.f32 %v3075_v53, %v1151_v27 }
 0x172   : > { %v1414_v21 = vadd.f32 %v2517_v18, %v1125_v51  ;;  %v1158_v55 = vpop.f32.mrb[45].mxu0  ;;  %v1405_v25 = vpop.f32.mrb[45].mxu1  ;;  %v1157_v6 = vadd.f32 %v3075_v53, %v1156_v63 }
 0x173   : > { %v1406_v29 = vadd.f32 %v1405_v25, %v1117_v31  ;;  %v1159_v43 = vpop.f32.mrb[46].mxu0  ;;  %v2518_v30 = vpop.f32.mrb[46].mxu1 }
 0x174   : > { %v1417_v33 = vadd.f32 %v2518_v30, %v1128_v23  ;;  %v1161_v34 = vpop.f32.mrb[47].mxu0  ;;  %v1408_v35 = vpop.f32.mrb[47].mxu1  ;;  %v1160_v10 = vadd.f32 %v3075_v53, %v1159_v43 }
 0x175   : > { %v1409_v37 = vadd.f32 %v1408_v35, %v1120_v26 }
 0x176   : > { %v2312_v38 = vpack.c.bf16 %v1417_v33, %v1414_v21 }
 0x177   : > { %v2307_v41 = vpack.c.bf16 %v1409_v37, %v1406_v29 }
 0x178   : > { %2440 = vst [vmem:[%s3091_s8 + $0x38] sm:$0xff] %v2312_v38  }
 0x179   : > { %2439 = vst [vmem:[%s3091_s8 + $0x30] sm:$0xff] %v2307_v41   ;;  %v1164_v3 = vpop.f32.mrb[48].mxu0  ;;  %v2521_v45 = vpop.f32.mrb[48].mxu1 }
 0x17a   : > { %v1430_v46 = vadd.f32 %v2521_v45, %v1141_v42  ;;  %v1166_v49 = vpop.f32.mrb[49].mxu0  ;;  %v1421_v50 = vpop.f32.mrb[49].mxu1  ;;  %v1165_v29 = vadd.f32 %v3075_v53, %v1164_v3 }
 0x17b   : > { %v1422_v57 = vadd.f32 %v1421_v50, %v1133_v47  ;;  %v1167_v7 = vpop.f32.mrb[50].mxu0  ;;  %v2522_v22 = vpop.f32.mrb[50].mxu1 }
 0x17c   : > { %v1433_v61 = vadd.f32 %v2522_v22, %v1144_v39  ;;  %v1169_v62 = vpop.f32.mrb[51].mxu0  ;;  %v1424_v1 = vpop.f32.mrb[51].mxu1  ;;  %v1168_v37 = vadd.f32 %v3075_v53, %v1167_v7 }
 0x17d   : > { %v1425_v58 = vadd.f32 %v1424_v1, %v1136_v15 }
 0x17e   : > { %v2322_v2 = vpack.c.bf16 %v1433_v61, %v1430_v46 }
 0x17f   : > { %v2317_v5 = vpack.c.bf16 %v1425_v58, %v1422_v57 }
 0x180   : > { %2442 = vst [vmem:[%s3091_s8 + $0x48] sm:$0xff] %v2322_v2  }
 0x181   : > { %2441 = vst [vmem:[%s3091_s8 + $0x40] sm:$0xff] %v2317_v5   ;;  %v1172_v9 = vpop.f32.mrb[52].mxu0  ;;  %v2525_v13 = vpop.f32.mrb[52].mxu1 }
 0x182   : > { %v1446_v19 = vadd.f32 %v2525_v13, %v1157_v6  ;;  %v1174_v59 = vpop.f32.mrb[53].mxu0  ;;  %v1437_v14 = vpop.f32.mrb[53].mxu1  ;;  %v1173_v26 = vadd.f32 %v3075_v53, %v1172_v9 }
 0x183   : > { %v1438_v51 = vadd.f32 %v1437_v14, %v1149_v11  ;;  %v1175_v31 = vpop.f32.mrb[54].mxu0  ;;  %v2526_v18 = vpop.f32.mrb[54].mxu1 }
 0x184   : > { %v1449_v23 = vadd.f32 %v2526_v18, %v1160_v10  ;;  %v1177_v63 = vpop.f32.mrb[55].mxu0  ;;  %v1440_v21 = vpop.f32.mrb[55].mxu1  ;;  %v1176_v27 = vadd.f32 %v3075_v53, %v1175_v31 }
 0x185   : > { %v1441_v55 = vadd.f32 %v1440_v21, %v1152_v17 }
 0x186   : > { %v2332_v54 = vpack.c.bf16 %v1449_v23, %v1446_v19 }
 0x187   : > { %v2327_v25 = vpack.c.bf16 %v1441_v55, %v1438_v51 }
 0x188   : > { %2444 = vst [vmem:[%s3091_s8 + $0x58] sm:$0xff] %v2332_v54  }
 0x189   : > { %2443 = vst [vmem:[%s3091_s8 + $0x50] sm:$0xff] %v2327_v25   ;;  %v1180_v43 = vpop.f32.mrb[56].mxu0  ;;  %v2529_v30 = vpop.f32.mrb[56].mxu1 }
 0x18a   : > { %v1462_v33 = vadd.f32 %v2529_v30, %v1173_v26  ;;  %v1182_v34 = vpop.f32.mrb[57].mxu0  ;;  %v1453_v35 = vpop.f32.mrb[57].mxu1  ;;  %v1181_v50 = vadd.f32 %v3075_v53, %v1180_v43 }
 0x18b   : > { %v1454_v38 = vadd.f32 %v1453_v35, %v1165_v29  ;;  %v1183_v41 = vpop.f32.mrb[58].mxu0  ;;  %v2530_v42 = vpop.f32.mrb[58].mxu1 }
 0x18c   : > { %v1465_v47 = vadd.f32 %v2530_v42, %v1176_v27  ;;  %v1185_v45 = vpop.f32.mrb[59].mxu0  ;;  %v1456_v39 = vpop.f32.mrb[59].mxu1  ;;  %v1184_v62 = vadd.f32 %v3075_v53, %v1183_v41 }
 0x18d   : > { %v1457_v46 = vadd.f32 %v1456_v39, %v1168_v37 }
 0x18e   : > { %v2342_v3 = vpack.c.bf16 %v1465_v47, %v1462_v33 }
 0x18f   : > { %v2337_v49 = vpack.c.bf16 %v1457_v46, %v1454_v38 }
 0x190   : > { %2446 = vst [vmem:[%s3091_s8 + $0x68] sm:$0xff] %v2342_v3  }
 0x191   : > { %2445 = vst [vmem:[%s3091_s8 + $0x60] sm:$0xff] %v2337_v49   ;;  %v1188_v15 = vpop.f32.mrb[60].mxu0  ;;  %v2533_v57 = vpop.f32.mrb[60].mxu1 }
 0x192   : > { %v1189_v22 = vadd.f32 %v3075_v53, %v1188_v15  ;;  %v1190_v61 = vpop.f32.mrb[61].mxu0  ;;  %v1469_v7 = vpop.f32.mrb[61].mxu1 }
 0x193   : > { %v1470_v1 = vadd.f32 %v1469_v7, %v1181_v50  ;;  %v1191_v58 = vpop.f32.mrb[62].mxu0  ;;  %v2534_v2 = vpop.f32.mrb[62].mxu1 }
 0x194   : > { %v1478_v5 = vadd.f32 %v2533_v57, %v1189_v22  ;;  %v1192_v6 = vadd.f32 %v3075_v53, %v1191_v58  ;;  %v1193_v11 = vpop.f32.mrb[63].mxu0  ;;  %v1472_v9 = vpop.f32.mrb[63].mxu1 }
 0x195   : > { %v1473_v13 = vadd.f32 %v1472_v9, %v1184_v62 }
 0x196   : > { %v1481_v10 = vadd.f32 %v2534_v2, %v1192_v6 }
 0x197   : > { %v2347_v19 = vpack.c.bf16 %v1473_v13, %v1470_v1 }
 0x198   : > { %v2352_v59 = vpack.c.bf16 %v1481_v10, %v1478_v5 }
 0x199   : > { %2447 = vst [vmem:[%s3091_s8 + $0x70] sm:$0xff] %v2347_v19   ;;  %v1196_v14 = vpop.f32.mrb[64].mxu0  ;;  %v2537_v17 = vpop.f32.mrb[64].mxu1 }
 0x19a   : > { %2448 = vst [vmem:[%s3091_s8 + $0x78] sm:$0xff] %v2352_v59   ;;  %v1197_v51 = vadd.f32 %v3075_v53, %v1196_v14  ;;  %v1198_v31 = vpop.f32.mrb[65].mxu0  ;;  %v1485_v18 = vpop.f32.mrb[65].mxu1 }
 0x19b   : > { %v1199_v23 = vpop.f32.mrb[66].mxu0  ;;  %v2538_v63 = vpop.f32.mrb[66].mxu1 }
 0x19c   : > { %v1486_v21 = vadd.f32 %v1485_v18, %v1197_v51  ;;  %v1200_v55 = vadd.f32 %v3075_v53, %v1199_v23  ;;  %v1201_v54 = vpop.f32.mrb[67].mxu0  ;;  %v1488_v25 = vpop.f32.mrb[67].mxu1  ;;  %v1269_v18 = vadd.f32 %v3075_v53, %v3022_v60 }
 0x19d   : > { %v1272_v54 = vadd.f32 %v3075_v53, %v3024_v0 }
 0x19e   : > { %v1489_v26 = vadd.f32 %v1488_v25, %v1200_v55 }
 0x1a0   : > { %v2357_v29 = vpack.c.bf16 %v1489_v26, %v1486_v21 }
 0x1a1   : > { %v1204_v43 = vpop.f32.mrb[68].mxu0  ;;  %v2541_v30 = vpop.f32.mrb[68].mxu1 }
 0x1a2   : > { %2449 = vst [vmem:[%s3091_s8 + $0x80] sm:$0xff] %v2357_v29   ;;  %v1205_v27 = vadd.f32 %v3075_v53, %v1204_v43  ;;  %v1206_v33 = vpop.f32.mrb[69].mxu0  ;;  %v1501_v34 = vpop.f32.mrb[69].mxu1 }
 0x1a3   : > { %v1207_v35 = vpop.f32.mrb[70].mxu0  ;;  %v2542_v37 = vpop.f32.mrb[70].mxu1 }
 0x1a4   : > { %v1494_v38 = vadd.f32 %v2537_v17, %v1205_v27  ;;  %v1208_v41 = vadd.f32 %v3075_v53, %v1207_v35  ;;  %v1209_v42 = vpop.f32.mrb[71].mxu0  ;;  %v1504_v47 = vpop.f32.mrb[71].mxu1 }
 0x1a6   : > { %v1497_v45 = vadd.f32 %v2538_v63, %v1208_v41  ;;  %v1261_v63 = vadd.f32 %v3075_v53, %v3016_v52 }
 0x1a8   : > { %v2362_v39 = vpack.c.bf16 %v1497_v45, %v1494_v38  ;;  %v1285_v45 = vadd.f32 %v3075_v53, %v3034_v12  ;;  %v1280_v12 = vadd.f32 %v3075_v53, %v3032_v8  ;;  %v1301_v8 = vadd.f32 %v3075_v53, %v3050_v28 }
 0x1a9   : > { %v1212_v46 = vpop.f32.mrb[72].mxu0  ;;  %v3155_v3 = vpop.f32.mrb[72].mxu1  ;;  %v1296_v28 = vadd.f32 %v3075_v53, %v3046_v24  ;;  %v1317_v24 = vadd.f32 %v3075_v53, %v3066_v44  ;;  %v1312_v44 = vadd.f32 %v3075_v53, %v3062_v40 }
 0x1aa   : > { %2450 = vst [vmem:[%s3091_s8 + $0x88] sm:$0xff] %v2362_v39   ;;  %v1213_v49 = vadd.f32 %v3075_v53, %v1212_v46  ;;  %v1214_v50 = vpop.f32.mrb[73].mxu0  ;;  %v1517_v15 = vpop.f32.mrb[73].mxu1 }
 0x1ab   : > { %v1215_v57 = vpop.f32.mrb[74].mxu0  ;;  %v3159_v22 = vpop.f32.mrb[74].mxu1  ;;  %v1288_v50 = vadd.f32 %v3075_v53, %v3038_v16 }
 0x1ac   : > { %v1502_v61 = vadd.f32 %v1501_v34, %v1213_v49  ;;  %v1216_v7 = vadd.f32 %v3075_v53, %v1215_v57  ;;  %v1217_v62 = vpop.f32.mrb[75].mxu0  ;;  %v1520_v1 = vpop.f32.mrb[75].mxu1 }
 0x1ae   : > { %v1505_v58 = vadd.f32 %v1504_v47, %v1216_v7 }
 0x1b0   : > { %v2367_v2 = vpack.c.bf16 %v1505_v58, %v1502_v61 }
 0x1b1   : > { %v1220_v5 = vpop.f32.mrb[76].mxu0  ;;  %v3162_v6 = vpop.f32.mrb[76].mxu1 }
 0x1b2   : > { %2451 = vst [vmem:[%s3091_s8 + $0x90] sm:$0xff] %v2367_v2   ;;  %v1221_v11 = vadd.f32 %v3075_v53, %v1220_v5  ;;  %v1222_v9 = vpop.f32.mrb[77].mxu0  ;;  %v3166_v13 = vpop.f32.mrb[77].mxu1 }
 0x1b3   : > { %v1223_v10 = vpop.f32.mrb[78].mxu0  ;;  %v3168_v19 = vpop.f32.mrb[78].mxu1 }
 0x1b4   : > { %v1510_v59 = vadd.f32 %v2541_v30, %v1221_v11  ;;  %v1224_v14 = vadd.f32 %v3075_v53, %v1223_v10  ;;  %v1225_v17 = vpop.f32.mrb[79].mxu0  ;;  %v3171_v51 = vpop.f32.mrb[79].mxu1  ;;  %v1264_v30 = vadd.f32 %v3075_v53, %v3020_v56  ;;  %v1277_v56 = vadd.f32 %v3075_v53, %v3028_v4 }
 0x1b6   : > { %v1513_v31 = vadd.f32 %v2542_v37, %v1224_v14 }
 0x1b8   : > { %v2372_v23 = vpack.c.bf16 %v1513_v31, %v1510_v59  ;;  %v1293_v31 = vadd.f32 %v3075_v53, %v3042_v20 }
 0x1b9   : > { %v1228_v21 = vpop.f32.mrb[80].mxu0  ;;  %v2553_v55 = vpop.f32.mrb[80].mxu1 }
 0x1ba   : > { %2452 = vst [vmem:[%s3091_s8 + $0x98] sm:$0xff] %v2372_v23   ;;  %v1229_v25 = vadd.f32 %v3075_v53, %v1228_v21  ;;  %v1558_v26 = vadd.f32 %v2553_v55, %v1269_v18  ;;  %v1230_v29 = vpop.f32.mrb[81].mxu0  ;;  %v1549_v43 = vpop.f32.mrb[81].mxu1  ;;  %v1304_v23 = vadd.f32 %v3075_v53, %v3054_v32 }
 0x1bb   : > { %v1550_v60 = vadd.f32 %v1549_v43, %v1261_v63  ;;  %v1231_v27 = vpop.f32.mrb[82].mxu0  ;;  %v2554_v33 = vpop.f32.mrb[82].mxu1 }
 0x1bc   : > { %v1518_v52 = vadd.f32 %v1517_v15, %v1229_v25  ;;  %v1232_v34 = vadd.f32 %v3075_v53, %v1231_v27  ;;  %v1561_v35 = vadd.f32 %v2554_v33, %v1272_v54  ;;  %v1233_v0 = vpop.f32.mrb[83].mxu0  ;;  %v1552_v37 = vpop.f32.mrb[83].mxu1 }
 0x1bd   : > { %v1553_v38 = vadd.f32 %v1552_v37, %v1264_v30  ;;  %v1320_v37 = vadd.f32 %v3075_v53, %v3070_v48 }
 0x1be   : > { %v1521_v41 = vadd.f32 %v1520_v1, %v1232_v34  ;;  %v2402_v42 = vpack.c.bf16 %v1561_v35, %v1558_v26  ;;  %v1309_v35 = vadd.f32 %v3075_v53, %v3058_v36 }
 0x1bf   : > { %v2397_v47 = vpack.c.bf16 %v1553_v38, %v1550_v60 }
 0x1c0   : > { %v2377_v39 = vpack.c.bf16 %v1521_v41, %v1518_v52  ;;  %2458 = vst [vmem:[%s3091_s8 + $0xc8] sm:$0xff] %v2402_v42  }
 0x1c1   : > { %2457 = vst [vmem:[%s3091_s8 + $0xc0] sm:$0xff] %v2397_v47   ;;  %v1236_v46 = vpop.f32.mrb[84].mxu0  ;;  %v2557_v49 = vpop.f32.mrb[84].mxu1 }
 0x1c2   : > { %2453 = vst [vmem:[%s3091_s8 + $0xa0] sm:$0xff] %v2377_v39   ;;  %v1237_v15 = vadd.f32 %v3075_v53, %v1236_v46  ;;  %v1574_v57 = vadd.f32 %v2557_v49, %v1285_v45  ;;  %v1238_v61 = vpop.f32.mrb[85].mxu0  ;;  %v1565_v7 = vpop.f32.mrb[85].mxu1 }
 0x1c3   : > { %v1566_v62 = vadd.f32 %v1565_v7, %v1277_v56  ;;  %v1239_v1 = vpop.f32.mrb[86].mxu0  ;;  %v2558_v4 = vpop.f32.mrb[86].mxu1 }
 0x1c4   : > { %v1526_v58 = vadd.f32 %v3155_v3, %v1237_v15  ;;  %v1240_v2 = vadd.f32 %v3075_v53, %v1239_v1  ;;  %v1577_v16 = vadd.f32 %v2558_v4, %v1288_v50  ;;  %v1241_v5 = vpop.f32.mrb[87].mxu0  ;;  %v1568_v11 = vpop.f32.mrb[87].mxu1 }
 0x1c5   : > { %v1569_v9 = vadd.f32 %v1568_v11, %v1280_v12 }
 0x1c6   : > { %v1529_v10 = vadd.f32 %v3159_v22, %v1240_v2  ;;  %v2412_v59 = vpack.c.bf16 %v1577_v16, %v1574_v57 }
 0x1c7   : > { %v2407_v14 = vpack.c.bf16 %v1569_v9, %v1566_v62 }
 0x1c8   : > { %v2382_v17 = vpack.c.bf16 %v1529_v10, %v1526_v58  ;;  %2460 = vst [vmem:[%s3091_s8 + $0xd8] sm:$0xff] %v2412_v59  }
 0x1c9   : > { %2459 = vst [vmem:[%s3091_s8 + $0xd0] sm:$0xff] %v2407_v14   ;;  %v1244_v3 = vpop.f32.mrb[88].mxu0  ;;  %v2561_v18 = vpop.f32.mrb[88].mxu1 }
 0x1ca   : > { %2454 = vst [vmem:[%s3091_s8 + $0xa8] sm:$0xff] %v2382_v17   ;;  %v1245_v63 = vadd.f32 %v3075_v53, %v1244_v3  ;;  %v1590_v22 = vadd.f32 %v2561_v18, %v1301_v8  ;;  %v1246_v21 = vpop.f32.mrb[89].mxu0  ;;  %v1581_v55 = vpop.f32.mrb[89].mxu1 }
 0x1cb   : > { %v1582_v54 = vadd.f32 %v1581_v55, %v1293_v31  ;;  %v1247_v25 = vpop.f32.mrb[90].mxu0  ;;  %v2562_v20 = vpop.f32.mrb[90].mxu1 }
 0x1cc   : > { %v1534_v26 = vadd.f32 %v3166_v13, %v1245_v63  ;;  %v1248_v29 = vadd.f32 %v3075_v53, %v1247_v25  ;;  %v1593_v32 = vadd.f32 %v2562_v20, %v1304_v23  ;;  %v1249_v43 = vpop.f32.mrb[91].mxu0  ;;  %v1584_v30 = vpop.f32.mrb[91].mxu1 }
 0x1cd   : > { %v1585_v60 = vadd.f32 %v1584_v30, %v1296_v28 }
 0x1ce   : > { %v1537_v27 = vadd.f32 %v3171_v51, %v1248_v29  ;;  %v2422_v33 = vpack.c.bf16 %v1593_v32, %v1590_v22 }
 0x1cf   : > { %v2417_v52 = vpack.c.bf16 %v1585_v60, %v1582_v54 }
 0x1d0   : > { %v2387_v34 = vpack.c.bf16 %v1537_v27, %v1534_v26  ;;  %2462 = vst [vmem:[%s3091_s8 + $0xe8] sm:$0xff] %v2422_v33  }
 0x1d1   : > { %2461 = vst [vmem:[%s3091_s8 + $0xe0] sm:$0xff] %v2417_v52   ;;  %v1252_v13 = vpop.f32.mrb[92].mxu0  ;;  %v2565_v0 = vpop.f32.mrb[92].mxu1 }
 0x1d2   : > { %2455 = vst [vmem:[%s3091_s8 + $0xb0] sm:$0xff] %v2387_v34   ;;  %v1253_v38 = vadd.f32 %v3075_v53, %v1252_v13  ;;  %v1606_v51 = vadd.f32 %v2565_v0, %v1317_v24  ;;  %v1254_v41 = vpop.f32.mrb[93].mxu0  ;;  %v1597_v42 = vpop.f32.mrb[93].mxu1 }
 0x1d3   : > { %v1598_v47 = vadd.f32 %v1597_v42, %v1309_v35  ;;  %v1255_v36 = vpop.f32.mrb[94].mxu0  ;;  %v2566_v45 = vpop.f32.mrb[94].mxu1 }
 0x1d4   : > { %v1542_v39 = vadd.f32 %v3162_v6, %v1253_v38  ;;  %v1256_v56 = vadd.f32 %v3075_v53, %v1255_v36  ;;  %v1609_v48 = vadd.f32 %v2566_v45, %v1320_v37  ;;  %v1257_v46 = vpop.f32.mrb[95].mxu0  ;;  %v1600_v49 = vpop.f32.mrb[95].mxu1 }
 0x1d5   : > { %v1601_v50 = vadd.f32 %v1600_v49, %v1312_v44 }
 0x1d6   : > { %v1545_v15 = vadd.f32 %v3168_v19, %v1256_v56  ;;  %v2432_v57 = vpack.c.bf16 %v1609_v48, %v1606_v51 }
 0x1d7   : > { %v2427_v61 = vpack.c.bf16 %v1601_v50, %v1598_v47 }
 0x1d8   : > { %v2392_v7 = vpack.c.bf16 %v1545_v15, %v1542_v39  ;;  %2464 = vst [vmem:[%s3091_s8 + $0xf8] sm:$0xff] %v2432_v57  }
 0x1d9   : > { %2463 = vst [vmem:[%s3091_s8 + $0xf0] sm:$0xff] %v2427_v61  }
 0x1da   : > { %2456 = vst [vmem:[%s3091_s8 + $0xb8] sm:$0xff] %v2392_v7  }
 0x1db PF: > { %s13_s12 = sadd.s32 1, %s2761_s12  }
 0x1dc   : > { %p10_p4 = scmp.ge.s32.totalorder %s13_s12, 4  }
 0x1de   :  { %12 = sbr.rel (!%p10_p4) target bundleno = 1 (0x1), region = 62 }

// kernel: fbn_forward.10
= control target key start
LH: loop header
LB: loop body
LE: loop exit
PB: predicated region body
PF: predicated region fallthrough
CT: control target
= control target key end

     0   :  { %s2045_s18 = smov 0   ;;  %s2379_s0 = inlined_call_operand.vmem [shape: bf16[1024,16], index: 0, kind: input, shape index: {}]   ;;  %s2380_s1 = inlined_call_operand.vmem [shape: f32[1,16], index: 1, kind: input, shape index: {}]   ;;  %s2381_s2 = inlined_call_operand.vmem [shape: f32[1,16], index: 2, kind: input, shape index: {}]   ;;  %s2382_s3 = inlined_call_operand.vmem [shape: bf16[16,128], index: 3, kind: input, shape index: {}]   ;;  %s2383_s4 = inlined_call_operand.vmem [shape: f32[1,128], index: 4, kind: input, shape index: {}]   ;;  %s2384_s5 = inlined_call_operand.vmem [shape: bf16[1024,128], index: 5, kind: output, shape index: {}]  }
   0x1 LB: > { %s1372_s19 = sadd.s32 4294967295, %s2013_s18   ;;  %p1376_p0 = scmp.ge.s32.totalorder %s2013_s18, 1  ;;  %s2013_s18 = sphi %s2045_s18, %s15_s18  }
   0x2   : > { %p188_p1 = scmp.lt.s32.totalorder %s2013_s18, 3 }
   0x4   : > { %p189_p2 = pnand %p1376_p0, %p188_p1 }
   0x5   : > { %v2006_v0 = vld [vmem:[%s2382_s3] sm:$0xff] (!%p189_p2)   ;;  %s1377_s22 = sshll.u32 (!%p189_p2), %s1372_s19, 6  ;;  %vm610_vm0 = vcmask (!%p189_p2), 130048  }
   0x6   : > { %192 = sbr.rel (%p189_p2) target bundleno = 314 (0x13a), region = 40  ;;  %p217_p3 = scmp.lt.s32.totalorder (!%p189_p2), %s1377_s22, 127  ;;  %1930 = vmatprep.subr.bf16.mxu0 (!%p189_p2), %v2006_v0  ;;  %1996 = vmatprep.subr.bf16.mxu1 (!%p189_p2), %v2006_v0  ;;  %v2069_v1 = vld [vmem:[%s2380_s1] ss:$0 sm:$0xff] (!%p189_p2) }
   0x7   : > { %1931 = vmatpush3.bf16.msra.mxu0 (!%p189_p2), %v2006_v0  ;;  %1997 = vmatpush3.bf16.msra.mxu1 (!%p189_p2), %v2006_v0  ;;  %v2078_v10 = vld [vmem:[%s2381_s2] ss:$0 sm:$0xff] (!%p189_p2) }
   0xd   : > { %s2386_s22 = smov (!%p217_p3, %s1377_s22), 127 }
   0xe   : > { %s1378_s23 = sshll.u32 %s2386_s22, 2 }
   0xf   : > { %s2064_s26 = scalar_lea.vmem %s2379_s0, %s1378_s23  ;;  %s2284_s10 = scalar_lea.vmem %s2384_s5, %s1378_s23 }
  0x10   : > { %v1548_v2 = vld [vmem:[%s2064_s26] sm:$0xff]   ;;  %v1835_v4 = vld [vmem:[%s2064_s26 + $0x8] sm:$0xff]   ;;  %v1836_v31 = vld [vmem:[%s2064_s26 + $0x10] sm:$0xff]  }
  0x11   : > { %v1850_v3 = vld [vmem:[%s2064_s26 + $0x80] sm:$0xff]   ;;  %v1549_v5 = vunpack.c.l.bf16 %v1548_v2  ;;  %v1550_v6 = vunpack.c.h.bf16 %v1548_v2  ;;  %v1851_v9 = vld [vmem:[%s2064_s26 + $0x88] sm:$0xff]   ;;  %v1553_v11 = vunpack.c.l.bf16 %v1835_v4  ;;  %v1554_v12 = vunpack.c.h.bf16 %v1835_v4  ;;  %v1852_v36 = vld [vmem:[%s2064_s26 + $0x90] sm:$0xff]  }
  0x12   : > { %v1613_v7 = vunpack.c.l.bf16 %v1850_v3  ;;  %v1614_v8 = vunpack.c.h.bf16 %v1850_v3  ;;  %v1617_v13 = vunpack.c.l.bf16 %v1851_v9  ;;  %v1618_v14 = vunpack.c.h.bf16 %v1851_v9  ;;  %v1837_v41 = vld [vmem:[%s2064_s26 + $0x18] sm:$0xff]   ;;  %v1838_v4 = vld [vmem:[%s2064_s26 + $0x20] sm:$0xff]  }
  0x13   : > { %v364_v15 = vmul.f32 %v1549_v5, %v2069_v1  ;;  %v365_v16 = vmul.f32 %v1550_v6, %v2069_v1  ;;  %v366_v19 = vmul.f32 %v1553_v11, %v2069_v1  ;;  %v367_v20 = vmul.f32 %v1554_v12, %v2069_v1  ;;  %v1853_v46 = vld [vmem:[%s2064_s26 + $0x98] sm:$0xff]  }
  0x14   : > { %v396_v17 = vmul.f32 %v1613_v7, %v2069_v1  ;;  %v397_v18 = vmul.f32 %v1614_v8, %v2069_v1  ;;  %v398_v21 = vmul.f32 %v1617_v13, %v2069_v1  ;;  %v399_v22 = vmul.f32 %v1618_v14, %v2069_v1  ;;  %v1854_v14 = vld [vmem:[%s2064_s26 + $0xa0] sm:$0xff]  }
  0x15   : > { %v435_v23 = vadd.f32 %v2078_v10, %v364_v15  ;;  %v436_v24 = vadd.f32 %v2078_v10, %v365_v16  ;;  %v437_v27 = vadd.f32 %v2078_v10, %v366_v19  ;;  %v438_v28 = vadd.f32 %v2078_v10, %v367_v20  ;;  %v1839_v19 = vld [vmem:[%s2064_s26 + $0x28] sm:$0xff]  }
  0x16   : > { %v467_v25 = vadd.f32 %v2078_v10, %v396_v17  ;;  %v468_v26 = vadd.f32 %v2078_v10, %v397_v18  ;;  %v469_v29 = vadd.f32 %v2078_v10, %v398_v21  ;;  %v470_v30 = vadd.f32 %v2078_v10, %v399_v22 }
  0x17   : > { %v499_v32 = vmax.f32 %v435_v23, 0.0  ;;  %v500_v33 = vmax.f32 %v436_v24, 0.0  ;;  %v501_v37 = vmax.f32 %v437_v27, 0.0  ;;  %v502_v38 = vmax.f32 %v438_v28, 0.0  ;;  %v1855_v24 = vld [vmem:[%s2064_s26 + $0xa8] sm:$0xff]  }
  0x18   : > { %v531_v34 = vmax.f32 %v467_v25, 0.0  ;;  %v532_v35 = vmax.f32 %v468_v26, 0.0  ;;  %v533_v39 = vmax.f32 %v469_v29, 0.0  ;;  %v534_v40 = vmax.f32 %v470_v30, 0.0 }
  0x19   : > { %v563_v42 = vpack.c.bf16 %v500_v33, %v499_v32  ;;  %v1557_v44 = vunpack.c.l.bf16 %v1836_v31  ;;  %v1558_v45 = vunpack.c.h.bf16 %v1836_v31  ;;  %v564_v47 = vpack.c.bf16 %v502_v38, %v501_v37 }
  0x1a   : > { %v579_v43 = vpack.c.bf16 %v532_v35, %v531_v34  ;;  %v580_v48 = vpack.c.bf16 %v534_v40, %v533_v39  ;;  %v1621_v49 = vunpack.c.l.bf16 %v1852_v36  ;;  %v1622_v50 = vunpack.c.h.bf16 %v1852_v36 }
  0x1b   : > { %1932 = vmatprep.mubr.msk.bf16.mxu0 %vm610_vm0, %v563_v42  ;;  %v368_v51 = vmul.f32 %v1557_v44, %v2069_v1  ;;  %v369_v52 = vmul.f32 %v1558_v45, %v2069_v1  ;;  %v1561_v53 = vunpack.c.l.bf16 %v1837_v41  ;;  %v1562_v54 = vunpack.c.h.bf16 %v1837_v41  ;;  %v1840_v41 = vld [vmem:[%s2064_s26 + $0x30] sm:$0xff]  }
  0x1c   : > { %1964 = vmatprep.mubr.msk.bf16.mxu1 %vm610_vm0, %v579_v43  ;;  %1933 = vmatmul.mubr.msk.bf16.vlgmr.msra.gmra.mrb[0].mxu0 %vm610_vm0, %v564_v47  ;;  %v400_v55 = vmul.f32 %v1621_v49, %v2069_v1  ;;  %v401_v56 = vmul.f32 %v1622_v50, %v2069_v1  ;;  %v1625_v57 = vunpack.c.l.bf16 %v1853_v46  ;;  %v1626_v58 = vunpack.c.h.bf16 %v1853_v46 }
  0x1d   : > { %1965 = vmatmul.mubr.msk.bf16.vlgmr.msra.gmra.mrb[0].mxu1 %vm610_vm0, %v580_v48  ;;  %v439_v59 = vadd.f32 %v2078_v10, %v368_v51  ;;  %v440_v60 = vadd.f32 %v2078_v10, %v369_v52  ;;  %v370_v61 = vmul.f32 %v1561_v53, %v2069_v1  ;;  %v371_v62 = vmul.f32 %v1562_v54, %v2069_v1  ;;  %v1856_v54 = vld [vmem:[%s2064_s26 + $0xb0] sm:$0xff]  }
  0x1e   : > { %v471_v63 = vadd.f32 %v2078_v10, %v400_v55  ;;  %v472_v0 = vadd.f32 %v2078_v10, %v401_v56  ;;  %v402_v2 = vmul.f32 %v1625_v57, %v2069_v1  ;;  %v403_v3 = vmul.f32 %v1626_v58, %v2069_v1 }
  0x1f   : > { %v503_v5 = vmax.f32 %v439_v59, 0.0  ;;  %v504_v6 = vmax.f32 %v440_v60, 0.0  ;;  %v441_v7 = vadd.f32 %v2078_v10, %v370_v61  ;;  %v442_v8 = vadd.f32 %v2078_v10, %v371_v62  ;;  %v1841_v59 = vld [vmem:[%s2064_s26 + $0x38] sm:$0xff]  }
  0x20   : > { %v535_v9 = vmax.f32 %v471_v63, 0.0  ;;  %v536_v11 = vmax.f32 %v472_v0, 0.0  ;;  %v473_v12 = vadd.f32 %v2078_v10, %v402_v2  ;;  %v474_v13 = vadd.f32 %v2078_v10, %v403_v3  ;;  %v1857_v0 = vld [vmem:[%s2064_s26 + $0xb8] sm:$0xff]  }
  0x21   : > { %v565_v15 = vpack.c.bf16 %v504_v6, %v503_v5  ;;  %v505_v16 = vmax.f32 %v441_v7, 0.0  ;;  %v506_v17 = vmax.f32 %v442_v8, 0.0  ;;  %v1565_v18 = vunpack.c.l.bf16 %v1838_v4 }
  0x22   : > { %v581_v20 = vpack.c.bf16 %v536_v11, %v535_v9  ;;  %v537_v21 = vmax.f32 %v473_v12, 0.0  ;;  %v538_v22 = vmax.f32 %v474_v13, 0.0  ;;  %v1566_v23 = vunpack.c.h.bf16 %v1838_v4 }
  0x23   : > { %1936 = vmatprep.mubr.msk.bf16.mxu0 %vm610_vm0, %v565_v15  ;;  %v566_v25 = vpack.c.bf16 %v506_v17, %v505_v16  ;;  %v372_v26 = vmul.f32 %v1565_v18, %v2069_v1  ;;  %v1629_v27 = vunpack.c.l.bf16 %v1854_v14  ;;  %v1630_v28 = vunpack.c.h.bf16 %v1854_v14  ;;  %v1842_v15 = vld [vmem:[%s2064_s26 + $0x40] sm:$0xff]  }
  0x24   : > { %1968 = vmatprep.mubr.msk.bf16.mxu1 %vm610_vm0, %v581_v20  ;;  %v582_v29 = vpack.c.bf16 %v538_v22, %v537_v21  ;;  %v373_v30 = vmul.f32 %v1566_v23, %v2069_v1  ;;  %v1569_v31 = vunpack.c.l.bf16 %v1839_v19  ;;  %v1570_v32 = vunpack.c.h.bf16 %v1839_v19 }
  0x25   : > { %1937 = vmatmul.mubr.msk.bf16.gmra.mrb[4].mxu0 %vm610_vm0, %v566_v25  ;;  %v443_v33 = vadd.f32 %v2078_v10, %v372_v26  ;;  %v404_v34 = vmul.f32 %v1629_v27, %v2069_v1  ;;  %v405_v35 = vmul.f32 %v1630_v28, %v2069_v1  ;;  %v1633_v36 = vunpack.c.l.bf16 %v1855_v24 }
  0x26   : > { %1969 = vmatmul.mubr.msk.bf16.gmra.mrb[4].mxu1 %vm610_vm0, %v582_v29  ;;  %v444_v37 = vadd.f32 %v2078_v10, %v373_v30  ;;  %v374_v38 = vmul.f32 %v1569_v31, %v2069_v1  ;;  %v375_v39 = vmul.f32 %v1570_v32, %v2069_v1  ;;  %v1634_v40 = vunpack.c.h.bf16 %v1855_v24  ;;  %v1858_v32 = vld [vmem:[%s2064_s26 + $0xc0] sm:$0xff]  }
  0x27   : > { %v507_v42 = vmax.f32 %v443_v33, 0.0  ;;  %v475_v43 = vadd.f32 %v2078_v10, %v404_v34  ;;  %v476_v44 = vadd.f32 %v2078_v10, %v405_v35  ;;  %v406_v45 = vmul.f32 %v1633_v36, %v2069_v1 }
  0x28   : > { %v508_v46 = vmax.f32 %v444_v37, 0.0  ;;  %v445_v47 = vadd.f32 %v2078_v10, %v374_v38  ;;  %v446_v48 = vadd.f32 %v2078_v10, %v375_v39  ;;  %v407_v49 = vmul.f32 %v1634_v40, %v2069_v1  ;;  %v1843_v37 = vld [vmem:[%s2064_s26 + $0x48] sm:$0xff]  }
  0x29   : > { %v539_v50 = vmax.f32 %v475_v43, 0.0  ;;  %v540_v51 = vmax.f32 %v476_v44, 0.0  ;;  %v477_v52 = vadd.f32 %v2078_v10, %v406_v45  ;;  %v1573_v53 = vunpack.c.l.bf16 %v1840_v41 }
  0x2a   : > { %v567_v55 = vpack.c.bf16 %v508_v46, %v507_v42  ;;  %v509_v56 = vmax.f32 %v445_v47, 0.0  ;;  %v510_v57 = vmax.f32 %v446_v48, 0.0  ;;  %v478_v58 = vadd.f32 %v2078_v10, %v407_v49  ;;  %v1859_v42 = vld [vmem:[%s2064_s26 + $0xc8] sm:$0xff]  }
  0x2b   : > { %v583_v60 = vpack.c.bf16 %v540_v51, %v539_v50  ;;  %v541_v61 = vmax.f32 %v477_v52, 0.0  ;;  %v1574_v62 = vunpack.c.h.bf16 %v1840_v41  ;;  %v376_v63 = vmul.f32 %v1573_v53, %v2069_v1 }
  0x2c   : > { %1940 = vmatprep.mubr.msk.bf16.mxu0 %vm610_vm0, %v567_v55  ;;  %v568_v2 = vpack.c.bf16 %v510_v57, %v509_v56  ;;  %v542_v3 = vmax.f32 %v478_v58, 0.0  ;;  %v1637_v4 = vunpack.c.l.bf16 %v1856_v54  ;;  %v1638_v5 = vunpack.c.h.bf16 %v1856_v54  ;;  %v1844_v55 = vld [vmem:[%s2064_s26 + $0x50] sm:$0xff]  }
  0x2d   : > { %1972 = vmatprep.mubr.msk.bf16.mxu1 %vm610_vm0, %v583_v60  ;;  %v377_v6 = vmul.f32 %v1574_v62, %v2069_v1  ;;  %v447_v7 = vadd.f32 %v2078_v10, %v376_v63  ;;  %v1577_v8 = vunpack.c.l.bf16 %v1841_v59  ;;  %v1578_v9 = vunpack.c.h.bf16 %v1841_v59 }
  0x2e   : > { %1941 = vmatmul.mubr.msk.bf16.gmra.mrb[8].mxu0 %vm610_vm0, %v568_v2  ;;  %v584_v11 = vpack.c.bf16 %v542_v3, %v541_v61  ;;  %v408_v12 = vmul.f32 %v1637_v4, %v2069_v1  ;;  %v409_v13 = vmul.f32 %v1638_v5, %v2069_v1  ;;  %v1641_v14 = vunpack.c.l.bf16 %v1857_v0  ;;  %v1860_v5 = vld [vmem:[%s2064_s26 + $0xd0] sm:$0xff]  }
  0x2f   : > { %v448_v16 = vadd.f32 %v2078_v10, %v377_v6  ;;  %v511_v17 = vmax.f32 %v447_v7, 0.0  ;;  %v378_v18 = vmul.f32 %v1577_v8, %v2069_v1  ;;  %v379_v19 = vmul.f32 %v1578_v9, %v2069_v1 }
  0x30   : > { %1973 = vmatmul.mubr.msk.bf16.gmra.mrb[8].mxu1 %vm610_vm0, %v584_v11  ;;  %v479_v20 = vadd.f32 %v2078_v10, %v408_v12  ;;  %v480_v21 = vadd.f32 %v2078_v10, %v409_v13  ;;  %v1642_v22 = vunpack.c.h.bf16 %v1857_v0  ;;  %v410_v23 = vmul.f32 %v1641_v14, %v2069_v1 }
  0x31   : > { %v512_v24 = vmax.f32 %v448_v16, 0.0  ;;  %v449_v25 = vadd.f32 %v2078_v10, %v378_v18  ;;  %v450_v26 = vadd.f32 %v2078_v10, %v379_v19  ;;  %v1581_v27 = vunpack.c.l.bf16 %v1842_v15 }
  0x32   : > { %v543_v28 = vmax.f32 %v479_v20, 0.0  ;;  %v544_v29 = vmax.f32 %v480_v21, 0.0  ;;  %v411_v30 = vmul.f32 %v1642_v22, %v2069_v1  ;;  %v481_v31 = vadd.f32 %v2078_v10, %v410_v23  ;;  %v1861_v20 = vld [vmem:[%s2064_s26 + $0xd8] sm:$0xff]  }
  0x33   : > { %v569_v33 = vpack.c.bf16 %v512_v24, %v511_v17  ;;  %v513_v34 = vmax.f32 %v449_v25, 0.0  ;;  %v514_v35 = vmax.f32 %v450_v26, 0.0  ;;  %v1582_v36 = vunpack.c.h.bf16 %v1842_v15  ;;  %v1845_v15 = vld [vmem:[%s2064_s26 + $0x58] sm:$0xff]  }
  0x34   : > { %v585_v38 = vpack.c.bf16 %v544_v29, %v543_v28  ;;  %v482_v39 = vadd.f32 %v2078_v10, %v411_v30  ;;  %v545_v40 = vmax.f32 %v481_v31, 0.0  ;;  %v380_v41 = vmul.f32 %v1581_v27, %v2069_v1 }
  0x35   : > { %1944 = vmatprep.mubr.msk.bf16.mxu0 %vm610_vm0, %v569_v33  ;;  %v570_v43 = vpack.c.bf16 %v514_v35, %v513_v34  ;;  %v381_v44 = vmul.f32 %v1582_v36, %v2069_v1  ;;  %v1645_v45 = vunpack.c.l.bf16 %v1858_v32  ;;  %v1646_v46 = vunpack.c.h.bf16 %v1858_v32  ;;  %v1846_v33 = vld [vmem:[%s2064_s26 + $0x60] sm:$0xff]  }
  0x36   : > { %1976 = vmatprep.mubr.msk.bf16.mxu1 %vm610_vm0, %v585_v38  ;;  %v546_v47 = vmax.f32 %v482_v39, 0.0  ;;  %v451_v48 = vadd.f32 %v2078_v10, %v380_v41  ;;  %v1585_v49 = vunpack.c.l.bf16 %v1843_v37  ;;  %v1586_v50 = vunpack.c.h.bf16 %v1843_v37 }
  0x37   : > { %1945 = vmatmul.mubr.msk.bf16.gmra.mrb[12].mxu0 %vm610_vm0, %v570_v43  ;;  %v452_v51 = vadd.f32 %v2078_v10, %v381_v44  ;;  %v412_v52 = vmul.f32 %v1645_v45, %v2069_v1  ;;  %v413_v53 = vmul.f32 %v1646_v46, %v2069_v1  ;;  %v1649_v54 = vunpack.c.l.bf16 %v1859_v42  ;;  %v1862_v46 = vld [vmem:[%s2064_s26 + $0xe0] sm:$0xff]  }
  0x38   : > { %v586_v56 = vpack.c.bf16 %v546_v47, %v545_v40  ;;  %v515_v57 = vmax.f32 %v451_v48, 0.0  ;;  %v382_v58 = vmul.f32 %v1585_v49, %v2069_v1  ;;  %v383_v59 = vmul.f32 %v1586_v50, %v2069_v1 }
  0x39   : > { %v516_v60 = vmax.f32 %v452_v51, 0.0  ;;  %v483_v61 = vadd.f32 %v2078_v10, %v412_v52  ;;  %v484_v62 = vadd.f32 %v2078_v10, %v413_v53  ;;  %v1650_v63 = vunpack.c.h.bf16 %v1859_v42 }
  0x3a   : > { %1977 = vmatmul.mubr.msk.bf16.gmra.mrb[12].mxu1 %vm610_vm0, %v586_v56  ;;  %v453_v0 = vadd.f32 %v2078_v10, %v382_v58  ;;  %v454_v2 = vadd.f32 %v2078_v10, %v383_v59  ;;  %v414_v3 = vmul.f32 %v1649_v54, %v2069_v1  ;;  %v1589_v4 = vunpack.c.l.bf16 %v1844_v55 }
  0x3b   : > { %v571_v6 = vpack.c.bf16 %v516_v60, %v515_v57  ;;  %v547_v7 = vmax.f32 %v483_v61, 0.0  ;;  %v548_v8 = vmax.f32 %v484_v62, 0.0  ;;  %v415_v9 = vmul.f32 %v1650_v63, %v2069_v1 }
  0x3c   : > { %v517_v11 = vmax.f32 %v453_v0, 0.0  ;;  %v518_v12 = vmax.f32 %v454_v2, 0.0  ;;  %v485_v13 = vadd.f32 %v2078_v10, %v414_v3  ;;  %v1590_v14 = vunpack.c.h.bf16 %v1844_v55  ;;  %v1847_v55 = vld [vmem:[%s2064_s26 + $0x68] sm:$0xff]  }
  0x3d   : > { %1948 = vmatprep.mubr.msk.bf16.mxu0 %vm610_vm0, %v571_v6  ;;  %v587_v16 = vpack.c.bf16 %v548_v8, %v547_v7  ;;  %v486_v17 = vadd.f32 %v2078_v10, %v415_v9  ;;  %v384_v18 = vmul.f32 %v1589_v4, %v2069_v1  ;;  %v1653_v19 = vunpack.c.l.bf16 %v1860_v5  ;;  %v1863_v0 = vld [vmem:[%s2064_s26 + $0xe8] sm:$0xff]  }
  0x3e   : > { %v572_v21 = vpack.c.bf16 %v518_v12, %v517_v11  ;;  %v549_v22 = vmax.f32 %v485_v13, 0.0  ;;  %v385_v23 = vmul.f32 %v1590_v14, %v2069_v1  ;;  %v1654_v24 = vunpack.c.h.bf16 %v1860_v5  ;;  %v1848_v11 = vld [vmem:[%s2064_s26 + $0x70] sm:$0xff]  }
  0x3f   : > { %1980 = vmatprep.mubr.msk.bf16.mxu1 %vm610_vm0, %v587_v16  ;;  %v550_v25 = vmax.f32 %v486_v17, 0.0  ;;  %v455_v26 = vadd.f32 %v2078_v10, %v384_v18  ;;  %v416_v27 = vmul.f32 %v1653_v19, %v2069_v1  ;;  %v1593_v28 = vunpack.c.l.bf16 %v1845_v15 }
  0x40   : > { %1949 = vmatmul.mubr.msk.bf16.gmra.mrb[16].mxu0 %vm610_vm0, %v572_v21  ;;  %v456_v29 = vadd.f32 %v2078_v10, %v385_v23  ;;  %v417_v30 = vmul.f32 %v1654_v24, %v2069_v1  ;;  %v1594_v31 = vunpack.c.h.bf16 %v1845_v15  ;;  %v1657_v32 = vunpack.c.l.bf16 %v1861_v20  ;;  %v1864_v24 = vld [vmem:[%s2064_s26 + $0xf0] sm:$0xff]  }
  0x41   : > { %v588_v34 = vpack.c.bf16 %v550_v25, %v549_v22  ;;  %v519_v35 = vmax.f32 %v455_v26, 0.0  ;;  %v487_v36 = vadd.f32 %v2078_v10, %v416_v27  ;;  %v386_v37 = vmul.f32 %v1593_v28, %v2069_v1 }
  0x42   : > { %v520_v38 = vmax.f32 %v456_v29, 0.0  ;;  %v488_v39 = vadd.f32 %v2078_v10, %v417_v30  ;;  %v387_v40 = vmul.f32 %v1594_v31, %v2069_v1  ;;  %v1658_v41 = vunpack.c.h.bf16 %v1861_v20 }
  0x43   : > { %1981 = vmatmul.mubr.msk.bf16.gmra.mrb[16].mxu1 %vm610_vm0, %v588_v34  ;;  %v551_v42 = vmax.f32 %v487_v36, 0.0  ;;  %v457_v43 = vadd.f32 %v2078_v10, %v386_v37  ;;  %v418_v44 = vmul.f32 %v1657_v32, %v2069_v1  ;;  %v1597_v45 = vunpack.c.l.bf16 %v1846_v33 }
  0x44   : > { %v573_v47 = vpack.c.bf16 %v520_v38, %v519_v35  ;;  %v552_v48 = vmax.f32 %v488_v39, 0.0  ;;  %v458_v49 = vadd.f32 %v2078_v10, %v387_v40  ;;  %v419_v50 = vmul.f32 %v1658_v41, %v2069_v1 }
  0x45   : > { %v521_v51 = vmax.f32 %v457_v43, 0.0  ;;  %v489_v52 = vadd.f32 %v2078_v10, %v418_v44  ;;  %v1598_v53 = vunpack.c.h.bf16 %v1846_v33  ;;  %v388_v54 = vmul.f32 %v1597_v45, %v2069_v1  ;;  %v1849_v33 = vld [vmem:[%s2064_s26 + $0x78] sm:$0xff]  }
  0x46   : > { %1952 = vmatprep.mubr.msk.bf16.mxu0 %vm610_vm0, %v573_v47  ;;  %v589_v56 = vpack.c.bf16 %v552_v48, %v551_v42  ;;  %v522_v57 = vmax.f32 %v458_v49, 0.0  ;;  %v490_v58 = vadd.f32 %v2078_v10, %v419_v50  ;;  %v1661_v59 = vunpack.c.l.bf16 %v1862_v46  ;;  %v1865_v42 = vld [vmem:[%s2064_s26 + $0xf8] sm:$0xff]  }
  0x47   : > { %v553_v60 = vmax.f32 %v489_v52, 0.0  ;;  %v389_v61 = vmul.f32 %v1598_v53, %v2069_v1  ;;  %v459_v62 = vadd.f32 %v2078_v10, %v388_v54  ;;  %v1662_v63 = vunpack.c.h.bf16 %v1862_v46 }
  0x48   : > { %1984 = vmatprep.mubr.msk.bf16.mxu1 %vm610_vm0, %v589_v56  ;;  %v574_v2 = vpack.c.bf16 %v522_v57, %v521_v51  ;;  %v554_v3 = vmax.f32 %v490_v58, 0.0  ;;  %v420_v4 = vmul.f32 %v1661_v59, %v2069_v1  ;;  %v1601_v5 = vunpack.c.l.bf16 %v1847_v55 }
  0x49   : > { %v460_v6 = vadd.f32 %v2078_v10, %v389_v61  ;;  %v523_v7 = vmax.f32 %v459_v62, 0.0  ;;  %v421_v8 = vmul.f32 %v1662_v63, %v2069_v1  ;;  %v1602_v9 = vunpack.c.h.bf16 %v1847_v55 }
  0x4a   : > { %1953 = vmatmul.mubr.msk.bf16.gmra.mrb[20].mxu0 %vm610_vm0, %v574_v2  ;;  %v590_v12 = vpack.c.bf16 %v554_v3, %v553_v60  ;;  %v491_v13 = vadd.f32 %v2078_v10, %v420_v4  ;;  %v390_v14 = vmul.f32 %v1601_v5, %v2069_v1  ;;  %v1665_v15 = vunpack.c.l.bf16 %v1863_v0 }
  0x4b   : > { %v524_v16 = vmax.f32 %v460_v6, 0.0  ;;  %v492_v17 = vadd.f32 %v2078_v10, %v421_v8  ;;  %v391_v18 = vmul.f32 %v1602_v9, %v2069_v1  ;;  %v1666_v19 = vunpack.c.h.bf16 %v1863_v0 }
  0x4c   : > { %1985 = vmatmul.mubr.msk.bf16.gmra.mrb[20].mxu1 %vm610_vm0, %v590_v12  ;;  %v555_v20 = vmax.f32 %v491_v13, 0.0  ;;  %v461_v21 = vadd.f32 %v2078_v10, %v390_v14  ;;  %v422_v22 = vmul.f32 %v1665_v15, %v2069_v1  ;;  %v1605_v23 = vunpack.c.l.bf16 %v1848_v11  ;;  %v2271_v13 = vld [vmem:[%s2383_s4] ss:$0 sm:$0xff] }
  0x4d   : > { %v575_v25 = vpack.c.bf16 %v524_v16, %v523_v7  ;;  %v556_v26 = vmax.f32 %v492_v17, 0.0  ;;  %v462_v27 = vadd.f32 %v2078_v10, %v391_v18  ;;  %v423_v28 = vmul.f32 %v1666_v19, %v2069_v1 }
  0x4e   : > { %v525_v29 = vmax.f32 %v461_v21, 0.0  ;;  %v493_v30 = vadd.f32 %v2078_v10, %v422_v22  ;;  %v1606_v31 = vunpack.c.h.bf16 %v1848_v11  ;;  %v392_v32 = vmul.f32 %v1605_v23, %v2069_v1 }
  0x4f   : > { %1956 = vmatprep.mubr.msk.bf16.mxu0 %vm610_vm0, %v575_v25  ;;  %v591_v34 = vpack.c.bf16 %v556_v26, %v555_v20  ;;  %v526_v35 = vmax.f32 %v462_v27, 0.0  ;;  %v494_v36 = vadd.f32 %v2078_v10, %v423_v28  ;;  %v1669_v37 = vunpack.c.l.bf16 %v1864_v24 }
  0x50   : > { %v557_v38 = vmax.f32 %v493_v30, 0.0  ;;  %v393_v39 = vmul.f32 %v1606_v31, %v2069_v1  ;;  %v463_v40 = vadd.f32 %v2078_v10, %v392_v32  ;;  %v1670_v41 = vunpack.c.h.bf16 %v1864_v24 }
  0x51   : > { %1988 = vmatprep.mubr.msk.bf16.mxu1 %vm610_vm0, %v591_v34  ;;  %v576_v43 = vpack.c.bf16 %v526_v35, %v525_v29  ;;  %v558_v44 = vmax.f32 %v494_v36, 0.0  ;;  %v424_v45 = vmul.f32 %v1669_v37, %v2069_v1  ;;  %v1609_v46 = vunpack.c.l.bf16 %v1849_v33 }
  0x52   : > { %v464_v47 = vadd.f32 %v2078_v10, %v393_v39  ;;  %v527_v48 = vmax.f32 %v463_v40, 0.0  ;;  %v425_v49 = vmul.f32 %v1670_v41, %v2069_v1  ;;  %v1610_v50 = vunpack.c.h.bf16 %v1849_v33 }
  0x53   : > { %1957 = vmatmul.mubr.msk.bf16.gmra.mrb[24].mxu0 %vm610_vm0, %v576_v43  ;;  %v592_v51 = vpack.c.bf16 %v558_v44, %v557_v38  ;;  %v495_v52 = vadd.f32 %v2078_v10, %v424_v45  ;;  %v394_v53 = vmul.f32 %v1609_v46, %v2069_v1  ;;  %v1673_v54 = vunpack.c.l.bf16 %v1865_v42 }
  0x54   : > { %v528_v55 = vmax.f32 %v464_v47, 0.0  ;;  %v496_v56 = vadd.f32 %v2078_v10, %v425_v49  ;;  %v395_v57 = vmul.f32 %v1610_v50, %v2069_v1  ;;  %v1674_v58 = vunpack.c.h.bf16 %v1865_v42 }
  0x55   : > { %1989 = vmatmul.mubr.msk.bf16.gmra.mrb[24].mxu1 %vm610_vm0, %v592_v51  ;;  %v559_v59 = vmax.f32 %v495_v52, 0.0  ;;  %v465_v60 = vadd.f32 %v2078_v10, %v394_v53  ;;  %v426_v61 = vmul.f32 %v1673_v54, %v2069_v1 }
  0x56   : > { %v577_v62 = vpack.c.bf16 %v528_v55, %v527_v48  ;;  %v560_v63 = vmax.f32 %v496_v56, 0.0  ;;  %v466_v0 = vadd.f32 %v2078_v10, %v395_v57  ;;  %v427_v2 = vmul.f32 %v1674_v58, %v2069_v1 }
  0x57   : > { %v529_v3 = vmax.f32 %v465_v60, 0.0  ;;  %v497_v4 = vadd.f32 %v2078_v10, %v426_v61 }
  0x58   : > { %1960 = vmatprep.mubr.msk.bf16.mxu0 %vm610_vm0, %v577_v62  ;;  %v593_v5 = vpack.c.bf16 %v560_v63, %v559_v59  ;;  %v530_v6 = vmax.f32 %v466_v0, 0.0  ;;  %v498_v7 = vadd.f32 %v2078_v10, %v427_v2 }
  0x59   : > { %v561_v8 = vmax.f32 %v497_v4, 0.0 }
  0x5a   : > { %1992 = vmatprep.mubr.msk.bf16.mxu1 %vm610_vm0, %v593_v5  ;;  %v578_v9 = vpack.c.bf16 %v530_v6, %v529_v3  ;;  %v562_v11 = vmax.f32 %v498_v7, 0.0 }
  0x5c   : > { %1961 = vmatmul.mubr.msk.bf16.gmra.mrb[28].mxu0 %vm610_vm0, %v578_v9  ;;  %v594_v12 = vpack.c.bf16 %v562_v11, %v561_v8 }
  0x5e   : > { %1993 = vmatmul.mubr.msk.bf16.gmra.mrb[28].mxu1 %vm610_vm0, %v594_v12 }
  0xef   : > { %v1934_v1 = vpop.f32.mrb[0].mxu0 }
  0xf0   : > { %v1966_v14 = vpop.f32.mrb[0].mxu1  ;;  %v741_v15 = vpop.f32.mrb[1].mxu0  ;;  %v750_v18 = vadd.f32 %v1934_v1, %v2271_v13 }
  0xf1   : > { %v869_v10 = vpop.f32.mrb[1].mxu1  ;;  %v1935_v16 = vpop.f32.mrb[2].mxu0  ;;  %v878_v19 = vadd.f32 %v1966_v14, %v2271_v13  ;;  %v742_v24 = vadd.f32 %v2271_v13, %v741_v15 }
  0xf2   : > { %v1967_v17 = vpop.f32.mrb[2].mxu1  ;;  %v753_v20 = vadd.f32 %v1935_v16, %v2271_v13  ;;  %v744_v22 = vpop.f32.mrb[3].mxu0  ;;  %v870_v25 = vadd.f32 %v2271_v13, %v869_v10 }
  0xf3   : > { %v881_v21 = vadd.f32 %v1967_v17, %v2271_v13  ;;  %v872_v23 = vpop.f32.mrb[3].mxu1  ;;  %v745_v26 = vadd.f32 %v2271_v13, %v744_v22 }
  0xf4   : > { %v873_v27 = vadd.f32 %v2271_v13, %v872_v23  ;;  %v1683_v28 = vpack.c.bf16 %v753_v20, %v750_v18 }
  0xf5   : > { %v1763_v29 = vpack.c.bf16 %v881_v21, %v878_v19  ;;  %v1678_v30 = vpack.c.bf16 %v745_v26, %v742_v24 }
  0xf6   : > { %v1758_v31 = vpack.c.bf16 %v873_v27, %v870_v25  ;;  %1866 = vst [vmem:[%s2284_s10 + $0x8] sm:$0xff] %v1683_v28  }
  0xf7   : > { %1882 = vst [vmem:[%s2284_s10 + $0x88] sm:$0xff] %v1763_v29   ;;  %1679 = vst [vmem:[%s2284_s10] sm:$0xff] %v1678_v30  }
  0xf8   : > { %1881 = vst [vmem:[%s2284_s10 + $0x80] sm:$0xff] %v1758_v31   ;;  %v1938_v32 = vpop.f32.mrb[4].mxu0 }
  0xf9   : > { %v1970_v33 = vpop.f32.mrb[4].mxu1  ;;  %v757_v34 = vpop.f32.mrb[5].mxu0  ;;  %v766_v37 = vadd.f32 %v1938_v32, %v2271_v13 }
  0xfa   : > { %v885_v35 = vpop.f32.mrb[5].mxu1  ;;  %v1939_v36 = vpop.f32.mrb[6].mxu0  ;;  %v894_v41 = vadd.f32 %v1970_v33, %v2271_v13  ;;  %v758_v42 = vadd.f32 %v2271_v13, %v757_v34 }
  0xfb   : > { %v769_v38 = vadd.f32 %v1939_v36, %v2271_v13  ;;  %v1971_v39 = vpop.f32.mrb[6].mxu1  ;;  %v760_v40 = vpop.f32.mrb[7].mxu0  ;;  %v886_v46 = vadd.f32 %v2271_v13, %v885_v35 }
  0xfc   : > { %v897_v43 = vadd.f32 %v1971_v39, %v2271_v13  ;;  %v761_v44 = vadd.f32 %v2271_v13, %v760_v40  ;;  %v888_v45 = vpop.f32.mrb[7].mxu1 }
  0xfd   : > { %v1693_v47 = vpack.c.bf16 %v769_v38, %v766_v37  ;;  %v889_v48 = vadd.f32 %v2271_v13, %v888_v45 }
  0xfe   : > { %v1773_v49 = vpack.c.bf16 %v897_v43, %v894_v41  ;;  %v1688_v50 = vpack.c.bf16 %v761_v44, %v758_v42 }
  0xff   : > { %1868 = vst [vmem:[%s2284_s10 + $0x18] sm:$0xff] %v1693_v47   ;;  %v1768_v51 = vpack.c.bf16 %v889_v48, %v886_v46 }
 0x100   : > { %1884 = vst [vmem:[%s2284_s10 + $0x98] sm:$0xff] %v1773_v49   ;;  %1867 = vst [vmem:[%s2284_s10 + $0x10] sm:$0xff] %v1688_v50  }
 0x101   : > { %1883 = vst [vmem:[%s2284_s10 + $0x90] sm:$0xff] %v1768_v51   ;;  %v1942_v52 = vpop.f32.mrb[8].mxu0 }
 0x102   : > { %v773_v53 = vpop.f32.mrb[9].mxu0  ;;  %v782_v56 = vadd.f32 %v1942_v52, %v2271_v13 }
 0x103   : > { %v1974_v54 = vpop.f32.mrb[8].mxu1  ;;  %v1943_v55 = vpop.f32.mrb[10].mxu0  ;;  %v774_v60 = vadd.f32 %v2271_v13, %v773_v53 }
 0x104   : > { %v901_v57 = vpop.f32.mrb[9].mxu1  ;;  %v785_v58 = vadd.f32 %v1943_v55, %v2271_v13  ;;  %v776_v59 = vpop.f32.mrb[11].mxu0  ;;  %v910_v63 = vadd.f32 %v1974_v54, %v2271_v13 }
 0x105   : > { %v1975_v61 = vpop.f32.mrb[10].mxu1  ;;  %v777_v62 = vadd.f32 %v2271_v13, %v776_v59  ;;  %v902_v4 = vadd.f32 %v2271_v13, %v901_v57 }
 0x106   : > { %v1703_v0 = vpack.c.bf16 %v785_v58, %v782_v56  ;;  %v913_v2 = vadd.f32 %v1975_v61, %v2271_v13  ;;  %v904_v3 = vpop.f32.mrb[11].mxu1 }
 0x107   : > { %v1698_v5 = vpack.c.bf16 %v777_v62, %v774_v60  ;;  %v905_v6 = vadd.f32 %v2271_v13, %v904_v3 }
 0x108   : > { %1870 = vst [vmem:[%s2284_s10 + $0x28] sm:$0xff] %v1703_v0   ;;  %v1783_v7 = vpack.c.bf16 %v913_v2, %v910_v63 }
 0x109   : > { %1869 = vst [vmem:[%s2284_s10 + $0x20] sm:$0xff] %v1698_v5   ;;  %v1778_v8 = vpack.c.bf16 %v905_v6, %v902_v4 }
 0x10a   : > { %1886 = vst [vmem:[%s2284_s10 + $0xa8] sm:$0xff] %v1783_v7   ;;  %v1946_v9 = vpop.f32.mrb[12].mxu0 }
 0x10b   : > { %1885 = vst [vmem:[%s2284_s10 + $0xa0] sm:$0xff] %v1778_v8   ;;  %v789_v11 = vpop.f32.mrb[13].mxu0  ;;  %v798_v1 = vadd.f32 %v1946_v9, %v2271_v13 }
 0x10c   : > { %v1947_v12 = vpop.f32.mrb[14].mxu0  ;;  %v790_v16 = vadd.f32 %v2271_v13, %v789_v11 }
 0x10d   : > { %v1978_v14 = vpop.f32.mrb[12].mxu1  ;;  %v801_v15 = vadd.f32 %v1947_v12, %v2271_v13  ;;  %v792_v10 = vpop.f32.mrb[15].mxu0 }
 0x10e   : > { %v917_v17 = vpop.f32.mrb[13].mxu1  ;;  %v793_v18 = vadd.f32 %v2271_v13, %v792_v10  ;;  %v926_v21 = vadd.f32 %v1978_v14, %v2271_v13 }
 0x10f   : > { %v1713_v19 = vpack.c.bf16 %v801_v15, %v798_v1  ;;  %v1979_v20 = vpop.f32.mrb[14].mxu1  ;;  %v918_v25 = vadd.f32 %v2271_v13, %v917_v17 }
 0x110   : > { %v929_v22 = vadd.f32 %v1979_v20, %v2271_v13  ;;  %v1708_v23 = vpack.c.bf16 %v793_v18, %v790_v16  ;;  %v920_v24 = vpop.f32.mrb[15].mxu1 }
 0x111   : > { %1872 = vst [vmem:[%s2284_s10 + $0x38] sm:$0xff] %v1713_v19   ;;  %v921_v26 = vadd.f32 %v2271_v13, %v920_v24 }
 0x112   : > { %v1793_v27 = vpack.c.bf16 %v929_v22, %v926_v21  ;;  %1871 = vst [vmem:[%s2284_s10 + $0x30] sm:$0xff] %v1708_v23  }
 0x113   : > { %v1788_v28 = vpack.c.bf16 %v921_v26, %v918_v25  ;;  %v1950_v29 = vpop.f32.mrb[16].mxu0 }
 0x114   : > { %1888 = vst [vmem:[%s2284_s10 + $0xb8] sm:$0xff] %v1793_v27   ;;  %v805_v30 = vpop.f32.mrb[17].mxu0  ;;  %v814_v32 = vadd.f32 %v1950_v29, %v2271_v13 }
 0x115   : > { %1887 = vst [vmem:[%s2284_s10 + $0xb0] sm:$0xff] %v1788_v28   ;;  %v1951_v31 = vpop.f32.mrb[18].mxu0  ;;  %v806_v36 = vadd.f32 %v2271_v13, %v805_v30 }
 0x116   : > { %v1982_v33 = vpop.f32.mrb[16].mxu1  ;;  %v817_v34 = vadd.f32 %v1951_v31, %v2271_v13  ;;  %v808_v35 = vpop.f32.mrb[19].mxu0 }
 0x117   : > { %v933_v37 = vpop.f32.mrb[17].mxu1  ;;  %v809_v38 = vadd.f32 %v2271_v13, %v808_v35  ;;  %v942_v41 = vadd.f32 %v1982_v33, %v2271_v13 }
 0x118   : > { %v1723_v39 = vpack.c.bf16 %v817_v34, %v814_v32  ;;  %v1983_v40 = vpop.f32.mrb[18].mxu1  ;;  %v934_v45 = vadd.f32 %v2271_v13, %v933_v37 }
 0x119   : > { %v945_v42 = vadd.f32 %v1983_v40, %v2271_v13  ;;  %v1718_v43 = vpack.c.bf16 %v809_v38, %v806_v36  ;;  %v936_v44 = vpop.f32.mrb[19].mxu1 }
 0x11a   : > { %1874 = vst [vmem:[%s2284_s10 + $0x48] sm:$0xff] %v1723_v39   ;;  %v937_v46 = vadd.f32 %v2271_v13, %v936_v44 }
 0x11b   : > { %v1803_v47 = vpack.c.bf16 %v945_v42, %v942_v41  ;;  %1873 = vst [vmem:[%s2284_s10 + $0x40] sm:$0xff] %v1718_v43  }
 0x11c   : > { %v1798_v48 = vpack.c.bf16 %v937_v46, %v934_v45 }
 0x11d   : > { %1890 = vst [vmem:[%s2284_s10 + $0xc8] sm:$0xff] %v1803_v47   ;;  %v1954_v49 = vpop.f32.mrb[20].mxu0 }
 0x11e   : > { %1889 = vst [vmem:[%s2284_s10 + $0xc0] sm:$0xff] %v1798_v48   ;;  %v821_v50 = vpop.f32.mrb[21].mxu0  ;;  %v830_v53 = vadd.f32 %v1954_v49, %v2271_v13 }
 0x11f   : > { %v1986_v51 = vpop.f32.mrb[20].mxu1  ;;  %v1955_v52 = vpop.f32.mrb[22].mxu0  ;;  %v822_v57 = vadd.f32 %v2271_v13, %v821_v50 }
 0x120   : > { %v949_v54 = vpop.f32.mrb[21].mxu1  ;;  %v833_v55 = vadd.f32 %v1955_v52, %v2271_v13  ;;  %v824_v56 = vpop.f32.mrb[23].mxu0  ;;  %v958_v60 = vadd.f32 %v1986_v51, %v2271_v13 }
 0x121   : > { %v1987_v58 = vpop.f32.mrb[22].mxu1  ;;  %v825_v59 = vadd.f32 %v2271_v13, %v824_v56  ;;  %v950_v0 = vadd.f32 %v2271_v13, %v949_v54 }
 0x122   : > { %v1733_v61 = vpack.c.bf16 %v833_v55, %v830_v53  ;;  %v961_v62 = vadd.f32 %v1987_v58, %v2271_v13  ;;  %v952_v63 = vpop.f32.mrb[23].mxu1 }
 0x123   : > { %v1728_v2 = vpack.c.bf16 %v825_v59, %v822_v57  ;;  %v953_v3 = vadd.f32 %v2271_v13, %v952_v63 }
 0x124   : > { %1876 = vst [vmem:[%s2284_s10 + $0x58] sm:$0xff] %v1733_v61   ;;  %v1813_v4 = vpack.c.bf16 %v961_v62, %v958_v60 }
 0x125   : > { %1875 = vst [vmem:[%s2284_s10 + $0x50] sm:$0xff] %v1728_v2   ;;  %v1808_v5 = vpack.c.bf16 %v953_v3, %v950_v0 }
 0x126   : > { %1892 = vst [vmem:[%s2284_s10 + $0xd8] sm:$0xff] %v1813_v4   ;;  %v1958_v6 = vpop.f32.mrb[24].mxu0 }
 0x127   : > { %1891 = vst [vmem:[%s2284_s10 + $0xd0] sm:$0xff] %v1808_v5   ;;  %v837_v7 = vpop.f32.mrb[25].mxu0  ;;  %v846_v11 = vadd.f32 %v1958_v6, %v2271_v13 }
 0x128   : > { %v1990_v8 = vpop.f32.mrb[24].mxu1  ;;  %v1959_v9 = vpop.f32.mrb[26].mxu0  ;;  %v838_v15 = vadd.f32 %v2271_v13, %v837_v7 }
 0x129   : > { %v965_v12 = vpop.f32.mrb[25].mxu1  ;;  %v849_v1 = vadd.f32 %v1959_v9, %v2271_v13  ;;  %v840_v14 = vpop.f32.mrb[27].mxu0  ;;  %v974_v17 = vadd.f32 %v1990_v8, %v2271_v13 }
 0x12a   : > { %v1991_v10 = vpop.f32.mrb[26].mxu1  ;;  %v841_v16 = vadd.f32 %v2271_v13, %v840_v14  ;;  %v966_v21 = vadd.f32 %v2271_v13, %v965_v12 }
 0x12b   : > { %v1743_v18 = vpack.c.bf16 %v849_v1, %v846_v11  ;;  %v977_v19 = vadd.f32 %v1991_v10, %v2271_v13  ;;  %v968_v20 = vpop.f32.mrb[27].mxu1 }
 0x12c   : > { %v1738_v22 = vpack.c.bf16 %v841_v16, %v838_v15  ;;  %v969_v23 = vadd.f32 %v2271_v13, %v968_v20 }
 0x12d   : > { %1878 = vst [vmem:[%s2284_s10 + $0x68] sm:$0xff] %v1743_v18   ;;  %v1823_v24 = vpack.c.bf16 %v977_v19, %v974_v17 }
 0x12e   : > { %1877 = vst [vmem:[%s2284_s10 + $0x60] sm:$0xff] %v1738_v22   ;;  %v1818_v25 = vpack.c.bf16 %v969_v23, %v966_v21 }
 0x12f   : > { %1894 = vst [vmem:[%s2284_s10 + $0xe8] sm:$0xff] %v1823_v24   ;;  %v1962_v26 = vpop.f32.mrb[28].mxu0 }
 0x130   : > { %1893 = vst [vmem:[%s2284_s10 + $0xe0] sm:$0xff] %v1818_v25   ;;  %v853_v27 = vpop.f32.mrb[29].mxu0  ;;  %v862_v30 = vadd.f32 %v1962_v26, %v2271_v13 }
 0x131   : > { %v1994_v28 = vpop.f32.mrb[28].mxu1  ;;  %v1963_v29 = vpop.f32.mrb[30].mxu0  ;;  %v854_v34 = vadd.f32 %v2271_v13, %v853_v27 }
 0x132   : > { %v981_v31 = vpop.f32.mrb[29].mxu1  ;;  %v865_v32 = vadd.f32 %v1963_v29, %v2271_v13  ;;  %v856_v33 = vpop.f32.mrb[31].mxu0  ;;  %v990_v37 = vadd.f32 %v1994_v28, %v2271_v13 }
 0x133   : > { %v1995_v35 = vpop.f32.mrb[30].mxu1  ;;  %v857_v36 = vadd.f32 %v2271_v13, %v856_v33  ;;  %v982_v41 = vadd.f32 %v2271_v13, %v981_v31 }
 0x134   : > { %v1753_v38 = vpack.c.bf16 %v865_v32, %v862_v30  ;;  %v993_v39 = vadd.f32 %v1995_v35, %v2271_v13  ;;  %v984_v40 = vpop.f32.mrb[31].mxu1 }
 0x135   : > { %v1748_v42 = vpack.c.bf16 %v857_v36, %v854_v34  ;;  %v985_v43 = vadd.f32 %v2271_v13, %v984_v40 }
 0x136   : > { %1880 = vst [vmem:[%s2284_s10 + $0x78] sm:$0xff] %v1753_v38   ;;  %v1833_v44 = vpack.c.bf16 %v993_v39, %v990_v37 }
 0x137   : > { %1879 = vst [vmem:[%s2284_s10 + $0x70] sm:$0xff] %v1748_v42   ;;  %v1828_v45 = vpack.c.bf16 %v985_v43, %v982_v41 }
 0x138   : > { %1896 = vst [vmem:[%s2284_s10 + $0xf8] sm:$0xff] %v1833_v44  }
 0x139   : > { %1895 = vst [vmem:[%s2284_s10 + $0xf0] sm:$0xff] %v1828_v45  }
 0x13a PF: > { %s15_s18 = sadd.s32 1, %s2013_s18  }
 0x13b   : > { %p12_p4 = scmp.ge.s32.totalorder %s15_s18, 4  }
 0x13d   :  { %14 = sbr.rel (!%p12_p4) target bundleno = 1 (0x1), region = 70 }

// kernel: tile.39
= control target key start
LH: loop header
LB: loop body
LE: loop exit
PB: predicated region body
PF: predicated region fallthrough
CT: control target
= control target key end

     0   :  { %s28_s0 = inlined_call_operand.vmem [shape: f32[32], index: 0, kind: input, shape index: {}]   ;;  %s29_s1 = inlined_call_operand.vmem [shape: f32[9,32], index: 1, kind: output, shape index: {}]  }
   0x1   :  { %v4_v0 = vld [vmem:[%s28_s0] ss:$0 sm:$0xff] }
   0x2   :  { %5 = vst [vmem:[%s29_s1] sm:$0xff] %v4_v0  ;;  %8 = vst [vmem:[%s29_s1 + $0x8] sm:$0xff] %v4_v0 }

// kernel: tile.44
= control target key start
LH: loop header
LB: loop body
LE: loop exit
PB: predicated region body
PF: predicated region fallthrough
CT: control target
= control target key end

     0   :  { %s6_s6 = smov 3  ;;  %s13_s11 = smov 3  ;;  %vm3_vm0 = vcmask 261120   ;;  %vm10_vm1 = vcmask 1048320   ;;  %vm17_vm2 = vcmask 785920   ;;  %vm24_vm3 = vcmask 523520   ;;  %s86_s0 = inlined_call_operand.vmem [shape: f32[9,32], index: 0, kind: input, shape index: {}]   ;;  %s87_s1 = inlined_call_operand.vmem [shape: f32[1,288], index: 1, kind: output, shape index: {}]  }
   0x1   :  { %v2_v0 = vld [vmem:[%s86_s0] ss:$4 sm:$0x7]   ;;  %v44_v1 = vld [vmem:[%s86_s0 + $0x3] ss:$4 sm:%s6_s6]   ;;  %s52_s12 = smov 96  }
   0x2   :  { %8 = vrot.lane.b32.xlu0 %v44_v1, %s52_s12  ;;  %s20_s13 = smov 3  ;;  %4 = vst.msk [vmem:[#allocation0] ss:$8 sm:$0x7] %vm3_vm0, %v2_v0   ;;  %v45_v2 = vld [vmem:[%s86_s0 + $0x2] ss:$4 sm:%s13_s11]  }
   0x3   :  { %v46_v3 = vld [vmem:[%s86_s0 + $0x1] ss:$4 sm:%s20_s13]   ;;  %s53_s0 = smov 32   ;;  %s54_s18 = smov 64  }
   0x4   :  { %22 = vrot.lane.b32.xlu1 %v46_v3, %s53_s0 }
   0x6   :  { %15 = vrot.lane.b32.xlu0 %v45_v2, %s54_s18 }
   0x9   :  { %v38_v4 = vld [vmem:[#allocation0 + $0x10] sm:$0x1] }
   0xa   :  { %48 = vst [vmem:[%s87_s1 + $0x2] sm:$0x1] %v38_v4 }
  0x74   :  { %v9_v5 = vpop.permute.xlu0 %8  }
  0x75   :  { %11 = vst.msk [vmem:[#allocation0] ss:$8 sm:$0x3] %vm10_vm1, %v9_v5  }
  0x76   :  { %v23_v6 = vpop.permute.xlu1 %22  }
  0x78   :  { %v16_v7 = vpop.permute.xlu0 %15  }
  0x79   :  { %18 = vst.msk [vmem:[#allocation0] ss:$8 sm:$0x3] %vm17_vm2, %v16_v7  }
  0x7a   :  { %25 = vst.msk [vmem:[#allocation0] ss:$8 sm:$0x3] %vm24_vm3, %v23_v6  }
  0x81   :  { %v29_v8 = vld [vmem:[#allocation0] sm:$0x1]  ;;  %v33_v9 = vld [vmem:[#allocation0 + $0x8] sm:$0x1] }
  0x82   :  { %31 = vst [vmem:[%s87_s1] sm:$0x1] %v29_v8  ;;  %47 = vst [vmem:[%s87_s1 + $0x1] sm:$0x1] %v33_v9 }

// kernel: fbn_forward.11
= control target key start
LH: loop header
LB: loop body
LE: loop exit
PB: predicated region body
PF: predicated region fallthrough
CT: control target
= control target key end

     0   :  { %v183_v5 = vlaneseq  ;;  %vm702_vm0 = vcmask 261120   ;;  %s2244_s3 = inlined_call_operand.vmem [shape: bf16[288,128], index: 3, kind: input, shape index: {}]   ;;  %s2245_s0 = inlined_call_operand.vmem [shape: bf16[256,288], index: 0, kind: input, shape index: {}]   ;;  %s2246_s1 = inlined_call_operand.vmem [shape: f32[1,288], index: 1, kind: input, shape index: {}]   ;;  %s2247_s2 = inlined_call_operand.vmem [shape: f32[1,288], index: 2, kind: input, shape index: {}]   ;;  %s2248_s4 = inlined_call_operand.vmem [shape: f32[1,128], index: 4, kind: input, shape index: {}]   ;;  %s2249_s5 = inlined_call_operand.vmem [shape: bf16[256,128], index: 5, kind: output, shape index: {}]  }
   0x1   :  { %v1645_v0 = vld [vmem:[%s2244_s3 + $0x40] sm:$0xff]   ;;  %v1647_v2 = vld [vmem:[%s2244_s3 + $0x48] sm:$0xff]   ;;  %v1649_v4 = vld [vmem:[%s2244_s3 + $0x50] sm:$0xff]  }
   0x2   :  { %v1646_v1 = vld [vmem:[%s2244_s3] sm:$0xff]   ;;  %1463 = vmatprep.subr.bf16.mxu0 %v1645_v0  ;;  %1629 = vmatprep.subr.bf16.mxu1 %v1645_v0  ;;  %v1648_v3 = vld [vmem:[%s2244_s3 + $0x8] sm:$0xff]   ;;  %v1650_v6 = vld [vmem:[%s2244_s3 + $0x10] sm:$0xff]   ;;  %v184_v8 = vshrl.u32 %v183_v5, 7 }
   0x3   :  { %1464 = vmatpush3.bf16.msra.mxu0 %v1646_v1  ;;  %1637 = vmatpush3.bf16.msra.mxu1 %v1646_v1  ;;  %v1651_v7 = vld [vmem:[%s2244_s3 + $0x58] sm:$0xff]   ;;  %v1653_v10 = vld [vmem:[%s2244_s3 + $0x60] sm:$0xff]   ;;  %v1655_v14 = vld [vmem:[%s2244_s3 + $0x68] sm:$0xff]  }
   0x4   :  { %1465 = vmatprep.subr.bf16.mxu0 %v1647_v2  ;;  %1630 = vmatprep.subr.bf16.mxu1 %v1647_v2  ;;  %v1652_v9 = vld [vmem:[%s2244_s3 + $0x18] sm:$0xff]   ;;  %v189_v11 = vsub.s32 1, %v184_v8  ;;  %v1654_v12 = vld [vmem:[%s2244_s3 + $0x20] sm:$0xff]   ;;  %v193_v13 = vsub.s32 2, %v184_v8  ;;  %v23_v16 = vld [vmem:[%s2245_s0 + $0xc] sm:$0xff]  ;;  %v185_v18 = vsub.s32 0, %v184_v8 }
   0x5   :  { %v21_v15 = vld [vmem:[%s2245_s0] sm:$0xff]  ;;  %v88_v21 = vunpack.c.l.bf16 %v23_v16  ;;  %v89_v22 = vunpack.c.h.bf16 %v23_v16  ;;  %v71_v25 = vld [vmem:[%s2245_s0 + $0x12c] sm:$0xff]  ;;  %v1758_v35 = vld [vmem:[%s2245_s0 + $0x18] sm:$0xff] }
   0x6   :  { %v181_v17 = vld [vmem:[%s2246_s1] sm:$0x7]  ;;  %v85_v19 = vunpack.c.l.bf16 %v21_v15  ;;  %v86_v20 = vunpack.c.h.bf16 %v21_v15  ;;  %v1656_v30 = vld [vmem:[%s2244_s3 + $0x28] sm:$0xff]   ;;  %v160_v33 = vunpack.c.l.bf16 %v71_v25  ;;  %v161_v34 = vunpack.c.h.bf16 %v71_v25  ;;  %v1657_v37 = vld [vmem:[%s2244_s3 + $0x70] sm:$0xff]  }
   0x7   :  { %1466 = vmatpush3.bf16.msra.mxu0 %v1648_v3  ;;  %1638 = vmatpush3.bf16.msra.mxu1 %v1648_v3  ;;  %v294_v23 = vld [vmem:[%s2247_s2] sm:$0x7]  ;;  %v1744_v26 = vrot.slane %v181_v17, %v189_v11  ;;  %v1746_v27 = vrot.slane %v181_v17, %v193_v13  ;;  %v1763_v36 = vld [vmem:[%s2245_s0 + $0x24] sm:$0xff]  ;;  %v1770_v40 = vrot.slane %v181_v17, %v185_v18  ;;  %v92_v41 = vunpack.c.h.bf16 %v1758_v35  ;;  %v1776_v42 = vld [vmem:[%s2245_s0 + $0x138] sm:$0xff] }
   0x8   :  { %1467 = vmatprep.subr.bf16.mxu0 %v1649_v4  ;;  %1631 = vmatprep.subr.bf16.mxu1 %v1649_v4  ;;  %v69_v24 = vld [vmem:[%s2245_s0 + $0x120] sm:$0xff]  ;;  %v1748_v28 = vrot.slane %v294_v23, %v189_v11  ;;  %v1750_v29 = vrot.slane %v294_v23, %v193_v13  ;;  %v1780_v45 = vrot.slane %v294_v23, %v185_v18  ;;  %v95_v46 = vunpack.c.h.bf16 %v1763_v36  ;;  %v1658_v51 = vld [vmem:[%s2244_s3 + $0x30] sm:$0xff]   ;;  %v1659_v56 = vld [vmem:[%s2244_s3 + $0x78] sm:$0xff]  }
   0x9   :  { %v157_v31 = vunpack.c.l.bf16 %v69_v24  ;;  %v158_v32 = vunpack.c.h.bf16 %v69_v24  ;;  %v199_v38 = vmul.f32 %v1744_v26, %v86_v20  ;;  %v202_v39 = vmul.f32 %v1744_v26, %v89_v22  ;;  %v75_v1 = vld [vmem:[%s2245_s0 + $0x144] sm:$0xff]  ;;  %v29_v24 = vld [vmem:[%s2245_s0 + $0x30] sm:$0xff] }
   0xa   :  { %v274_v44 = vmul.f32 %v1744_v26, %v161_v34  ;;  %v198_v49 = vmul.f32 %v1770_v40, %v85_v19  ;;  %v201_v50 = vmul.f32 %v1770_v40, %v88_v21  ;;  %v164_v55 = vunpack.c.h.bf16 %v1776_v42 }
   0xb   :  { %1468 = vmatpush3.bf16.msra.mxu0 %v1650_v6  ;;  %1639 = vmatpush3.bf16.msra.mxu1 %v1650_v6  ;;  %v271_v43 = vmul.f32 %v1744_v26, %v158_v32  ;;  %v312_v47 = vadd.f32 %v1748_v28, %v199_v38  ;;  %v315_v48 = vadd.f32 %v1748_v28, %v202_v39  ;;  %v1660_v6 = vld [vmem:[%s2244_s3 + $0x38] sm:$0xff]   ;;  %v91_v18 = vunpack.c.l.bf16 %v1758_v35  ;;  %v77_v38 = vld [vmem:[%s2245_s0 + $0x150] sm:$0xff]  ;;  %v1662_v39 = vld [vmem:[%s2244_s3 + $0x88] sm:$0xff]  }
   0xc   :  { %1469 = vmatprep.subr.bf16.mxu0 %v1651_v7  ;;  %1632 = vmatprep.subr.bf16.mxu1 %v1651_v7  ;;  %v387_v53 = vadd.f32 %v1748_v28, %v274_v44  ;;  %v270_v54 = vmul.f32 %v1770_v40, %v157_v31  ;;  %v311_v59 = vadd.f32 %v1780_v45, %v198_v49  ;;  %v94_v19 = vunpack.c.l.bf16 %v1763_v36 }
   0xd   :  { %v384_v52 = vadd.f32 %v1748_v28, %v271_v43  ;;  %v408_v57 = vmax.f32 %v312_v47, 0.0  ;;  %v411_v58 = vmax.f32 %v315_v48, 0.0  ;;  %v314_v60 = vadd.f32 %v1780_v45, %v201_v50  ;;  %v79_v50 = vld [vmem:[%s2245_s0 + $0x15c] sm:$0xff] }
   0xe   :  { %v483_v62 = vmax.f32 %v387_v53, 0.0  ;;  %v273_v63 = vmul.f32 %v1770_v40, %v160_v33  ;;  %v383_v0 = vadd.f32 %v1780_v45, %v270_v54  ;;  %v407_v3 = vmax.f32 %v311_v59, 0.0  ;;  %v31_v33 = vld [vmem:[%s2245_s0 + $0x3c] sm:$0xff] }
   0xf   :  { %1470 = vmatpush3.bf16.msra.mxu0 %v1652_v9  ;;  %1640 = vmatpush3.bf16.msra.mxu1 %v1652_v9  ;;  %v480_v61 = vmax.f32 %v384_v52, 0.0  ;;  %v504_v2 = vpack.c.bf16 %v411_v58, %v408_v57  ;;  %v410_v4 = vmax.f32 %v314_v60, 0.0  ;;  %v205_v5 = vmul.f32 %v1744_v26, %v92_v41 }
  0x10   :  { %1471 = vmatprep.subr.bf16.mxu0 %v1653_v10  ;;  %1633 = vmatprep.subr.bf16.mxu1 %v1653_v10  ;;  %v386_v8 = vadd.f32 %v1780_v45, %v273_v63  ;;  %v479_v9 = vmax.f32 %v383_v0, 0.0  ;;  %v208_v10 = vmul.f32 %v1744_v26, %v95_v46  ;;  %v277_v15 = vmul.f32 %v1744_v26, %v164_v55 }
  0x11   :  { %v540_v7 = vpack.c.bf16 %v483_v62, %v480_v61  ;;  %v503_v11 = vpack.c.bf16 %v410_v4, %v407_v3  ;;  %v318_v13 = vadd.f32 %v1748_v28, %v205_v5  ;;  %783 = vmatprep.mubr.bf16.mxu0 %v504_v2  ;;  %v163_v23 = vunpack.c.l.bf16 %v1776_v42 }
  0x12   :  { %v482_v16 = vmax.f32 %v386_v8, 0.0  ;;  %v321_v17 = vadd.f32 %v1748_v28, %v208_v10  ;;  %v390_v22 = vadd.f32 %v1748_v28, %v277_v15  ;;  %v204_v31 = vmul.f32 %v1770_v40, %v91_v18 }
  0x13   :  { %1472 = vmatpush3.bf16.msra.mxu0 %v1654_v12  ;;  %1641 = vmatpush3.bf16.msra.mxu1 %v1654_v12  ;;  %v1661_v12 = vld [vmem:[%s2244_s3 + $0x80] sm:$0xff]   ;;  %v414_v20 = vmax.f32 %v318_v13, 0.0  ;;  %v207_v32 = vmul.f32 %v1770_v40, %v94_v19  ;;  %v166_v36 = vunpack.c.l.bf16 %v75_v1  ;;  %v98_v44 = vunpack.c.h.bf16 %v29_v24 }
  0x14   :  { %1473 = vmatprep.subr.bf16.mxu0 %v1655_v14  ;;  %1634 = vmatprep.subr.bf16.mxu1 %v1655_v14  ;;  %v167_v14 = vunpack.c.h.bf16 %v75_v1  ;;  %v539_v25 = vpack.c.bf16 %v482_v16, %v479_v9  ;;  %v486_v35 = vmax.f32 %v390_v22, 0.0  ;;  %v317_v42 = vadd.f32 %v1780_v45, %v204_v31 }
  0x15   :  { %879 = vmatprep.mubr.bf16.mxu1 %v540_v7  ;;  %v320_v43 = vadd.f32 %v1780_v45, %v207_v32  ;;  %v279_v47 = vmul.f32 %v1770_v40, %v166_v36  ;;  %v101_v49 = vunpack.c.h.bf16 %v31_v33  ;;  %v211_v53 = vmul.f32 %v1744_v26, %v98_v44  ;;  %v33_v7 = vld [vmem:[%s2245_s0 + $0x48] sm:$0xff] }
  0x16   :  { %v280_v21 = vmul.f32 %v1744_v26, %v167_v14  ;;  %v170_v54 = vunpack.c.h.bf16 %v77_v38  ;;  %v173_v61 = vunpack.c.h.bf16 %v79_v50  ;;  %v97_v1 = vunpack.c.l.bf16 %v29_v24 }
  0x17   :  { %1474 = vmatpush3.bf16.msra.mxu0 %v1656_v30  ;;  %1642 = vmatpush3.bf16.msra.mxu1 %v1656_v30  ;;  %v417_v30 = vmax.f32 %v321_v17, 0.0  ;;  %v416_v52 = vmax.f32 %v320_v43, 0.0  ;;  %v214_v58 = vmul.f32 %v1744_v26, %v101_v49  ;;  %v324_v60 = vadd.f32 %v1748_v28, %v211_v53  ;;  %v81_v17 = vld [vmem:[%s2245_s0 + $0x168] sm:$0xff]  ;;  %v37_v53 = vld [vmem:[%s2245_s0 + $0x60] sm:$0xff] }
  0x18   :  { %1475 = vmatprep.subr.bf16.mxu0 %v1657_v37  ;;  %1635 = vmatprep.subr.bf16.mxu1 %v1657_v37  ;;  %v393_v34 = vadd.f32 %v1748_v28, %v280_v21  ;;  %v276_v37 = vmul.f32 %v1770_v40, %v163_v23  ;;  %v283_v62 = vmul.f32 %v1744_v26, %v170_v54  ;;  %v100_v2 = vunpack.c.l.bf16 %v31_v33 }
  0x19   :  { %v507_v41 = vpack.c.bf16 %v417_v30, %v414_v20  ;;  %v327_v0 = vadd.f32 %v1748_v28, %v214_v58  ;;  %v420_v3 = vmax.f32 %v324_v60, 0.0  ;;  %v286_v4 = vmul.f32 %v1744_v26, %v173_v61  ;;  %v83_v30 = vld [vmem:[%s2245_s0 + $0x174] sm:$0xff]  ;;  %v39_v58 = vld [vmem:[%s2245_s0 + $0x6c] sm:$0xff] }
  0x1a   :  { %v489_v46 = vmax.f32 %v393_v34, 0.0  ;;  %v389_v48 = vadd.f32 %v1780_v45, %v276_v37  ;;  %v396_v5 = vadd.f32 %v1748_v28, %v283_v62  ;;  %v210_v10 = vmul.f32 %v1770_v40, %v97_v1 }
  0x1b   :  { %1476 = vmatpush3.bf16.msra.mxu0 %v1658_v51  ;;  %1643 = vmatpush3.bf16.msra.mxu1 %v1658_v51  ;;  %v413_v51 = vmax.f32 %v317_v42, 0.0  ;;  %v423_v9 = vmax.f32 %v327_v0, 0.0  ;;  %v399_v13 = vadd.f32 %v1748_v28, %v286_v4  ;;  %v172_v15 = vunpack.c.l.bf16 %v79_v50 }
  0x1c   :  { %1477 = vmatprep.subr.bf16.mxu0 %v1659_v56  ;;  %1636 = vmatprep.subr.bf16.mxu1 %v1659_v56  ;;  %v543_v55 = vpack.c.bf16 %v489_v46, %v486_v35  ;;  %v392_v56 = vadd.f32 %v1780_v45, %v279_v47  ;;  %v485_v57 = vmax.f32 %v389_v48, 0.0  ;;  %v492_v14 = vmax.f32 %v396_v5, 0.0 }
  0x1d   :  { %v506_v59 = vpack.c.bf16 %v416_v52, %v413_v51  ;;  %v510_v18 = vpack.c.bf16 %v423_v9, %v420_v3  ;;  %v323_v19 = vadd.f32 %v1780_v45, %v210_v10  ;;  %v104_v21 = vunpack.c.h.bf16 %v33_v7 }
  0x1e   :  { %v488_v63 = vmax.f32 %v392_v56, 0.0  ;;  %v495_v22 = vmax.f32 %v399_v13, 0.0  ;;  %v285_v23 = vmul.f32 %v1770_v40, %v172_v15  ;;  %v176_v34 = vunpack.c.h.bf16 %v81_v17 }
  0x1f   :  { %1478 = vmatpush3.bf16.msra.mxu0 %v1660_v6  ;;  %1644 = vmatpush3.bf16.msra.mxu1 %v1660_v6  ;;  %v169_v6 = vunpack.c.l.bf16 %v77_v38  ;;  %v419_v31 = vmax.f32 %v323_v19, 0.0  ;;  %v217_v33 = vmul.f32 %v1744_v26, %v104_v21  ;;  %v179_v42 = vunpack.c.h.bf16 %v83_v30 }
  0x20   :  { %1593 = vmatprep.subr.bf16.mxu1 %v1661_v12  ;;  %v542_v8 = vpack.c.bf16 %v488_v63, %v485_v57  ;;  %v546_v35 = vpack.c.bf16 %v495_v22, %v492_v14  ;;  %v398_v36 = vadd.f32 %v1780_v45, %v285_v23  ;;  %v289_v43 = vmul.f32 %v1744_v26, %v176_v34  ;;  %v22_v63 = vld [vmem:[%s2245_s0 + $0x8] ss:$12 sps:$4 sm:$0xff]  }
  0x21   :  { %v282_v16 = vmul.f32 %v1770_v40, %v169_v6  ;;  %v103_v47 = vunpack.c.l.bf16 %v33_v7  ;;  %v292_v50 = vmul.f32 %v1744_v26, %v179_v42  ;;  %v175_v52 = vunpack.c.l.bf16 %v81_v17 }
  0x22   :  { %784 = vmatmul.mubr.bf16.vlgmr.msra.gmra.mrb[0].mxu0 %v503_v11  ;;  %880 = vmatmul.mubr.bf16.vlgmr.msra.gmra.mrb[0].mxu1 %v539_v25  ;;  %v213_v11 = vmul.f32 %v1770_v40, %v100_v2  ;;  %v494_v44 = vmax.f32 %v398_v36, 0.0  ;;  %v402_v51 = vadd.f32 %v1748_v28, %v289_v43  ;;  %v178_v61 = vunpack.c.l.bf16 %v83_v30 }
  0x23   :  { %1594 = vmatpush3.bf16.msra.mxu1 %v1661_v12  ;;  %791 = vmatprep.mubr.bf16.mxu0 %v507_v41  ;;  %v35_v12 = vld [vmem:[%s2245_s0 + $0x54] sm:$0xff]  ;;  %v395_v24 = vadd.f32 %v1780_v45, %v282_v16  ;;  %v330_v41 = vadd.f32 %v1748_v28, %v217_v33  ;;  %v216_v56 = vmul.f32 %v1770_v40, %v103_v47  ;;  %v110_v3 = vunpack.c.h.bf16 %v37_v53  ;;  %v26_v16 = vld [vmem:[%s2245_s0 + $0x20] ss:$12 sps:$4 sm:$0xff]  }
  0x24   :  { %1595 = vmatprep.subr.bf16.mxu1 %v1662_v39  ;;  %887 = vmatprep.mubr.bf16.mxu1 %v543_v55  ;;  %v326_v20 = vadd.f32 %v1780_v45, %v213_v11  ;;  %v107_v25 = vunpack.c.h.bf16 %v35_v12  ;;  %v106_v48 = vunpack.c.l.bf16 %v35_v12  ;;  %v498_v60 = vmax.f32 %v402_v51, 0.0  ;;  %v41_v33 = vld [vmem:[%s2245_s0 + $0x78] sm:$0xff] }
  0x25   :  { %v491_v37 = vmax.f32 %v395_v24, 0.0  ;;  %v426_v49 = vmax.f32 %v330_v41, 0.0  ;;  %v288_v62 = vmul.f32 %v1770_v40, %v175_v52  ;;  %v329_v1 = vadd.f32 %v1780_v45, %v216_v56 }
  0x26   :  { %v422_v32 = vmax.f32 %v326_v20, 0.0  ;;  %v220_v38 = vmul.f32 %v1744_v26, %v107_v25  ;;  %v219_v57 = vmul.f32 %v1770_v40, %v106_v48  ;;  %v291_v5 = vmul.f32 %v1770_v40, %v178_v61 }
  0x27   :  { %1596 = vmatpush3.bf16.msra.mxu1 %v1662_v39  ;;  %v545_v54 = vpack.c.bf16 %v494_v44, %v491_v37  ;;  %v401_v6 = vadd.f32 %v1780_v45, %v288_v62  ;;  %v113_v7 = vunpack.c.h.bf16 %v39_v58  ;;  %v223_v10 = vmul.f32 %v1744_v26, %v110_v3  ;;  %v30_v44 = vld [vmem:[%s2245_s0 + $0x38] ss:$12 sps:$4 sm:$0xff]   ;;  %v34_v62 = vld [vmem:[%s2245_s0 + $0x50] ss:$12 sps:$4 sm:$0xff]  }
  0x28   :  { %v509_v39 = vpack.c.bf16 %v422_v32, %v419_v31  ;;  %v333_v46 = vadd.f32 %v1748_v28, %v220_v38  ;;  %v332_v2 = vadd.f32 %v1780_v45, %v219_v57  ;;  %v87_v11 = vunpack.c.l.bf16 %v22_v63  ;;  %v43_v38 = vld [vmem:[%s2245_s0 + $0x84] sm:$0xff] }
  0x29   :  { %v404_v13 = vadd.f32 %v1780_v45, %v291_v5  ;;  %v497_v14 = vmax.f32 %v401_v6, 0.0  ;;  %v226_v15 = vmul.f32 %v1744_v26, %v113_v7  ;;  %v90_v19 = vunpack.c.h.bf16 %v22_v63 }
  0x2a   :  { %792 = vmatmul.mubr.bf16.gmra.mrb[4].mxu0 %v506_v59  ;;  %888 = vmatmul.mubr.bf16.gmra.mrb[4].mxu1 %v542_v8  ;;  %v429_v55 = vmax.f32 %v333_v46, 0.0  ;;  %v405_v59 = vadd.f32 %v1748_v28, %v292_v50  ;;  %v425_v8 = vmax.f32 %v329_v1, 0.0  ;;  %v428_v9 = vmax.f32 %v332_v2, 0.0 }
  0x2b   :  { %799 = vmatprep.mubr.bf16.mxu0 %v510_v18  ;;  %895 = vmatprep.mubr.bf16.mxu1 %v546_v35  ;;  %v336_v18 = vadd.f32 %v1748_v28, %v223_v10  ;;  %v200_v20 = vmul.f32 %v1746_v27, %v87_v11  ;;  %v500_v21 = vmax.f32 %v404_v13, 0.0  ;;  %v339_v22 = vadd.f32 %v1748_v28, %v226_v15  ;;  %v45_v11 = vld [vmem:[%s2245_s0 + $0x90] sm:$0xff] }
  0x2c   :  { %v513_v0 = vpack.c.bf16 %v429_v55, %v426_v49  ;;  %v501_v4 = vmax.f32 %v405_v59, 0.0  ;;  %v512_v17 = vpack.c.bf16 %v428_v9, %v425_v8  ;;  %v109_v23 = vunpack.c.l.bf16 %v37_v53 }
  0x2d   :  { %v112_v24 = vunpack.c.l.bf16 %v39_v58  ;;  %v432_v25 = vmax.f32 %v336_v18, 0.0  ;;  %v203_v30 = vmul.f32 %v1746_v27, %v90_v19  ;;  %v313_v31 = vadd.f32 %v1750_v29, %v200_v20 }
  0x2e   :  { %v549_v12 = vpack.c.bf16 %v501_v4, %v498_v60  ;;  %v93_v32 = vunpack.c.l.bf16 %v26_v16  ;;  %v548_v34 = vpack.c.bf16 %v500_v21, %v497_v14  ;;  %v435_v35 = vmax.f32 %v339_v22, 0.0  ;;  %v38_v21 = vld [vmem:[%s2245_s0 + $0x68] ss:$12 sps:$4 sm:$0xff]  }
  0x2f   :  { %v222_v36 = vmul.f32 %v1770_v40, %v109_v23  ;;  %v225_v37 = vmul.f32 %v1770_v40, %v112_v24  ;;  %v409_v41 = vmax.f32 %v313_v31, 0.0  ;;  %v96_v42 = vunpack.c.h.bf16 %v26_v16  ;;  %v47_v16 = vld [vmem:[%s2245_s0 + $0x9c] sm:$0xff] }
  0x30   :  { %v206_v43 = vmul.f32 %v1746_v27, %v93_v32  ;;  %v516_v46 = vpack.c.bf16 %v435_v35, %v432_v25  ;;  %v116_v49 = vunpack.c.h.bf16 %v41_v33  ;;  %v119_v53 = vunpack.c.h.bf16 %v43_v38 }
  0x31   :  { %v335_v47 = vadd.f32 %v1780_v45, %v222_v36  ;;  %v338_v48 = vadd.f32 %v1780_v45, %v225_v37  ;;  %v209_v51 = vmul.f32 %v1746_v27, %v96_v42  ;;  %v99_v57 = vunpack.c.l.bf16 %v30_v44 }
  0x32   :  { %800 = vmatmul.mubr.bf16.gmra.mrb[8].mxu0 %v509_v39  ;;  %896 = vmatmul.mubr.bf16.gmra.mrb[8].mxu1 %v545_v54  ;;  %v316_v39 = vadd.f32 %v1750_v29, %v203_v30  ;;  %v319_v52 = vadd.f32 %v1750_v29, %v206_v43  ;;  %v229_v56 = vmul.f32 %v1744_v26, %v116_v49  ;;  %v102_v1 = vunpack.c.h.bf16 %v30_v44  ;;  %v42_v43 = vld [vmem:[%s2245_s0 + $0x80] ss:$12 sps:$4 sm:$0xff]  }
  0x33   :  { %807 = vmatprep.mubr.bf16.mxu0 %v513_v0  ;;  %903 = vmatprep.mubr.bf16.mxu1 %v549_v12  ;;  %v431_v54 = vmax.f32 %v335_v47, 0.0  ;;  %v434_v55 = vmax.f32 %v338_v48, 0.0  ;;  %v322_v59 = vadd.f32 %v1750_v29, %v209_v51  ;;  %v232_v61 = vmul.f32 %v1744_v26, %v119_v53 }
  0x34   :  { %v412_v50 = vmax.f32 %v316_v39, 0.0  ;;  %v415_v60 = vmax.f32 %v319_v52, 0.0  ;;  %v342_v0 = vadd.f32 %v1748_v28, %v229_v56  ;;  %v212_v2 = vmul.f32 %v1746_v27, %v99_v57  ;;  %v49_v57 = vld [vmem:[%s2245_s0 + $0xa8] sm:$0xff] }
  0x35   :  { %v515_v63 = vpack.c.bf16 %v434_v55, %v431_v54  ;;  %v418_v3 = vmax.f32 %v322_v59, 0.0  ;;  %v345_v4 = vadd.f32 %v1748_v28, %v232_v61  ;;  %v115_v5 = vunpack.c.l.bf16 %v41_v33 }
  0x36   :  { %v505_v58 = vpack.c.bf16 %v412_v50, %v409_v41  ;;  %v118_v6 = vunpack.c.l.bf16 %v43_v38  ;;  %v438_v7 = vmax.f32 %v342_v0, 0.0  ;;  %v215_v8 = vmul.f32 %v1746_v27, %v102_v1 }
  0x37   :  { %v325_v9 = vadd.f32 %v1750_v29, %v212_v2  ;;  %v105_v10 = vunpack.c.l.bf16 %v34_v62  ;;  %v508_v12 = vpack.c.bf16 %v418_v3, %v415_v60  ;;  %v441_v13 = vmax.f32 %v345_v4, 0.0  ;;  %v46_v3 = vld [vmem:[%s2245_s0 + $0x98] ss:$12 sps:$4 sm:$0xff]  }
  0x38   :  { %v228_v14 = vmul.f32 %v1770_v40, %v115_v5  ;;  %v231_v15 = vmul.f32 %v1770_v40, %v118_v6  ;;  %v108_v19 = vunpack.c.h.bf16 %v34_v62  ;;  %v122_v25 = vunpack.c.h.bf16 %v45_v11  ;;  %v51_v62 = vld [vmem:[%s2245_s0 + $0xb4] sm:$0xff] }
  0x39   :  { %v421_v18 = vmax.f32 %v325_v9, 0.0  ;;  %v218_v20 = vmul.f32 %v1746_v27, %v105_v10  ;;  %v519_v22 = vpack.c.bf16 %v441_v13, %v438_v7  ;;  %v125_v33 = vunpack.c.h.bf16 %v47_v16 }
  0x3a   :  { %808 = vmatmul.mubr.bf16.gmra.mrb[12].mxu0 %v512_v17  ;;  %904 = vmatmul.mubr.bf16.gmra.mrb[12].mxu1 %v548_v34  ;;  %v328_v17 = vadd.f32 %v1750_v29, %v215_v8  ;;  %v341_v23 = vadd.f32 %v1780_v45, %v228_v14  ;;  %v344_v24 = vadd.f32 %v1780_v45, %v231_v15  ;;  %v111_v37 = vunpack.c.l.bf16 %v38_v21 }
  0x3b   :  { %815 = vmatprep.mubr.bf16.mxu0 %v516_v46  ;;  %1597 = vmatprep.mubr.msk.bf16.mxu1 %vm702_vm0, %v505_v58  ;;  %v221_v31 = vmul.f32 %v1746_v27, %v108_v19  ;;  %v331_v32 = vadd.f32 %v1750_v29, %v218_v20  ;;  %v235_v36 = vmul.f32 %v1744_v26, %v122_v25  ;;  %v114_v47 = vunpack.c.h.bf16 %v38_v21  ;;  %v50_v20 = vld [vmem:[%s2245_s0 + $0xb0] ss:$12 sps:$4 sm:$0xff]  }
  0x3c   :  { %v424_v30 = vmax.f32 %v328_v17, 0.0  ;;  %v437_v34 = vmax.f32 %v341_v23, 0.0  ;;  %v440_v35 = vmax.f32 %v344_v24, 0.0  ;;  %v238_v42 = vmul.f32 %v1744_v26, %v125_v33 }
  0x3d   :  { %v334_v39 = vadd.f32 %v1750_v29, %v221_v31  ;;  %v427_v41 = vmax.f32 %v331_v32, 0.0  ;;  %v348_v46 = vadd.f32 %v1748_v28, %v235_v36  ;;  %v224_v48 = vmul.f32 %v1746_v27, %v111_v37  ;;  %v53_v37 = vld [vmem:[%s2245_s0 + $0xc0] sm:$0xff] }
  0x3e   :  { %v511_v38 = vpack.c.bf16 %v424_v30, %v421_v18  ;;  %v518_v44 = vpack.c.bf16 %v440_v35, %v437_v34  ;;  %v351_v50 = vadd.f32 %v1748_v28, %v238_v42  ;;  %v121_v51 = vunpack.c.l.bf16 %v45_v11 }
  0x3f   :  { %v430_v49 = vmax.f32 %v334_v39, 0.0  ;;  %v124_v52 = vunpack.c.l.bf16 %v47_v16  ;;  %v444_v53 = vmax.f32 %v348_v46, 0.0  ;;  %v227_v54 = vmul.f32 %v1746_v27, %v114_v47 }
  0x40   :  { %v337_v55 = vadd.f32 %v1750_v29, %v224_v48  ;;  %v117_v56 = vunpack.c.l.bf16 %v42_v43  ;;  %v447_v59 = vmax.f32 %v351_v50, 0.0  ;;  %v234_v60 = vmul.f32 %v1770_v40, %v121_v51 }
  0x41   :  { %v514_v58 = vpack.c.bf16 %v430_v49, %v427_v41  ;;  %v237_v61 = vmul.f32 %v1770_v40, %v124_v52  ;;  %v120_v1 = vunpack.c.h.bf16 %v42_v43  ;;  %v128_v7 = vunpack.c.h.bf16 %v49_v57  ;;  %v55_v43 = vld [vmem:[%s2245_s0 + $0xcc] sm:$0xff]  ;;  %v54_v49 = vld [vmem:[%s2245_s0 + $0xc8] ss:$12 sps:$4 sm:$0xff]  }
  0x42   :  { %816 = vmatmul.mubr.bf16.gmra.mrb[16].mxu0 %v515_v63  ;;  %1598 = vmatmul.mubr.msk.bf16.vlgmr.msra.gmra.mrb[16].mxu1 %vm702_vm0, %v508_v12  ;;  %v340_v63 = vadd.f32 %v1750_v29, %v227_v54  ;;  %v433_v0 = vmax.f32 %v337_v55, 0.0  ;;  %v230_v2 = vmul.f32 %v1746_v27, %v117_v56  ;;  %v522_v4 = vpack.c.bf16 %v447_v59, %v444_v53 }
  0x43   :  { %823 = vmatprep.mubr.bf16.mxu0 %v519_v22  ;;  %1601 = vmatprep.mubr.msk.bf16.mxu1 %vm702_vm0, %v511_v38  ;;  %v347_v5 = vadd.f32 %v1780_v45, %v234_v60  ;;  %v350_v6 = vadd.f32 %v1780_v45, %v237_v61  ;;  %v233_v9 = vmul.f32 %v1746_v27, %v120_v1  ;;  %v131_v11 = vunpack.c.h.bf16 %v51_v62 }
  0x44   :  { %v436_v8 = vmax.f32 %v340_v63, 0.0  ;;  %v343_v10 = vadd.f32 %v1750_v29, %v230_v2  ;;  %v241_v14 = vmul.f32 %v1744_v26, %v128_v7  ;;  %v123_v15 = vunpack.c.l.bf16 %v46_v3  ;;  %v58_v2 = vld [vmem:[%s2245_s0 + $0xe0] ss:$12 sps:$4 sm:$0xff]  }
  0x45   :  { %v443_v12 = vmax.f32 %v347_v5, 0.0  ;;  %v446_v13 = vmax.f32 %v350_v6, 0.0  ;;  %v346_v17 = vadd.f32 %v1750_v29, %v233_v9  ;;  %v244_v19 = vmul.f32 %v1744_v26, %v131_v11 }
  0x46   :  { %v517_v16 = vpack.c.bf16 %v436_v8, %v433_v0  ;;  %v439_v18 = vmax.f32 %v343_v10, 0.0  ;;  %v354_v22 = vadd.f32 %v1748_v28, %v241_v14  ;;  %v126_v23 = vunpack.c.h.bf16 %v46_v3 }
  0x47   :  { %v521_v21 = vpack.c.bf16 %v446_v13, %v443_v12  ;;  %v236_v24 = vmul.f32 %v1746_v27, %v123_v15  ;;  %v442_v25 = vmax.f32 %v346_v17, 0.0  ;;  %v357_v30 = vadd.f32 %v1748_v28, %v244_v19  ;;  %v57_v15 = vld [vmem:[%s2245_s0 + $0xd8] sm:$0xff] }
  0x48   :  { %v127_v31 = vunpack.c.l.bf16 %v49_v57  ;;  %v130_v32 = vunpack.c.l.bf16 %v51_v62  ;;  %v450_v33 = vmax.f32 %v354_v22, 0.0  ;;  %v239_v34 = vmul.f32 %v1746_v27, %v126_v23 }
  0x49   :  { %v349_v35 = vadd.f32 %v1750_v29, %v236_v24  ;;  %v129_v36 = vunpack.c.l.bf16 %v50_v20  ;;  %v520_v38 = vpack.c.bf16 %v442_v25, %v439_v18  ;;  %v453_v39 = vmax.f32 %v357_v30, 0.0  ;;  %v62_v25 = vld [vmem:[%s2245_s0 + $0xf8] ss:$12 sps:$4 sm:$0xff]  }
  0x4a   :  { %824 = vmatmul.mubr.bf16.gmra.mrb[20].mxu0 %v518_v44  ;;  %1602 = vmatmul.mubr.msk.bf16.gmra.mrb[20].mxu1 %vm702_vm0, %v514_v58  ;;  %v240_v41 = vmul.f32 %v1770_v40, %v127_v31  ;;  %v243_v42 = vmul.f32 %v1770_v40, %v130_v32  ;;  %v352_v44 = vadd.f32 %v1750_v29, %v239_v34  ;;  %v132_v47 = vunpack.c.h.bf16 %v50_v20  ;;  %v59_v20 = vld [vmem:[%s2245_s0 + $0xe4] sm:$0xff] }
  0x4b   :  { %831 = vmatprep.mubr.bf16.mxu0 %v522_v4  ;;  %1605 = vmatprep.mubr.msk.bf16.mxu1 %vm702_vm0, %v517_v16  ;;  %v445_v46 = vmax.f32 %v349_v35, 0.0  ;;  %v242_v48 = vmul.f32 %v1746_v27, %v129_v36  ;;  %v525_v50 = vpack.c.bf16 %v453_v39, %v450_v33  ;;  %v134_v53 = vunpack.c.h.bf16 %v53_v37 }
  0x4c   :  { %v353_v51 = vadd.f32 %v1780_v45, %v240_v41  ;;  %v356_v52 = vadd.f32 %v1780_v45, %v243_v42  ;;  %v448_v54 = vmax.f32 %v352_v44, 0.0  ;;  %v245_v55 = vmul.f32 %v1746_v27, %v132_v47 }
  0x4d   :  { %v355_v56 = vadd.f32 %v1750_v29, %v242_v48  ;;  %v137_v57 = vunpack.c.h.bf16 %v55_v43  ;;  %v247_v60 = vmul.f32 %v1744_v26, %v134_v53  ;;  %v135_v61 = vunpack.c.l.bf16 %v54_v49  ;;  %v66_v48 = vld [vmem:[%s2245_s0 + $0x110] ss:$12 sps:$4 sm:$0xff]  }
  0x4e   :  { %v449_v58 = vmax.f32 %v353_v51, 0.0  ;;  %v452_v59 = vmax.f32 %v356_v52, 0.0  ;;  %v523_v62 = vpack.c.bf16 %v448_v54, %v445_v46  ;;  %v358_v63 = vadd.f32 %v1750_v29, %v245_v55 }
  0x4f   :  { %v451_v0 = vmax.f32 %v355_v56, 0.0  ;;  %v250_v1 = vmul.f32 %v1744_v26, %v137_v57  ;;  %v360_v4 = vadd.f32 %v1748_v28, %v247_v60  ;;  %v138_v5 = vunpack.c.h.bf16 %v54_v49 }
  0x50   :  { %v524_v3 = vpack.c.bf16 %v452_v59, %v449_v58  ;;  %v248_v6 = vmul.f32 %v1746_v27, %v135_v61  ;;  %v454_v7 = vmax.f32 %v358_v63, 0.0  ;;  %v133_v9 = vunpack.c.l.bf16 %v53_v37  ;;  %v61_v61 = vld [vmem:[%s2245_s0 + $0xf0] sm:$0xff] }
  0x51   :  { %v363_v8 = vadd.f32 %v1748_v28, %v250_v1  ;;  %v136_v10 = vunpack.c.l.bf16 %v55_v43  ;;  %v456_v11 = vmax.f32 %v360_v4, 0.0  ;;  %v251_v12 = vmul.f32 %v1746_v27, %v138_v5 }
  0x52   :  { %832 = vmatmul.mubr.bf16.gmra.mrb[24].mxu0 %v521_v21  ;;  %1606 = vmatmul.mubr.msk.bf16.gmra.mrb[24].mxu1 %vm702_vm0, %v520_v38  ;;  %v361_v13 = vadd.f32 %v1750_v29, %v248_v6  ;;  %v141_v14 = vunpack.c.l.bf16 %v58_v2  ;;  %v526_v16 = vpack.c.bf16 %v454_v7, %v451_v0  ;;  %v246_v18 = vmul.f32 %v1770_v40, %v133_v9  ;;  %v70_v7 = vld [vmem:[%s2245_s0 + $0x128] ss:$12 sps:$4 sm:$0xff]  }
  0x53   :  { %839 = vmatprep.mubr.bf16.mxu0 %v525_v50  ;;  %1609 = vmatprep.mubr.msk.bf16.mxu1 %vm702_vm0, %v523_v62  ;;  %v459_v17 = vmax.f32 %v363_v8, 0.0  ;;  %v249_v19 = vmul.f32 %v1770_v40, %v136_v10  ;;  %v364_v21 = vadd.f32 %v1750_v29, %v251_v12  ;;  %v144_v23 = vunpack.c.h.bf16 %v58_v2  ;;  %v63_v2 = vld [vmem:[%s2245_s0 + $0xfc] sm:$0xff] }
  0x54   :  { %v457_v22 = vmax.f32 %v361_v13, 0.0  ;;  %v254_v24 = vmul.f32 %v1746_v27, %v141_v14  ;;  %v359_v31 = vadd.f32 %v1780_v45, %v246_v18  ;;  %v140_v33 = vunpack.c.h.bf16 %v57_v15 }
  0x55   :  { %v528_v30 = vpack.c.bf16 %v459_v17, %v456_v11  ;;  %v362_v32 = vadd.f32 %v1780_v45, %v249_v19  ;;  %v460_v34 = vmax.f32 %v364_v21, 0.0  ;;  %v257_v35 = vmul.f32 %v1746_v27, %v144_v23 }
  0x56   :  { %v367_v36 = vadd.f32 %v1750_v29, %v254_v24  ;;  %v143_v37 = vunpack.c.h.bf16 %v59_v20  ;;  %v455_v38 = vmax.f32 %v359_v31, 0.0  ;;  %v253_v41 = vmul.f32 %v1744_v26, %v140_v33  ;;  %v74_v24 = vld [vmem:[%s2245_s0 + $0x140] ss:$12 sps:$4 sm:$0xff]  }
  0x57   :  { %v458_v39 = vmax.f32 %v362_v32, 0.0  ;;  %v147_v42 = vunpack.c.l.bf16 %v62_v25  ;;  %v529_v43 = vpack.c.bf16 %v460_v34, %v457_v22  ;;  %v370_v44 = vadd.f32 %v1750_v29, %v257_v35 }
  0x58   :  { %v463_v46 = vmax.f32 %v367_v36, 0.0  ;;  %v256_v47 = vmul.f32 %v1744_v26, %v143_v37  ;;  %v366_v50 = vadd.f32 %v1748_v28, %v253_v41  ;;  %v150_v51 = vunpack.c.h.bf16 %v62_v25 }
  0x59   :  { %v527_v49 = vpack.c.bf16 %v458_v39, %v455_v38  ;;  %v260_v52 = vmul.f32 %v1746_v27, %v147_v42  ;;  %v466_v53 = vmax.f32 %v370_v44, 0.0  ;;  %v139_v55 = vunpack.c.l.bf16 %v57_v15  ;;  %v65_v42 = vld [vmem:[%s2245_s0 + $0x108] sm:$0xff] }
  0x5a   :  { %840 = vmatmul.mubr.bf16.gmra.mrb[28].mxu0 %v524_v3  ;;  %1610 = vmatmul.mubr.msk.bf16.gmra.mrb[28].mxu1 %vm702_vm0, %v526_v16  ;;  %v369_v54 = vadd.f32 %v1748_v28, %v256_v47  ;;  %v142_v56 = vunpack.c.l.bf16 %v59_v20  ;;  %v462_v57 = vmax.f32 %v366_v50, 0.0  ;;  %v263_v58 = vmul.f32 %v1746_v27, %v150_v51 }
  0x5b   :  { %847 = vmatprep.mubr.bf16.mxu0 %v528_v30  ;;  %1613 = vmatprep.mubr.msk.bf16.mxu1 %vm702_vm0, %v529_v43  ;;  %v373_v59 = vadd.f32 %v1750_v29, %v260_v52  ;;  %v153_v60 = vunpack.c.l.bf16 %v66_v48  ;;  %v532_v62 = vpack.c.bf16 %v466_v53, %v463_v46  ;;  %v252_v0 = vmul.f32 %v1770_v40, %v139_v55  ;;  %v78_v53 = vld [vmem:[%s2245_s0 + $0x158] ss:$12 sps:$4 sm:$0xff]  }
  0x5c   :  { %v465_v63 = vmax.f32 %v369_v54, 0.0  ;;  %v255_v1 = vmul.f32 %v1770_v40, %v142_v56  ;;  %v376_v3 = vadd.f32 %v1750_v29, %v263_v58  ;;  %v156_v5 = vunpack.c.h.bf16 %v66_v48  ;;  %v67_v48 = vld [vmem:[%s2245_s0 + $0x114] sm:$0xff] }
  0x5d   :  { %v469_v4 = vmax.f32 %v373_v59, 0.0  ;;  %v266_v6 = vmul.f32 %v1746_v27, %v153_v60  ;;  %v365_v9 = vadd.f32 %v1780_v45, %v252_v0  ;;  %v146_v11 = vunpack.c.h.bf16 %v61_v61 }
  0x5e   :  { %v531_v8 = vpack.c.bf16 %v465_v63, %v462_v57  ;;  %v368_v10 = vadd.f32 %v1780_v45, %v255_v1  ;;  %v472_v12 = vmax.f32 %v376_v3, 0.0  ;;  %v269_v13 = vmul.f32 %v1746_v27, %v156_v5 }
  0x5f   :  { %v379_v14 = vadd.f32 %v1750_v29, %v266_v6  ;;  %v149_v15 = vunpack.c.h.bf16 %v63_v2  ;;  %v461_v16 = vmax.f32 %v365_v9, 0.0  ;;  %v259_v18 = vmul.f32 %v1744_v26, %v146_v11  ;;  %v82_v6 = vld [vmem:[%s2245_s0 + $0x170] ss:$12 sps:$4 sm:$0xff]  }
  0x60   :  { %v464_v17 = vmax.f32 %v368_v10, 0.0  ;;  %v159_v19 = vunpack.c.l.bf16 %v70_v7  ;;  %v535_v20 = vpack.c.bf16 %v472_v12, %v469_v4  ;;  %v382_v21 = vadd.f32 %v1750_v29, %v269_v13 }
  0x61   :  { %v475_v22 = vmax.f32 %v379_v14, 0.0  ;;  %v262_v23 = vmul.f32 %v1744_v26, %v149_v15  ;;  %v372_v30 = vadd.f32 %v1748_v28, %v259_v18  ;;  %v162_v31 = vunpack.c.h.bf16 %v70_v7 }
  0x62   :  { %848 = vmatmul.mubr.bf16.gmra.mrb[32].mxu0 %v527_v49  ;;  %1614 = vmatmul.mubr.msk.bf16.gmra.mrb[32].mxu1 %vm702_vm0, %v532_v62  ;;  %v530_v25 = vpack.c.bf16 %v464_v17, %v461_v16  ;;  %v272_v32 = vmul.f32 %v1746_v27, %v159_v19  ;;  %v478_v33 = vmax.f32 %v382_v21, 0.0  ;;  %v145_v35 = vunpack.c.l.bf16 %v61_v61 }
  0x63   :  { %855 = vmatprep.mubr.bf16.mxu0 %v531_v8  ;;  %1617 = vmatprep.mubr.msk.bf16.mxu1 %vm702_vm0, %v535_v20  ;;  %v375_v34 = vadd.f32 %v1748_v28, %v262_v23  ;;  %v148_v36 = vunpack.c.l.bf16 %v63_v2  ;;  %v468_v37 = vmax.f32 %v372_v30, 0.0  ;;  %v275_v38 = vmul.f32 %v1746_v27, %v162_v31 }
  0x64   :  { %v385_v39 = vadd.f32 %v1750_v29, %v272_v32  ;;  %v165_v41 = vunpack.c.l.bf16 %v74_v24  ;;  %v538_v43 = vpack.c.bf16 %v478_v33, %v475_v22  ;;  %v258_v46 = vmul.f32 %v1770_v40, %v145_v35 }
  0x65   :  { %v471_v44 = vmax.f32 %v375_v34, 0.0  ;;  %v261_v47 = vmul.f32 %v1770_v40, %v148_v36  ;;  %v388_v49 = vadd.f32 %v1750_v29, %v275_v38  ;;  %v168_v51 = vunpack.c.h.bf16 %v74_v24 }
  0x66   :  { %v481_v50 = vmax.f32 %v385_v39, 0.0  ;;  %v278_v52 = vmul.f32 %v1746_v27, %v165_v41  ;;  %v371_v55 = vadd.f32 %v1780_v45, %v258_v46  ;;  %v152_v57 = vunpack.c.h.bf16 %v65_v42 }
  0x67   :  { %v534_v54 = vpack.c.bf16 %v471_v44, %v468_v37  ;;  %v374_v56 = vadd.f32 %v1780_v45, %v261_v47  ;;  %v484_v58 = vmax.f32 %v388_v49, 0.0  ;;  %v281_v59 = vmul.f32 %v1746_v27, %v168_v51 }
  0x68   :  { %v391_v60 = vadd.f32 %v1750_v29, %v278_v52  ;;  %v155_v61 = vunpack.c.h.bf16 %v67_v48  ;;  %v467_v62 = vmax.f32 %v371_v55, 0.0  ;;  %v265_v0 = vmul.f32 %v1744_v26, %v152_v57 }
  0x69   :  { %v470_v63 = vmax.f32 %v374_v56, 0.0  ;;  %v171_v1 = vunpack.c.l.bf16 %v78_v53  ;;  %v541_v2 = vpack.c.bf16 %v484_v58, %v481_v50  ;;  %v394_v3 = vadd.f32 %v1750_v29, %v281_v59 }
  0x6a   :  { %856 = vmatmul.mubr.bf16.gmra.mrb[36].mxu0 %v530_v25  ;;  %1618 = vmatmul.mubr.msk.bf16.gmra.mrb[36].mxu1 %vm702_vm0, %v538_v43  ;;  %v487_v4 = vmax.f32 %v391_v60, 0.0  ;;  %v268_v5 = vmul.f32 %v1744_v26, %v155_v61  ;;  %v378_v8 = vadd.f32 %v1748_v28, %v265_v0  ;;  %v174_v9 = vunpack.c.h.bf16 %v78_v53 }
  0x6b   :  { %863 = vmatprep.mubr.bf16.mxu0 %v534_v54  ;;  %v533_v7 = vpack.c.bf16 %v470_v63, %v467_v62  ;;  %v284_v10 = vmul.f32 %v1746_v27, %v171_v1  ;;  %1621 = vmatprep.mubr.msk.bf16.mxu1 %vm702_vm0, %v541_v2  ;;  %v490_v11 = vmax.f32 %v394_v3, 0.0  ;;  %v151_v13 = vunpack.c.l.bf16 %v65_v42 }
  0x6c   :  { %v381_v12 = vadd.f32 %v1748_v28, %v268_v5  ;;  %v154_v14 = vunpack.c.l.bf16 %v67_v48  ;;  %v474_v15 = vmax.f32 %v378_v8, 0.0  ;;  %v287_v26 = vmul.f32 %v1746_v27, %v174_v9 }
  0x6d   :  { %v397_v16 = vadd.f32 %v1750_v29, %v284_v10  ;;  %v177_v17 = vunpack.c.l.bf16 %v82_v6  ;;  %v544_v18 = vpack.c.bf16 %v490_v11, %v487_v4  ;;  %v264_v20 = vmul.f32 %v1770_v40, %v151_v13 }
  0x6e   :  { %v477_v19 = vmax.f32 %v381_v12, 0.0  ;;  %v267_v21 = vmul.f32 %v1770_v40, %v154_v14  ;;  %v400_v22 = vadd.f32 %v1750_v29, %v287_v26  ;;  %v180_v24 = vunpack.c.h.bf16 %v82_v6 }
  0x6f   :  { %v493_v23 = vmax.f32 %v397_v16, 0.0  ;;  %v290_v28 = vmul.f32 %v1746_v27, %v177_v17  ;;  %v377_v30 = vadd.f32 %v1780_v45, %v264_v20 }
  0x70   :  { %v537_v25 = vpack.c.bf16 %v477_v19, %v474_v15  ;;  %v380_v31 = vadd.f32 %v1780_v45, %v267_v21  ;;  %v496_v32 = vmax.f32 %v400_v22, 0.0  ;;  %v293_v33 = vmul.f32 %v1746_v27, %v180_v24 }
  0x71   :  { %v403_v34 = vadd.f32 %v1750_v29, %v290_v28  ;;  %v473_v40 = vmax.f32 %v377_v30, 0.0  ;;  %v2148_v28 = vld [vmem:[%s2248_s4] ss:$0 sm:$0xff] }
  0x72   :  { %864 = vmatmul.mubr.bf16.gmra.mrb[40].mxu0 %v533_v7  ;;  %1622 = vmatmul.mubr.msk.bf16.gmra.mrb[40].mxu1 %vm702_vm0, %v544_v18  ;;  %v476_v35 = vmax.f32 %v380_v31, 0.0  ;;  %v547_v36 = vpack.c.bf16 %v496_v32, %v493_v23  ;;  %v406_v37 = vadd.f32 %v1750_v29, %v293_v33 }
  0x73   :  { %871 = vmatprep.mubr.bf16.mxu0 %v537_v25  ;;  %v499_v38 = vmax.f32 %v403_v34, 0.0 }
  0x74   :  { %v536_v39 = vpack.c.bf16 %v476_v35, %v473_v40  ;;  %1625 = vmatprep.mubr.msk.bf16.mxu1 %vm702_vm0, %v547_v36  ;;  %v502_v41 = vmax.f32 %v406_v37, 0.0 }
  0x76   :  { %v550_v42 = vpack.c.bf16 %v502_v41, %v499_v38 }
  0x7a   :  { %872 = vmatmul.mubr.bf16.gmra.mrb[44].mxu0 %v536_v39  ;;  %1626 = vmatmul.mubr.msk.bf16.gmra.mrb[44].mxu1 %vm702_vm0, %v550_v42 }
  0xf5   :  { %v1479_v45 = vpop.f32.mrb[0].mxu0  ;;  %v1551_v43 = vpop.f32.mrb[0].mxu1 }
  0xf6   :  { %v1480_v27 = vpop.f32.mrb[1].mxu0  ;;  %v1552_v44 = vpop.f32.mrb[1].mxu1 }
  0xf7   :  { %v1481_v46 = vadd.f32 %v1480_v27, %v1479_v45  ;;  %v1482_v47 = vpop.f32.mrb[2].mxu0  ;;  %v2129_v48 = vadd.f32 %v1552_v44, %v1551_v43  ;;  %v1554_v49 = vpop.f32.mrb[2].mxu1 }
  0xf8   :  { %v1483_v50 = vpop.f32.mrb[3].mxu0  ;;  %v1555_v29 = vpop.f32.mrb[3].mxu1 }
  0xf9   :  { %v1484_v51 = vadd.f32 %v1483_v50, %v1482_v47  ;;  %v2131_v52 = vadd.f32 %v1555_v29, %v1554_v49  ;;  %v786_v34 = vadd.f32 %v1481_v46, %v2148_v28 }
  0xfb   :  { %v789_v42 = vadd.f32 %v1484_v51, %v2148_v28 }
  0xfd   :  { %v1485_v53 = vpop.f32.mrb[4].mxu0  ;;  %v1557_v54 = vpop.f32.mrb[4].mxu1 }
  0xfe   :  { %v1486_v55 = vpop.f32.mrb[5].mxu0  ;;  %v1558_v56 = vpop.f32.mrb[5].mxu1 }
  0xff   :  { %v1487_v57 = vadd.f32 %v1486_v55, %v1485_v53  ;;  %v1488_v58 = vpop.f32.mrb[6].mxu0  ;;  %v2133_v59 = vadd.f32 %v1558_v56, %v1557_v54  ;;  %v1560_v60 = vpop.f32.mrb[6].mxu1 }
 0x100   :  { %v1489_v61 = vpop.f32.mrb[7].mxu0  ;;  %v1561_v62 = vpop.f32.mrb[7].mxu1 }
 0x101   :  { %v1490_v63 = vadd.f32 %v1489_v61, %v1488_v58  ;;  %v2135_v0 = vadd.f32 %v1561_v62, %v1560_v60  ;;  %v794_v30 = vadd.f32 %v1487_v57, %v2148_v28 }
 0x103   :  { %v797_v37 = vadd.f32 %v1490_v63, %v2148_v28 }
 0x105   :  { %v1491_v1 = vpop.f32.mrb[8].mxu0  ;;  %v1563_v3 = vpop.f32.mrb[8].mxu1 }
 0x106   :  { %v1492_v2 = vpop.f32.mrb[9].mxu0  ;;  %v1564_v6 = vpop.f32.mrb[9].mxu1 }
 0x107   :  { %v1493_v4 = vadd.f32 %v1492_v2, %v1491_v1  ;;  %v1494_v5 = vpop.f32.mrb[10].mxu0  ;;  %v2137_v7 = vadd.f32 %v1564_v6, %v1563_v3  ;;  %v1566_v9 = vpop.f32.mrb[10].mxu1 }
 0x108   :  { %v1495_v8 = vpop.f32.mrb[11].mxu0  ;;  %v1567_v11 = vpop.f32.mrb[11].mxu1 }
 0x109   :  { %v1496_v10 = vadd.f32 %v1495_v8, %v1494_v5  ;;  %v2139_v12 = vadd.f32 %v1567_v11, %v1566_v9  ;;  %v802_v58 = vadd.f32 %v1493_v4, %v2148_v28 }
 0x10b   :  { %v805_v5 = vadd.f32 %v1496_v10, %v2148_v28 }
 0x10d   :  { %v1497_v13 = vpop.f32.mrb[12].mxu0  ;;  %v1569_v26 = vpop.f32.mrb[12].mxu1 }
 0x10e   :  { %v1498_v14 = vpop.f32.mrb[13].mxu0  ;;  %v1570_v17 = vpop.f32.mrb[13].mxu1 }
 0x10f   :  { %v1499_v15 = vadd.f32 %v1498_v14, %v1497_v13  ;;  %v1500_v16 = vpop.f32.mrb[14].mxu0  ;;  %v2141_v19 = vadd.f32 %v1570_v17, %v1569_v26  ;;  %v1572_v21 = vpop.f32.mrb[14].mxu1 }
 0x110   :  { %v1501_v18 = vpop.f32.mrb[15].mxu0  ;;  %v1573_v22 = vpop.f32.mrb[15].mxu1 }
 0x111   :  { %v1502_v20 = vadd.f32 %v1501_v18, %v1500_v16  ;;  %v2143_v23 = vadd.f32 %v1573_v22, %v1572_v21  ;;  %v810_v55 = vadd.f32 %v1499_v15, %v2148_v28 }
 0x113   :  { %v813_v63 = vadd.f32 %v1502_v20, %v2148_v28 }
 0x115   :  { %v1503_v24 = vpop.f32.mrb[16].mxu0  ;;  %v1599_v33 = vpop.f32.mrb[16].mxu1 }
 0x116   :  { %v1504_v25 = vpop.f32.mrb[17].mxu0  ;;  %v955_v35 = vadd.f32 %v1599_v33, %v794_v30  ;;  %v946_v36 = vpop.f32.mrb[17].mxu1 }
 0x117   :  { %v1505_v31 = vadd.f32 %v1504_v25, %v1503_v24  ;;  %v1506_v32 = vpop.f32.mrb[18].mxu0  ;;  %v947_v39 = vadd.f32 %v946_v36, %v786_v34  ;;  %v1600_v41 = vpop.f32.mrb[18].mxu1 }
 0x118   :  { %v1507_v40 = vpop.f32.mrb[19].mxu0  ;;  %v958_v45 = vadd.f32 %v1600_v41, %v797_v37  ;;  %v949_v43 = vpop.f32.mrb[19].mxu1  ;;  %v1075_v44 = vmax.f32 %v955_v35, 0.0 }
 0x119   :  { %v1508_v38 = vadd.f32 %v1507_v40, %v1506_v32  ;;  %v950_v27 = vadd.f32 %v949_v43, %v789_v42  ;;  %v1073_v49 = vmax.f32 %v947_v39, 0.0  ;;  %v818_v22 = vadd.f32 %v1505_v31, %v2148_v28 }
 0x11a   :  { %v1076_v47 = vmax.f32 %v958_v45, 0.0 }
 0x11b   :  { %v1074_v50 = vmax.f32 %v950_v27, 0.0  ;;  %v821_v35 = vadd.f32 %v1508_v38, %v2148_v28 }
 0x11c   :  { %v1376_v53 = vpack.c.bf16 %v1076_v47, %v1075_v44 }
 0x11d   :  { %v1509_v29 = vpop.f32.mrb[20].mxu0  ;;  %v1371_v54 = vpack.c.bf16 %v1074_v50, %v1073_v49  ;;  %v1603_v51 = vpop.f32.mrb[20].mxu1 }
 0x11e   :  { %v1510_v46 = vpop.f32.mrb[21].mxu0  ;;  %1448 = vst [vmem:[%s2249_s5 + $0x8] sm:$0xff] %v1376_v53   ;;  %v971_v61 = vadd.f32 %v1603_v51, %v810_v55  ;;  %v962_v62 = vpop.f32.mrb[21].mxu1 }
 0x11f   :  { %v1511_v56 = vadd.f32 %v1510_v46, %v1509_v29  ;;  %v1512_v57 = vpop.f32.mrb[22].mxu0  ;;  %1372 = vst [vmem:[%s2249_s5] sm:$0xff] %v1371_v54   ;;  %v963_v2 = vadd.f32 %v962_v62, %v802_v58  ;;  %v1604_v3 = vpop.f32.mrb[22].mxu1 }
 0x120   :  { %v1513_v60 = vpop.f32.mrb[23].mxu0  ;;  %v974_v6 = vadd.f32 %v1604_v3, %v813_v63  ;;  %v965_v8 = vpop.f32.mrb[23].mxu1  ;;  %v1079_v11 = vmax.f32 %v971_v61, 0.0 }
 0x121   :  { %v1514_v1 = vadd.f32 %v1513_v60, %v1512_v57  ;;  %v966_v9 = vadd.f32 %v965_v8, %v805_v5  ;;  %v1077_v4 = vmax.f32 %v963_v2, 0.0  ;;  %v826_v18 = vadd.f32 %v1511_v56, %v2148_v28 }
 0x122   :  { %v1080_v13 = vmax.f32 %v974_v6, 0.0 }
 0x123   :  { %v1078_v14 = vmax.f32 %v966_v9, 0.0  ;;  %v829_v32 = vadd.f32 %v1514_v1, %v2148_v28 }
 0x124   :  { %v1386_v26 = vpack.c.bf16 %v1080_v13, %v1079_v11 }
 0x125   :  { %v1515_v15 = vpop.f32.mrb[24].mxu0  ;;  %v1381_v17 = vpack.c.bf16 %v1078_v14, %v1077_v4  ;;  %v1607_v10 = vpop.f32.mrb[24].mxu1 }
 0x126   :  { %v1516_v16 = vpop.f32.mrb[25].mxu0  ;;  %1450 = vst [vmem:[%s2249_s5 + $0x18] sm:$0xff] %v1386_v26   ;;  %v987_v25 = vadd.f32 %v1607_v10, %v826_v18  ;;  %v978_v30 = vpop.f32.mrb[25].mxu1 }
 0x127   :  { %v1517_v21 = vadd.f32 %v1516_v16, %v1515_v15  ;;  %v1518_v20 = vpop.f32.mrb[26].mxu0  ;;  %1449 = vst [vmem:[%s2249_s5 + $0x10] sm:$0xff] %v1381_v17   ;;  %v979_v34 = vadd.f32 %v978_v30, %v818_v22  ;;  %v1608_v40 = vpop.f32.mrb[26].mxu1 }
 0x128   :  { %v1519_v24 = vpop.f32.mrb[27].mxu0  ;;  %v990_v36 = vadd.f32 %v1608_v40, %v829_v32  ;;  %v981_v37 = vpop.f32.mrb[27].mxu1  ;;  %v1083_v41 = vmax.f32 %v987_v25, 0.0 }
 0x129   :  { %v1520_v33 = vadd.f32 %v1519_v24, %v1518_v20  ;;  %v982_v39 = vadd.f32 %v981_v37, %v821_v35  ;;  %v1081_v31 = vmax.f32 %v979_v34, 0.0  ;;  %v834_v38 = vadd.f32 %v1517_v21, %v2148_v28 }
 0x12a   :  { %v1084_v42 = vmax.f32 %v990_v36, 0.0 }
 0x12b   :  { %v1082_v45 = vmax.f32 %v982_v39, 0.0  ;;  %v837_v51 = vadd.f32 %v1520_v33, %v2148_v28 }
 0x12c   :  { %v1396_v27 = vpack.c.bf16 %v1084_v42, %v1083_v41 }
 0x12d   :  { %v1521_v43 = vpop.f32.mrb[28].mxu0  ;;  %v1391_v47 = vpack.c.bf16 %v1082_v45, %v1081_v31  ;;  %v1611_v29 = vpop.f32.mrb[28].mxu1 }
 0x12e   :  { %v1522_v44 = vpop.f32.mrb[29].mxu0  ;;  %1452 = vst [vmem:[%s2249_s5 + $0x28] sm:$0xff] %v1396_v27   ;;  %v994_v54 = vpop.f32.mrb[29].mxu1 }
 0x12f   :  { %v1523_v49 = vadd.f32 %v1522_v44, %v1521_v43  ;;  %v1524_v50 = vpop.f32.mrb[30].mxu0  ;;  %1451 = vst [vmem:[%s2249_s5 + $0x20] sm:$0xff] %v1391_v47   ;;  %v995_v56 = vadd.f32 %v994_v54, %v834_v38  ;;  %v1612_v57 = vpop.f32.mrb[30].mxu1 }
 0x130   :  { %v1525_v53 = vpop.f32.mrb[31].mxu0  ;;  %v997_v61 = vpop.f32.mrb[31].mxu1 }
 0x131   :  { %v842_v46 = vadd.f32 %v1523_v49, %v2148_v28  ;;  %v1526_v55 = vadd.f32 %v1525_v53, %v1524_v50  ;;  %v998_v62 = vadd.f32 %v997_v61, %v837_v51  ;;  %v1085_v1 = vmax.f32 %v995_v56, 0.0 }
 0x133   :  { %v1003_v58 = vadd.f32 %v1611_v29, %v842_v46  ;;  %v845_v60 = vadd.f32 %v1526_v55, %v2148_v28  ;;  %v1086_v2 = vmax.f32 %v998_v62, 0.0  ;;  %v890_v29 = vadd.f32 %v2133_v59, %v2148_v28 }
 0x134   :  { %v882_v55 = vadd.f32 %v2129_v48, %v2148_v28 }
 0x135   :  { %v1006_v63 = vadd.f32 %v1612_v57, %v845_v60  ;;  %v1527_v3 = vpop.f32.mrb[32].mxu0  ;;  %v1087_v5 = vmax.f32 %v1003_v58, 0.0  ;;  %v1401_v9 = vpack.c.bf16 %v1086_v2, %v1085_v1  ;;  %v1615_v14 = vpop.f32.mrb[32].mxu1  ;;  %v893_v60 = vadd.f32 %v2135_v0, %v2148_v28 }
 0x136   :  { %v1528_v8 = vpop.f32.mrb[33].mxu0  ;;  %v1010_v16 = vpop.f32.mrb[33].mxu1 }
 0x137   :  { %v1088_v6 = vmax.f32 %v1006_v63, 0.0  ;;  %v1529_v11 = vadd.f32 %v1528_v8, %v1527_v3  ;;  %v1530_v13 = vpop.f32.mrb[34].mxu0  ;;  %1453 = vst [vmem:[%s2249_s5 + $0x30] sm:$0xff] %v1401_v9   ;;  %v1616_v18 = vpop.f32.mrb[34].mxu1  ;;  %v885_v63 = vadd.f32 %v2131_v52, %v2148_v28  ;;  %v906_v52 = vadd.f32 %v2141_v19, %v2148_v28 }
 0x138   :  { %v1531_v15 = vpop.f32.mrb[35].mxu0  ;;  %v1013_v10 = vpop.f32.mrb[35].mxu1 }
 0x139   :  { %v1406_v4 = vpack.c.bf16 %v1088_v6, %v1087_v5  ;;  %v850_v26 = vadd.f32 %v1529_v11, %v2148_v28  ;;  %v1532_v17 = vadd.f32 %v1531_v15, %v1530_v13 }
 0x13b   :  { %1454 = vst [vmem:[%s2249_s5 + $0x38] sm:$0xff] %v1406_v4   ;;  %v1011_v21 = vadd.f32 %v1010_v16, %v850_v26  ;;  %v853_v20 = vadd.f32 %v1532_v17, %v2148_v28 }
 0x13d   :  { %v1014_v22 = vadd.f32 %v1013_v10, %v853_v20  ;;  %v1533_v24 = vpop.f32.mrb[36].mxu0  ;;  %v1089_v25 = vmax.f32 %v1011_v21, 0.0  ;;  %v2192_v35 = vpop.f32.mrb[36].mxu1  ;;  %v898_v10 = vadd.f32 %v2137_v7, %v2148_v28  ;;  %v901_v7 = vadd.f32 %v2139_v12, %v2148_v28 }
 0x13e   :  { %v1534_v32 = vpop.f32.mrb[37].mxu0  ;;  %v1026_v39 = vpop.f32.mrb[37].mxu1 }
 0x13f   :  { %v1090_v30 = vmax.f32 %v1014_v22, 0.0  ;;  %v1535_v33 = vadd.f32 %v1534_v32, %v1533_v24  ;;  %v1536_v34 = vpop.f32.mrb[38].mxu0  ;;  %v2198_v42 = vpop.f32.mrb[38].mxu1 }
 0x140   :  { %v1537_v36 = vpop.f32.mrb[39].mxu0  ;;  %v1029_v43 = vpop.f32.mrb[39].mxu1 }
 0x141   :  { %v1411_v40 = vpack.c.bf16 %v1090_v30, %v1089_v25  ;;  %v858_v37 = vadd.f32 %v1535_v33, %v2148_v28  ;;  %v1538_v41 = vadd.f32 %v1537_v36, %v1536_v34  ;;  %v909_v30 = vadd.f32 %v2143_v23, %v2148_v28 }
 0x143   :  { %1455 = vst [vmem:[%s2249_s5 + $0x40] sm:$0xff] %v1411_v40   ;;  %v1019_v31 = vadd.f32 %v1615_v14, %v858_v37  ;;  %v861_v45 = vadd.f32 %v1538_v41, %v2148_v28 }
 0x145   :  { %v1022_v27 = vadd.f32 %v1616_v18, %v861_v45  ;;  %v1539_v44 = vpop.f32.mrb[40].mxu0  ;;  %v1091_v47 = vmax.f32 %v1019_v31, 0.0  ;;  %v1623_v54 = vpop.f32.mrb[40].mxu1 }
 0x146   :  { %v1540_v50 = vpop.f32.mrb[41].mxu0  ;;  %v1051_v57 = vadd.f32 %v1623_v54, %v890_v29  ;;  %v1042_v58 = vpop.f32.mrb[41].mxu1 }
 0x147   :  { %v1092_v49 = vmax.f32 %v1022_v27, 0.0  ;;  %v1541_v38 = vadd.f32 %v1540_v50, %v1539_v44  ;;  %v1542_v53 = vpop.f32.mrb[42].mxu0  ;;  %v1043_v59 = vadd.f32 %v1042_v58, %v882_v55  ;;  %v1624_v62 = vpop.f32.mrb[42].mxu1 }
 0x148   :  { %v1543_v56 = vpop.f32.mrb[43].mxu0  ;;  %v1054_v48 = vadd.f32 %v1624_v62, %v893_v60  ;;  %v1045_v3 = vpop.f32.mrb[43].mxu1  ;;  %v1099_v6 = vmax.f32 %v1051_v57, 0.0 }
 0x149   :  { %v1416_v46 = vpack.c.bf16 %v1092_v49, %v1091_v47  ;;  %v866_v51 = vadd.f32 %v1541_v38, %v2148_v28  ;;  %v1544_v61 = vadd.f32 %v1543_v56, %v1542_v53  ;;  %v1046_v5 = vadd.f32 %v1045_v3, %v885_v63 }
 0x14a   :  { %v1100_v8 = vmax.f32 %v1054_v48, 0.0  ;;  %v1097_v0 = vmax.f32 %v1043_v59, 0.0 }
 0x14b   :  { %1456 = vst [vmem:[%s2249_s5 + $0x48] sm:$0xff] %v1416_v46   ;;  %v1027_v1 = vadd.f32 %v1026_v39, %v866_v51  ;;  %v869_v2 = vadd.f32 %v1544_v61, %v2148_v28  ;;  %v1098_v11 = vmax.f32 %v1046_v5, 0.0 }
 0x14c   :  { %v1436_v14 = vpack.c.bf16 %v1100_v8, %v1099_v6 }
 0x14d   :  { %v1030_v9 = vadd.f32 %v1029_v43, %v869_v2  ;;  %v1545_v13 = vpop.f32.mrb[44].mxu0  ;;  %v1093_v4 = vmax.f32 %v1027_v1, 0.0  ;;  %v1431_v16 = vpack.c.bf16 %v1098_v11, %v1097_v0  ;;  %v1627_v20 = vpop.f32.mrb[44].mxu1 }
 0x14e   :  { %v1546_v26 = vpop.f32.mrb[45].mxu0  ;;  %1460 = vst [vmem:[%s2249_s5 + $0x68] sm:$0xff] %v1436_v14   ;;  %v1067_v24 = vadd.f32 %v1627_v20, %v906_v52  ;;  %v1058_v19 = vpop.f32.mrb[45].mxu1 }
 0x14f   :  { %v1094_v15 = vmax.f32 %v1030_v9, 0.0  ;;  %v1547_v17 = vadd.f32 %v1546_v26, %v1545_v13  ;;  %v1548_v18 = vpop.f32.mrb[46].mxu0  ;;  %1459 = vst [vmem:[%s2249_s5 + $0x60] sm:$0xff] %v1431_v16   ;;  %v1059_v33 = vadd.f32 %v1058_v19, %v898_v10  ;;  %v1628_v34 = vpop.f32.mrb[46].mxu1 }
 0x150   :  { %v1549_v22 = vpop.f32.mrb[47].mxu0  ;;  %v1070_v36 = vadd.f32 %v1628_v34, %v909_v30  ;;  %v1061_v39 = vpop.f32.mrb[47].mxu1  ;;  %v1103_v31 = vmax.f32 %v1067_v24, 0.0 }
 0x151   :  { %v1421_v21 = vpack.c.bf16 %v1094_v15, %v1093_v4  ;;  %v874_v25 = vadd.f32 %v1547_v17, %v2148_v28  ;;  %v1550_v32 = vadd.f32 %v1549_v22, %v1548_v18  ;;  %v1062_v41 = vadd.f32 %v1061_v39, %v901_v7 }
 0x152   :  { %v1104_v45 = vmax.f32 %v1070_v36, 0.0  ;;  %v1101_v43 = vmax.f32 %v1059_v33, 0.0 }
 0x153   :  { %1457 = vst [vmem:[%s2249_s5 + $0x50] sm:$0xff] %v1421_v21   ;;  %v1035_v40 = vadd.f32 %v2192_v35, %v874_v25  ;;  %v877_v37 = vadd.f32 %v1550_v32, %v2148_v28  ;;  %v1102_v27 = vmax.f32 %v1062_v41, 0.0 }
 0x154   :  { %v1446_v47 = vpack.c.bf16 %v1104_v45, %v1103_v31 }
 0x155   :  { %v1038_v23 = vadd.f32 %v2198_v42, %v877_v37  ;;  %v1095_v44 = vmax.f32 %v1035_v40, 0.0  ;;  %v1441_v50 = vpack.c.bf16 %v1102_v27, %v1101_v43 }
 0x156   :  { %1462 = vst [vmem:[%s2249_s5 + $0x78] sm:$0xff] %v1446_v47  }
 0x157   :  { %v1096_v49 = vmax.f32 %v1038_v23, 0.0  ;;  %1461 = vst [vmem:[%s2249_s5 + $0x70] sm:$0xff] %v1441_v50  }
 0x159   :  { %v1426_v12 = vpack.c.bf16 %v1096_v49, %v1095_v44 }
 0x15b   :  { %1458 = vst [vmem:[%s2249_s5 + $0x58] sm:$0xff] %v1426_v12  }

// kernel: fbn_forward.13
= control target key start
LH: loop header
LB: loop body
LE: loop exit
PB: predicated region body
PF: predicated region fallthrough
CT: control target
= control target key end

     0   :  { %vm234_vm0 = vcmask 261120   ;;  %s1186_s3 = inlined_call_operand.vmem [shape: bf16[32,128], index: 3, kind: input, shape index: {}]   ;;  %s1187_s0 = inlined_call_operand.vmem [shape: bf16[256,32], index: 0, kind: input, shape index: {}]   ;;  %s1188_s1 = inlined_call_operand.vmem [shape: f32[1,32], index: 1, kind: input, shape index: {}]   ;;  %s1189_s2 = inlined_call_operand.vmem [shape: f32[1,32], index: 2, kind: input, shape index: {}]   ;;  %s1190_s4 = inlined_call_operand.vmem [shape: f32[1,128], index: 4, kind: input, shape index: {}]   ;;  %s1191_s5 = inlined_call_operand.vmem [shape: bf16[256,128], index: 5, kind: output, shape index: {}]  }
   0x1   :  { %v925_v0 = vld [vmem:[%s1186_s3] sm:$0xff]   ;;  %v926_v1 = vld [vmem:[%s1186_s3 + $0x8] sm:$0xff]   ;;  %v838_v14 = vld [vmem:[%s1187_s0 + $0x10] sm:$0xff]  }
   0x2   :  { %885 = vmatprep.subr.bf16.mxu0 %v925_v0  ;;  %921 = vmatprep.subr.bf16.mxu1 %v925_v0  ;;  %v694_v2 = vld [vmem:[%s1187_s0] sm:$0xff]   ;;  %v837_v7 = vld [vmem:[%s1187_s0 + $0x8] sm:$0xff]   ;;  %v703_v26 = vunpack.c.l.bf16 %v838_v14  ;;  %v846_v35 = vld [vmem:[%s1187_s0 + $0x50] sm:$0xff]   ;;  %v704_v44 = vunpack.c.h.bf16 %v838_v14 }
   0x3   :  { %v969_v3 = vld [vmem:[%s1188_s1] ss:$0 sm:$0xff]  ;;  %886 = vmatpush3.bf16.msra.mxu0 %v925_v0  ;;  %923 = vmatpush3.bf16.msra.mxu1 %v925_v0  ;;  %v695_v4 = vunpack.c.l.bf16 %v694_v2  ;;  %v696_v5 = vunpack.c.h.bf16 %v694_v2  ;;  %v845_v8 = vld [vmem:[%s1187_s0 + $0x48] sm:$0xff]   ;;  %v699_v12 = vunpack.c.l.bf16 %v837_v7  ;;  %v700_v13 = vunpack.c.h.bf16 %v837_v7  ;;  %v839_v40 = vld [vmem:[%s1187_s0 + $0x18] sm:$0xff]  }
   0x4   :  { %v844_v6 = vld [vmem:[%s1187_s0 + $0x40] sm:$0xff]   ;;  %887 = vmatprep.subr.bf16.mxu0 %v926_v1  ;;  %922 = vmatprep.subr.bf16.mxu1 %v926_v1  ;;  %v731_v17 = vunpack.c.l.bf16 %v845_v8  ;;  %v732_v18 = vunpack.c.h.bf16 %v845_v8  ;;  %v847_v45 = vld [vmem:[%s1187_s0 + $0x58] sm:$0xff]   ;;  %v96_v48 = vmul.f32 %v703_v26, %v969_v3  ;;  %v735_v49 = vunpack.c.l.bf16 %v846_v35 }
   0x5   :  { %v983_v9 = vld [vmem:[%s1189_s2] ss:$0 sm:$0xff]  ;;  %v727_v10 = vunpack.c.l.bf16 %v844_v6  ;;  %v728_v11 = vunpack.c.h.bf16 %v844_v6  ;;  %v92_v15 = vmul.f32 %v695_v4, %v969_v3  ;;  %v93_v16 = vmul.f32 %v696_v5, %v969_v3 }
   0x6   :  { %v94_v21 = vmul.f32 %v699_v12, %v969_v3  ;;  %v95_v22 = vmul.f32 %v700_v13, %v969_v3  ;;  %v110_v25 = vmul.f32 %v731_v17, %v969_v3  ;;  %v111_v33 = vmul.f32 %v732_v18, %v969_v3  ;;  %v840_v62 = vld [vmem:[%s1187_s0 + $0x20] sm:$0xff]  }
   0x7   :  { %v108_v19 = vmul.f32 %v727_v10, %v969_v3  ;;  %v109_v20 = vmul.f32 %v728_v11, %v969_v3  ;;  %888 = vmatpush3.bf16.msra.mxu0 %v926_v1  ;;  %924 = vmatpush3.bf16.msra.mxu1 %v926_v1  ;;  %v131_v23 = vadd.f32 %v983_v9, %v92_v15  ;;  %v736_v52 = vunpack.c.h.bf16 %v846_v35  ;;  %v848_v13 = vld [vmem:[%s1187_s0 + $0x60] sm:$0xff]  }
   0x8   :  { %v132_v24 = vadd.f32 %v983_v9, %v93_v16  ;;  %v133_v29 = vadd.f32 %v983_v9, %v94_v21  ;;  %v134_v30 = vadd.f32 %v983_v9, %v95_v22  ;;  %v149_v34 = vadd.f32 %v983_v9, %v110_v25  ;;  %v841_v22 = vld [vmem:[%s1187_s0 + $0x28] sm:$0xff]  }
   0x9   :  { %v147_v27 = vadd.f32 %v983_v9, %v108_v19  ;;  %v148_v28 = vadd.f32 %v983_v9, %v109_v20  ;;  %v163_v31 = vmax.f32 %v131_v23, 0.0  ;;  %v150_v42 = vadd.f32 %v983_v9, %v111_v33 }
   0xa   :  { %v164_v32 = vmax.f32 %v132_v24, 0.0  ;;  %v165_v38 = vmax.f32 %v133_v29, 0.0  ;;  %v166_v39 = vmax.f32 %v134_v30, 0.0  ;;  %v181_v43 = vmax.f32 %v149_v34, 0.0 }
   0xb   :  { %v179_v36 = vmax.f32 %v147_v27, 0.0  ;;  %v180_v37 = vmax.f32 %v148_v28, 0.0  ;;  %v182_v50 = vmax.f32 %v150_v42, 0.0  ;;  %v97_v51 = vmul.f32 %v704_v44, %v969_v3  ;;  %v849_v27 = vld [vmem:[%s1187_s0 + $0x68] sm:$0xff]  }
   0xc   :  { %v195_v41 = vpack.c.bf16 %v164_v32, %v163_v31  ;;  %v196_v47 = vpack.c.bf16 %v166_v39, %v165_v38  ;;  %v707_v53 = vunpack.c.l.bf16 %v839_v40  ;;  %v135_v54 = vadd.f32 %v983_v9, %v96_v48 }
   0xd   :  { %v203_v46 = vpack.c.bf16 %v180_v37, %v179_v36  ;;  %v112_v55 = vmul.f32 %v735_v49, %v969_v3  ;;  %v708_v56 = vunpack.c.h.bf16 %v839_v40  ;;  %v739_v57 = vunpack.c.l.bf16 %v847_v45  ;;  %v842_v36 = vld [vmem:[%s1187_s0 + $0x30] sm:$0xff]  }
   0xe   :  { %889 = vmatprep.mubr.msk.bf16.mxu0 %vm234_vm0, %v195_v41  ;;  %v204_v58 = vpack.c.bf16 %v182_v50, %v181_v43  ;;  %v136_v59 = vadd.f32 %v983_v9, %v97_v51  ;;  %v113_v60 = vmul.f32 %v736_v52, %v969_v3  ;;  %v98_v61 = vmul.f32 %v707_v53, %v969_v3  ;;  %v850_v53 = vld [vmem:[%s1187_s0 + $0x70] sm:$0xff]  }
   0xf   :  { %905 = vmatprep.mubr.msk.bf16.mxu1 %vm234_vm0, %v203_v46  ;;  %890 = vmatmul.mubr.msk.bf16.vlgmr.msra.gmra.mrb[0].mxu0 %vm234_vm0, %v196_v47  ;;  %v167_v63 = vmax.f32 %v135_v54, 0.0  ;;  %v151_v0 = vadd.f32 %v983_v9, %v112_v55  ;;  %v99_v1 = vmul.f32 %v708_v56, %v969_v3  ;;  %v740_v2 = vunpack.c.h.bf16 %v847_v45 }
  0x10   :  { %906 = vmatmul.mubr.msk.bf16.vlgmr.msra.gmra.mrb[0].mxu1 %vm234_vm0, %v204_v58  ;;  %v168_v4 = vmax.f32 %v136_v59, 0.0  ;;  %v152_v5 = vadd.f32 %v983_v9, %v113_v60  ;;  %v137_v6 = vadd.f32 %v983_v9, %v98_v61  ;;  %v114_v7 = vmul.f32 %v739_v57, %v969_v3  ;;  %v843_v58 = vld [vmem:[%s1187_s0 + $0x38] sm:$0xff]  }
  0x11   :  { %v183_v8 = vmax.f32 %v151_v0, 0.0  ;;  %v138_v10 = vadd.f32 %v983_v9, %v99_v1  ;;  %v115_v11 = vmul.f32 %v740_v2, %v969_v3  ;;  %v711_v12 = vunpack.c.l.bf16 %v840_v62 }
  0x12   :  { %v197_v14 = vpack.c.bf16 %v168_v4, %v167_v63  ;;  %v184_v15 = vmax.f32 %v152_v5, 0.0  ;;  %v169_v16 = vmax.f32 %v137_v6, 0.0  ;;  %v153_v17 = vadd.f32 %v983_v9, %v114_v7  ;;  %v851_v4 = vld [vmem:[%s1187_s0 + $0x78] sm:$0xff]  }
  0x13   :  { %v170_v18 = vmax.f32 %v138_v10, 0.0  ;;  %v154_v19 = vadd.f32 %v983_v9, %v115_v11  ;;  %v712_v20 = vunpack.c.h.bf16 %v840_v62  ;;  %v100_v21 = vmul.f32 %v711_v12, %v969_v3 }
  0x14   :  { %893 = vmatprep.mubr.msk.bf16.mxu0 %vm234_vm0, %v197_v14  ;;  %v205_v23 = vpack.c.bf16 %v184_v15, %v183_v8  ;;  %v185_v24 = vmax.f32 %v153_v17, 0.0  ;;  %v743_v25 = vunpack.c.l.bf16 %v848_v13  ;;  %v744_v26 = vunpack.c.h.bf16 %v848_v13 }
  0x15   :  { %v198_v28 = vpack.c.bf16 %v170_v18, %v169_v16  ;;  %v186_v29 = vmax.f32 %v154_v19, 0.0  ;;  %v101_v30 = vmul.f32 %v712_v20, %v969_v3  ;;  %v139_v31 = vadd.f32 %v983_v9, %v100_v21 }
  0x16   :  { %909 = vmatprep.mubr.msk.bf16.mxu1 %vm234_vm0, %v205_v23  ;;  %v116_v32 = vmul.f32 %v743_v25, %v969_v3  ;;  %v117_v33 = vmul.f32 %v744_v26, %v969_v3  ;;  %v715_v34 = vunpack.c.l.bf16 %v841_v22  ;;  %v716_v35 = vunpack.c.h.bf16 %v841_v22 }
  0x17   :  { %894 = vmatmul.mubr.msk.bf16.gmra.mrb[4].mxu0 %vm234_vm0, %v198_v28  ;;  %v206_v37 = vpack.c.bf16 %v186_v29, %v185_v24  ;;  %v140_v38 = vadd.f32 %v983_v9, %v101_v30  ;;  %v171_v39 = vmax.f32 %v139_v31, 0.0  ;;  %v747_v40 = vunpack.c.l.bf16 %v849_v27 }
  0x18   :  { %v155_v41 = vadd.f32 %v983_v9, %v116_v32  ;;  %v156_v42 = vadd.f32 %v983_v9, %v117_v33  ;;  %v102_v43 = vmul.f32 %v715_v34, %v969_v3  ;;  %v103_v44 = vmul.f32 %v716_v35, %v969_v3 }
  0x19   :  { %910 = vmatmul.mubr.msk.bf16.gmra.mrb[4].mxu1 %vm234_vm0, %v206_v37  ;;  %v172_v45 = vmax.f32 %v140_v38, 0.0  ;;  %v748_v46 = vunpack.c.h.bf16 %v849_v27  ;;  %v118_v47 = vmul.f32 %v747_v40, %v969_v3  ;;  %v719_v48 = vunpack.c.l.bf16 %v842_v36 }
  0x1a   :  { %v187_v49 = vmax.f32 %v155_v41, 0.0  ;;  %v188_v50 = vmax.f32 %v156_v42, 0.0  ;;  %v141_v51 = vadd.f32 %v983_v9, %v102_v43  ;;  %v142_v52 = vadd.f32 %v983_v9, %v103_v44 }
  0x1b   :  { %v199_v54 = vpack.c.bf16 %v172_v45, %v171_v39  ;;  %v119_v55 = vmul.f32 %v748_v46, %v969_v3  ;;  %v157_v56 = vadd.f32 %v983_v9, %v118_v47  ;;  %v720_v57 = vunpack.c.h.bf16 %v842_v36 }
  0x1c   :  { %v207_v59 = vpack.c.bf16 %v188_v50, %v187_v49  ;;  %v173_v60 = vmax.f32 %v141_v51, 0.0  ;;  %v174_v61 = vmax.f32 %v142_v52, 0.0  ;;  %v104_v62 = vmul.f32 %v719_v48, %v969_v3 }
  0x1d   :  { %897 = vmatprep.mubr.msk.bf16.mxu0 %vm234_vm0, %v199_v54  ;;  %v158_v63 = vadd.f32 %v983_v9, %v119_v55  ;;  %v189_v0 = vmax.f32 %v157_v56, 0.0  ;;  %v105_v1 = vmul.f32 %v720_v57, %v969_v3  ;;  %v751_v2 = vunpack.c.l.bf16 %v850_v53 }
  0x1e   :  { %913 = vmatprep.mubr.msk.bf16.mxu1 %vm234_vm0, %v207_v59  ;;  %v200_v5 = vpack.c.bf16 %v174_v61, %v173_v60  ;;  %v143_v6 = vadd.f32 %v983_v9, %v104_v62  ;;  %v752_v7 = vunpack.c.h.bf16 %v850_v53  ;;  %v723_v8 = vunpack.c.l.bf16 %v843_v58 }
  0x1f   :  { %v190_v10 = vmax.f32 %v158_v63, 0.0  ;;  %v144_v11 = vadd.f32 %v983_v9, %v105_v1  ;;  %v120_v12 = vmul.f32 %v751_v2, %v969_v3  ;;  %v724_v13 = vunpack.c.h.bf16 %v843_v58 }
  0x20   :  { %898 = vmatmul.mubr.msk.bf16.gmra.mrb[8].mxu0 %vm234_vm0, %v200_v5  ;;  %v175_v14 = vmax.f32 %v143_v6, 0.0  ;;  %v121_v15 = vmul.f32 %v752_v7, %v969_v3  ;;  %v106_v16 = vmul.f32 %v723_v8, %v969_v3  ;;  %v755_v17 = vunpack.c.l.bf16 %v851_v4 }
  0x21   :  { %v208_v18 = vpack.c.bf16 %v190_v10, %v189_v0  ;;  %v176_v19 = vmax.f32 %v144_v11, 0.0  ;;  %v159_v20 = vadd.f32 %v983_v9, %v120_v12  ;;  %v107_v21 = vmul.f32 %v724_v13, %v969_v3 }
  0x22   :  { %v160_v22 = vadd.f32 %v983_v9, %v121_v15  ;;  %v145_v23 = vadd.f32 %v983_v9, %v106_v16  ;;  %v756_v24 = vunpack.c.h.bf16 %v851_v4  ;;  %v122_v25 = vmul.f32 %v755_v17, %v969_v3 }
  0x23   :  { %914 = vmatmul.mubr.msk.bf16.gmra.mrb[8].mxu1 %vm234_vm0, %v208_v18  ;;  %v201_v26 = vpack.c.bf16 %v176_v19, %v175_v14  ;;  %v191_v27 = vmax.f32 %v159_v20, 0.0  ;;  %v146_v28 = vadd.f32 %v983_v9, %v107_v21 }
  0x24   :  { %v192_v29 = vmax.f32 %v160_v22, 0.0  ;;  %v177_v30 = vmax.f32 %v145_v23, 0.0  ;;  %v123_v31 = vmul.f32 %v756_v24, %v969_v3  ;;  %v161_v32 = vadd.f32 %v983_v9, %v122_v25  ;;  %v1104_v3 = vld [vmem:[%s1190_s4] ss:$0 sm:$0xff] }
  0x25   :  { %901 = vmatprep.mubr.msk.bf16.mxu0 %vm234_vm0, %v201_v26  ;;  %v178_v33 = vmax.f32 %v146_v28, 0.0 }
  0x26   :  { %v209_v34 = vpack.c.bf16 %v192_v29, %v191_v27  ;;  %v162_v35 = vadd.f32 %v983_v9, %v123_v31  ;;  %v193_v36 = vmax.f32 %v161_v32, 0.0 }
  0x27   :  { %v202_v37 = vpack.c.bf16 %v178_v33, %v177_v30 }
  0x28   :  { %917 = vmatprep.mubr.msk.bf16.mxu1 %vm234_vm0, %v209_v34  ;;  %v194_v38 = vmax.f32 %v162_v35, 0.0 }
  0x29   :  { %902 = vmatmul.mubr.msk.bf16.gmra.mrb[12].mxu0 %vm234_vm0, %v202_v37 }
  0x2a   :  { %v210_v39 = vpack.c.bf16 %v194_v38, %v193_v36 }
  0x2c   :  { %918 = vmatmul.mubr.msk.bf16.gmra.mrb[12].mxu1 %vm234_vm0, %v210_v39 }
  0xe2   :  { %v891_v40 = vpop.f32.mrb[0].mxu0 }
  0xe3   :  { %v317_v41 = vpop.f32.mrb[1].mxu0  ;;  %v326_v9 = vadd.f32 %v891_v40, %v1104_v3  ;;  %v907_v43 = vpop.f32.mrb[0].mxu1 }
  0xe4   :  { %v892_v42 = vpop.f32.mrb[2].mxu0  ;;  %v318_v46 = vadd.f32 %v1104_v3, %v317_v41  ;;  %v381_v47 = vpop.f32.mrb[1].mxu1  ;;  %v390_v51 = vadd.f32 %v907_v43, %v1104_v3 }
  0xe5   :  { %v329_v44 = vadd.f32 %v892_v42, %v1104_v3  ;;  %v320_v45 = vpop.f32.mrb[3].mxu0  ;;  %v908_v50 = vpop.f32.mrb[2].mxu1  ;;  %v382_v55 = vadd.f32 %v1104_v3, %v381_v47 }
  0xe6   :  { %v321_v48 = vadd.f32 %v1104_v3, %v320_v45  ;;  %v393_v52 = vadd.f32 %v908_v50, %v1104_v3  ;;  %v384_v54 = vpop.f32.mrb[3].mxu1 }
  0xe7   :  { %v765_v49 = vpack.c.bf16 %v329_v44, %v326_v9  ;;  %v385_v56 = vadd.f32 %v1104_v3, %v384_v54 }
  0xe8   :  { %v760_v53 = vpack.c.bf16 %v321_v48, %v318_v46  ;;  %v805_v57 = vpack.c.bf16 %v393_v52, %v390_v51 }
  0xe9   :  { %852 = vst [vmem:[%s1191_s5 + $0x8] sm:$0xff] %v765_v49   ;;  %v800_v58 = vpack.c.bf16 %v385_v56, %v382_v55 }
  0xea   :  { %761 = vst [vmem:[%s1191_s5] sm:$0xff] %v760_v53   ;;  %860 = vst [vmem:[%s1191_s5 + $0x48] sm:$0xff] %v805_v57   ;;  %v895_v59 = vpop.f32.mrb[4].mxu0 }
  0xeb   :  { %859 = vst [vmem:[%s1191_s5 + $0x40] sm:$0xff] %v800_v58   ;;  %v333_v60 = vpop.f32.mrb[5].mxu0  ;;  %v342_v63 = vadd.f32 %v895_v59, %v1104_v3 }
  0xec   :  { %v911_v61 = vpop.f32.mrb[4].mxu1  ;;  %v896_v62 = vpop.f32.mrb[6].mxu0  ;;  %v334_v4 = vadd.f32 %v1104_v3, %v333_v60 }
  0xed   :  { %v397_v0 = vpop.f32.mrb[5].mxu1  ;;  %v345_v1 = vadd.f32 %v896_v62, %v1104_v3  ;;  %v336_v2 = vpop.f32.mrb[7].mxu0  ;;  %v406_v7 = vadd.f32 %v911_v61, %v1104_v3 }
  0xee   :  { %v912_v5 = vpop.f32.mrb[6].mxu1  ;;  %v337_v6 = vadd.f32 %v1104_v3, %v336_v2  ;;  %v398_v12 = vadd.f32 %v1104_v3, %v397_v0 }
  0xef   :  { %v775_v8 = vpack.c.bf16 %v345_v1, %v342_v63  ;;  %v409_v10 = vadd.f32 %v912_v5, %v1104_v3  ;;  %v400_v11 = vpop.f32.mrb[7].mxu1 }
  0xf0   :  { %v770_v13 = vpack.c.bf16 %v337_v6, %v334_v4  ;;  %v401_v14 = vadd.f32 %v1104_v3, %v400_v11 }
  0xf1   :  { %854 = vst [vmem:[%s1191_s5 + $0x18] sm:$0xff] %v775_v8   ;;  %v815_v15 = vpack.c.bf16 %v409_v10, %v406_v7 }
  0xf2   :  { %853 = vst [vmem:[%s1191_s5 + $0x10] sm:$0xff] %v770_v13   ;;  %v810_v16 = vpack.c.bf16 %v401_v14, %v398_v12 }
  0xf3   :  { %862 = vst [vmem:[%s1191_s5 + $0x58] sm:$0xff] %v815_v15   ;;  %v899_v17 = vpop.f32.mrb[8].mxu0 }
  0xf4   :  { %861 = vst [vmem:[%s1191_s5 + $0x50] sm:$0xff] %v810_v16   ;;  %v349_v18 = vpop.f32.mrb[9].mxu0  ;;  %v358_v20 = vadd.f32 %v899_v17, %v1104_v3 }
  0xf5   :  { %v900_v19 = vpop.f32.mrb[10].mxu0  ;;  %v350_v24 = vadd.f32 %v1104_v3, %v349_v18 }
  0xf6   :  { %v915_v21 = vpop.f32.mrb[8].mxu1  ;;  %v361_v22 = vadd.f32 %v900_v19, %v1104_v3  ;;  %v352_v23 = vpop.f32.mrb[11].mxu0 }
  0xf7   :  { %v413_v25 = vpop.f32.mrb[9].mxu1  ;;  %v353_v26 = vadd.f32 %v1104_v3, %v352_v23  ;;  %v422_v29 = vadd.f32 %v915_v21, %v1104_v3 }
  0xf8   :  { %v785_v27 = vpack.c.bf16 %v361_v22, %v358_v20  ;;  %v916_v28 = vpop.f32.mrb[10].mxu1  ;;  %v414_v33 = vadd.f32 %v1104_v3, %v413_v25 }
  0xf9   :  { %v425_v30 = vadd.f32 %v916_v28, %v1104_v3  ;;  %v780_v31 = vpack.c.bf16 %v353_v26, %v350_v24  ;;  %v416_v32 = vpop.f32.mrb[11].mxu1 }
  0xfa   :  { %856 = vst [vmem:[%s1191_s5 + $0x28] sm:$0xff] %v785_v27   ;;  %v417_v34 = vadd.f32 %v1104_v3, %v416_v32 }
  0xfb   :  { %v825_v35 = vpack.c.bf16 %v425_v30, %v422_v29  ;;  %855 = vst [vmem:[%s1191_s5 + $0x20] sm:$0xff] %v780_v31  }
  0xfc   :  { %v820_v36 = vpack.c.bf16 %v417_v34, %v414_v33  ;;  %v903_v37 = vpop.f32.mrb[12].mxu0 }
  0xfd   :  { %864 = vst [vmem:[%s1191_s5 + $0x68] sm:$0xff] %v825_v35   ;;  %v365_v38 = vpop.f32.mrb[13].mxu0  ;;  %v374_v40 = vadd.f32 %v903_v37, %v1104_v3 }
  0xfe   :  { %863 = vst [vmem:[%s1191_s5 + $0x60] sm:$0xff] %v820_v36   ;;  %v904_v39 = vpop.f32.mrb[14].mxu0  ;;  %v366_v43 = vadd.f32 %v1104_v3, %v365_v38 }
  0xff   :  { %v919_v41 = vpop.f32.mrb[12].mxu1  ;;  %v377_v42 = vadd.f32 %v904_v39, %v1104_v3  ;;  %v368_v9 = vpop.f32.mrb[15].mxu0 }
 0x100   :  { %v429_v44 = vpop.f32.mrb[13].mxu1  ;;  %v369_v45 = vadd.f32 %v1104_v3, %v368_v9  ;;  %v438_v48 = vadd.f32 %v919_v41, %v1104_v3 }
 0x101   :  { %v795_v46 = vpack.c.bf16 %v377_v42, %v374_v40  ;;  %v920_v47 = vpop.f32.mrb[14].mxu1  ;;  %v430_v52 = vadd.f32 %v1104_v3, %v429_v44 }
 0x102   :  { %v441_v49 = vadd.f32 %v920_v47, %v1104_v3  ;;  %v790_v50 = vpack.c.bf16 %v369_v45, %v366_v43  ;;  %v432_v51 = vpop.f32.mrb[15].mxu1 }
 0x103   :  { %858 = vst [vmem:[%s1191_s5 + $0x38] sm:$0xff] %v795_v46   ;;  %v433_v53 = vadd.f32 %v1104_v3, %v432_v51 }
 0x104   :  { %v835_v54 = vpack.c.bf16 %v441_v49, %v438_v48  ;;  %857 = vst [vmem:[%s1191_s5 + $0x30] sm:$0xff] %v790_v50  }
 0x105   :  { %v830_v55 = vpack.c.bf16 %v433_v53, %v430_v52 }
 0x106   :  { %866 = vst [vmem:[%s1191_s5 + $0x78] sm:$0xff] %v835_v54  }
 0x107   :  { %865 = vst [vmem:[%s1191_s5 + $0x70] sm:$0xff] %v830_v55  }

// kernel: fbn_forward.12
= control target key start
LH: loop header
LB: loop body
LE: loop exit
PB: predicated region body
PF: predicated region fallthrough
CT: control target
= control target key end

     0   :  { %vm806_vm0 = vcmask 523264   ;;  %s2810_s1 = inlined_call_operand.vmem [shape: bf16[576,128], index: 1, kind: input, shape index: {}]   ;;  %s2811_s0 = inlined_call_operand.vmem [shape: bf16[256,576], index: 0, kind: input, shape index: {}]   ;;  %s2812_s2 = inlined_call_operand.vmem [shape: f32[1,128], index: 2, kind: input, shape index: {}]   ;;  %s2813_s3 = inlined_call_operand.vmem [shape: bf16[256,128], index: 3, kind: output, shape index: {}]  }
   0x1   :  { %v2094_v0 = vld [vmem:[%s2810_s1 + $0x40] sm:$0xff]   ;;  %v2096_v2 = vld [vmem:[%s2810_s1 + $0x48] sm:$0xff]   ;;  %v2098_v4 = vld [vmem:[%s2810_s1 + $0x50] sm:$0xff]  }
   0x2   :  { %v2095_v1 = vld [vmem:[%s2810_s1] sm:$0xff]   ;;  %1794 = vmatprep.subr.bf16.mxu0 %v2094_v0  ;;  %2078 = vmatprep.subr.bf16.mxu1 %v2094_v0  ;;  %v2097_v3 = vld [vmem:[%s2810_s1 + $0x8] sm:$0xff]   ;;  %v2099_v5 = vld [vmem:[%s2810_s1 + $0x10] sm:$0xff]  }
   0x3   :  { %1795 = vmatpush3.bf16.msra.mxu0 %v2095_v1  ;;  %2086 = vmatpush3.bf16.msra.mxu1 %v2095_v1  ;;  %v2100_v6 = vld [vmem:[%s2810_s1 + $0x58] sm:$0xff]   ;;  %v2102_v8 = vld [vmem:[%s2810_s1 + $0x60] sm:$0xff]   ;;  %v2104_v10 = vld [vmem:[%s2810_s1 + $0x68] sm:$0xff]  }
   0x4   :  { %1796 = vmatprep.subr.bf16.mxu0 %v2096_v2  ;;  %2079 = vmatprep.subr.bf16.mxu1 %v2096_v2  ;;  %v2101_v7 = vld [vmem:[%s2810_s1 + $0x18] sm:$0xff]   ;;  %v2103_v9 = vld [vmem:[%s2810_s1 + $0x20] sm:$0xff]   ;;  %v2105_v13 = vld [vmem:[%s2810_s1 + $0x28] sm:$0xff]  }
   0x5   :  { %v2112_v11 = vld [vmem:[%s2811_s0 + $0x4] ss:$20 sps:$4 sm:$0xff]   ;;  %v2106_v14 = vld [vmem:[%s2810_s1 + $0x70] sm:$0xff]   ;;  %v2118_v23 = vld [vmem:[%s2810_s1 + $0xc8] sm:$0xff]  }
   0x6   :  { %v2115_v12 = vld [vmem:[%s2811_s0 + $0x1e4] ss:$20 sps:$4 sm:$0xff]   ;;  %887 = vmatprep.mubr.bf16.mxu0 %v2112_v11  ;;  %v2107_v15 = vld [vmem:[%s2810_s1 + $0x30] sm:$0xff]   ;;  %v2121_v24 = vld [vmem:[%s2811_s0 + $0x2c] ss:$20 sps:$4 sm:$0xff]  }
   0x7   :  { %1797 = vmatpush3.bf16.msra.mxu0 %v2097_v3  ;;  %2087 = vmatpush3.bf16.msra.mxu1 %v2097_v3  ;;  %v2108_v16 = vld [vmem:[%s2810_s1 + $0x78] sm:$0xff]   ;;  %v2116_v18 = vld [vmem:[%s2810_s1 + $0xc0] sm:$0xff]   ;;  %v2120_v26 = vld [vmem:[%s2810_s1 + $0x88] sm:$0xff]  }
   0x8   :  { %1798 = vmatprep.subr.bf16.mxu0 %v2098_v4  ;;  %2080 = vmatprep.subr.bf16.mxu1 %v2098_v4  ;;  %v2109_v17 = vld [vmem:[%s2810_s1 + $0x38] sm:$0xff]   ;;  %v2119_v19 = vld [vmem:[%s2810_s1 + $0x100] sm:$0xff]   ;;  %v2127_v28 = vld [vmem:[%s2810_s1 + $0xd0] sm:$0xff]  }
   0x9   :  { %983 = vmatprep.mubr.bf16.mxu1 %v2115_v12  ;;  %v2110_v20 = vld [vmem:[%s2811_s0] ss:$20 sps:$4 sm:$0xff]   ;;  %v2125_v27 = vld [vmem:[%s2811_s0 + $0x28] ss:$20 sps:$4 sm:$0xff]   ;;  %v2135_v36 = vld [vmem:[%s2811_s0 + $0x50] ss:$20 sps:$4 sm:$0xff]  }
   0xa   :  { %v2113_v21 = vld [vmem:[%s2811_s0 + $0x1e0] ss:$20 sps:$4 sm:$0xff]   ;;  %v2126_v29 = vld [vmem:[%s2811_s0 + $0x208] ss:$20 sps:$4 sm:$0xff]   ;;  %v2136_v38 = vld [vmem:[%s2811_s0 + $0x230] ss:$20 sps:$4 sm:$0xff]  }
   0xb   :  { %1799 = vmatpush3.bf16.msra.mxu0 %v2099_v5  ;;  %2088 = vmatpush3.bf16.msra.mxu1 %v2099_v5  ;;  %v2117_v22 = vld [vmem:[%s2810_s1 + $0x80] sm:$0xff]   ;;  %v2128_v30 = vld [vmem:[%s2810_s1 + $0x90] sm:$0xff]   ;;  %v2129_v31 = vld [vmem:[%s2810_s1 + $0xd8] sm:$0xff]  }
   0xc   :  { %1800 = vmatprep.subr.bf16.mxu0 %v2100_v6  ;;  %2081 = vmatprep.subr.bf16.mxu1 %v2100_v6  ;;  %v2123_v25 = vld [vmem:[%s2811_s0 + $0x20c] ss:$20 sps:$4 sm:$0xff]   ;;  %v2131_v32 = vld [vmem:[%s2811_s0 + $0x54] ss:$20 sps:$4 sm:$0xff]   ;;  %v2130_v34 = vld [vmem:[%s2810_s1 + $0x98] sm:$0xff]  }
   0xd   :  { %v2133_v33 = vld [vmem:[%s2811_s0 + $0x234] ss:$20 sps:$4 sm:$0xff]   ;;  %v2137_v37 = vld [vmem:[%s2810_s1 + $0xe0] sm:$0xff]   ;;  %v2141_v41 = vld [vmem:[%s2811_s0 + $0x7c] ss:$20 sps:$4 sm:$0xff]  }
   0xe   :  { %v2150_v35 = vld [vmem:[%s2810_s1 + $0x108] sm:$0xff]   ;;  %v2138_v39 = vld [vmem:[%s2810_s1 + $0xa0] sm:$0xff]   ;;  %v2143_v42 = vld [vmem:[%s2811_s0 + $0x25c] ss:$20 sps:$4 sm:$0xff]  }
   0xf   :  { %1801 = vmatpush3.bf16.msra.mxu0 %v2101_v7  ;;  %2089 = vmatpush3.bf16.msra.mxu1 %v2101_v7  ;;  %v2139_v40 = vld [vmem:[%s2810_s1 + $0xe8] sm:$0xff]   ;;  %v2147_v46 = vld [vmem:[%s2810_s1 + $0xf0] sm:$0xff]   ;;  %v2149_v49 = vld [vmem:[%s2810_s1 + $0xf8] sm:$0xff]  }
  0x10   :  { %1802 = vmatprep.subr.bf16.mxu0 %v2102_v8  ;;  %2082 = vmatprep.subr.bf16.mxu1 %v2102_v8  ;;  %v2140_v43 = vld [vmem:[%s2810_s1 + $0xa8] sm:$0xff]   ;;  %v2170_v47 = vld [vmem:[%s2810_s1 + $0x110] sm:$0xff]   ;;  %v2152_v50 = vld [vmem:[%s2811_s0 + $0xa4] ss:$20 sps:$4 sm:$0xff]  }
  0x11   :  { %v2145_v44 = vld [vmem:[%s2811_s0 + $0x78] ss:$20 sps:$4 sm:$0xff]   ;;  %v2148_v48 = vld [vmem:[%s2810_s1 + $0xb0] sm:$0xff]   ;;  %v2154_v53 = vld [vmem:[%s2811_s0 + $0x8] ss:$20 sps:$4 sm:$0xff]  }
  0x12   :  { %v2146_v45 = vld [vmem:[%s2811_s0 + $0x258] ss:$20 sps:$4 sm:$0xff]   ;;  %v2157_v54 = vld [vmem:[%s2811_s0 + $0xa0] ss:$20 sps:$4 sm:$0xff]   ;;  %v2162_v58 = vld [vmem:[%s2811_s0 + $0xc8] ss:$20 sps:$4 sm:$0xff]  }
  0x13   :  { %1803 = vmatpush3.bf16.msra.mxu0 %v2103_v9  ;;  %2090 = vmatpush3.bf16.msra.mxu1 %v2103_v9  ;;  %v2156_v51 = vld [vmem:[%s2811_s0 + $0xc] ss:$20 sps:$4 sm:$0xff]   ;;  %v2151_v52 = vld [vmem:[%s2810_s1 + $0xb8] sm:$0xff]   ;;  %v2160_v57 = vld [vmem:[%s2811_s0 + $0x34] ss:$20 sps:$4 sm:$0xff]  }
  0x14   :  { %1804 = vmatprep.subr.bf16.mxu0 %v2104_v10  ;;  %2083 = vmatprep.subr.bf16.mxu1 %v2104_v10  ;;  %v2158_v55 = vld [vmem:[%s2811_s0 + $0xcc] ss:$20 sps:$4 sm:$0xff]   ;;  %v2189_v56 = vld [vmem:[%s2810_s1 + $0x118] sm:$0xff]   ;;  %v2163_v59 = vld [vmem:[%s2811_s0 + $0x30] ss:$20 sps:$4 sm:$0xff]  }
  0x15   :  { %v2164_v60 = vld [vmem:[%s2811_s0 + $0xf4] ss:$20 sps:$4 sm:$0xff]   ;;  %v2166_v61 = vld [vmem:[%s2811_s0 + $0x5c] ss:$20 sps:$4 sm:$0xff]   ;;  %v2169_v63 = vld [vmem:[%s2811_s0 + $0x58] ss:$20 sps:$4 sm:$0xff]  }
  0x16   :  { %v2168_v62 = vld [vmem:[%s2811_s0 + $0xf0] ss:$20 sps:$4 sm:$0xff]   ;;  %v2175_v2 = vld [vmem:[%s2811_s0 + $0x118] ss:$20 sps:$4 sm:$0xff]   ;;  %v2176_v3 = vld [vmem:[%s2811_s0 + $0x80] ss:$20 sps:$4 sm:$0xff]  }
  0x17   :  { %1805 = vmatpush3.bf16.msra.mxu0 %v2105_v13  ;;  %2091 = vmatpush3.bf16.msra.mxu1 %v2105_v13  ;;  %v2171_v0 = vld [vmem:[%s2811_s0 + $0x11c] ss:$20 sps:$4 sm:$0xff]   ;;  %v2173_v1 = vld [vmem:[%s2811_s0 + $0x84] ss:$20 sps:$4 sm:$0xff]   ;;  %v2179_v5 = vld [vmem:[%s2811_s0 + $0xac] ss:$20 sps:$4 sm:$0xff]  }
  0x18   :  { %1806 = vmatprep.subr.bf16.mxu0 %v2106_v14  ;;  %2084 = vmatprep.subr.bf16.mxu1 %v2106_v14  ;;  %v2177_v4 = vld [vmem:[%s2811_s0 + $0x144] ss:$20 sps:$4 sm:$0xff]   ;;  %v2181_v6 = vld [vmem:[%s2811_s0 + $0x140] ss:$20 sps:$4 sm:$0xff]   ;;  %v2182_v7 = vld [vmem:[%s2811_s0 + $0xa8] ss:$20 sps:$4 sm:$0xff]  }
  0x19   :  { %v2183_v8 = vld [vmem:[%s2811_s0 + $0x16c] ss:$20 sps:$4 sm:$0xff]   ;;  %v2185_v9 = vld [vmem:[%s2811_s0 + $0xd4] ss:$20 sps:$4 sm:$0xff]   ;;  %v2188_v11 = vld [vmem:[%s2811_s0 + $0xd0] ss:$20 sps:$4 sm:$0xff]  }
  0x1a   :  { %v2187_v10 = vld [vmem:[%s2811_s0 + $0x168] ss:$20 sps:$4 sm:$0xff]   ;;  %v2194_v14 = vld [vmem:[%s2811_s0 + $0x190] ss:$20 sps:$4 sm:$0xff]  }
  0x1b   :  { %1807 = vmatpush3.bf16.msra.mxu0 %v2107_v15  ;;  %2092 = vmatpush3.bf16.msra.mxu1 %v2107_v15  ;;  %v2190_v12 = vld [vmem:[%s2811_s0 + $0x194] ss:$20 sps:$4 sm:$0xff]   ;;  %v2192_v13 = vld [vmem:[%s2811_s0 + $0xfc] ss:$20 sps:$4 sm:$0xff]   ;;  %v2195_v15 = vld [vmem:[%s2811_s0 + $0xf8] ss:$20 sps:$4 sm:$0xff]  }
  0x1c   :  { %1808 = vmatprep.subr.bf16.mxu0 %v2108_v16  ;;  %2085 = vmatprep.subr.bf16.mxu1 %v2108_v16  ;;  %v2196_v16 = vld [vmem:[%s2811_s0 + $0x1bc] ss:$20 sps:$4 sm:$0xff]  }
  0x1f   :  { %1809 = vmatpush3.bf16.msra.mxu0 %v2109_v17  ;;  %2093 = vmatpush3.bf16.msra.mxu1 %v2109_v17  ;;  %v2198_v17 = vld [vmem:[%s2811_s0 + $0x124] ss:$20 sps:$4 sm:$0xff]  }
  0x20   :  { %1906 = vmatprep.subr.bf16.mxu1 %v2116_v18  ;;  %2038 = vmatprep.subr.bf16.mxu0 %v2119_v19  ;;  %v2200_v18 = vld [vmem:[%s2811_s0 + $0x1b8] ss:$20 sps:$4 sm:$0xff]  }
  0x22   :  { %888 = vmatmul.mubr.bf16.vlgmr.msra.gmra.mrb[0].mxu0 %v2110_v20  ;;  %984 = vmatmul.mubr.bf16.vlgmr.msra.gmra.mrb[0].mxu1 %v2113_v21  ;;  %v2202_v20 = vld [vmem:[%s2811_s0 + $0x14c] ss:$20 sps:$4 sm:$0xff]   ;;  %v2204_v21 = vld [vmem:[%s2811_s0 + $0x10] ss:$20 sps:$4 sm:$0xff]  }
  0x23   :  { %1907 = vmatpush3.bf16.msra.mxu1 %v2117_v22  ;;  %2039 = vmatpush3.bf16.msra.mxu0 %v2119_v19  ;;  %v2201_v19 = vld [vmem:[%s2811_s0 + $0x120] ss:$20 sps:$4 sm:$0xff]   ;;  %v2205_v22 = vld [vmem:[%s2811_s0 + $0x148] ss:$20 sps:$4 sm:$0xff]  }
  0x24   :  { %1908 = vmatprep.subr.bf16.mxu1 %v2118_v23  ;;  %895 = vmatprep.mubr.bf16.mxu0 %v2121_v24  ;;  %v2206_v23 = vld [vmem:[%s2811_s0 + $0x38] ss:$20 sps:$4 sm:$0xff]   ;;  %v2207_v24 = vld [vmem:[%s2811_s0 + $0x174] ss:$20 sps:$4 sm:$0xff]  }
  0x25   :  { %991 = vmatprep.mubr.bf16.mxu1 %v2123_v25  ;;  %2040 = vmatprep.subr.bf16.mxu0 %v2150_v35  ;;  %v2209_v25 = vld [vmem:[%s2811_s0 + $0x60] ss:$20 sps:$4 sm:$0xff]  }
  0x27   :  { %1909 = vmatpush3.bf16.msra.mxu1 %v2120_v26  ;;  %2041 = vmatpush3.bf16.msra.mxu0 %v2150_v35  ;;  %v2210_v26 = vld [vmem:[%s2811_s0 + $0x170] ss:$20 sps:$4 sm:$0xff]   ;;  %v2221_v35 = vld [vmem:[%s2811_s0 + $0x128] ss:$20 sps:$4 sm:$0xff]  }
  0x28   :  { %1910 = vmatprep.subr.bf16.mxu1 %v2127_v28  ;;  %2042 = vmatprep.subr.bf16.mxu0 %v2170_v47  ;;  %v2212_v28 = vld [vmem:[%s2811_s0 + $0x19c] ss:$20 sps:$4 sm:$0xff]  }
  0x2a   :  { %896 = vmatmul.mubr.bf16.gmra.mrb[4].mxu0 %v2125_v27  ;;  %992 = vmatmul.mubr.bf16.gmra.mrb[4].mxu1 %v2126_v29  ;;  %v2211_v27 = vld [vmem:[%s2811_s0 + $0x88] ss:$20 sps:$4 sm:$0xff]   ;;  %v2214_v29 = vld [vmem:[%s2811_s0 + $0xb0] ss:$20 sps:$4 sm:$0xff]  }
  0x2b   :  { %1911 = vmatpush3.bf16.msra.mxu1 %v2128_v30  ;;  %903 = vmatprep.mubr.bf16.mxu0 %v2131_v32  ;;  %v2215_v30 = vld [vmem:[%s2811_s0 + $0x198] ss:$20 sps:$4 sm:$0xff]  }
  0x2c   :  { %1912 = vmatprep.subr.bf16.mxu1 %v2129_v31  ;;  %999 = vmatprep.mubr.bf16.mxu1 %v2133_v33  ;;  %v2216_v31 = vld [vmem:[%s2811_s0 + $0xd8] ss:$20 sps:$4 sm:$0xff]   ;;  %v2219_v33 = vld [vmem:[%s2811_s0 + $0x100] ss:$20 sps:$4 sm:$0xff]  }
  0x2d   :  { %2043 = vmatpush3.bf16.msra.mxu0 %v2170_v47  ;;  %v2217_v32 = vld [vmem:[%s2811_s0 + $0x1c4] ss:$20 sps:$4 sm:$0xff]  }
  0x2e   :  { %2044 = vmatprep.subr.bf16.mxu0 %v2189_v56  ;;  %v2236_v47 = vld [vmem:[%s2811_s0 + $0x218] ss:$20 sps:$4 sm:$0xff]  }
  0x2f   :  { %1913 = vmatpush3.bf16.msra.mxu1 %v2130_v34  ;;  %v2220_v34 = vld [vmem:[%s2811_s0 + $0x1c0] ss:$20 sps:$4 sm:$0xff]  }
  0x30   :  { %1914 = vmatprep.subr.bf16.mxu1 %v2137_v37  ;;  %v2224_v37 = vld [vmem:[%s2811_s0 + $0x150] ss:$20 sps:$4 sm:$0xff]  }
  0x31   :  { %2045 = vmatpush3.bf16.msra.mxu0 %v2189_v56 }
  0x32   :  { %904 = vmatmul.mubr.bf16.gmra.mrb[8].mxu0 %v2135_v36  ;;  %1000 = vmatmul.mubr.bf16.gmra.mrb[8].mxu1 %v2136_v38  ;;  %v2222_v36 = vld [vmem:[%s2811_s0 + $0x1ec] ss:$20 sps:$4 sm:$0xff]   ;;  %v2225_v38 = vld [vmem:[%s2811_s0 + $0x1e8] ss:$20 sps:$4 sm:$0xff]  }
  0x33   :  { %1915 = vmatpush3.bf16.msra.mxu1 %v2138_v39  ;;  %911 = vmatprep.mubr.bf16.mxu0 %v2141_v41  ;;  %v2226_v39 = vld [vmem:[%s2811_s0 + $0x178] ss:$20 sps:$4 sm:$0xff]   ;;  %v2229_v41 = vld [vmem:[%s2811_s0 + $0x1a0] ss:$20 sps:$4 sm:$0xff]  }
  0x34   :  { %1916 = vmatprep.subr.bf16.mxu1 %v2139_v40  ;;  %1007 = vmatprep.mubr.bf16.mxu1 %v2143_v42  ;;  %v2227_v40 = vld [vmem:[%s2811_s0 + $0x214] ss:$20 sps:$4 sm:$0xff]   ;;  %v2230_v42 = vld [vmem:[%s2811_s0 + $0x210] ss:$20 sps:$4 sm:$0xff]  }
  0x37   :  { %1917 = vmatpush3.bf16.msra.mxu1 %v2140_v43  ;;  %v2231_v43 = vld [vmem:[%s2811_s0 + $0x1c8] ss:$20 sps:$4 sm:$0xff]  }
  0x38   :  { %1918 = vmatprep.subr.bf16.mxu1 %v2147_v46  ;;  %v2235_v46 = vld [vmem:[%s2811_s0 + $0x238] ss:$20 sps:$4 sm:$0xff]  }
  0x3a   :  { %912 = vmatmul.mubr.bf16.gmra.mrb[12].mxu0 %v2145_v44  ;;  %1008 = vmatmul.mubr.bf16.gmra.mrb[12].mxu1 %v2146_v45  ;;  %v2232_v44 = vld [vmem:[%s2811_s0 + $0x23c] ss:$20 sps:$4 sm:$0xff]  }
  0x3b   :  { %1919 = vmatpush3.bf16.msra.mxu1 %v2148_v48  ;;  %919 = vmatprep.mubr.bf16.mxu0 %v2152_v50  ;;  %v2234_v45 = vld [vmem:[%s2811_s0 + $0x1f0] ss:$20 sps:$4 sm:$0xff]   ;;  %v2240_v50 = vld [vmem:[%s2811_s0 + $0x260] ss:$20 sps:$4 sm:$0xff]  }
  0x3c   :  { %1920 = vmatprep.subr.bf16.mxu1 %v2149_v49  ;;  %1048 = vmatprep.mubr.bf16.mxu1 %v2156_v51  ;;  %v2237_v48 = vld [vmem:[%s2811_s0 + $0x264] ss:$20 sps:$4 sm:$0xff]   ;;  %v2239_v49 = vld [vmem:[%s2811_s0 + $0x240] ss:$20 sps:$4 sm:$0xff]   ;;  %v2241_v51 = vld [vmem:[%s2811_s0 + $0x268] ss:$20 sps:$4 sm:$0xff]  }
  0x3f   :  { %1921 = vmatpush3.bf16.msra.mxu1 %v2151_v52 }
  0x42   :  { %920 = vmatmul.mubr.bf16.gmra.mrb[16].mxu0 %v2157_v54  ;;  %1049 = vmatmul.mubr.bf16.vlgmr.msra.gmra.mrb[16].mxu1 %v2154_v53 }
  0x43   :  { %927 = vmatprep.mubr.bf16.mxu0 %v2158_v55  ;;  %1056 = vmatprep.mubr.bf16.mxu1 %v2160_v57 }
  0x4a   :  { %928 = vmatmul.mubr.bf16.gmra.mrb[20].mxu0 %v2162_v58  ;;  %1057 = vmatmul.mubr.bf16.gmra.mrb[20].mxu1 %v2163_v59 }
  0x4b   :  { %935 = vmatprep.mubr.bf16.mxu0 %v2164_v60  ;;  %1064 = vmatprep.mubr.bf16.mxu1 %v2166_v61 }
  0x52   :  { %936 = vmatmul.mubr.bf16.gmra.mrb[24].mxu0 %v2168_v62  ;;  %1065 = vmatmul.mubr.bf16.gmra.mrb[24].mxu1 %v2169_v63 }
  0x53   :  { %943 = vmatprep.mubr.bf16.mxu0 %v2171_v0  ;;  %1072 = vmatprep.mubr.bf16.mxu1 %v2173_v1 }
  0x5a   :  { %944 = vmatmul.mubr.bf16.gmra.mrb[28].mxu0 %v2175_v2  ;;  %1073 = vmatmul.mubr.bf16.gmra.mrb[28].mxu1 %v2176_v3 }
  0x5b   :  { %951 = vmatprep.mubr.bf16.mxu0 %v2177_v4  ;;  %1080 = vmatprep.mubr.bf16.mxu1 %v2179_v5 }
  0x62   :  { %952 = vmatmul.mubr.bf16.gmra.mrb[32].mxu0 %v2181_v6  ;;  %1081 = vmatmul.mubr.bf16.gmra.mrb[32].mxu1 %v2182_v7 }
  0x63   :  { %959 = vmatprep.mubr.bf16.mxu0 %v2183_v8  ;;  %1088 = vmatprep.mubr.bf16.mxu1 %v2185_v9 }
  0x6a   :  { %960 = vmatmul.mubr.bf16.gmra.mrb[36].mxu0 %v2187_v10  ;;  %1089 = vmatmul.mubr.bf16.gmra.mrb[36].mxu1 %v2188_v11 }
  0x6b   :  { %967 = vmatprep.mubr.bf16.mxu0 %v2190_v12  ;;  %1096 = vmatprep.mubr.bf16.mxu1 %v2192_v13 }
  0x72   :  { %968 = vmatmul.mubr.bf16.gmra.mrb[40].mxu0 %v2194_v14  ;;  %1097 = vmatmul.mubr.bf16.gmra.mrb[40].mxu1 %v2195_v15 }
  0x73   :  { %975 = vmatprep.mubr.bf16.mxu0 %v2196_v16  ;;  %1104 = vmatprep.mubr.bf16.mxu1 %v2198_v17 }
  0x7a   :  { %976 = vmatmul.mubr.bf16.gmra.mrb[44].mxu0 %v2200_v18  ;;  %1105 = vmatmul.mubr.bf16.gmra.mrb[44].mxu1 %v2201_v19 }
  0x7b   :  { %1112 = vmatprep.mubr.bf16.mxu1 %v2202_v20  ;;  %2046 = vmatprep.mubr.msk.bf16.mxu0 %vm806_vm0, %v2204_v21 }
  0x82   :  { %1113 = vmatmul.mubr.bf16.gmra.mrb[48].mxu1 %v2205_v22  ;;  %2047 = vmatmul.mubr.msk.bf16.vlgmr.msra.gmra.mrb[48].mxu0 %vm806_vm0, %v2206_v23 }
  0x83   :  { %1120 = vmatprep.mubr.bf16.mxu1 %v2207_v24  ;;  %2050 = vmatprep.mubr.msk.bf16.mxu0 %vm806_vm0, %v2209_v25 }
  0x8a   :  { %1121 = vmatmul.mubr.bf16.gmra.mrb[52].mxu1 %v2210_v26  ;;  %2051 = vmatmul.mubr.msk.bf16.gmra.mrb[52].mxu0 %vm806_vm0, %v2211_v27 }
  0x8b   :  { %1128 = vmatprep.mubr.bf16.mxu1 %v2212_v28  ;;  %2054 = vmatprep.mubr.msk.bf16.mxu0 %vm806_vm0, %v2214_v29 }
  0x92   :  { %1129 = vmatmul.mubr.bf16.gmra.mrb[56].mxu1 %v2215_v30  ;;  %2055 = vmatmul.mubr.msk.bf16.gmra.mrb[56].mxu0 %vm806_vm0, %v2216_v31 }
  0x93   :  { %1136 = vmatprep.mubr.bf16.mxu1 %v2217_v32  ;;  %2058 = vmatprep.mubr.msk.bf16.mxu0 %vm806_vm0, %v2219_v33 }
  0x9a   :  { %1137 = vmatmul.mubr.bf16.gmra.mrb[60].mxu1 %v2220_v34  ;;  %2059 = vmatmul.mubr.msk.bf16.gmra.mrb[60].mxu0 %vm806_vm0, %v2221_v35 }
  0x9b   :  { %1144 = vmatprep.mubr.bf16.mxu1 %v2222_v36  ;;  %2062 = vmatprep.mubr.msk.bf16.mxu0 %vm806_vm0, %v2224_v37 }
  0xa2   :  { %1145 = vmatmul.mubr.bf16.gmra.mrb[64].mxu1 %v2225_v38  ;;  %2063 = vmatmul.mubr.msk.bf16.gmra.mrb[64].mxu0 %vm806_vm0, %v2226_v39  ;;  %v2645_v38 = vld [vmem:[%s2812_s2] ss:$0 sm:$0xff] }
  0xa3   :  { %1152 = vmatprep.mubr.bf16.mxu1 %v2227_v40  ;;  %2066 = vmatprep.mubr.msk.bf16.mxu0 %vm806_vm0, %v2229_v41 }
  0xaa   :  { %1153 = vmatmul.mubr.bf16.gmra.mrb[68].mxu1 %v2230_v42  ;;  %2067 = vmatmul.mubr.msk.bf16.gmra.mrb[68].mxu0 %vm806_vm0, %v2231_v43 }
  0xab   :  { %1160 = vmatprep.mubr.bf16.mxu1 %v2232_v44  ;;  %2070 = vmatprep.mubr.msk.bf16.mxu0 %vm806_vm0, %v2234_v45 }
  0xb2   :  { %1161 = vmatmul.mubr.bf16.gmra.mrb[72].mxu1 %v2235_v46  ;;  %2071 = vmatmul.mubr.msk.bf16.gmra.mrb[72].mxu0 %vm806_vm0, %v2236_v47 }
  0xb3   :  { %1168 = vmatprep.mubr.bf16.mxu1 %v2237_v48  ;;  %2074 = vmatprep.mubr.msk.bf16.mxu0 %vm806_vm0, %v2239_v49 }
  0xba   :  { %1169 = vmatmul.mubr.bf16.gmra.mrb[76].mxu1 %v2240_v50  ;;  %2075 = vmatmul.mubr.msk.bf16.gmra.mrb[76].mxu0 %vm806_vm0, %v2241_v51 }
  0xf5   :  { %v1882_v52 = vpop.f32.mrb[0].mxu1  ;;  %v1810_v53 = vpop.f32.mrb[0].mxu0 }
  0xf6   :  { %v1883_v54 = vpop.f32.mrb[1].mxu1  ;;  %v1811_v55 = vpop.f32.mrb[1].mxu0 }
  0xf7   :  { %v2626_v56 = vadd.f32 %v1883_v54, %v1882_v52  ;;  %v1885_v57 = vpop.f32.mrb[2].mxu1  ;;  %v1812_v58 = vadd.f32 %v1811_v55, %v1810_v53  ;;  %v1813_v59 = vpop.f32.mrb[2].mxu0 }
  0xf8   :  { %v1886_v60 = vpop.f32.mrb[3].mxu1  ;;  %v1814_v61 = vpop.f32.mrb[3].mxu0 }
  0xf9   :  { %v2628_v62 = vadd.f32 %v1886_v60, %v1885_v57  ;;  %v1815_v63 = vadd.f32 %v1814_v61, %v1813_v59  ;;  %v890_v41 = vadd.f32 %v1812_v58, %v2645_v38 }
  0xfb   :  { %v893_v48 = vadd.f32 %v1815_v63, %v2645_v38 }
  0xfd   :  { %v1888_v0 = vpop.f32.mrb[4].mxu1  ;;  %v1816_v1 = vpop.f32.mrb[4].mxu0 }
  0xfe   :  { %v1889_v2 = vpop.f32.mrb[5].mxu1  ;;  %v1817_v3 = vpop.f32.mrb[5].mxu0 }
  0xff   :  { %v2630_v4 = vadd.f32 %v1889_v2, %v1888_v0  ;;  %v1891_v5 = vpop.f32.mrb[6].mxu1  ;;  %v1818_v6 = vadd.f32 %v1817_v3, %v1816_v1  ;;  %v1819_v7 = vpop.f32.mrb[6].mxu0 }
 0x100   :  { %v1892_v8 = vpop.f32.mrb[7].mxu1  ;;  %v1820_v9 = vpop.f32.mrb[7].mxu0 }
 0x101   :  { %v2632_v10 = vadd.f32 %v1892_v8, %v1891_v5  ;;  %v1821_v11 = vadd.f32 %v1820_v9, %v1819_v7  ;;  %v898_v58 = vadd.f32 %v1818_v6, %v2645_v38 }
 0x103   :  { %v901_v63 = vadd.f32 %v1821_v11, %v2645_v38 }
 0x105   :  { %v1894_v12 = vpop.f32.mrb[8].mxu1  ;;  %v1822_v13 = vpop.f32.mrb[8].mxu0 }
 0x106   :  { %v1895_v14 = vpop.f32.mrb[9].mxu1  ;;  %v1823_v15 = vpop.f32.mrb[9].mxu0 }
 0x107   :  { %v2634_v16 = vadd.f32 %v1895_v14, %v1894_v12  ;;  %v1897_v17 = vpop.f32.mrb[10].mxu1  ;;  %v1824_v18 = vadd.f32 %v1823_v15, %v1822_v13  ;;  %v1825_v19 = vpop.f32.mrb[10].mxu0 }
 0x108   :  { %v1898_v20 = vpop.f32.mrb[11].mxu1  ;;  %v1826_v21 = vpop.f32.mrb[11].mxu0 }
 0x109   :  { %v2636_v22 = vadd.f32 %v1898_v20, %v1897_v17  ;;  %v1827_v23 = vadd.f32 %v1826_v21, %v1825_v19  ;;  %v906_v6 = vadd.f32 %v1824_v18, %v2645_v38 }
 0x10b   :  { %v909_v11 = vadd.f32 %v1827_v23, %v2645_v38 }
 0x10d   :  { %v1900_v24 = vpop.f32.mrb[12].mxu1  ;;  %v1828_v25 = vpop.f32.mrb[12].mxu0 }
 0x10e   :  { %v1901_v26 = vpop.f32.mrb[13].mxu1  ;;  %v1829_v27 = vpop.f32.mrb[13].mxu0 }
 0x10f   :  { %v2638_v28 = vadd.f32 %v1901_v26, %v1900_v24  ;;  %v1903_v29 = vpop.f32.mrb[14].mxu1  ;;  %v1830_v30 = vadd.f32 %v1829_v27, %v1828_v25  ;;  %v1831_v31 = vpop.f32.mrb[14].mxu0 }
 0x110   :  { %v1904_v32 = vpop.f32.mrb[15].mxu1  ;;  %v1832_v33 = vpop.f32.mrb[15].mxu0 }
 0x111   :  { %v2640_v34 = vadd.f32 %v1904_v32, %v1903_v29  ;;  %v1833_v35 = vadd.f32 %v1832_v33, %v1831_v31  ;;  %v914_v18 = vadd.f32 %v1830_v30, %v2645_v38 }
 0x113   :  { %v917_v23 = vadd.f32 %v1833_v35, %v2645_v38 }
 0x115   :  { %v1922_v36 = vpop.f32.mrb[16].mxu1  ;;  %v1834_v37 = vpop.f32.mrb[16].mxu0 }
 0x116   :  { %v1923_v39 = vpop.f32.mrb[17].mxu1  ;;  %v1835_v40 = vpop.f32.mrb[17].mxu0 }
 0x117   :  { %v1924_v42 = vadd.f32 %v1923_v39, %v1922_v36  ;;  %v1925_v43 = vpop.f32.mrb[18].mxu1  ;;  %v1836_v44 = vadd.f32 %v1835_v40, %v1834_v37  ;;  %v1837_v45 = vpop.f32.mrb[18].mxu0 }
 0x118   :  { %v1926_v46 = vpop.f32.mrb[19].mxu1  ;;  %v1838_v47 = vpop.f32.mrb[19].mxu0 }
 0x119   :  { %v1927_v49 = vadd.f32 %v1926_v46, %v1925_v43  ;;  %v1839_v50 = vadd.f32 %v1838_v47, %v1837_v45  ;;  %v2649_v51 = vadd.f32 %v1924_v42, %v890_v41  ;;  %v922_v30 = vadd.f32 %v1836_v44, %v2645_v38 }
 0x11b   :  { %v2651_v52 = vadd.f32 %v1927_v49, %v893_v48  ;;  %v925_v35 = vadd.f32 %v1839_v50, %v2645_v38 }
 0x11d   :  { %v1928_v53 = vpop.f32.mrb[20].mxu1  ;;  %v1840_v54 = vpop.f32.mrb[20].mxu0 }
 0x11e   :  { %v1929_v55 = vpop.f32.mrb[21].mxu1  ;;  %v1841_v57 = vpop.f32.mrb[21].mxu0 }
 0x11f   :  { %v1930_v59 = vadd.f32 %v1929_v55, %v1928_v53  ;;  %v1931_v60 = vpop.f32.mrb[22].mxu1  ;;  %v1842_v61 = vadd.f32 %v1841_v57, %v1840_v54  ;;  %v1843_v0 = vpop.f32.mrb[22].mxu0 }
 0x120   :  { %v1932_v1 = vpop.f32.mrb[23].mxu1  ;;  %v1844_v2 = vpop.f32.mrb[23].mxu0 }
 0x121   :  { %v1933_v3 = vadd.f32 %v1932_v1, %v1931_v60  ;;  %v1845_v5 = vadd.f32 %v1844_v2, %v1843_v0  ;;  %v2655_v7 = vadd.f32 %v1930_v59, %v898_v58  ;;  %v930_v44 = vadd.f32 %v1842_v61, %v2645_v38 }
 0x123   :  { %v2657_v8 = vadd.f32 %v1933_v3, %v901_v63 }
 0x125   :  { %v1934_v9 = vpop.f32.mrb[24].mxu1  ;;  %v1846_v12 = vpop.f32.mrb[24].mxu0 }
 0x126   :  { %v1935_v13 = vpop.f32.mrb[25].mxu1  ;;  %v1847_v14 = vpop.f32.mrb[25].mxu0 }
 0x127   :  { %v1936_v15 = vadd.f32 %v1935_v13, %v1934_v9  ;;  %v1937_v17 = vpop.f32.mrb[26].mxu1  ;;  %v1848_v19 = vadd.f32 %v1847_v14, %v1846_v12  ;;  %v1849_v20 = vpop.f32.mrb[26].mxu0 }
 0x128   :  { %v1938_v21 = vpop.f32.mrb[27].mxu1  ;;  %v1850_v24 = vpop.f32.mrb[27].mxu0 }
 0x129   :  { %v1939_v25 = vadd.f32 %v1938_v21, %v1937_v17  ;;  %v1851_v26 = vadd.f32 %v1850_v24, %v1849_v20  ;;  %v2661_v27 = vadd.f32 %v1936_v15, %v906_v6 }
 0x12b   :  { %v2663_v29 = vadd.f32 %v1939_v25, %v909_v11  ;;  %v933_v11 = vadd.f32 %v1845_v5, %v2645_v38 }
 0x12d   :  { %v1940_v31 = vpop.f32.mrb[28].mxu1  ;;  %v1852_v32 = vpop.f32.mrb[28].mxu0 }
 0x12e   :  { %v1941_v33 = vpop.f32.mrb[29].mxu1  ;;  %v1853_v36 = vpop.f32.mrb[29].mxu0 }
 0x12f   :  { %v1942_v37 = vadd.f32 %v1941_v33, %v1940_v31  ;;  %v1943_v39 = vpop.f32.mrb[30].mxu1  ;;  %v1854_v40 = vadd.f32 %v1853_v36, %v1852_v32  ;;  %v1855_v41 = vpop.f32.mrb[30].mxu0 }
 0x130   :  { %v1944_v42 = vpop.f32.mrb[31].mxu1  ;;  %v1856_v43 = vpop.f32.mrb[31].mxu0 }
 0x131   :  { %v1945_v45 = vadd.f32 %v1944_v42, %v1943_v39  ;;  %v1857_v46 = vadd.f32 %v1856_v43, %v1855_v41  ;;  %v2667_v47 = vadd.f32 %v1942_v37, %v914_v18  ;;  %v938_v39 = vadd.f32 %v1848_v19, %v2645_v38 }
 0x133   :  { %v2669_v48 = vadd.f32 %v1945_v45, %v917_v23 }
 0x135   :  { %v1946_v49 = vpop.f32.mrb[32].mxu1  ;;  %v1858_v53 = vpop.f32.mrb[32].mxu0 }
 0x136   :  { %v1947_v54 = vpop.f32.mrb[33].mxu1  ;;  %v1859_v55 = vpop.f32.mrb[33].mxu0 }
 0x137   :  { %v1948_v57 = vadd.f32 %v1947_v54, %v1946_v49  ;;  %v1949_v58 = vpop.f32.mrb[34].mxu1  ;;  %v1860_v59 = vadd.f32 %v1859_v55, %v1858_v53  ;;  %v1861_v60 = vpop.f32.mrb[34].mxu0  ;;  %v941_v49 = vadd.f32 %v1851_v26, %v2645_v38 }
 0x138   :  { %v1950_v0 = vpop.f32.mrb[35].mxu1  ;;  %v1862_v1 = vpop.f32.mrb[35].mxu0 }
 0x139   :  { %v1951_v2 = vadd.f32 %v1950_v0, %v1949_v58  ;;  %v2673_v63 = vadd.f32 %v1862_v1, %v1861_v60  ;;  %v2675_v3 = vadd.f32 %v1948_v57, %v922_v30  ;;  %v946_v0 = vadd.f32 %v1854_v40, %v2645_v38 }
 0x13b   :  { %v2677_v9 = vadd.f32 %v1951_v2, %v925_v35 }
 0x13d   :  { %v1952_v12 = vpop.f32.mrb[36].mxu1  ;;  %v1864_v13 = vpop.f32.mrb[36].mxu0 }
 0x13e   :  { %v1953_v14 = vpop.f32.mrb[37].mxu1  ;;  %v1865_v6 = vpop.f32.mrb[37].mxu0 }
 0x13f   :  { %v1954_v15 = vadd.f32 %v1953_v14, %v1952_v12  ;;  %v1955_v17 = vpop.f32.mrb[38].mxu1  ;;  %v2680_v20 = vadd.f32 %v1865_v6, %v1864_v13  ;;  %v1867_v21 = vpop.f32.mrb[38].mxu0  ;;  %v949_v14 = vadd.f32 %v1857_v46, %v2645_v38 }
 0x140   :  { %v1956_v24 = vpop.f32.mrb[39].mxu1  ;;  %v1868_v50 = vpop.f32.mrb[39].mxu0 }
 0x141   :  { %v1957_v25 = vadd.f32 %v1956_v24, %v1955_v17  ;;  %v2683_v31 = vadd.f32 %v1868_v50, %v1867_v21  ;;  %v2685_v32 = vadd.f32 %v1954_v15, %v930_v44 }
 0x143   :  { %v2687_v33 = vadd.f32 %v1957_v25, %v933_v11  ;;  %v954_v25 = vadd.f32 %v1860_v59, %v2645_v38 }
 0x145   :  { %v1958_v36 = vpop.f32.mrb[40].mxu1  ;;  %v1870_v18 = vpop.f32.mrb[40].mxu0 }
 0x146   :  { %v1959_v37 = vpop.f32.mrb[41].mxu1  ;;  %v1871_v61 = vpop.f32.mrb[41].mxu0 }
 0x147   :  { %v1960_v41 = vadd.f32 %v1959_v37, %v1958_v36  ;;  %v1961_v42 = vpop.f32.mrb[42].mxu1  ;;  %v2690_v43 = vadd.f32 %v1871_v61, %v1870_v18  ;;  %v1873_v23 = vpop.f32.mrb[42].mxu0 }
 0x148   :  { %v1962_v45 = vpop.f32.mrb[43].mxu1  ;;  %v1874_v5 = vpop.f32.mrb[43].mxu0 }
 0x149   :  { %v1963_v53 = vadd.f32 %v1962_v45, %v1961_v42  ;;  %v2693_v54 = vadd.f32 %v1874_v5, %v1873_v23  ;;  %v2695_v55 = vadd.f32 %v1960_v41, %v938_v39  ;;  %v957_v42 = vadd.f32 %v2673_v63, %v2645_v38 }
 0x14b   :  { %v2697_v30 = vadd.f32 %v1963_v53, %v941_v49 }
 0x14d   :  { %v1964_v57 = vpop.f32.mrb[44].mxu1  ;;  %v1876_v58 = vpop.f32.mrb[44].mxu0 }
 0x14e   :  { %v1965_v60 = vpop.f32.mrb[45].mxu1  ;;  %v1877_v19 = vpop.f32.mrb[45].mxu0 }
 0x14f   :  { %v1966_v1 = vadd.f32 %v1965_v60, %v1964_v57  ;;  %v1967_v35 = vpop.f32.mrb[46].mxu1  ;;  %v2700_v2 = vadd.f32 %v1877_v19, %v1876_v58  ;;  %v1879_v12 = vpop.f32.mrb[46].mxu0  ;;  %v962_v57 = vadd.f32 %v2680_v20, %v2645_v38 }
 0x150   :  { %v1968_v13 = vpop.f32.mrb[47].mxu1  ;;  %v1880_v26 = vpop.f32.mrb[47].mxu0 }
 0x151   :  { %v1969_v6 = vadd.f32 %v1968_v13, %v1967_v35  ;;  %v2703_v44 = vadd.f32 %v1880_v26, %v1879_v12  ;;  %v2705_v15 = vadd.f32 %v1966_v1, %v946_v0  ;;  %v965_v13 = vadd.f32 %v2683_v31, %v2645_v38 }
 0x153   :  { %v2707_v17 = vadd.f32 %v1969_v6, %v949_v14 }
 0x155   :  { %v1970_v21 = vpop.f32.mrb[48].mxu1  ;;  %v2048_v24 = vpop.f32.mrb[48].mxu0 }
 0x156   :  { %v1220_v40 = vadd.f32 %v2048_v24, %v2655_v7  ;;  %v1971_v50 = vpop.f32.mrb[49].mxu1  ;;  %v1211_v11 = vpop.f32.mrb[49].mxu0 }
 0x157   :  { %v1972_v36 = vadd.f32 %v1971_v50, %v1970_v21  ;;  %v1212_v18 = vadd.f32 %v1211_v11, %v2649_v51  ;;  %v1973_v37 = vpop.f32.mrb[50].mxu1  ;;  %v2049_v46 = vpop.f32.mrb[50].mxu0 }
 0x158   :  { %v1223_v61 = vadd.f32 %v2049_v46, %v2657_v8  ;;  %v1974_v39 = vpop.f32.mrb[51].mxu1  ;;  %v1214_v41 = vpop.f32.mrb[51].mxu0 }
 0x159   :  { %v1975_v23 = vadd.f32 %v1974_v39, %v1973_v37  ;;  %v1215_v45 = vadd.f32 %v1214_v41, %v2651_v52  ;;  %v2716_v7 = vadd.f32 %v1972_v36, %v954_v25 }
 0x15a   :  { %v1707_v5 = vpack.c.bf16 %v1223_v61, %v1220_v40  ;;  %v973_v61 = vadd.f32 %v2693_v54, %v2645_v38 }
 0x15b   :  { %v1702_v49 = vpack.c.bf16 %v1215_v45, %v1212_v18  ;;  %v2718_v59 = vadd.f32 %v1975_v23, %v957_v42 }
 0x15c   :  { %1779 = vst [vmem:[%s2813_s3 + $0x8] sm:$0xff] %v1707_v5  }
 0x15d   :  { %1703 = vst [vmem:[%s2813_s3] sm:$0xff] %v1702_v49   ;;  %v1976_v51 = vpop.f32.mrb[52].mxu1  ;;  %v2052_v8 = vpop.f32.mrb[52].mxu0 }
 0x15e   :  { %v1236_v63 = vadd.f32 %v2052_v8, %v2667_v47  ;;  %v1977_v53 = vpop.f32.mrb[53].mxu1  ;;  %v1227_v52 = vpop.f32.mrb[53].mxu0 }
 0x15f   :  { %v1978_v58 = vadd.f32 %v1977_v53, %v1976_v51  ;;  %v1228_v60 = vadd.f32 %v1227_v52, %v2661_v27  ;;  %v1979_v19 = vpop.f32.mrb[54].mxu1  ;;  %v2053_v0 = vpop.f32.mrb[54].mxu0 }
 0x160   :  { %v1239_v1 = vadd.f32 %v2053_v0, %v2669_v48  ;;  %v1980_v35 = vpop.f32.mrb[55].mxu1  ;;  %v1230_v12 = vpop.f32.mrb[55].mxu0 }
 0x161   :  { %v1981_v26 = vadd.f32 %v1980_v35, %v1979_v19  ;;  %v1231_v47 = vadd.f32 %v1230_v12, %v2663_v29  ;;  %v1123_v14 = vadd.f32 %v1978_v58, %v962_v57  ;;  %v970_v29 = vadd.f32 %v2690_v43, %v2645_v38 }
 0x162   :  { %v1717_v6 = vpack.c.bf16 %v1239_v1, %v1236_v63  ;;  %v981_v58 = vadd.f32 %v2703_v44, %v2645_v38 }
 0x163   :  { %v1712_v21 = vpack.c.bf16 %v1231_v47, %v1228_v60  ;;  %v1126_v24 = vadd.f32 %v1981_v26, %v965_v13 }
 0x164   :  { %1781 = vst [vmem:[%s2813_s3 + $0x18] sm:$0xff] %v1717_v6  }
 0x165   :  { %1780 = vst [vmem:[%s2813_s3 + $0x10] sm:$0xff] %v1712_v21   ;;  %v1982_v27 = vpop.f32.mrb[56].mxu1  ;;  %v2056_v48 = vpop.f32.mrb[56].mxu0 }
 0x166   :  { %v1252_v20 = vadd.f32 %v2056_v48, %v2685_v32  ;;  %v1983_v31 = vpop.f32.mrb[57].mxu1  ;;  %v1243_v40 = vpop.f32.mrb[57].mxu0 }
 0x167   :  { %v1984_v50 = vadd.f32 %v1983_v31, %v1982_v27  ;;  %v1244_v11 = vadd.f32 %v1243_v40, %v2675_v3  ;;  %v1985_v25 = vpop.f32.mrb[58].mxu1  ;;  %v2057_v36 = vpop.f32.mrb[58].mxu0 }
 0x168   :  { %v1255_v18 = vadd.f32 %v2057_v36, %v2687_v33  ;;  %v1986_v37 = vpop.f32.mrb[59].mxu1  ;;  %v1246_v46 = vpop.f32.mrb[59].mxu0 }
 0x169   :  { %v1987_v39 = vadd.f32 %v1986_v37, %v1985_v25  ;;  %v1247_v32 = vadd.f32 %v1246_v46, %v2677_v9  ;;  %v1131_v41 = vadd.f32 %v1984_v50, %v970_v29  ;;  %v978_v9 = vadd.f32 %v2700_v2, %v2645_v38 }
 0x16a   :  { %v1727_v42 = vpack.c.bf16 %v1255_v18, %v1252_v20  ;;  %v989_v20 = vadd.f32 %v2628_v62, %v2645_v38 }
 0x16b   :  { %v1722_v23 = vpack.c.bf16 %v1247_v32, %v1244_v11  ;;  %v1134_v45 = vadd.f32 %v1987_v39, %v973_v61 }
 0x16c   :  { %1783 = vst [vmem:[%s2813_s3 + $0x28] sm:$0xff] %v1727_v42   ;;  %v997_v42 = vadd.f32 %v2632_v10, %v2645_v38  ;;  %v1002_v10 = vadd.f32 %v2634_v16, %v2645_v38 }
 0x16d   :  { %1782 = vst [vmem:[%s2813_s3 + $0x20] sm:$0xff] %v1722_v23   ;;  %v1988_v3 = vpop.f32.mrb[60].mxu1  ;;  %v2060_v33 = vpop.f32.mrb[60].mxu0 }
 0x16e   :  { %v1268_v43 = vadd.f32 %v2060_v33, %v2705_v15  ;;  %v1989_v54 = vpop.f32.mrb[61].mxu1  ;;  %v1259_v5 = vpop.f32.mrb[61].mxu0 }
 0x16f   :  { %v1990_v49 = vadd.f32 %v1989_v54, %v1988_v3  ;;  %v1260_v51 = vadd.f32 %v1259_v5, %v2695_v55  ;;  %v1991_v8 = vpop.f32.mrb[62].mxu1  ;;  %v2061_v63 = vpop.f32.mrb[62].mxu0 }
 0x170   :  { %v1271_v53 = vadd.f32 %v2061_v63, %v2707_v17  ;;  %v1992_v52 = vpop.f32.mrb[63].mxu1  ;;  %v1262_v57 = vpop.f32.mrb[63].mxu0 }
 0x171   :  { %v1993_v60 = vadd.f32 %v1992_v52, %v1991_v8  ;;  %v1263_v15 = vadd.f32 %v1262_v57, %v2697_v30  ;;  %v1139_v19 = vadd.f32 %v1990_v49, %v978_v9  ;;  %v986_v30 = vadd.f32 %v2626_v56, %v2645_v38 }
 0x172   :  { %v1737_v0 = vpack.c.bf16 %v1271_v53, %v1268_v43 }
 0x173   :  { %v1732_v1 = vpack.c.bf16 %v1263_v15, %v1260_v51  ;;  %v1142_v35 = vadd.f32 %v1993_v60, %v981_v58  ;;  %v1005_v60 = vadd.f32 %v2636_v22, %v2645_v38  ;;  %v1010_v22 = vadd.f32 %v2638_v28, %v2645_v38 }
 0x174   :  { %1785 = vst [vmem:[%s2813_s3 + $0x38] sm:$0xff] %v1737_v0  }
 0x175   :  { %1784 = vst [vmem:[%s2813_s3 + $0x30] sm:$0xff] %v1732_v1   ;;  %v1994_v55 = vpop.f32.mrb[64].mxu1  ;;  %v2064_v2 = vpop.f32.mrb[64].mxu0 }
 0x176   :  { %v1284_v17 = vadd.f32 %v2064_v2, %v1123_v14  ;;  %v1995_v12 = vpop.f32.mrb[65].mxu1  ;;  %v1275_v44 = vpop.f32.mrb[65].mxu0 }
 0x177   :  { %v1996_v13 = vadd.f32 %v1995_v12, %v1994_v55  ;;  %v1276_v26 = vadd.f32 %v1275_v44, %v2716_v7  ;;  %v1997_v47 = vpop.f32.mrb[66].mxu1  ;;  %v2065_v6 = vpop.f32.mrb[66].mxu0 }
 0x178   :  { %v1287_v21 = vadd.f32 %v2065_v6, %v1126_v24  ;;  %v1998_v27 = vpop.f32.mrb[67].mxu1  ;;  %v1278_v48 = vpop.f32.mrb[67].mxu0 }
 0x179   :  { %v1999_v31 = vadd.f32 %v1998_v27, %v1997_v47  ;;  %v1279_v40 = vadd.f32 %v1278_v48, %v2718_v59  ;;  %v1147_v14 = vadd.f32 %v1996_v13, %v986_v30  ;;  %v994_v59 = vadd.f32 %v2630_v4, %v2645_v38 }
 0x17a   :  { %v1747_v29 = vpack.c.bf16 %v1287_v21, %v1284_v17  ;;  %v1013_v21 = vadd.f32 %v2640_v34, %v2645_v38 }
 0x17b   :  { %v1742_v50 = vpack.c.bf16 %v1279_v40, %v1276_v26  ;;  %v1150_v11 = vadd.f32 %v1999_v31, %v989_v20 }
 0x17c   :  { %1787 = vst [vmem:[%s2813_s3 + $0x48] sm:$0xff] %v1747_v29  }
 0x17d   :  { %1786 = vst [vmem:[%s2813_s3 + $0x40] sm:$0xff] %v1742_v50   ;;  %v2000_v56 = vpop.f32.mrb[68].mxu1  ;;  %v2068_v7 = vpop.f32.mrb[68].mxu0 }
 0x17e   :  { %v1300_v24 = vadd.f32 %v2068_v7, %v1139_v19  ;;  %v2001_v25 = vpop.f32.mrb[69].mxu1  ;;  %v1291_v62 = vpop.f32.mrb[69].mxu0 }
 0x17f   :  { %v2002_v36 = vadd.f32 %v2001_v25, %v2000_v56  ;;  %v1292_v18 = vadd.f32 %v1291_v62, %v1131_v41  ;;  %v2003_v37 = vpop.f32.mrb[70].mxu1  ;;  %v2069_v46 = vpop.f32.mrb[70].mxu0 }
 0x180   :  { %v1303_v61 = vadd.f32 %v2069_v46, %v1142_v35  ;;  %v2004_v39 = vpop.f32.mrb[71].mxu1  ;;  %v1294_v32 = vpop.f32.mrb[71].mxu0 }
 0x181   :  { %v2005_v23 = vadd.f32 %v2004_v39, %v2003_v37  ;;  %v1295_v3 = vadd.f32 %v1294_v32, %v1134_v45  ;;  %v1155_v33 = vadd.f32 %v2002_v36, %v994_v59 }
 0x182   :  { %v1757_v43 = vpack.c.bf16 %v1303_v61, %v1300_v24 }
 0x183   :  { %v1752_v54 = vpack.c.bf16 %v1295_v3, %v1292_v18  ;;  %v1158_v5 = vadd.f32 %v2005_v23, %v997_v42 }
 0x184   :  { %1789 = vst [vmem:[%s2813_s3 + $0x58] sm:$0xff] %v1757_v43  }
 0x185   :  { %1788 = vst [vmem:[%s2813_s3 + $0x50] sm:$0xff] %v1752_v54   ;;  %v2006_v4 = vpop.f32.mrb[72].mxu1  ;;  %v2072_v41 = vpop.f32.mrb[72].mxu0 }
 0x186   :  { %v1316_v9 = vadd.f32 %v2072_v41, %v1155_v33  ;;  %v2007_v49 = vpop.f32.mrb[73].mxu1  ;;  %v1307_v51 = vpop.f32.mrb[73].mxu0 }
 0x187   :  { %v2008_v45 = vadd.f32 %v2007_v49, %v2006_v4  ;;  %v1308_v8 = vadd.f32 %v1307_v51, %v1147_v14  ;;  %v2009_v63 = vpop.f32.mrb[74].mxu1  ;;  %v2073_v53 = vpop.f32.mrb[74].mxu0 }
 0x188   :  { %v1319_v52 = vadd.f32 %v2073_v53, %v1158_v5  ;;  %v2010_v57 = vpop.f32.mrb[75].mxu1  ;;  %v1310_v58 = vpop.f32.mrb[75].mxu0 }
 0x189   :  { %v2011_v15 = vadd.f32 %v2010_v57, %v2009_v63  ;;  %v1311_v19 = vadd.f32 %v1310_v58, %v1150_v11  ;;  %v1163_v0 = vadd.f32 %v2008_v45, %v1002_v10 }
 0x18a   :  { %v1767_v1 = vpack.c.bf16 %v1319_v52, %v1316_v9 }
 0x18b   :  { %v1762_v35 = vpack.c.bf16 %v1311_v19, %v1308_v8  ;;  %v1166_v55 = vadd.f32 %v2011_v15, %v1005_v60 }
 0x18c   :  { %1791 = vst [vmem:[%s2813_s3 + $0x68] sm:$0xff] %v1767_v1  }
 0x18d   :  { %1790 = vst [vmem:[%s2813_s3 + $0x60] sm:$0xff] %v1762_v35   ;;  %v2012_v16 = vpop.f32.mrb[76].mxu1  ;;  %v2076_v2 = vpop.f32.mrb[76].mxu0 }
 0x18e   :  { %v2013_v17 = vpop.f32.mrb[77].mxu1  ;;  %v1323_v12 = vpop.f32.mrb[77].mxu0 }
 0x18f   :  { %v2014_v44 = vadd.f32 %v2013_v17, %v2012_v16  ;;  %v1324_v30 = vadd.f32 %v1323_v12, %v1163_v0  ;;  %v2015_v13 = vpop.f32.mrb[78].mxu1  ;;  %v2077_v26 = vpop.f32.mrb[78].mxu0 }
 0x190   :  { %v2016_v47 = vpop.f32.mrb[79].mxu1  ;;  %v1326_v6 = vpop.f32.mrb[79].mxu0 }
 0x191   :  { %v1171_v27 = vadd.f32 %v2014_v44, %v1010_v22  ;;  %v2017_v48 = vadd.f32 %v2016_v47, %v2015_v13  ;;  %v1327_v20 = vadd.f32 %v1326_v6, %v1166_v55 }
 0x193   :  { %v1332_v31 = vadd.f32 %v2076_v2, %v1171_v27  ;;  %v1174_v40 = vadd.f32 %v2017_v48, %v1013_v21  ;;  %v1772_v14 = vpack.c.bf16 %v1327_v20, %v1324_v30 }
 0x195   :  { %v1335_v29 = vadd.f32 %v2077_v26, %v1174_v40  ;;  %1792 = vst [vmem:[%s2813_s3 + $0x70] sm:$0xff] %v1772_v14  }
 0x197   :  { %v1777_v28 = vpack.c.bf16 %v1335_v29, %v1332_v31 }
 0x199   :  { %1793 = vst [vmem:[%s2813_s3 + $0x78] sm:$0xff] %v1777_v28  }

// kernel: custom-call
= control target key start
LH: loop header
LB: loop body
LE: loop exit
PB: predicated region body
PF: predicated region fallthrough
CT: control target
= control target key end

     0   :  { %s6_s0 = inlined_call_operand.vmem [shape: f32[2,2,8,8,32], index: 0, kind: output, shape index: {}]  }

// kernel: custom-call.1
= control target key start
LH: loop header
LB: loop body
LE: loop exit
PB: predicated region body
PF: predicated region fallthrough
CT: control target
= control target key end

     0   :  { %s6_s0 = inlined_call_operand.vmem [shape: f32[2,2,4,4,32], index: 0, kind: output, shape index: {}]  }

// kernel: custom-call.2
= control target key start
LH: loop header
LB: loop body
LE: loop exit
PB: predicated region body
PF: predicated region fallthrough
CT: control target
= control target key end

     0   :  { %s6_s0 = inlined_call_operand.vmem [shape: f32[2,2,2,2,32], index: 0, kind: output, shape index: {}]  }

// kernel: custom-call.3
= control target key start
LH: loop header
LB: loop body
LE: loop exit
PB: predicated region body
PF: predicated region fallthrough
CT: control target
= control target key end

     0   :  { %s6_s0 = inlined_call_operand.vmem [shape: f32[2,2,1,1,32], index: 0, kind: output, shape index: {}]  }

// kernel: closed_call.77
= control target key start
LH: loop header
LB: loop body
LE: loop exit
PB: predicated region body
PF: predicated region fallthrough
CT: control target
= control target key end

     0   :  { %vm558_vm0 = vcmask 523264   ;;  %s1733_s1 = inlined_call_operand.vmem [shape: bf16[576,128], index: 1, kind: input, shape index: {}]   ;;  %s1734_s0 = inlined_call_operand.vmem [shape: bf16[128,576], index: 0, kind: input, shape index: {}]   ;;  %s1735_s2 = inlined_call_operand.vmem [shape: f32[1,128], index: 2, kind: input, shape index: {}]   ;;  %s1736_s3 = inlined_call_operand.vmem [shape: bf16[128,128], index: 3, kind: output, shape index: {}]  }
   0x1   :  { %v1310_v0 = vld [vmem:[%s1733_s1 + $0x40] sm:$0xff]   ;;  %v1314_v4 = vld [vmem:[%s1733_s1 + $0x48] sm:$0xff]   ;;  %v1318_v8 = vld [vmem:[%s1733_s1 + $0x50] sm:$0xff]  }
   0x2   :  { %v1311_v1 = vld [vmem:[%s1733_s1 + $0xc0] sm:$0xff]   ;;  %1138 = vmatprep.subr.bf16.mxu0 %v1310_v0  ;;  %v1315_v5 = vld [vmem:[%s1733_s1 + $0xc8] sm:$0xff]   ;;  %v1319_v9 = vld [vmem:[%s1733_s1 + $0xd0] sm:$0xff]  }
   0x3   :  { %v1312_v2 = vld [vmem:[%s1733_s1] sm:$0xff]   ;;  %1202 = vmatprep.subr.bf16.mxu1 %v1311_v1  ;;  %v1316_v6 = vld [vmem:[%s1733_s1 + $0x8] sm:$0xff]   ;;  %v1320_v10 = vld [vmem:[%s1733_s1 + $0x10] sm:$0xff]  }
   0x4   :  { %v1313_v3 = vld [vmem:[%s1733_s1 + $0x80] sm:$0xff]   ;;  %1139 = vmatpush3.bf16.msra.mxu0 %v1312_v2  ;;  %v1317_v7 = vld [vmem:[%s1733_s1 + $0x88] sm:$0xff]   ;;  %v1321_v11 = vld [vmem:[%s1733_s1 + $0x90] sm:$0xff]  }
   0x5   :  { %1203 = vmatpush3.bf16.msra.mxu1 %v1313_v3  ;;  %1140 = vmatprep.subr.bf16.mxu0 %v1314_v4  ;;  %v1322_v12 = vld [vmem:[%s1733_s1 + $0x58] sm:$0xff]   ;;  %v1326_v16 = vld [vmem:[%s1733_s1 + $0x60] sm:$0xff]   ;;  %v1330_v20 = vld [vmem:[%s1733_s1 + $0x68] sm:$0xff]  }
   0x6   :  { %1204 = vmatprep.subr.bf16.mxu1 %v1315_v5  ;;  %v1323_v13 = vld [vmem:[%s1733_s1 + $0xd8] sm:$0xff]   ;;  %v1327_v17 = vld [vmem:[%s1733_s1 + $0xe0] sm:$0xff]   ;;  %v1331_v21 = vld [vmem:[%s1733_s1 + $0xe8] sm:$0xff]  }
   0x7   :  { %v1324_v14 = vld [vmem:[%s1733_s1 + $0x18] sm:$0xff]   ;;  %v1328_v18 = vld [vmem:[%s1733_s1 + $0x20] sm:$0xff]   ;;  %v1332_v22 = vld [vmem:[%s1733_s1 + $0x28] sm:$0xff]  }
   0x8   :  { %1141 = vmatpush3.bf16.msra.mxu0 %v1316_v6  ;;  %v1325_v15 = vld [vmem:[%s1733_s1 + $0x98] sm:$0xff]   ;;  %v1329_v19 = vld [vmem:[%s1733_s1 + $0xa0] sm:$0xff]   ;;  %v1333_v23 = vld [vmem:[%s1733_s1 + $0xa8] sm:$0xff]  }
   0x9   :  { %1205 = vmatpush3.bf16.msra.mxu1 %v1317_v7  ;;  %1142 = vmatprep.subr.bf16.mxu0 %v1318_v8  ;;  %v1334_v24 = vld [vmem:[%s1733_s1 + $0x70] sm:$0xff]   ;;  %v1338_v28 = vld [vmem:[%s1733_s1 + $0x78] sm:$0xff]   ;;  %v1347_v35 = vld [vmem:[%s1734_s0 + $0xc] ss:$20 sps:$4 sm:$0xff]  }
   0xa   :  { %1206 = vmatprep.subr.bf16.mxu1 %v1319_v9  ;;  %v1335_v25 = vld [vmem:[%s1733_s1 + $0xf0] sm:$0xff]   ;;  %v1339_v29 = vld [vmem:[%s1733_s1 + $0xf8] sm:$0xff]   ;;  %v1348_v36 = vld [vmem:[%s1733_s1 + $0x100] sm:$0xff]   ;;  %712 = vmatprep.mubr.bf16.mxu1 %v1347_v35 }
   0xb   :  { %v1336_v26 = vld [vmem:[%s1733_s1 + $0x30] sm:$0xff]   ;;  %v1340_v30 = vld [vmem:[%s1733_s1 + $0x38] sm:$0xff]   ;;  %v1349_v37 = vld [vmem:[%s1734_s0 + $0x2c] ss:$20 sps:$4 sm:$0xff]  }
   0xc   :  { %1143 = vmatpush3.bf16.msra.mxu0 %v1320_v10  ;;  %v1337_v27 = vld [vmem:[%s1733_s1 + $0xb0] sm:$0xff]   ;;  %v1341_v31 = vld [vmem:[%s1733_s1 + $0xb8] sm:$0xff]   ;;  %v1361_v42 = vld [vmem:[%s1733_s1 + $0x108] sm:$0xff]  }
   0xd   :  { %1207 = vmatpush3.bf16.msra.mxu1 %v1321_v11  ;;  %1144 = vmatprep.subr.bf16.mxu0 %v1322_v12  ;;  %v1342_v32 = vld [vmem:[%s1734_s0] ss:$20 sps:$4 sm:$0xff]   ;;  %v1344_v33 = vld [vmem:[%s1734_s0 + $0x4] ss:$20 sps:$4 sm:$0xff]   ;;  %v1345_v34 = vld [vmem:[%s1734_s0 + $0x8] ss:$20 sps:$4 sm:$0xff]  }
   0xe   :  { %1208 = vmatprep.subr.bf16.mxu1 %v1323_v13  ;;  %615 = vmatprep.mubr.bf16.mxu0 %v1344_v33  ;;  %v1351_v38 = vld [vmem:[%s1734_s0 + $0x34] ss:$20 sps:$4 sm:$0xff]   ;;  %v1354_v40 = vld [vmem:[%s1734_s0 + $0x30] ss:$20 sps:$4 sm:$0xff]   ;;  %v1360_v45 = vld [vmem:[%s1734_s0 + $0x58] ss:$20 sps:$4 sm:$0xff]  }
   0xf   :  { %v1353_v39 = vld [vmem:[%s1734_s0 + $0x28] ss:$20 sps:$4 sm:$0xff]   ;;  %v1359_v44 = vld [vmem:[%s1734_s0 + $0x50] ss:$20 sps:$4 sm:$0xff]   ;;  %v1366_v50 = vld [vmem:[%s1734_s0 + $0x78] ss:$20 sps:$4 sm:$0xff]  }
  0x10   :  { %1145 = vmatpush3.bf16.msra.mxu0 %v1324_v14  ;;  %v1355_v41 = vld [vmem:[%s1734_s0 + $0x54] ss:$20 sps:$4 sm:$0xff]   ;;  %v1357_v43 = vld [vmem:[%s1734_s0 + $0x5c] ss:$20 sps:$4 sm:$0xff]   ;;  %v1364_v48 = vld [vmem:[%s1734_s0 + $0x84] ss:$20 sps:$4 sm:$0xff]  }
  0x11   :  { %1209 = vmatpush3.bf16.msra.mxu1 %v1325_v15  ;;  %1146 = vmatprep.subr.bf16.mxu0 %v1326_v16  ;;  %v1374_v46 = vld [vmem:[%s1733_s1 + $0x110] sm:$0xff]   ;;  %v1387_v49 = vld [vmem:[%s1733_s1 + $0x118] sm:$0xff]   ;;  %v1370_v53 = vld [vmem:[%s1734_s0 + $0xac] ss:$20 sps:$4 sm:$0xff]  }
  0x12   :  { %1210 = vmatprep.subr.bf16.mxu1 %v1327_v17  ;;  %v1362_v47 = vld [vmem:[%s1734_s0 + $0x7c] ss:$20 sps:$4 sm:$0xff]   ;;  %v1367_v51 = vld [vmem:[%s1734_s0 + $0x80] ss:$20 sps:$4 sm:$0xff]   ;;  %v1368_v52 = vld [vmem:[%s1734_s0 + $0xa4] ss:$20 sps:$4 sm:$0xff]  }
  0x13   :  { %v1372_v54 = vld [vmem:[%s1734_s0 + $0xa0] ss:$20 sps:$4 sm:$0xff]   ;;  %v1373_v55 = vld [vmem:[%s1734_s0 + $0xa8] ss:$20 sps:$4 sm:$0xff]   ;;  %v1380_v59 = vld [vmem:[%s1734_s0 + $0xd0] ss:$20 sps:$4 sm:$0xff]  }
  0x14   :  { %1147 = vmatpush3.bf16.msra.mxu0 %v1328_v18  ;;  %v1375_v56 = vld [vmem:[%s1734_s0 + $0xcc] ss:$20 sps:$4 sm:$0xff]   ;;  %v1377_v57 = vld [vmem:[%s1734_s0 + $0xd4] ss:$20 sps:$4 sm:$0xff]   ;;  %v1383_v61 = vld [vmem:[%s1734_s0 + $0xfc] ss:$20 sps:$4 sm:$0xff]  }
  0x15   :  { %1211 = vmatpush3.bf16.msra.mxu1 %v1329_v19  ;;  %1148 = vmatprep.subr.bf16.mxu0 %v1330_v20  ;;  %v1379_v58 = vld [vmem:[%s1734_s0 + $0xc8] ss:$20 sps:$4 sm:$0xff]   ;;  %v1385_v62 = vld [vmem:[%s1734_s0 + $0xf0] ss:$20 sps:$4 sm:$0xff]   ;;  %v1386_v63 = vld [vmem:[%s1734_s0 + $0xf8] ss:$20 sps:$4 sm:$0xff]  }
  0x16   :  { %1212 = vmatprep.subr.bf16.mxu1 %v1331_v21  ;;  %v1381_v60 = vld [vmem:[%s1734_s0 + $0xf4] ss:$20 sps:$4 sm:$0xff]   ;;  %v1388_v0 = vld [vmem:[%s1734_s0 + $0x11c] ss:$20 sps:$4 sm:$0xff]   ;;  %v1390_v1 = vld [vmem:[%s1734_s0 + $0x124] ss:$20 sps:$4 sm:$0xff]  }
  0x17   :  { %v1392_v2 = vld [vmem:[%s1734_s0 + $0x118] ss:$20 sps:$4 sm:$0xff]   ;;  %v1393_v3 = vld [vmem:[%s1734_s0 + $0x120] ss:$20 sps:$4 sm:$0xff]   ;;  %v1394_v4 = vld [vmem:[%s1734_s0 + $0x10] ss:$20 sps:$4 sm:$0xff]  }
  0x18   :  { %1149 = vmatpush3.bf16.msra.mxu0 %v1332_v22  ;;  %v1395_v5 = vld [vmem:[%s1734_s0 + $0xb0] ss:$20 sps:$4 sm:$0xff]   ;;  %v1396_v6 = vld [vmem:[%s1734_s0 + $0x38] ss:$20 sps:$4 sm:$0xff]   ;;  %v1398_v8 = vld [vmem:[%s1734_s0 + $0x60] ss:$20 sps:$4 sm:$0xff]  }
  0x19   :  { %1213 = vmatpush3.bf16.msra.mxu1 %v1333_v23  ;;  %1150 = vmatprep.subr.bf16.mxu0 %v1334_v24  ;;  %v1397_v7 = vld [vmem:[%s1734_s0 + $0xd8] ss:$20 sps:$4 sm:$0xff]   ;;  %v1399_v9 = vld [vmem:[%s1734_s0 + $0x100] ss:$20 sps:$4 sm:$0xff]   ;;  %v1400_v10 = vld [vmem:[%s1734_s0 + $0x88] ss:$20 sps:$4 sm:$0xff]  }
  0x1a   :  { %1214 = vmatprep.subr.bf16.mxu1 %v1335_v25  ;;  %v1401_v11 = vld [vmem:[%s1734_s0 + $0x128] ss:$20 sps:$4 sm:$0xff]   ;;  %v1661_v14 = vld [vmem:[%s1735_s2] ss:$0 sm:$0xff] }
  0x1c   :  { %1151 = vmatpush3.bf16.msra.mxu0 %v1336_v26 }
  0x1d   :  { %1215 = vmatpush3.bf16.msra.mxu1 %v1337_v27  ;;  %1152 = vmatprep.subr.bf16.mxu0 %v1338_v28 }
  0x1e   :  { %1216 = vmatprep.subr.bf16.mxu1 %v1339_v29 }
  0x20   :  { %1153 = vmatpush3.bf16.msra.mxu0 %v1340_v30 }
  0x21   :  { %1217 = vmatpush3.bf16.msra.mxu1 %v1341_v31  ;;  %1278 = vmatprep.subr.bf16.mxu0 %v1348_v36 }
  0x22   :  { %1302 = vmatprep.subr.bf16.mxu1 %v1348_v36 }
  0x23   :  { %616 = vmatmul.mubr.bf16.vlgmr.msra.gmra.mrb[0].mxu0 %v1342_v32 }
  0x24   :  { %713 = vmatmul.mubr.bf16.vlgmr.msra.gmra.mrb[0].mxu1 %v1345_v34  ;;  %1279 = vmatpush3.bf16.msra.mxu0 %v1348_v36 }
  0x25   :  { %1306 = vmatpush3.bf16.msra.mxu1 %v1348_v36  ;;  %623 = vmatprep.mubr.bf16.mxu0 %v1349_v37 }
  0x26   :  { %720 = vmatprep.mubr.bf16.mxu1 %v1351_v38  ;;  %1280 = vmatprep.subr.bf16.mxu0 %v1361_v42 }
  0x27   :  { %1303 = vmatprep.subr.bf16.mxu1 %v1361_v42 }
  0x28   :  { %1281 = vmatpush3.bf16.msra.mxu0 %v1361_v42 }
  0x29   :  { %1307 = vmatpush3.bf16.msra.mxu1 %v1361_v42  ;;  %1282 = vmatprep.subr.bf16.mxu0 %v1374_v46 }
  0x2a   :  { %1304 = vmatprep.subr.bf16.mxu1 %v1374_v46 }
  0x2b   :  { %624 = vmatmul.mubr.bf16.gmra.mrb[4].mxu0 %v1353_v39 }
  0x2c   :  { %721 = vmatmul.mubr.bf16.gmra.mrb[4].mxu1 %v1354_v40  ;;  %631 = vmatprep.mubr.bf16.mxu0 %v1355_v41 }
  0x2d   :  { %728 = vmatprep.mubr.bf16.mxu1 %v1357_v43  ;;  %1283 = vmatpush3.bf16.msra.mxu0 %v1374_v46 }
  0x2e   :  { %1308 = vmatpush3.bf16.msra.mxu1 %v1374_v46  ;;  %1284 = vmatprep.subr.bf16.mxu0 %v1387_v49 }
  0x2f   :  { %1305 = vmatprep.subr.bf16.mxu1 %v1387_v49 }
  0x31   :  { %1285 = vmatpush3.bf16.msra.mxu0 %v1387_v49 }
  0x32   :  { %1309 = vmatpush3.bf16.msra.mxu1 %v1387_v49 }
  0x33   :  { %632 = vmatmul.mubr.bf16.gmra.mrb[8].mxu0 %v1359_v44 }
  0x34   :  { %729 = vmatmul.mubr.bf16.gmra.mrb[8].mxu1 %v1360_v45  ;;  %639 = vmatprep.mubr.bf16.mxu0 %v1362_v47 }
  0x35   :  { %736 = vmatprep.mubr.bf16.mxu1 %v1364_v48 }
  0x3b   :  { %640 = vmatmul.mubr.bf16.gmra.mrb[12].mxu0 %v1366_v50 }
  0x3c   :  { %737 = vmatmul.mubr.bf16.gmra.mrb[12].mxu1 %v1367_v51  ;;  %647 = vmatprep.mubr.bf16.mxu0 %v1368_v52 }
  0x3d   :  { %744 = vmatprep.mubr.bf16.mxu1 %v1370_v53 }
  0x43   :  { %648 = vmatmul.mubr.bf16.gmra.mrb[16].mxu0 %v1372_v54 }
  0x44   :  { %745 = vmatmul.mubr.bf16.gmra.mrb[16].mxu1 %v1373_v55  ;;  %655 = vmatprep.mubr.bf16.mxu0 %v1375_v56 }
  0x45   :  { %752 = vmatprep.mubr.bf16.mxu1 %v1377_v57 }
  0x4b   :  { %656 = vmatmul.mubr.bf16.gmra.mrb[20].mxu0 %v1379_v58 }
  0x4c   :  { %753 = vmatmul.mubr.bf16.gmra.mrb[20].mxu1 %v1380_v59  ;;  %663 = vmatprep.mubr.bf16.mxu0 %v1381_v60 }
  0x4d   :  { %760 = vmatprep.mubr.bf16.mxu1 %v1383_v61 }
  0x53   :  { %664 = vmatmul.mubr.bf16.gmra.mrb[24].mxu0 %v1385_v62 }
  0x54   :  { %761 = vmatmul.mubr.bf16.gmra.mrb[24].mxu1 %v1386_v63  ;;  %671 = vmatprep.mubr.bf16.mxu0 %v1388_v0 }
  0x55   :  { %768 = vmatprep.mubr.bf16.mxu1 %v1390_v1 }
  0x5b   :  { %672 = vmatmul.mubr.bf16.gmra.mrb[28].mxu0 %v1392_v2 }
  0x5c   :  { %769 = vmatmul.mubr.bf16.gmra.mrb[28].mxu1 %v1393_v3  ;;  %1286 = vmatprep.mubr.msk.bf16.mxu0 %vm558_vm0, %v1394_v4 }
  0x5d   :  { %1294 = vmatprep.mubr.msk.bf16.mxu1 %vm558_vm0, %v1395_v5 }
  0x63   :  { %1287 = vmatmul.mubr.msk.bf16.vlgmr.msra.gmra.mrb[32].mxu0 %vm558_vm0, %v1396_v6 }
  0x64   :  { %1295 = vmatmul.mubr.msk.bf16.vlgmr.msra.gmra.mrb[32].mxu1 %vm558_vm0, %v1397_v7  ;;  %1290 = vmatprep.mubr.msk.bf16.mxu0 %vm558_vm0, %v1398_v8 }
  0x65   :  { %1298 = vmatprep.mubr.msk.bf16.mxu1 %vm558_vm0, %v1399_v9 }
  0x6b   :  { %1291 = vmatmul.mubr.msk.bf16.gmra.mrb[36].mxu0 %vm558_vm0, %v1400_v10 }
  0x6c   :  { %1299 = vmatmul.mubr.msk.bf16.gmra.mrb[36].mxu1 %vm558_vm0, %v1401_v11 }
  0xf6   :  { %v1154_v12 = vpop.f32.mrb[0].mxu0 }
  0xf7   :  { %v1218_v13 = vpop.f32.mrb[0].mxu1  ;;  %v1155_v15 = vpop.f32.mrb[1].mxu0 }
  0xf8   :  { %v1156_v16 = vadd.f32 %v1155_v15, %v1154_v12  ;;  %v1219_v17 = vpop.f32.mrb[1].mxu1  ;;  %v1157_v18 = vpop.f32.mrb[2].mxu0 }
  0xf9   :  { %v1220_v19 = vadd.f32 %v1219_v17, %v1218_v13  ;;  %v1221_v20 = vpop.f32.mrb[2].mxu1  ;;  %v1158_v21 = vpop.f32.mrb[3].mxu0 }
  0xfa   :  { %v618_v22 = vadd.f32 %v1156_v16, %v1661_v14  ;;  %v1159_v23 = vadd.f32 %v1158_v21, %v1157_v18  ;;  %v1222_v24 = vpop.f32.mrb[3].mxu1 }
  0xfb   :  { %v1223_v25 = vadd.f32 %v1222_v24, %v1221_v20 }
  0xfc   :  { %v621_v26 = vadd.f32 %v1159_v23, %v1661_v14  ;;  %v1665_v27 = vadd.f32 %v1220_v19, %v618_v22 }
  0xfe   :  { %v1160_v28 = vpop.f32.mrb[4].mxu0  ;;  %v1667_v29 = vadd.f32 %v1223_v25, %v621_v26 }
  0xff   :  { %v1224_v30 = vpop.f32.mrb[4].mxu1  ;;  %v1161_v31 = vpop.f32.mrb[5].mxu0 }
 0x100   :  { %v1162_v32 = vadd.f32 %v1161_v31, %v1160_v28  ;;  %v1225_v33 = vpop.f32.mrb[5].mxu1  ;;  %v1163_v34 = vpop.f32.mrb[6].mxu0 }
 0x101   :  { %v1226_v35 = vadd.f32 %v1225_v33, %v1224_v30  ;;  %v1227_v36 = vpop.f32.mrb[6].mxu1  ;;  %v1164_v37 = vpop.f32.mrb[7].mxu0 }
 0x102   :  { %v626_v38 = vadd.f32 %v1162_v32, %v1661_v14  ;;  %v1165_v39 = vadd.f32 %v1164_v37, %v1163_v34  ;;  %v1228_v40 = vpop.f32.mrb[7].mxu1 }
 0x103   :  { %v1229_v41 = vadd.f32 %v1228_v40, %v1227_v36 }
 0x104   :  { %v629_v42 = vadd.f32 %v1165_v39, %v1661_v14  ;;  %v1671_v43 = vadd.f32 %v1226_v35, %v626_v38 }
 0x106   :  { %v1166_v44 = vpop.f32.mrb[8].mxu0  ;;  %v1673_v45 = vadd.f32 %v1229_v41, %v629_v42 }
 0x107   :  { %v1230_v46 = vpop.f32.mrb[8].mxu1  ;;  %v1167_v47 = vpop.f32.mrb[9].mxu0 }
 0x108   :  { %v1168_v48 = vadd.f32 %v1167_v47, %v1166_v44  ;;  %v1231_v49 = vpop.f32.mrb[9].mxu1  ;;  %v1169_v50 = vpop.f32.mrb[10].mxu0 }
 0x109   :  { %v1232_v51 = vadd.f32 %v1231_v49, %v1230_v46  ;;  %v1233_v52 = vpop.f32.mrb[10].mxu1  ;;  %v1170_v53 = vpop.f32.mrb[11].mxu0 }
 0x10a   :  { %v634_v54 = vadd.f32 %v1168_v48, %v1661_v14  ;;  %v1171_v55 = vadd.f32 %v1170_v53, %v1169_v50  ;;  %v1234_v56 = vpop.f32.mrb[11].mxu1 }
 0x10b   :  { %v1235_v57 = vadd.f32 %v1234_v56, %v1233_v52 }
 0x10c   :  { %v637_v58 = vadd.f32 %v1171_v55, %v1661_v14  ;;  %v1677_v59 = vadd.f32 %v1232_v51, %v634_v54 }
 0x10e   :  { %v1172_v60 = vpop.f32.mrb[12].mxu0  ;;  %v1679_v61 = vadd.f32 %v1235_v57, %v637_v58 }
 0x10f   :  { %v1236_v62 = vpop.f32.mrb[12].mxu1  ;;  %v1173_v63 = vpop.f32.mrb[13].mxu0 }
 0x110   :  { %v1174_v0 = vadd.f32 %v1173_v63, %v1172_v60  ;;  %v1237_v1 = vpop.f32.mrb[13].mxu1  ;;  %v1175_v2 = vpop.f32.mrb[14].mxu0 }
 0x111   :  { %v1238_v3 = vadd.f32 %v1237_v1, %v1236_v62  ;;  %v1239_v4 = vpop.f32.mrb[14].mxu1  ;;  %v1176_v5 = vpop.f32.mrb[15].mxu0 }
 0x112   :  { %v642_v6 = vadd.f32 %v1174_v0, %v1661_v14  ;;  %v1177_v7 = vadd.f32 %v1176_v5, %v1175_v2  ;;  %v1240_v8 = vpop.f32.mrb[15].mxu1 }
 0x113   :  { %v1241_v9 = vadd.f32 %v1240_v8, %v1239_v4 }
 0x114   :  { %v645_v10 = vadd.f32 %v1177_v7, %v1661_v14  ;;  %v1683_v11 = vadd.f32 %v1238_v3, %v642_v6 }
 0x116   :  { %v1178_v12 = vpop.f32.mrb[16].mxu0  ;;  %v1685_v13 = vadd.f32 %v1241_v9, %v645_v10 }
 0x117   :  { %v1242_v15 = vpop.f32.mrb[16].mxu1  ;;  %v1179_v16 = vpop.f32.mrb[17].mxu0 }
 0x118   :  { %v1180_v17 = vadd.f32 %v1179_v16, %v1178_v12  ;;  %v1243_v18 = vpop.f32.mrb[17].mxu1  ;;  %v1181_v19 = vpop.f32.mrb[18].mxu0 }
 0x119   :  { %v1244_v20 = vadd.f32 %v1243_v18, %v1242_v15  ;;  %v1245_v21 = vpop.f32.mrb[18].mxu1  ;;  %v1182_v22 = vpop.f32.mrb[19].mxu0 }
 0x11a   :  { %v650_v23 = vadd.f32 %v1180_v17, %v1661_v14  ;;  %v1183_v24 = vadd.f32 %v1182_v22, %v1181_v19  ;;  %v1246_v25 = vpop.f32.mrb[19].mxu1 }
 0x11b   :  { %v1247_v26 = vadd.f32 %v1246_v25, %v1245_v21 }
 0x11c   :  { %v653_v28 = vadd.f32 %v1183_v24, %v1661_v14  ;;  %v747_v30 = vadd.f32 %v1244_v20, %v650_v23 }
 0x11e   :  { %v1184_v31 = vpop.f32.mrb[20].mxu0  ;;  %v1689_v32 = vadd.f32 %v1247_v26, %v653_v28 }
 0x11f   :  { %v1248_v33 = vpop.f32.mrb[20].mxu1  ;;  %v1185_v34 = vpop.f32.mrb[21].mxu0 }
 0x120   :  { %v1186_v35 = vadd.f32 %v1185_v34, %v1184_v31  ;;  %v1249_v36 = vpop.f32.mrb[21].mxu1  ;;  %v1187_v37 = vpop.f32.mrb[22].mxu0 }
 0x121   :  { %v1250_v38 = vadd.f32 %v1249_v36, %v1248_v33  ;;  %v1251_v39 = vpop.f32.mrb[22].mxu1  ;;  %v1188_v40 = vpop.f32.mrb[23].mxu0 }
 0x122   :  { %v658_v41 = vadd.f32 %v1186_v35, %v1661_v14  ;;  %v1189_v42 = vadd.f32 %v1188_v40, %v1187_v37  ;;  %v1252_v44 = vpop.f32.mrb[23].mxu1 }
 0x123   :  { %v1253_v46 = vadd.f32 %v1252_v44, %v1251_v39 }
 0x124   :  { %v661_v47 = vadd.f32 %v1189_v42, %v1661_v14  ;;  %v755_v48 = vadd.f32 %v1250_v38, %v658_v41 }
 0x126   :  { %v1190_v49 = vpop.f32.mrb[24].mxu0  ;;  %v758_v50 = vadd.f32 %v1253_v46, %v661_v47 }
 0x127   :  { %v1254_v51 = vpop.f32.mrb[24].mxu1  ;;  %v1191_v52 = vpop.f32.mrb[25].mxu0 }
 0x128   :  { %v1192_v53 = vadd.f32 %v1191_v52, %v1190_v49  ;;  %v1255_v54 = vpop.f32.mrb[25].mxu1  ;;  %v1193_v55 = vpop.f32.mrb[26].mxu0 }
 0x129   :  { %v1256_v56 = vadd.f32 %v1255_v54, %v1254_v51  ;;  %v1257_v57 = vpop.f32.mrb[26].mxu1  ;;  %v1194_v58 = vpop.f32.mrb[27].mxu0 }
 0x12a   :  { %v666_v60 = vadd.f32 %v1192_v53, %v1661_v14  ;;  %v1195_v62 = vadd.f32 %v1194_v58, %v1193_v55  ;;  %v1258_v63 = vpop.f32.mrb[27].mxu1 }
 0x12b   :  { %v1259_v0 = vadd.f32 %v1258_v63, %v1257_v57 }
 0x12c   :  { %v669_v1 = vadd.f32 %v1195_v62, %v1661_v14  ;;  %v763_v2 = vadd.f32 %v1256_v56, %v666_v60 }
 0x12e   :  { %v1196_v3 = vpop.f32.mrb[28].mxu0  ;;  %v1695_v4 = vadd.f32 %v1259_v0, %v669_v1 }
 0x12f   :  { %v1260_v5 = vpop.f32.mrb[28].mxu1  ;;  %v1197_v6 = vpop.f32.mrb[29].mxu0 }
 0x130   :  { %v1198_v7 = vadd.f32 %v1197_v6, %v1196_v3  ;;  %v1261_v8 = vpop.f32.mrb[29].mxu1  ;;  %v1199_v9 = vpop.f32.mrb[30].mxu0 }
 0x131   :  { %v1262_v10 = vadd.f32 %v1261_v8, %v1260_v5  ;;  %v1263_v12 = vpop.f32.mrb[30].mxu1  ;;  %v1200_v15 = vpop.f32.mrb[31].mxu0 }
 0x132   :  { %v674_v16 = vadd.f32 %v1198_v7, %v1661_v14  ;;  %v1201_v17 = vadd.f32 %v1200_v15, %v1199_v9  ;;  %v1264_v18 = vpop.f32.mrb[31].mxu1 }
 0x133   :  { %v1265_v19 = vadd.f32 %v1264_v18, %v1263_v12 }
 0x134   :  { %v677_v20 = vadd.f32 %v1201_v17, %v1661_v14  ;;  %v771_v21 = vadd.f32 %v1262_v10, %v674_v16 }
 0x136   :  { %v1288_v22 = vpop.f32.mrb[32].mxu0  ;;  %v774_v23 = vadd.f32 %v1265_v19, %v677_v20 }
 0x137   :  { %v820_v24 = vadd.f32 %v1288_v22, %v1671_v43  ;;  %v1296_v25 = vpop.f32.mrb[32].mxu1  ;;  %v811_v26 = vpop.f32.mrb[33].mxu0 }
 0x138   :  { %v852_v28 = vadd.f32 %v1296_v25, %v755_v48  ;;  %v812_v31 = vadd.f32 %v811_v26, %v1665_v27  ;;  %v843_v33 = vpop.f32.mrb[33].mxu1  ;;  %v1289_v34 = vpop.f32.mrb[34].mxu0 }
 0x139   :  { %v844_v35 = vadd.f32 %v843_v33, %v747_v30  ;;  %v823_v36 = vadd.f32 %v1289_v34, %v1673_v45  ;;  %v1297_v37 = vpop.f32.mrb[34].mxu1  ;;  %v814_v38 = vpop.f32.mrb[35].mxu0  ;;  %v876_v41 = vmax.f32 %v820_v24, 0.0 }
 0x13a   :  { %v855_v39 = vadd.f32 %v1297_v37, %v758_v50  ;;  %v815_v14 = vadd.f32 %v814_v38, %v1667_v29  ;;  %v846_v40 = vpop.f32.mrb[35].mxu1  ;;  %v884_v44 = vmax.f32 %v852_v28, 0.0  ;;  %v874_v46 = vmax.f32 %v812_v31, 0.0 }
 0x13b   :  { %v877_v42 = vmax.f32 %v823_v36, 0.0  ;;  %v847_v43 = vadd.f32 %v846_v40, %v1689_v32  ;;  %v882_v27 = vmax.f32 %v844_v35, 0.0 }
 0x13c   :  { %v885_v47 = vmax.f32 %v855_v39, 0.0  ;;  %v875_v48 = vmax.f32 %v815_v14, 0.0 }
 0x13d   :  { %v1099_v49 = vpack.c.bf16 %v877_v42, %v876_v41  ;;  %v883_v51 = vmax.f32 %v847_v43, 0.0 }
 0x13e   :  { %v1119_v30 = vpack.c.bf16 %v885_v47, %v884_v44  ;;  %v1094_v52 = vpack.c.bf16 %v875_v48, %v874_v46  ;;  %v1292_v45 = vpop.f32.mrb[36].mxu0 }
 0x13f   :  { %1131 = vst [vmem:[%s1736_s3 + $0x8] sm:$0xff] %v1099_v49   ;;  %v1114_v29 = vpack.c.bf16 %v883_v51, %v882_v27  ;;  %v836_v50 = vadd.f32 %v1292_v45, %v1683_v11  ;;  %v1300_v53 = vpop.f32.mrb[36].mxu1  ;;  %v827_v54 = vpop.f32.mrb[37].mxu0 }
 0x140   :  { %1135 = vst [vmem:[%s1736_s3 + $0x28] sm:$0xff] %v1119_v30   ;;  %1095 = vst [vmem:[%s1736_s3] sm:$0xff] %v1094_v52   ;;  %v868_v32 = vadd.f32 %v1300_v53, %v771_v21  ;;  %v828_v55 = vadd.f32 %v827_v54, %v1677_v59  ;;  %v859_v56 = vpop.f32.mrb[37].mxu1  ;;  %v1293_v57 = vpop.f32.mrb[38].mxu0 }
 0x141   :  { %1134 = vst [vmem:[%s1736_s3 + $0x20] sm:$0xff] %v1114_v29   ;;  %v860_v11 = vadd.f32 %v859_v56, %v763_v2  ;;  %v839_v58 = vadd.f32 %v1293_v57, %v1685_v13  ;;  %v1301_v60 = vpop.f32.mrb[38].mxu1  ;;  %v830_v62 = vpop.f32.mrb[39].mxu0  ;;  %v880_v3 = vmax.f32 %v836_v50, 0.0 }
 0x142   :  { %v871_v63 = vadd.f32 %v1301_v60, %v774_v23  ;;  %v831_v0 = vadd.f32 %v830_v62, %v1679_v61  ;;  %v862_v1 = vpop.f32.mrb[39].mxu1  ;;  %v888_v59 = vmax.f32 %v868_v32, 0.0  ;;  %v878_v7 = vmax.f32 %v828_v55, 0.0 }
 0x143   :  { %v881_v5 = vmax.f32 %v839_v58, 0.0  ;;  %v863_v6 = vadd.f32 %v862_v1, %v1695_v4  ;;  %v886_v10 = vmax.f32 %v860_v11, 0.0 }
 0x144   :  { %v889_v8 = vmax.f32 %v871_v63, 0.0  ;;  %v879_v9 = vmax.f32 %v831_v0, 0.0 }
 0x145   :  { %v1109_v12 = vpack.c.bf16 %v881_v5, %v880_v3  ;;  %v887_v15 = vmax.f32 %v863_v6, 0.0 }
 0x146   :  { %v1129_v2 = vpack.c.bf16 %v889_v8, %v888_v59  ;;  %v1104_v16 = vpack.c.bf16 %v879_v9, %v878_v7 }
 0x147   :  { %1133 = vst [vmem:[%s1736_s3 + $0x18] sm:$0xff] %v1109_v12   ;;  %v1124_v13 = vpack.c.bf16 %v887_v15, %v886_v10 }
 0x148   :  { %1137 = vst [vmem:[%s1736_s3 + $0x38] sm:$0xff] %v1129_v2   ;;  %1132 = vst [vmem:[%s1736_s3 + $0x10] sm:$0xff] %v1104_v16  }
 0x149   :  { %1136 = vst [vmem:[%s1736_s3 + $0x30] sm:$0xff] %v1124_v13  }

// kernel: closed_call.78
= control target key start
LH: loop header
LB: loop body
LE: loop exit
PB: predicated region body
PF: predicated region fallthrough
CT: control target
= control target key end

     0   :  { %vm388_vm0 = vcmask 261120   ;;  %s2240_s29 = smov 32   ;;  %vm1620_vm1 = vcmask 523264   ;;  %s3060_s3 = inlined_call_operand.vmem [shape: bf16[288,128], index: 3, kind: input, shape index: {}]   ;;  %s3061_s2 = inlined_call_operand.vmem [shape: bf16[128,288], index: 2, kind: input, shape index: {}]   ;;  %s3062_s1 = inlined_call_operand.vmem [shape: bf16[288,128], index: 1, kind: input, shape index: {}]   ;;  %s3063_s0 = inlined_call_operand.vmem [shape: bf16[128,288], index: 0, kind: input, shape index: {}]   ;;  %s3064_s5 = inlined_call_operand.vmem [shape: f32[128,32], index: 5, kind: input, shape index: {}]   ;;  %s3065_s4 = inlined_call_operand.vmem [shape: f32[1,128], index: 4, kind: input, shape index: {}]   ;;  %s3066_s6 = inlined_call_operand.vmem [shape: f32[128,128], index: 6, kind: output, shape index: {}]  }
   0x1   :  { %v2012_v0 = vld [vmem:[%s3060_s3 + $0x40] sm:$0xff]   ;;  %v2015_v3 = vld [vmem:[%s3060_s3 + $0x48] sm:$0xff]   ;;  %v2019_v7 = vld [vmem:[%s3060_s3 + $0x50] sm:$0xff]  }
   0x2   :  { %v2013_v1 = vld [vmem:[%s3060_s3 + $0x80] sm:$0xff]   ;;  %1758 = vmatprep.subr.bf16.mxu0 %v2012_v0  ;;  %v2016_v4 = vld [vmem:[%s3060_s3 + $0x88] sm:$0xff]   ;;  %v2022_v10 = vld [vmem:[%s3060_s3 + $0x10] sm:$0xff]  }
   0x3   :  { %v2014_v2 = vld [vmem:[%s3060_s3] sm:$0xff]   ;;  %1906 = vmatprep.subr.bf16.mxu1 %v2013_v1  ;;  %v2017_v5 = vld [vmem:[%s3060_s3 + $0x8] sm:$0xff]   ;;  %v2024_v12 = vld [vmem:[%s3060_s3 + $0x58] sm:$0xff]  }
   0x4   :  { %1759 = vmatpush3.bf16.msra.mxu0 %v2014_v2  ;;  %1907 = vmatpush3.bf16.msra.mxu1 %v2013_v1  ;;  %v2018_v6 = vld [vmem:[%s3061_s2 + $0x8] ss:$12 sps:$4 sm:$0xff]   ;;  %v2020_v8 = vld [vmem:[%s3061_s2 + $0x20] ss:$12 sps:$4 sm:$0xff]   ;;  %v2026_v14 = vld [vmem:[%s3060_s3 + $0x18] sm:$0xff]  }
   0x5   :  { %1760 = vmatprep.subr.bf16.mxu0 %v2015_v3  ;;  %1908 = vmatprep.subr.bf16.mxu1 %v2016_v4  ;;  %v2021_v9 = vld [vmem:[%s3062_s1 + $0x40] sm:$0xff]   ;;  %v2025_v13 = vld [vmem:[%s3062_s1 + $0x48] sm:$0xff]   ;;  %v2030_v18 = vld [vmem:[%s3061_s2 + $0x50] ss:$12 sps:$4 sm:$0xff]  }
   0x6   :  { %1910 = vmatprep.mubr.msk.bf16.mxu1 %vm388_vm0, %v2018_v6  ;;  %v2023_v11 = vld [vmem:[%s3062_s1] sm:$0xff]   ;;  %v2327_v15 = vld [vmem:[%s3062_s1 + $0x8] sm:$0xff]   ;;  %v2031_v19 = vld [vmem:[%s3062_s1 + $0x50] sm:$0xff]  }
   0x7   :  { %v2028_v16 = vld [vmem:[%s3061_s2 + $0x38] ss:$12 sps:$4 sm:$0xff]   ;;  %v2350_v21 = vld [vmem:[%s3062_s1 + $0x10] sm:$0xff]   ;;  %v2034_v22 = vld [vmem:[%s3060_s3 + $0x68] sm:$0xff]  }
   0x8   :  { %1761 = vmatpush3.bf16.msra.mxu0 %v2017_v5  ;;  %1909 = vmatpush3.bf16.msra.mxu1 %v2016_v4  ;;  %v2029_v17 = vld [vmem:[%s3060_s3 + $0x60] sm:$0xff]   ;;  %v2035_v23 = vld [vmem:[%s3062_s1 + $0x58] sm:$0xff]   ;;  %v2036_v24 = vld [vmem:[%s3060_s3 + $0x28] sm:$0xff]  }
   0x9   :  { %1762 = vmatprep.subr.bf16.mxu0 %v2019_v7  ;;  %1946 = vmatprep.subr.bf16.mxu1 %v2021_v9  ;;  %v2032_v20 = vld [vmem:[%s3060_s3 + $0x20] sm:$0xff]   ;;  %v2365_v25 = vld [vmem:[%s3062_s1 + $0x18] sm:$0xff]   ;;  %v2038_v26 = vld [vmem:[%s3061_s2 + $0x68] ss:$12 sps:$4 sm:$0xff]  }
   0xa   :  { %v2039_v27 = vld [vmem:[%s3060_s3 + $0x70] sm:$0xff]   ;;  %v2040_v28 = vld [vmem:[%s3061_s2 + $0x80] ss:$12 sps:$4 sm:$0xff]   ;;  %v2044_v32 = vld [vmem:[%s3060_s3 + $0x78] sm:$0xff]  }
   0xb   :  { %1911 = vmatmul.mubr.msk.bf16.vlgmr.msra.gmra.mrb[0].mxu1 %vm388_vm0, %v2020_v8  ;;  %v2041_v29 = vld [vmem:[%s3062_s1 + $0x60] sm:$0xff]   ;;  %v2042_v30 = vld [vmem:[%s3060_s3 + $0x30] sm:$0xff]   ;;  %v2045_v33 = vld [vmem:[%s3062_s1 + $0x68] sm:$0xff]  }
   0xc   :  { %1763 = vmatpush3.bf16.msra.mxu0 %v2022_v10  ;;  %1954 = vmatpush3.bf16.msra.mxu1 %v2023_v11  ;;  %v2043_v31 = vld [vmem:[%s3062_s1 + $0x20] sm:$0xff]   ;;  %v2046_v34 = vld [vmem:[%s3060_s3 + $0x38] sm:$0xff]   ;;  %v2047_v35 = vld [vmem:[%s3062_s1 + $0x28] sm:$0xff]  }
   0xd   :  { %1764 = vmatprep.subr.bf16.mxu0 %v2024_v12  ;;  %1947 = vmatprep.subr.bf16.mxu1 %v2025_v13  ;;  %v2048_v36 = vld [vmem:[%s3061_s2] ss:$12 sps:$4 sm:$0xff]   ;;  %v2050_v37 = vld [vmem:[%s3061_s2 + $0x4] ss:$12 sps:$4 sm:$0xff]   ;;  %v2055_v42 = vld [vmem:[%s3062_s1 + $0x78] sm:$0xff]  }
   0xe   :  { %1914 = vmatprep.mubr.msk.bf16.mxu1 %vm388_vm0, %v2028_v16  ;;  %v2051_v38 = vld [vmem:[%s3061_s2 + $0x98] ss:$12 sps:$4 sm:$0xff]   ;;  %445 = vmatprep.mubr.bf16.mxu0 %v2050_v37  ;;  %v2052_v39 = vld [vmem:[%s3061_s2 + $0xb0] ss:$12 sps:$4 sm:$0xff]   ;;  %v2061_v46 = vld [vmem:[%s3063_s0 + $0x34] ss:$12 sps:$4 sm:$0xff]  }
   0xf   :  { %v2053_v40 = vld [vmem:[%s3062_s1 + $0x70] sm:$0xff]   ;;  %v2056_v43 = vld [vmem:[%s3062_s1 + $0x38] sm:$0xff]   ;;  %v2063_v48 = vld [vmem:[%s3062_s1 + $0x80] sm:$0xff]  }
  0x10   :  { %1765 = vmatpush3.bf16.msra.mxu0 %v2026_v14  ;;  %1955 = vmatpush3.bf16.msra.mxu1 %v2327_v15  ;;  %v2054_v41 = vld [vmem:[%s3062_s1 + $0x30] sm:$0xff]   ;;  %v2057_v44 = vld [vmem:[%s3061_s2 + $0x1c] ss:$12 sps:$4 sm:$0xff]   ;;  %v2062_v47 = vld [vmem:[%s3061_s2 + $0x18] ss:$12 sps:$4 sm:$0xff]  }
  0x11   :  { %1766 = vmatprep.subr.bf16.mxu0 %v2029_v17  ;;  %1948 = vmatprep.subr.bf16.mxu1 %v2031_v19  ;;  %v2059_v45 = vld [vmem:[%s3063_s0 + $0x30] ss:$12 sps:$4 sm:$0xff]   ;;  %v2064_v49 = vld [vmem:[%s3061_s2 + $0x34] ss:$12 sps:$4 sm:$0xff]   ;;  %v2066_v50 = vld [vmem:[%s3063_s0 + $0x4c] ss:$12 sps:$4 sm:$0xff]  }
  0x12   :  { %v2068_v51 = vld [vmem:[%s3061_s2 + $0x30] ss:$12 sps:$4 sm:$0xff]   ;;  %v2070_v52 = vld [vmem:[%s3061_s2 + $0x4c] ss:$12 sps:$4 sm:$0xff]   ;;  %v2069_v53 = vld [vmem:[%s3063_s0 + $0x48] ss:$12 sps:$4 sm:$0xff]  }
  0x13   :  { %1915 = vmatmul.mubr.msk.bf16.gmra.mrb[4].mxu1 %vm388_vm0, %v2030_v18  ;;  %v2072_v54 = vld [vmem:[%s3063_s0 + $0x64] ss:$12 sps:$4 sm:$0xff]   ;;  %v2082_v55 = vld [vmem:[%s3062_s1 + $0x88] sm:$0xff]   ;;  %v2085_v63 = vld [vmem:[%s3063_s0 + $0x94] ss:$12 sps:$4 sm:$0xff]  }
  0x14   :  { %1767 = vmatpush3.bf16.msra.mxu0 %v2032_v20  ;;  %1956 = vmatpush3.bf16.msra.mxu1 %v2350_v21  ;;  %v2074_v56 = vld [vmem:[%s3061_s2 + $0x48] ss:$12 sps:$4 sm:$0xff]   ;;  %v2076_v57 = vld [vmem:[%s3061_s2 + $0x64] ss:$12 sps:$4 sm:$0xff]   ;;  %v2075_v58 = vld [vmem:[%s3063_s0 + $0x60] ss:$12 sps:$4 sm:$0xff]  }
  0x15   :  { %1768 = vmatprep.subr.bf16.mxu0 %v2034_v22  ;;  %1949 = vmatprep.subr.bf16.mxu1 %v2035_v23  ;;  %v2078_v59 = vld [vmem:[%s3063_s0 + $0x7c] ss:$12 sps:$4 sm:$0xff]   ;;  %v2080_v60 = vld [vmem:[%s3061_s2 + $0x60] ss:$12 sps:$4 sm:$0xff]   ;;  %v2081_v62 = vld [vmem:[%s3063_s0 + $0x78] ss:$12 sps:$4 sm:$0xff]  }
  0x16   :  { %1918 = vmatprep.mubr.msk.bf16.mxu1 %vm388_vm0, %v2038_v26  ;;  %v2083_v61 = vld [vmem:[%s3061_s2 + $0x7c] ss:$12 sps:$4 sm:$0xff]   ;;  %v1188_v0 = vld [vmem:[%s3064_s5] sm:$0xff]  ;;  %v2091_v5 = vld [vmem:[%s3063_s0 + $0xac] ss:$12 sps:$4 sm:$0xff]  }
  0x17   :  { %v1189_v1 = vld [vmem:[%s3064_s5 + $0x8] sm:$0xff]  ;;  %1220 = vrot.lane.b32.xlu0 %v1188_v0, %s2240_s29  ;;  %v2087_v2 = vld [vmem:[%s3061_s2 + $0x78] ss:$12 sps:$4 sm:$0xff]   ;;  %v2089_v3 = vld [vmem:[%s3061_s2 + $0x94] ss:$12 sps:$4 sm:$0xff]  }
  0x18   :  { %1769 = vmatpush3.bf16.msra.mxu0 %v2036_v24  ;;  %1957 = vmatpush3.bf16.msra.mxu1 %v2365_v25  ;;  %v2088_v4 = vld [vmem:[%s3063_s0 + $0x90] ss:$12 sps:$4 sm:$0xff]   ;;  %v2095_v7 = vld [vmem:[%s3061_s2 + $0xac] ss:$12 sps:$4 sm:$0xff]   ;;  %v2094_v8 = vld [vmem:[%s3063_s0 + $0xa8] ss:$12 sps:$4 sm:$0xff]  }
  0x19   :  { %1770 = vmatprep.subr.bf16.mxu0 %v2039_v27  ;;  %1950 = vmatprep.subr.bf16.mxu1 %v2041_v29  ;;  %v2093_v6 = vld [vmem:[%s3061_s2 + $0x90] ss:$12 sps:$4 sm:$0xff]   ;;  %v2098_v10 = vld [vmem:[%s3061_s2 + $0xa8] ss:$12 sps:$4 sm:$0xff]   ;;  %v2099_v12 = vld [vmem:[%s3063_s0 + $0x20] ss:$12 sps:$4 sm:$0xff]  }
  0x1a   :  { %1222 = vrot.lane.b32.xlu1 %v1189_v1, %s2240_s29  ;;  %v2100_v14 = vld [vmem:[%s3063_s0] ss:$12 sps:$4 sm:$0xff]   ;;  %v2104_v16 = vld [vmem:[%s3063_s0 + $0x50] ss:$12 sps:$4 sm:$0xff]   ;;  %v2107_v17 = vld [vmem:[%s3063_s0 + $0x68] ss:$12 sps:$4 sm:$0xff]  }
  0x1b   :  { %1919 = vmatmul.mubr.msk.bf16.gmra.mrb[8].mxu1 %vm388_vm0, %v2040_v28  ;;  %v2108_v18 = vld [vmem:[%s3063_s0 + $0x18] ss:$12 sps:$4 sm:$0xff]  }
  0x1c   :  { %1771 = vmatpush3.bf16.msra.mxu0 %v2042_v30  ;;  %1958 = vmatpush3.bf16.msra.mxu1 %v2043_v31  ;;  %v2110_v20 = vld [vmem:[%s3063_s0 + $0x98] ss:$12 sps:$4 sm:$0xff]  }
  0x1d   :  { %1772 = vmatprep.subr.bf16.mxu0 %v2044_v32  ;;  %1951 = vmatprep.subr.bf16.mxu1 %v2045_v33 }
  0x1e   :  { %1922 = vmatprep.mubr.msk.bf16.mxu1 %vm388_vm0, %v2051_v38 }
  0x20   :  { %1773 = vmatpush3.bf16.msra.mxu0 %v2046_v34  ;;  %1959 = vmatpush3.bf16.msra.mxu1 %v2047_v35 }
  0x21   :  { %1832 = vmatprep.subr.bf16.mxu0 %v2021_v9  ;;  %1952 = vmatprep.subr.bf16.mxu1 %v2053_v40  ;;  %v2097_v9 = vld [vmem:[%s3063_s0 + $0x8] ss:$12 sps:$4 sm:$0xff]  }
  0x23   :  { %446 = vmatmul.mubr.bf16.vlgmr.msra.gmra.mrb[0].mxu0 %v2048_v36  ;;  %1923 = vmatmul.mubr.msk.bf16.gmra.mrb[12].mxu1 %vm388_vm0, %v2052_v39 }
  0x24   :  { %1833 = vmatpush3.bf16.msra.mxu0 %v2023_v11  ;;  %1960 = vmatpush3.bf16.msra.mxu1 %v2054_v41  ;;  %v2102_v11 = vld [vmem:[%s3063_s0 + $0x4] ss:$12 sps:$4 sm:$0xff]  }
  0x25   :  { %1834 = vmatprep.subr.bf16.mxu0 %v2025_v13  ;;  %1953 = vmatprep.subr.bf16.mxu1 %v2055_v42  ;;  %v2103_v13 = vld [vmem:[%s3063_s0 + $0x38] ss:$12 sps:$4 sm:$0xff]  }
  0x26   :  { %453 = vmatprep.mubr.bf16.mxu0 %v2057_v44  ;;  %907 = vmatprep.mubr.bf16.mxu1 %v2061_v46 }
  0x28   :  { %1835 = vmatpush3.bf16.msra.mxu0 %v2327_v15  ;;  %1961 = vmatpush3.bf16.msra.mxu1 %v2056_v43  ;;  %v2105_v15 = vld [vmem:[%s3063_s0 + $0x1c] ss:$12 sps:$4 sm:$0xff]  }
  0x29   :  { %1836 = vmatprep.subr.bf16.mxu0 %v2031_v19  ;;  %1926 = vmatprep.subr.bf16.mxu1 %v2063_v48  ;;  %v2109_v19 = vld [vmem:[%s3063_s0 + $0x80] ss:$12 sps:$4 sm:$0xff]  }
  0x2b   :  { %454 = vmatmul.mubr.bf16.gmra.mrb[4].mxu0 %v2062_v47  ;;  %908 = vmatmul.mubr.bf16.vlgmr.msra.gmra.mrb[16].mxu1 %v2059_v45 }
  0x2c   :  { %461 = vmatprep.mubr.bf16.mxu0 %v2064_v49  ;;  %1837 = vmatpush3.bf16.msra.mxu0 %v2350_v21  ;;  %v2111_v21 = vld [vmem:[%s3063_s0 + $0xb0] ss:$12 sps:$4 sm:$0xff]  }
  0x2d   :  { %1838 = vmatprep.subr.bf16.mxu0 %v2035_v23  ;;  %1927 = vmatpush3.bf16.msra.mxu1 %v2063_v48 }
  0x2e   :  { %915 = vmatprep.mubr.bf16.mxu1 %v2066_v50  ;;  %1928 = vmatprep.subr.bf16.mxu1 %v2082_v55 }
  0x30   :  { %1839 = vmatpush3.bf16.msra.mxu0 %v2365_v25 }
  0x31   :  { %1840 = vmatprep.subr.bf16.mxu0 %v2041_v29  ;;  %1929 = vmatpush3.bf16.msra.mxu1 %v2082_v55 }
  0x33   :  { %462 = vmatmul.mubr.bf16.gmra.mrb[8].mxu0 %v2068_v51  ;;  %916 = vmatmul.mubr.bf16.gmra.mrb[20].mxu1 %v2069_v53 }
  0x34   :  { %469 = vmatprep.mubr.bf16.mxu0 %v2070_v52  ;;  %1841 = vmatpush3.bf16.msra.mxu0 %v2043_v31 }
  0x35   :  { %923 = vmatprep.mubr.bf16.mxu1 %v2072_v54  ;;  %1842 = vmatprep.subr.bf16.mxu0 %v2045_v33 }
  0x38   :  { %1843 = vmatpush3.bf16.msra.mxu0 %v2047_v35 }
  0x39   :  { %1844 = vmatprep.subr.bf16.mxu0 %v2053_v40 }
  0x3b   :  { %470 = vmatmul.mubr.bf16.gmra.mrb[12].mxu0 %v2074_v56  ;;  %924 = vmatmul.mubr.bf16.gmra.mrb[24].mxu1 %v2075_v58 }
  0x3c   :  { %477 = vmatprep.mubr.bf16.mxu0 %v2076_v57  ;;  %1845 = vmatpush3.bf16.msra.mxu0 %v2054_v41 }
  0x3d   :  { %931 = vmatprep.mubr.bf16.mxu1 %v2078_v59  ;;  %1846 = vmatprep.subr.bf16.mxu0 %v2055_v42 }
  0x40   :  { %1847 = vmatpush3.bf16.msra.mxu0 %v2056_v43 }
  0x43   :  { %478 = vmatmul.mubr.bf16.gmra.mrb[16].mxu0 %v2080_v60  ;;  %932 = vmatmul.mubr.bf16.gmra.mrb[28].mxu1 %v2081_v62 }
  0x44   :  { %485 = vmatprep.mubr.bf16.mxu0 %v2083_v61  ;;  %939 = vmatprep.mubr.bf16.mxu1 %v2085_v63 }
  0x4b   :  { %486 = vmatmul.mubr.bf16.gmra.mrb[20].mxu0 %v2087_v2  ;;  %940 = vmatmul.mubr.bf16.gmra.mrb[32].mxu1 %v2088_v4 }
  0x4c   :  { %493 = vmatprep.mubr.bf16.mxu0 %v2089_v3  ;;  %947 = vmatprep.mubr.bf16.mxu1 %v2091_v5 }
  0x53   :  { %494 = vmatmul.mubr.bf16.gmra.mrb[24].mxu0 %v2093_v6  ;;  %948 = vmatmul.mubr.bf16.gmra.mrb[36].mxu1 %v2094_v8 }
  0x54   :  { %501 = vmatprep.mubr.bf16.mxu0 %v2095_v7  ;;  %1930 = vmatprep.mubr.msk.bf16.mxu1 %vm388_vm0, %v2097_v9 }
  0x5b   :  { %502 = vmatmul.mubr.bf16.gmra.mrb[28].mxu0 %v2098_v10  ;;  %1931 = vmatmul.mubr.msk.bf16.vlgmr.msra.gmra.mrb[0].mxu1 %vm388_vm0, %v2099_v12 }
  0x5c   :  { %891 = vmatprep.mubr.bf16.mxu0 %v2102_v11  ;;  %1934 = vmatprep.mubr.msk.bf16.mxu1 %vm388_vm0, %v2103_v13 }
  0x63   :  { %892 = vmatmul.mubr.bf16.vlgmr.msra.gmra.mrb[32].mxu0 %v2100_v14  ;;  %1935 = vmatmul.mubr.msk.bf16.gmra.mrb[4].mxu1 %vm388_vm0, %v2104_v16 }
  0x64   :  { %899 = vmatprep.mubr.bf16.mxu0 %v2105_v15  ;;  %1938 = vmatprep.mubr.msk.bf16.mxu1 %vm388_vm0, %v2107_v17 }
  0x6b   :  { %900 = vmatmul.mubr.bf16.gmra.mrb[36].mxu0 %v2108_v18  ;;  %1939 = vmatmul.mubr.msk.bf16.gmra.mrb[8].mxu1 %vm388_vm0, %v2109_v19 }
  0x6c   :  { %1942 = vmatprep.mubr.msk.bf16.mxu1 %vm388_vm0, %v2110_v20 }
  0x73   :  { %1943 = vmatmul.mubr.msk.bf16.gmra.mrb[12].mxu1 %vm388_vm0, %v2111_v21 }
  0xf6   :  { %v1774_v22 = vpop.f32.mrb[0].mxu0 }
  0xf7   :  { %v1775_v23 = vpop.f32.mrb[1].mxu0 }
  0xf8   :  { %v2565_v24 = vadd.f32 %v1775_v23, %v1774_v22  ;;  %v1777_v25 = vpop.f32.mrb[2].mxu0 }
  0xf9   :  { %v1778_v26 = vpop.f32.mrb[3].mxu0 }
  0xfa   :  { %v2567_v27 = vadd.f32 %v1778_v26, %v1777_v25 }
  0xfe   :  { %v1780_v28 = vpop.f32.mrb[4].mxu0  ;;  %v1860_v30 = vpop.f32.mrb[16].mxu1 }
  0xff   :  { %v1781_v29 = vpop.f32.mrb[5].mxu0  ;;  %v1861_v33 = vpop.f32.mrb[17].mxu1 }
 0x100   :  { %v2569_v31 = vadd.f32 %v1781_v29, %v1780_v28  ;;  %v1783_v32 = vpop.f32.mrb[6].mxu0  ;;  %v1862_v35 = vadd.f32 %v1861_v33, %v1860_v30  ;;  %v1863_v36 = vpop.f32.mrb[18].mxu1 }
 0x101   :  { %v1784_v34 = vpop.f32.mrb[7].mxu0  ;;  %v1864_v38 = vpop.f32.mrb[19].mxu1 }
 0x102   :  { %v2571_v37 = vadd.f32 %v1784_v34, %v1783_v32  ;;  %v1865_v39 = vadd.f32 %v1864_v38, %v1863_v36 }
 0x106   :  { %v1786_v40 = vpop.f32.mrb[8].mxu0  ;;  %v1866_v42 = vpop.f32.mrb[20].mxu1 }
 0x107   :  { %v1787_v41 = vpop.f32.mrb[9].mxu0  ;;  %v1867_v45 = vpop.f32.mrb[21].mxu1 }
 0x108   :  { %v1788_v43 = vadd.f32 %v1787_v41, %v1786_v40  ;;  %v1789_v44 = vpop.f32.mrb[10].mxu0  ;;  %v1868_v47 = vadd.f32 %v1867_v45, %v1866_v42  ;;  %v1869_v48 = vpop.f32.mrb[22].mxu1 }
 0x109   :  { %v1790_v46 = vpop.f32.mrb[11].mxu0  ;;  %v1870_v51 = vpop.f32.mrb[23].mxu1 }
 0x10a   :  { %v1791_v49 = vadd.f32 %v1790_v46, %v1789_v44  ;;  %v2573_v50 = vadd.f32 %v1862_v35, %v1788_v43  ;;  %v1871_v52 = vadd.f32 %v1870_v51, %v1869_v48 }
 0x10c   :  { %v2575_v53 = vadd.f32 %v1865_v39, %v1791_v49 }
 0x10e   :  { %v1792_v54 = vpop.f32.mrb[12].mxu0  ;;  %v1872_v56 = vpop.f32.mrb[24].mxu1 }
 0x10f   :  { %v1793_v55 = vpop.f32.mrb[13].mxu0  ;;  %v1873_v59 = vpop.f32.mrb[25].mxu1 }
 0x110   :  { %v1794_v57 = vadd.f32 %v1793_v55, %v1792_v54  ;;  %v1795_v58 = vpop.f32.mrb[14].mxu0  ;;  %v1874_v61 = vadd.f32 %v1873_v59, %v1872_v56  ;;  %v1875_v62 = vpop.f32.mrb[26].mxu1 }
 0x111   :  { %v1796_v60 = vpop.f32.mrb[15].mxu0  ;;  %v1876_v1 = vpop.f32.mrb[27].mxu1 }
 0x112   :  { %v1797_v63 = vadd.f32 %v1796_v60, %v1795_v58  ;;  %v2577_v0 = vadd.f32 %v1868_v47, %v1794_v57  ;;  %v1877_v2 = vadd.f32 %v1876_v1, %v1875_v62 }
 0x114   :  { %v2579_v3 = vadd.f32 %v1871_v52, %v1797_v63 }
 0x116   :  { %v1798_v4 = vpop.f32.mrb[16].mxu0  ;;  %v1878_v6 = vpop.f32.mrb[28].mxu1 }
 0x117   :  { %v1799_v5 = vpop.f32.mrb[17].mxu0  ;;  %v1879_v9 = vpop.f32.mrb[29].mxu1 }
 0x118   :  { %v1800_v7 = vadd.f32 %v1799_v5, %v1798_v4  ;;  %v1801_v8 = vpop.f32.mrb[18].mxu0  ;;  %v1880_v11 = vadd.f32 %v1879_v9, %v1878_v6  ;;  %v1881_v12 = vpop.f32.mrb[30].mxu1  ;;  %v2596_v5 = vld [vmem:[%s3065_s4] ss:$0 sm:$0xff]  ;;  %s2241_s4 = smov 64  }
 0x119   :  { %v1802_v10 = vpop.f32.mrb[19].mxu0  ;;  %v1882_v15 = vpop.f32.mrb[31].mxu1 }
 0x11a   :  { %v1803_v13 = vadd.f32 %v1802_v10, %v1801_v8  ;;  %v2581_v14 = vadd.f32 %v1874_v61, %v1800_v7  ;;  %v1883_v16 = vadd.f32 %v1882_v15, %v1881_v12 }
 0x11c   :  { %v2583_v17 = vadd.f32 %v1877_v2, %v1803_v13 }
 0x11e   :  { %v1804_v18 = vpop.f32.mrb[20].mxu0  ;;  %v1884_v20 = vpop.f32.mrb[32].mxu1 }
 0x11f   :  { %v1805_v19 = vpop.f32.mrb[21].mxu0  ;;  %v1885_v23 = vpop.f32.mrb[33].mxu1 }
 0x120   :  { %v1806_v21 = vadd.f32 %v1805_v19, %v1804_v18  ;;  %v1807_v22 = vpop.f32.mrb[22].mxu0  ;;  %v1886_v26 = vadd.f32 %v1885_v23, %v1884_v20  ;;  %v1887_v28 = vpop.f32.mrb[34].mxu1 }
 0x121   :  { %v1808_v25 = vpop.f32.mrb[23].mxu0  ;;  %v1888_v32 = vpop.f32.mrb[35].mxu1 }
 0x122   :  { %v1809_v29 = vadd.f32 %v1808_v25, %v1807_v22  ;;  %v1978_v30 = vadd.f32 %v1880_v11, %v1806_v21  ;;  %v1889_v33 = vadd.f32 %v1888_v32, %v1887_v28 }
 0x124   :  { %v2585_v34 = vadd.f32 %v1883_v16, %v1809_v29 }
 0x126   :  { %v1810_v35 = vpop.f32.mrb[24].mxu0  ;;  %v1890_v38 = vpop.f32.mrb[36].mxu1 }
 0x127   :  { %v1811_v36 = vpop.f32.mrb[25].mxu0  ;;  %v1891_v41 = vpop.f32.mrb[37].mxu1 }
 0x128   :  { %v1812_v39 = vadd.f32 %v1811_v36, %v1810_v35  ;;  %v1813_v40 = vpop.f32.mrb[26].mxu0  ;;  %v1892_v43 = vadd.f32 %v1891_v41, %v1890_v38  ;;  %v1893_v44 = vpop.f32.mrb[38].mxu1 }
 0x129   :  { %v1814_v42 = vpop.f32.mrb[27].mxu0  ;;  %v1894_v47 = vpop.f32.mrb[39].mxu1 }
 0x12a   :  { %v1815_v45 = vadd.f32 %v1814_v42, %v1813_v40  ;;  %v2587_v46 = vadd.f32 %v1886_v26, %v1812_v39  ;;  %v1895_v48 = vadd.f32 %v1894_v47, %v1893_v44 }
 0x12c   :  { %v2589_v49 = vadd.f32 %v1889_v33, %v1815_v45 }
 0x12e   :  { %v1816_v51 = vpop.f32.mrb[28].mxu0  ;;  %v1932_v54 = vpop.f32.mrb[0].mxu1 }
 0x12f   :  { %v1817_v52 = vpop.f32.mrb[29].mxu0  ;;  %v990_v57 = vpop.f32.mrb[1].mxu1 }
 0x130   :  { %v1818_v55 = vadd.f32 %v1817_v52, %v1816_v51  ;;  %v1819_v56 = vpop.f32.mrb[30].mxu0  ;;  %v1933_v59 = vpop.f32.mrb[2].mxu1 }
 0x131   :  { %v1820_v58 = vpop.f32.mrb[31].mxu0  ;;  %v993_v62 = vpop.f32.mrb[3].mxu1 }
 0x132   :  { %v1821_v60 = vadd.f32 %v1820_v58, %v1819_v56  ;;  %v1986_v61 = vadd.f32 %v1892_v43, %v1818_v55 }
 0x134   :  { %v2591_v63 = vadd.f32 %v1895_v48, %v1821_v60 }
 0x136   :  { %v1848_v1 = vpop.f32.mrb[32].mxu0  ;;  %v1936_v4 = vpop.f32.mrb[4].mxu1 }
 0x137   :  { %v1849_v2 = vpop.f32.mrb[33].mxu0  ;;  %v1971_v8 = vadd.f32 %v2577_v0, %v1936_v4  ;;  %v1006_v9 = vpop.f32.mrb[5].mxu1 }
 0x138   :  { %v1850_v6 = vadd.f32 %v1849_v2, %v1848_v1  ;;  %v1851_v7 = vpop.f32.mrb[34].mxu0  ;;  %v1973_v12 = vadd.f32 %v2573_v50, %v1006_v9  ;;  %v1937_v13 = vpop.f32.mrb[6].mxu1 }
 0x139   :  { %v1852_v10 = vpop.f32.mrb[35].mxu0  ;;  %v2602_v16 = vadd.f32 %v1971_v8, %v2596_v5  ;;  %v1975_v18 = vadd.f32 %v2579_v3, %v1937_v13  ;;  %v1009_v19 = vpop.f32.mrb[7].mxu1 }
 0x13a   :  { %v1964_v11 = vadd.f32 %v1850_v6, %v2565_v24  ;;  %v1853_v15 = vadd.f32 %v1852_v10, %v1851_v7  ;;  %v1977_v22 = vadd.f32 %v2575_v53, %v1009_v19  ;;  %v2609_v0 = vadd.f32 %v1973_v12, %v2596_v5 }
 0x13b   :  { %2112 = vtanh.f32 %v2602_v16  ;;  %v2612_v24 = vadd.f32 %v1975_v18, %v2596_v5  ;;  %v1192_v18 = vld [vmem:[%s3064_s5 + $0x20] sm:$0xff] }
 0x13c   :  { %v1965_v20 = vadd.f32 %v1964_v11, %v990_v57  ;;  %v1968_v21 = vadd.f32 %v1853_v15, %v2567_v27  ;;  %v2621_v38 = vadd.f32 %v1977_v22, %v2596_v5  ;;  %v1190_v15 = vld [vmem:[%s3064_s5 + $0x10] sm:$0xff]  ;;  %v1196_v22 = vld [vmem:[%s3064_s5 + $0x40] sm:$0xff] }
 0x13d   :  { %2114 = vtanh.f32 %v2612_v24 }
 0x13e   :  { %v1969_v50 = vadd.f32 %v1968_v21, %v993_v62  ;;  %v1854_v23 = vpop.f32.mrb[36].mxu0  ;;  %v1940_v3 = vpop.f32.mrb[8].mxu1  ;;  %v2616_v28 = vadd.f32 %v1965_v20, %v2596_v5  ;;  %2116 = vtanh.f32 %v2609_v0  ;;  %v1194_v20 = vld [vmem:[%s3064_s5 + $0x30] sm:$0xff]  ;;  %v1191_v21 = vld [vmem:[%s3064_s5 + $0x18] sm:$0xff] }
 0x13f   :  { %v1855_v25 = vpop.f32.mrb[37].mxu0  ;;  %v1979_v27 = vadd.f32 %v1978_v30, %v1940_v3  ;;  %v1022_v53 = vpop.f32.mrb[9].mxu1  ;;  %v1200_v3 = vld [vmem:[%s3064_s5 + $0x60] sm:$0xff] }
 0x140   :  { %v1857_v26 = vpop.f32.mrb[38].mxu0  ;;  %v1856_v32 = vadd.f32 %v1855_v25, %v1854_v23  ;;  %v1941_v33 = vpop.f32.mrb[10].mxu1  ;;  %v1981_v35 = vadd.f32 %v2581_v14, %v1022_v53  ;;  %2118 = vtanh.f32 %v2616_v28  ;;  %v2627_v41 = vadd.f32 %v1969_v50, %v2596_v5  ;;  %v1193_v50 = vld [vmem:[%s3064_s5 + $0x28] sm:$0xff]  ;;  %v1198_v23 = vld [vmem:[%s3064_s5 + $0x50] sm:$0xff]  ;;  %v1195_v25 = vld [vmem:[%s3064_s5 + $0x38] sm:$0xff] }
 0x141   :  { %v1858_v29 = vpop.f32.mrb[39].mxu0  ;;  %v1025_v36 = vpop.f32.mrb[11].mxu1  ;;  %v1983_v40 = vadd.f32 %v2585_v34, %v1941_v33  ;;  %2120 = vtanh.f32 %v2621_v38  ;;  %v2635_v34 = vadd.f32 %v1979_v27, %v2596_v5  ;;  %v1202_v27 = vld [vmem:[%s3064_s5 + $0x70] sm:$0xff]  ;;  %v1199_v53 = vld [vmem:[%s3064_s5 + $0x58] sm:$0xff]  ;;  %v1082_v33 = vsub.f32 0.0, %v2602_v16 }
 0x142   :  { %v1962_v39 = vadd.f32 %v1856_v32, %v2569_v31  ;;  %v1859_v30 = vadd.f32 %v1858_v29, %v1857_v26  ;;  %v1985_v43 = vadd.f32 %v2583_v17, %v1025_v36  ;;  %2122 = vtanh.f32 %v2627_v41  ;;  %v1197_v26 = vld [vmem:[%s3064_s5 + $0x48] sm:$0xff]  ;;  %v1203_v32 = vld [vmem:[%s3064_s5 + $0x78] sm:$0xff] }
 0x143   :  { %2124 = vtanh.f32 %v2635_v34  ;;  %v2642_v55 = vadd.f32 %v1981_v35, %v2596_v5  ;;  %v1201_v29 = vld [vmem:[%s3064_s5 + $0x68] sm:$0xff]  ;;  %v1083_v35 = vsub.f32 0.0, %v2612_v24  ;;  %v1104_v36 = vmul.f32 1.442695, %v1082_v33 }
 0x144   :  { %v1963_v42 = vadd.f32 %v1962_v39, %v1932_v54  ;;  %v1966_v14 = vadd.f32 %v1859_v30, %v2571_v37  ;;  %v2655_v62 = vadd.f32 %v1985_v43, %v2596_v5  ;;  %v1080_v39 = vsub.f32 0.0, %v2609_v0 }
 0x145   :  { %v2113_v44 = vpop.eup %2112  ;;  %2126 = vtanh.f32 %v2642_v55  ;;  %v1076_v30 = vsub.f32 0.0, %v2616_v28  ;;  %v1081_v43 = vsub.f32 0.0, %v2621_v38  ;;  %v1086_v16 = vsub.f32 0.0, %v2635_v34 }
 0x146   :  { %1312 = vrot.lane.b32.xlu0 %v2113_v44, %s2241_s4  ;;  %v1944_v31 = vpop.f32.mrb[12].mxu1  ;;  %v1967_v47 = vadd.f32 %v1966_v14, %v1933_v59  ;;  %v2662_v1 = vadd.f32 %v1963_v42, %v2596_v5  ;;  %v1100_v42 = vmul.f32 1.442695, %v1080_v39  ;;  %v1077_v14 = vsub.f32 0.0, %v2627_v41 }
 0x147   :  { %v2115_v45 = vpop.eup %2114  ;;  %v1987_v48 = vadd.f32 %v1986_v61, %v1944_v31  ;;  %v1038_v51 = vpop.f32.mrb[13].mxu1  ;;  %v1092_v44 = vmul.f32 1.442695, %v1076_v30  ;;  %v1102_v31 = vmul.f32 1.442695, %v1081_v43  ;;  %v1084_v0 = vsub.f32 0.0, %v2642_v55 }
 0x148   :  { %1314 = vrot.lane.b32.xlu1 %v2115_v45, %s2241_s4  ;;  %v1945_v17 = vpop.f32.mrb[14].mxu1  ;;  %v2117_v52 = vpop.eup %2116  ;;  %v1989_v37 = vadd.f32 %v2587_v46, %v1038_v51  ;;  %v2649_v46 = vadd.f32 %v1983_v40, %v2596_v5  ;;  %v2672_v4 = vadd.f32 %v1967_v47, %v2596_v5  ;;  %v1106_v40 = vmul.f32 1.442695, %v1083_v35 }
 0x149   :  { %v1041_v54 = vpop.f32.mrb[15].mxu1  ;;  %v1991_v56 = vadd.f32 %v2591_v63, %v1945_v17  ;;  %v1094_v24 = vmul.f32 1.442695, %v1077_v14  ;;  %v1108_v17 = vmul.f32 1.442695, %v1084_v0 }
 0x14a   :  { %1308 = vrot.lane.b32.xlu0 %v2117_v52, %s2241_s4  ;;  %v2119_v57 = vpop.eup %2118  ;;  %v1993_v58 = vadd.f32 %v2589_v49, %v1041_v54  ;;  %2128 = vtanh.f32 %v2649_v46  ;;  %v2659_v49 = vadd.f32 %v1987_v48, %v2596_v5  ;;  %v2668_v2 = vadd.f32 %v1989_v37, %v2596_v5 }
 0x14b   :  { %v2121_v59 = vpop.eup %2120  ;;  %2130 = vtanh.f32 %v2655_v62  ;;  %v2678_v7 = vadd.f32 %v1991_v56, %v2596_v5  ;;  %v1112_v48 = vmul.f32 1.442695, %v1086_v16  ;;  %v1087_v37 = vsub.f32 0.0, %v2649_v46 }
 0x14c   :  { %v2123_v60 = vpop.eup %2122  ;;  %1310 = vrot.lane.b32.xlu1 %v2121_v59, %s2241_s4  ;;  %2132 = vtanh.f32 %v2659_v49  ;;  %v2683_v10 = vadd.f32 %v1993_v58, %v2596_v5  ;;  %v2758_v58 = vpop.permute.xlu0 %1220  ;;  %v1078_v46 = vsub.f32 0.0, %v2662_v1 }
 0x14d   :  { %v2125_v61 = vpop.eup %2124  ;;  %2134 = vtanh.f32 %v2662_v1  ;;  %v1114_v55 = vmul.f32 1.442695, %v1087_v37  ;;  %v1091_v43 = vsub.f32 0.0, %v2678_v7 }
 0x14e   :  { %1300 = vrot.lane.b32.xlu0 %v2119_v57, %s2241_s4  ;;  %2136 = vtanh.f32 %v2668_v2  ;;  %v1085_v57 = vsub.f32 0.0, %v2655_v62  ;;  %v1096_v1 = vmul.f32 1.442695, %v1078_v46 }
 0x14f   :  { %v2127_v63 = vpop.eup %2126  ;;  %2138 = vtanh.f32 %v2672_v4  ;;  %v1122_v0 = vmul.f32 1.442695, %v1091_v43 }
 0x150   :  { %2140 = vtanh.f32 %v2678_v7 }
 0x151   :  { %2142 = vtanh.f32 %v2683_v10 }
 0x152   :  { %1302 = vrot.lane.b32.xlu0 %v2123_v60, %s2241_s4  ;;  %2144 = vpow2.f32 %v1104_v36  ;;  %v2760_v60 = vpop.permute.xlu1 %1222 }
 0x153   :  { %2146 = vpow2.f32 %v1106_v40 }
 0x154   :  { %v2129_v6 = vpop.eup %2128  ;;  %2148 = vpow2.f32 %v1100_v42 }
 0x155   :  { %1322 = vrot.lane.b32.xlu1 %v2129_v6, %s2241_s4  ;;  %v2131_v8 = vpop.eup %2130  ;;  %2150 = vpow2.f32 %v1092_v44 }
 0x156   :  { %1320 = vrot.lane.b32.xlu0 %v2125_v61, %s2241_s4  ;;  %v2133_v9 = vpop.eup %2132  ;;  %2152 = vpow2.f32 %v1102_v31 }
 0x157   :  { %v2135_v11 = vpop.eup %2134  ;;  %2154 = vpow2.f32 %v1094_v24 }
 0x158   :  { %v2137_v12 = vpop.eup %2136  ;;  %2156 = vpow2.f32 %v1112_v48 }
 0x159   :  { %1318 = vrot.lane.b32.xlu1 %v2131_v8, %s2241_s4  ;;  %v2139_v13 = vpop.eup %2138  ;;  %v1110_v8 = vmul.f32 1.442695, %v1085_v57 }
 0x15a   :  { %1316 = vrot.lane.b32.xlu0 %v2127_v63, %s2241_s4  ;;  %v2141_v5 = vpop.eup %2140 }
 0x15b   :  { %v2143_v19 = vpop.eup %2142 }
 0x15c   :  { %v2145_v45 = vpop.eup %2144 }
 0x15d   :  { %1304 = vrot.lane.b32.xlu1 %v2135_v11, %s2241_s4  ;;  %v2147_v47 = vpop.eup %2146  ;;  %v1130_v28 = vadd.f32 1.0, %v2145_v45 }
 0x15e   :  { %1328 = vrot.lane.b32.xlu0 %v2133_v9, %s2241_s4  ;;  %v2149_v51 = vpop.eup %2148  ;;  %v1131_v38 = vadd.f32 1.0, %v2147_v47 }
 0x15f   :  { %2158 = vrcp.f32 %v1130_v28  ;;  %v1128_v52 = vadd.f32 1.0, %v2149_v51  ;;  %v2151_v41 = vpop.eup %2150 }
 0x160   :  { %2160 = vpow2.f32 %v1108_v17  ;;  %v2153_v34 = vpop.eup %2152  ;;  %v1124_v54 = vadd.f32 1.0, %v2151_v41 }
 0x161   :  { %1306 = vrot.lane.b32.xlu1 %v2139_v13, %s2241_s4  ;;  %2162 = vrcp.f32 %v1131_v38  ;;  %v2155_v56 = vpop.eup %2154  ;;  %v1129_v59 = vadd.f32 1.0, %v2153_v34 }
 0x162   :  { %1324 = vrot.lane.b32.xlu0 %v2137_v12, %s2241_s4  ;;  %2164 = vrcp.f32 %v1128_v52  ;;  %v2157_v61 = vpop.eup %2156  ;;  %v1125_v63 = vadd.f32 1.0, %v2155_v56 }
 0x163   :  { %2166 = vrcp.f32 %v1124_v54  ;;  %v1134_v13 = vadd.f32 1.0, %v2157_v61 }
 0x164   :  { %2168 = vpow2.f32 %v1114_v55 }
 0x165   :  { %1330 = vrot.lane.b32.xlu1 %v2141_v5, %s2241_s4  ;;  %2170 = vrcp.f32 %v1129_v59 }
 0x166   :  { %1224 = vrot.lane.b32.xlu0 %v1190_v15, %s2240_s29  ;;  %v1088_v15 = vsub.f32 0.0, %v2668_v2  ;;  %2172 = vrcp.f32 %v1125_v63 }
 0x167   :  { %2174 = vpow2.f32 %v1110_v8 }
 0x168   :  { %2176 = vrcp.f32 %v1134_v13  ;;  %v1116_v2 = vmul.f32 1.442695, %v1088_v15 }
 0x169   :  { %1326 = vrot.lane.b32.xlu1 %v2143_v19, %s2241_s4  ;;  %v2762_v6 = vpop.eup %2158  ;;  %2178 = vpow2.f32 %v1096_v1 }
 0x16a   :  { %1228 = vrot.lane.b32.xlu0 %v1192_v18, %s2240_s29  ;;  %v2161_v11 = vpop.eup %2160 }
 0x16b   :  { %v2766_v62 = vpop.eup %2162 }
 0x16c   :  { %v2771_v19 = vpop.eup %2164 }
 0x16d   :  { %1226 = vrot.lane.b32.xlu1 %v1191_v21, %s2240_s29 }
 0x16e   :  { %1232 = vrot.lane.b32.xlu0 %v1194_v20, %s2240_s29  ;;  %v1079_v20 = vsub.f32 0.0, %v2672_v4 }
 0x171   :  { %1230 = vrot.lane.b32.xlu1 %v1193_v50, %s2240_s29 }
 0x172   :  { %1236 = vrot.lane.b32.xlu0 %v1196_v22, %s2240_s29  ;;  %v1132_v22 = vadd.f32 1.0, %v2161_v11 }
 0x174   :  { %2180 = vrcp.f32 %v1132_v22 }
 0x175   :  { %1234 = vrot.lane.b32.xlu1 %v1195_v25, %s2240_s29  ;;  %v2778_v25 = vpop.eup %2166  ;;  %2182 = vpow2.f32 %v1116_v2 }
 0x176   :  { %1240 = vrot.lane.b32.xlu0 %v1198_v23, %s2240_s29  ;;  %v1090_v23 = vsub.f32 0.0, %v2659_v49  ;;  %v1089_v49 = vsub.f32 0.0, %v2683_v10 }
 0x178   :  { %v1118_v44 = vmul.f32 1.442695, %v1089_v49 }
 0x179   :  { %1238 = vrot.lane.b32.xlu1 %v1197_v26, %s2240_s29 }
 0x17a   :  { %1244 = vrot.lane.b32.xlu0 %v1200_v3, %s2240_s29  ;;  %v1098_v3 = vmul.f32 1.442695, %v1079_v20 }
 0x17c   :  { %2184 = vpow2.f32 %v1098_v3 }
 0x17d   :  { %1242 = vrot.lane.b32.xlu1 %v1199_v53, %s2240_s29 }
 0x17e   :  { %1248 = vrot.lane.b32.xlu0 %v1202_v27, %s2240_s29  ;;  %v2169_v27 = vpop.eup %2168 }
 0x17f   :  { %v2781_v53 = vpop.eup %2170  ;;  %v1135_v33 = vadd.f32 1.0, %v2169_v27 }
 0x180   :  { %v2786_v39 = vpop.eup %2172 }
 0x181   :  { %1246 = vrot.lane.b32.xlu1 %v1201_v29, %s2240_s29  ;;  %v1120_v29 = vmul.f32 1.442695, %v1090_v23  ;;  %v2175_v40 = vpop.eup %2174 }
 0x182   :  { %v2790_v42 = vpop.eup %2176  ;;  %v1133_v31 = vadd.f32 1.0, %v2175_v40 }
 0x183   :  { %2186 = vpow2.f32 %v1120_v29  ;;  %v2179_v16 = vpop.eup %2178 }
 0x184   :  { %2188 = vrcp.f32 %v1135_v33  ;;  %v2795_v24 = vpop.eup %2180  ;;  %v1126_v48 = vadd.f32 1.0, %v2179_v16 }
 0x185   :  { %1250 = vrot.lane.b32.xlu1 %v1203_v32, %s2240_s29  ;;  %v2183_v45 = vpop.eup %2182  ;;  %2190 = vpow2.f32 %v1118_v44 }
 0x186   :  { %2192 = vrcp.f32 %v1133_v31  ;;  %v2185_v28 = vpop.eup %2184  ;;  %v1136_v51 = vadd.f32 1.0, %v2183_v45 }
 0x187   :  { %2194 = vpow2.f32 %v1122_v0  ;;  %v1127_v38 = vadd.f32 1.0, %v2185_v28 }
 0x188   :  { %2196 = vrcp.f32 %v1126_v48 }
 0x189   :  { %2198 = vrcp.f32 %v1136_v51 }
 0x18a   :  { %2200 = vrcp.f32 %v1127_v38 }
 0x18d   :  { %v2187_v17 = vpop.eup %2186 }
 0x18e   :  { %v2800_v52 = vpop.eup %2188  ;;  %v1138_v34 = vadd.f32 1.0, %v2187_v17  ;;  %v1268_v17 = vmul.f32 %v2778_v25, %v2758_v58 }
 0x18f   :  { %v2191_v54 = vpop.eup %2190 }
 0x190   :  { %v2804_v55 = vpop.eup %2192  ;;  %2202 = vrcp.f32 %v1138_v34  ;;  %v1137_v59 = vadd.f32 1.0, %v2191_v54 }
 0x191   :  { %v2195_v63 = vpop.eup %2194 }
 0x192   :  { %v2808_v46 = vpop.eup %2196  ;;  %2204 = vrcp.f32 %v1137_v59 }
 0x193   :  { %v2811_v11 = vpop.eup %2198 }
 0x1b8   :  { %v1313_v9 = vpop.permute.xlu0 %1312 }
 0x1b9   :  { %v1354_v12 = vmul.f32 %v2762_v6, %v1313_v9 }
 0x1ba   :  { %v1315_v5 = vpop.permute.xlu1 %1314 }
 0x1bb   :  { %v1355_v18 = vmul.f32 %v2766_v62, %v1315_v5  ;;  %1392 = vrot.lane.b32.xlu0 %v1354_v12, %s2240_s29  ;;  %v1139_v12 = vadd.f32 1.0, %v2195_v63  ;;  %v2815_v5 = vpop.eup %2200 }
 0x1bc   :  { %v1309_v21 = vpop.permute.xlu0 %1308  ;;  %v2820_v20 = vpop.eup %2202 }
 0x1bd   :  { %v1352_v50 = vmul.f32 %v2771_v19, %v1309_v21  ;;  %1394 = vrot.lane.b32.xlu1 %v1355_v18, %s2240_s29  ;;  %2206 = vrcp.f32 %v1139_v12 }
 0x1be   :  { %v1311_v32 = vpop.permute.xlu1 %1310 }
 0x1bf   :  { %1388 = vrot.lane.b32.xlu0 %v1352_v50, %s2240_s29  ;;  %v1353_v35 = vmul.f32 %v2781_v53, %v1311_v32  ;;  %v2824_v50 = vpop.eup %2204 }
 0x1c0   :  { %v1301_v26 = vpop.permute.xlu0 %1300 }
 0x1c1   :  { %v1348_v4 = vmul.f32 %v2778_v25, %v1301_v26  ;;  %1390 = vrot.lane.b32.xlu1 %v1353_v35, %s2240_s29 }
 0x1c3   :  { %1380 = vrot.lane.b32.xlu0 %v1348_v4, %s2240_s29 }
 0x1c4   :  { %v1303_v36 = vpop.permute.xlu0 %1302 }
 0x1c5   :  { %v1349_v30 = vmul.f32 %v2786_v39, %v1303_v36 }
 0x1c7   :  { %1382 = vrot.lane.b32.xlu1 %v1349_v30, %s2240_s29  ;;  %v1323_v41 = vpop.permute.xlu1 %1322  ;;  %v2828_v3 = vpop.eup %2206 }
 0x1c8   :  { %v1321_v14 = vpop.permute.xlu0 %1320  ;;  %v1359_v37 = vmul.f32 %v2800_v52, %v1323_v41 }
 0x1c9   :  { %v1358_v10 = vmul.f32 %v2790_v42, %v1321_v14 }
 0x1cb   :  { %1400 = vrot.lane.b32.xlu0 %v1358_v10, %s2240_s29  ;;  %1402 = vrot.lane.b32.xlu1 %v1359_v37, %s2240_s29  ;;  %v1319_v56 = vpop.permute.xlu1 %1318 }
 0x1cc   :  { %v1317_v47 = vpop.permute.xlu0 %1316  ;;  %v1357_v57 = vmul.f32 %v2804_v55, %v1319_v56 }
 0x1cd   :  { %v1356_v7 = vmul.f32 %v2795_v24, %v1317_v47 }
 0x1cf   :  { %1396 = vrot.lane.b32.xlu0 %v1356_v7, %s2240_s29  ;;  %1398 = vrot.lane.b32.xlu1 %v1357_v57, %s2240_s29  ;;  %v1305_v8 = vpop.permute.xlu1 %1304  ;;  %v1269_v57 = vmul.f32 %v2786_v39, %v2760_v60 }
 0x1d0   :  { %v1329_v61 = vpop.permute.xlu0 %1328  ;;  %v1350_v9 = vmul.f32 %v2808_v46, %v1305_v8 }
 0x1d1   :  { %v1362_v22 = vmul.f32 %v2820_v20, %v1329_v61 }
 0x1d3   :  { %1384 = vrot.lane.b32.xlu0 %v1350_v9, %s2240_s29  ;;  %v1307_v18 = vpop.permute.xlu1 %1306 }
 0x1d4   :  { %v1325_v13 = vpop.permute.xlu0 %1324  ;;  %v1351_v1 = vmul.f32 %v2815_v5, %v1307_v18 }
 0x1d5   :  { %v1360_v15 = vmul.f32 %v2811_v11, %v1325_v13 }
 0x1d6   :  { %1386 = vrot.lane.b32.xlu1 %v1351_v1, %s2240_s29 }
 0x1d7   :  { %1404 = vrot.lane.b32.xlu0 %v1360_v15, %s2240_s29  ;;  %v1331_v21 = vpop.permute.xlu1 %1330 }
 0x1d8   :  { %v1363_v26 = vmul.f32 %v2828_v3, %v1331_v21  ;;  %v2832_v27 = vpop.permute.xlu0 %1224 }
 0x1db   :  { %1408 = vrot.lane.b32.xlu0 %v1362_v22, %s2240_s29  ;;  %v1327_v2 = vpop.permute.xlu1 %1326 }
 0x1dc   :  { %v1361_v23 = vmul.f32 %v2824_v50, %v1327_v2  ;;  %v1229_v29 = vpop.permute.xlu0 %1228 }
 0x1dd   :  { %v1272_v48 = vmul.f32 %v2771_v19, %v1229_v29 }
 0x1de   :  { %1406 = vrot.lane.b32.xlu1 %v1361_v23, %s2240_s29 }
 0x1df   :  { %v2834_v4 = vpop.permute.xlu1 %1226 }
 0x1e0   :  { %v1233_v33 = vpop.permute.xlu0 %1232 }
 0x1e1   :  { %v1274_v10 = vmul.f32 %v2762_v6, %v1233_v33 }
 0x1e2   :  { %1410 = vrot.lane.b32.xlu1 %v1363_v26, %s2240_s29 }
 0x1e3   :  { %v1231_v32 = vpop.permute.xlu1 %1230 }
 0x1e4   :  { %v1237_v35 = vpop.permute.xlu0 %1236  ;;  %v1273_v37 = vmul.f32 %v2781_v53, %v1231_v32 }
 0x1e5   :  { %v1276_v60 = vmul.f32 %v2795_v24, %v1237_v35  ;;  %v1270_v35 = vmul.f32 %v2808_v46, %v2832_v27 }
 0x1e7   :  { %v1235_v49 = vpop.permute.xlu1 %1234 }
 0x1e8   :  { %v1241_v40 = vpop.permute.xlu0 %1240  ;;  %v1275_v45 = vmul.f32 %v2766_v62, %v1235_v49 }
 0x1e9   :  { %v1278_v59 = vmul.f32 %v2790_v42, %v1241_v40 }
 0x1eb   :  { %v1239_v36 = vpop.permute.xlu1 %1238 }
 0x1ec   :  { %v2836_v43 = vpop.permute.xlu0 %1244  ;;  %v1277_v29 = vmul.f32 %v2804_v55, %v1239_v36 }
 0x1ed   :  { %v1280_v36 = vmul.f32 %v2811_v11, %v2836_v43 }
 0x1ef   :  { %v1243_v30 = vpop.permute.xlu1 %1242 }
 0x1f0   :  { %v2840_v14 = vpop.permute.xlu0 %1248  ;;  %v1279_v21 = vmul.f32 %v2800_v52, %v1243_v30 }
 0x1f3   :  { %v2838_v44 = vpop.permute.xlu1 %1246 }
 0x1f7   :  { %v2842_v31 = vpop.permute.xlu1 %1250 }
 0x22d   :  { %v1393_v16 = vpop.permute.xlu0 %1392 }
 0x22e   :  { %v2846_v0 = vadd.f32 %v1393_v16, %v1274_v10  ;;  %v1271_v10 = vmul.f32 %v2815_v5, %v2834_v4 }
 0x22f   :  { %v1395_v47 = vpop.permute.xlu1 %1394 }
 0x230   :  { %2208 = vtanh.f32 %v2846_v0  ;;  %v2850_v7 = vadd.f32 %v1395_v47, %v1275_v45 }
 0x231   :  { %v1389_v28 = vpop.permute.xlu0 %1388 }
 0x232   :  { %2210 = vtanh.f32 %v2850_v7  ;;  %v2853_v51 = vadd.f32 %v1389_v28, %v1272_v48  ;;  %v1282_v28 = vmul.f32 %v2820_v20, %v2840_v14  ;;  %v1283_v14 = vmul.f32 %v2828_v3, %v2842_v31 }
 0x233   :  { %v1391_v34 = vpop.permute.xlu1 %1390 }
 0x234   :  { %2212 = vtanh.f32 %v2853_v51  ;;  %v2862_v54 = vadd.f32 %v1391_v34, %v1273_v37 }
 0x235   :  { %v1381_v38 = vpop.permute.xlu0 %1380 }
 0x236   :  { %v2858_v41 = vadd.f32 %v1381_v38, %v1268_v17  ;;  %v1281_v38 = vmul.f32 %v2824_v50, %v2838_v44 }
 0x238   :  { %2214 = vtanh.f32 %v2858_v41 }
 0x239   :  { %2216 = vtanh.f32 %v2862_v54  ;;  %v1383_v61 = vpop.permute.xlu1 %1382 }
 0x23a   :  { %v2209_v56 = vpop.eup %2208  ;;  %v2869_v63 = vadd.f32 %v1383_v61, %v1269_v57 }
 0x23b   :  { %1488 = vrot.lane.b32.xlu0 %v2209_v56, %s2241_s4 }
 0x23c   :  { %v2211_v58 = vpop.eup %2210  ;;  %2218 = vtanh.f32 %v2869_v63 }
 0x23d   :  { %1490 = vrot.lane.b32.xlu1 %v2211_v58, %s2241_s4  ;;  %v1401_v8 = vpop.permute.xlu0 %1400  ;;  %v1403_v22 = vpop.permute.xlu1 %1402 }
 0x23e   :  { %v2213_v9 = vpop.eup %2212  ;;  %v2872_v12 = vadd.f32 %v1401_v8, %v1278_v59  ;;  %v2884_v2 = vadd.f32 %v1403_v22, %v1279_v21 }
 0x23f   :  { %1484 = vrot.lane.b32.xlu0 %v2213_v9, %s2241_s4 }
 0x240   :  { %2220 = vtanh.f32 %v2872_v12 }
 0x241   :  { %v1397_v13 = vpop.permute.xlu0 %1396  ;;  %v1399_v32 = vpop.permute.xlu1 %1398 }
 0x242   :  { %v2215_v15 = vpop.eup %2214  ;;  %v2878_v18 = vadd.f32 %v1397_v13, %v1276_v60  ;;  %v2890_v33 = vadd.f32 %v1399_v32, %v1277_v29 }
 0x243   :  { %1476 = vrot.lane.b32.xlu0 %v2215_v15, %s2241_s4  ;;  %v2217_v1 = vpop.eup %2216 }
 0x244   :  { %2222 = vtanh.f32 %v2878_v18  ;;  %1486 = vrot.lane.b32.xlu1 %v2217_v1, %s2241_s4 }
 0x245   :  { %2224 = vtanh.f32 %v2884_v2  ;;  %v1385_v40 = vpop.permute.xlu0 %1384 }
 0x246   :  { %v2219_v23 = vpop.eup %2218  ;;  %2226 = vtanh.f32 %v2890_v33  ;;  %v2896_v30 = vadd.f32 %v1385_v40, %v1270_v35 }
 0x248   :  { %1478 = vrot.lane.b32.xlu1 %v2219_v23, %s2241_s4  ;;  %2228 = vtanh.f32 %v2896_v30  ;;  %v1387_v45 = vpop.permute.xlu1 %1386 }
 0x249   :  { %v1405_v47 = vpop.permute.xlu0 %1404  ;;  %v2903_v48 = vadd.f32 %v1387_v45, %v1271_v10 }
 0x24a   :  { %v2221_v26 = vpop.eup %2220  ;;  %v2905_v27 = vadd.f32 %v1405_v47, %v1280_v36 }
 0x24b   :  { %1496 = vrot.lane.b32.xlu0 %v2221_v26, %s2241_s4  ;;  %2230 = vtanh.f32 %v2903_v48 }
 0x24c   :  { %2232 = vtanh.f32 %v2905_v27 }
 0x24d   :  { %v1409_v4 = vpop.permute.xlu0 %1408 }
 0x24e   :  { %v2223_v49 = vpop.eup %2222  ;;  %v2912_v17 = vadd.f32 %v1409_v4, %v1282_v28 }
 0x24f   :  { %1492 = vrot.lane.b32.xlu0 %v2223_v49, %s2241_s4  ;;  %v2225_v16 = vpop.eup %2224 }
 0x250   :  { %1498 = vrot.lane.b32.xlu1 %v2225_v16, %s2241_s4  ;;  %v2227_v43 = vpop.eup %2226  ;;  %2234 = vtanh.f32 %v2912_v17  ;;  %v1407_v37 = vpop.permute.xlu1 %1406 }
 0x251   :  { %v2918_v56 = vadd.f32 %v1407_v37, %v1281_v38 }
 0x252   :  { %v2229_v34 = vpop.eup %2228 }
 0x253   :  { %1480 = vrot.lane.b32.xlu0 %v2229_v34, %s2241_s4  ;;  %2236 = vtanh.f32 %v2918_v56 }
 0x254   :  { %1494 = vrot.lane.b32.xlu1 %v2227_v43, %s2241_s4  ;;  %v1411_v57 = vpop.permute.xlu1 %1410 }
 0x255   :  { %v2231_v58 = vpop.eup %2230  ;;  %v2924_v59 = vadd.f32 %v1411_v57, %v1283_v14 }
 0x256   :  { %v2233_v61 = vpop.eup %2232 }
 0x257   :  { %2238 = vtanh.f32 %v2924_v59  ;;  %1500 = vrot.lane.b32.xlu0 %v2233_v61, %s2241_s4 }
 0x258   :  { %1482 = vrot.lane.b32.xlu1 %v2231_v58, %s2241_s4 }
 0x25a   :  { %v2235_v44 = vpop.eup %2234 }
 0x25b   :  { %1504 = vrot.lane.b32.xlu0 %v2235_v44, %s2241_s4 }
 0x25d   :  { %v2237_v8 = vpop.eup %2236 }
 0x25e   :  { %1502 = vrot.lane.b32.xlu1 %v2237_v8, %s2241_s4 }
 0x261   :  { %v2239_v31 = vpop.eup %2238 }
 0x262   :  { %1506 = vrot.lane.b32.xlu1 %v2239_v31, %s2241_s4 }
 0x2ad   :  { %v1489_v9 = vpop.permute.xlu0 %1488 }
 0x2ae   :  { %v1530_v60 = vmul.f32 %v2762_v6, %v1489_v9 }
 0x2af   :  { %v1491_v13 = vpop.permute.xlu1 %1490 }
 0x2b0   :  { %v1531_v15 = vmul.f32 %v2766_v62, %v1491_v13  ;;  %1568 = vrot.lane.b32.xlu0 %v1530_v60, %s2240_s29 }
 0x2b1   :  { %v1485_v1 = vpop.permute.xlu0 %1484 }
 0x2b2   :  { %v1528_v21 = vmul.f32 %v2771_v19, %v1485_v1  ;;  %1570 = vrot.lane.b32.xlu1 %v1531_v15, %s2240_s29 }
 0x2b4   :  { %1564 = vrot.lane.b32.xlu0 %v1528_v21, %s2240_s29 }
 0x2b5   :  { %v1477_v22 = vpop.permute.xlu0 %1476 }
 0x2b6   :  { %v1524_v23 = vmul.f32 %v2778_v25, %v1477_v22  ;;  %v1487_v26 = vpop.permute.xlu1 %1486 }
 0x2b7   :  { %v1529_v6 = vmul.f32 %v2781_v53, %v1487_v26 }
 0x2b8   :  { %1556 = vrot.lane.b32.xlu0 %v1524_v23, %s2240_s29 }
 0x2b9   :  { %1566 = vrot.lane.b32.xlu1 %v1529_v6, %s2240_s29 }
 0x2ba   :  { %v1479_v62 = vpop.permute.xlu1 %1478 }
 0x2bb   :  { %v1525_v29 = vmul.f32 %v2786_v39, %v1479_v62 }
 0x2bd   :  { %v1497_v32 = vpop.permute.xlu0 %1496  ;;  %1558 = vrot.lane.b32.xlu1 %v1525_v29, %s2240_s29 }
 0x2be   :  { %v1534_v19 = vmul.f32 %v2790_v42, %v1497_v32 }
 0x2c0   :  { %1576 = vrot.lane.b32.xlu0 %v1534_v19, %s2240_s29 }
 0x2c1   :  { %v1493_v49 = vpop.permute.xlu0 %1492 }
 0x2c2   :  { %v1532_v25 = vmul.f32 %v2795_v24, %v1493_v49  ;;  %v1499_v35 = vpop.permute.xlu1 %1498 }
 0x2c3   :  { %v1535_v53 = vmul.f32 %v2800_v52, %v1499_v35 }
 0x2c4   :  { %1572 = vrot.lane.b32.xlu0 %v1532_v25, %s2240_s29 }
 0x2c5   :  { %1578 = vrot.lane.b32.xlu1 %v1535_v53, %s2240_s29  ;;  %v1481_v42 = vpop.permute.xlu0 %1480 }
 0x2c6   :  { %v1495_v40 = vpop.permute.xlu1 %1494  ;;  %v1526_v10 = vmul.f32 %v2808_v46, %v1481_v42 }
 0x2c7   :  { %v1533_v39 = vmul.f32 %v2804_v55, %v1495_v40 }
 0x2c8   :  { %1560 = vrot.lane.b32.xlu0 %v1526_v10, %s2240_s29 }
 0x2c9   :  { %1574 = vrot.lane.b32.xlu1 %v1533_v39, %s2240_s29  ;;  %v1501_v16 = vpop.permute.xlu0 %1500 }
 0x2ca   :  { %v1483_v36 = vpop.permute.xlu1 %1482  ;;  %v1536_v45 = vmul.f32 %v2811_v11, %v1501_v16 }
 0x2cb   :  { %v1527_v24 = vmul.f32 %v2815_v5, %v1483_v36 }
 0x2cc   :  { %1580 = vrot.lane.b32.xlu0 %v1536_v45, %s2240_s29 }
 0x2cd   :  { %1562 = vrot.lane.b32.xlu1 %v1527_v24, %s2240_s29  ;;  %v1505_v52 = vpop.permute.xlu0 %1504 }
 0x2ce   :  { %v1538_v55 = vmul.f32 %v2820_v20, %v1505_v52 }
 0x2d0   :  { %v1503_v47 = vpop.permute.xlu1 %1502  ;;  %1584 = vrot.lane.b32.xlu0 %v1538_v55, %s2240_s29 }
 0x2d1   :  { %v1537_v46 = vmul.f32 %v2824_v50, %v1503_v47 }
 0x2d3   :  { %1582 = vrot.lane.b32.xlu1 %v1537_v46, %s2240_s29 }
 0x2d4   :  { %v1507_v28 = vpop.permute.xlu1 %1506 }
 0x2d5   :  { %v1539_v5 = vmul.f32 %v2828_v3, %v1507_v28 }
 0x2d7   :  { %1586 = vrot.lane.b32.xlu1 %v1539_v5, %s2240_s29 }
 0x322   :  { %v1569_v11 = vpop.permute.xlu0 %1568 }
 0x323   :  { %v1610_v4 = vsel %vm388_vm0, %v1569_v11, %v2846_v0 }
 0x324   :  { %v1627_v43 = vsel %vm1620_vm1, %v1610_v4, 0.0  ;;  %v1571_v20 = vpop.permute.xlu1 %1570 }
 0x325   :  { %1643 = vst [vmem:[%s3066_s6 + $0x30] sm:$0xff] %v1627_v43  ;;  %v1611_v50 = vsel %vm388_vm0, %v1571_v20, %v2850_v7 }
 0x326   :  { %v1628_v38 = vsel %vm1620_vm1, %v1611_v50, 0.0  ;;  %v1565_v3 = vpop.permute.xlu0 %1564 }
 0x327   :  { %1644 = vst [vmem:[%s3066_s6 + $0x38] sm:$0xff] %v1628_v38  ;;  %v1608_v0 = vsel %vm388_vm0, %v1565_v3, %v2853_v51 }
 0x328   :  { %v1625_v37 = vsel %vm1620_vm1, %v1608_v0, 0.0 }
 0x329   :  { %1641 = vst [vmem:[%s3066_s6 + $0x20] sm:$0xff] %v1625_v37 }
 0x32a   :  { %v1557_v34 = vpop.permute.xlu0 %1556 }
 0x32b   :  { %v1604_v7 = vsel %vm388_vm0, %v1557_v34, %v2858_v41  ;;  %v1567_v57 = vpop.permute.xlu1 %1566 }
 0x32c   :  { %v1621_v14 = vsel %vm1620_vm1, %v1604_v7, 0.0  ;;  %v1609_v51 = vsel %vm388_vm0, %v1567_v57, %v2862_v54 }
 0x32d   :  { %1637 = vst [vmem:[%s3066_s6] sm:$0xff] %v1621_v14  ;;  %v1626_v58 = vsel %vm1620_vm1, %v1609_v51, 0.0 }
 0x32e   :  { %1642 = vst [vmem:[%s3066_s6 + $0x28] sm:$0xff] %v1626_v58 }
 0x32f   :  { %v1559_v61 = vpop.permute.xlu1 %1558 }
 0x330   :  { %v1605_v41 = vsel %vm388_vm0, %v1559_v61, %v2869_v63 }
 0x331   :  { %v1622_v8 = vsel %vm1620_vm1, %v1605_v41, 0.0 }
 0x332   :  { %v1577_v44 = vpop.permute.xlu0 %1576  ;;  %1638 = vst [vmem:[%s3066_s6 + $0x8] sm:$0xff] %v1622_v8 }
 0x333   :  { %v1614_v31 = vsel %vm388_vm0, %v1577_v44, %v2872_v12 }
 0x334   :  { %v1631_v54 = vsel %vm1620_vm1, %v1614_v31, 0.0 }
 0x335   :  { %1647 = vst [vmem:[%s3066_s6 + $0x50] sm:$0xff] %v1631_v54 }
 0x336   :  { %v1573_v9 = vpop.permute.xlu0 %1572 }
 0x337   :  { %v1612_v63 = vsel %vm388_vm0, %v1573_v9, %v2878_v18  ;;  %v1579_v12 = vpop.permute.xlu1 %1578 }
 0x338   :  { %v1629_v60 = vsel %vm1620_vm1, %v1612_v63, 0.0  ;;  %v1615_v13 = vsel %vm388_vm0, %v1579_v12, %v2884_v2 }
 0x339   :  { %1645 = vst [vmem:[%s3066_s6 + $0x40] sm:$0xff] %v1629_v60  ;;  %v1632_v15 = vsel %vm1620_vm1, %v1615_v13, 0.0 }
 0x33a   :  { %1648 = vst [vmem:[%s3066_s6 + $0x58] sm:$0xff] %v1632_v15  ;;  %v1561_v22 = vpop.permute.xlu0 %1560 }
 0x33b   :  { %v1575_v1 = vpop.permute.xlu1 %1574  ;;  %v1606_v2 = vsel %vm388_vm0, %v1561_v22, %v2896_v30 }
 0x33c   :  { %v1613_v18 = vsel %vm388_vm0, %v1575_v1, %v2890_v33  ;;  %v1623_v23 = vsel %vm1620_vm1, %v1606_v2, 0.0 }
 0x33d   :  { %v1630_v21 = vsel %vm1620_vm1, %v1613_v18, 0.0  ;;  %1639 = vst [vmem:[%s3066_s6 + $0x10] sm:$0xff] %v1623_v23 }
 0x33e   :  { %1646 = vst [vmem:[%s3066_s6 + $0x48] sm:$0xff] %v1630_v21  ;;  %v1581_v6 = vpop.permute.xlu0 %1580 }
 0x33f   :  { %v1563_v26 = vpop.permute.xlu1 %1562  ;;  %v1616_v29 = vsel %vm388_vm0, %v1581_v6, %v2905_v27 }
 0x340   :  { %v1607_v33 = vsel %vm388_vm0, %v1563_v26, %v2903_v48  ;;  %v1633_v30 = vsel %vm1620_vm1, %v1616_v29, 0.0 }
 0x341   :  { %v1624_v62 = vsel %vm1620_vm1, %v1607_v33, 0.0  ;;  %1649 = vst [vmem:[%s3066_s6 + $0x60] sm:$0xff] %v1633_v30 }
 0x342   :  { %1640 = vst [vmem:[%s3066_s6 + $0x18] sm:$0xff] %v1624_v62  ;;  %v1585_v32 = vpop.permute.xlu0 %1584 }
 0x343   :  { %v1618_v48 = vsel %vm388_vm0, %v1585_v32, %v2912_v17 }
 0x344   :  { %v1635_v19 = vsel %vm1620_vm1, %v1618_v48, 0.0 }
 0x345   :  { %v1583_v49 = vpop.permute.xlu1 %1582  ;;  %1651 = vst [vmem:[%s3066_s6 + $0x70] sm:$0xff] %v1635_v19 }
 0x346   :  { %v1617_v27 = vsel %vm388_vm0, %v1583_v49, %v2918_v56 }
 0x347   :  { %v1634_v25 = vsel %vm1620_vm1, %v1617_v27, 0.0 }
 0x348   :  { %1650 = vst [vmem:[%s3066_s6 + $0x68] sm:$0xff] %v1634_v25 }
 0x349   :  { %v1587_v35 = vpop.permute.xlu1 %1586 }
 0x34a   :  { %v1619_v17 = vsel %vm388_vm0, %v1587_v35, %v2924_v59 }
 0x34b   :  { %v1636_v53 = vsel %vm1620_vm1, %v1619_v17, 0.0 }
 0x34c   :  { %1652 = vst [vmem:[%s3066_s6 + $0x78] sm:$0xff] %v1636_v53 }

// kernel: closed_call.79
= control target key start
LH: loop header
LB: loop body
LE: loop exit
PB: predicated region body
PF: predicated region fallthrough
CT: control target
= control target key end

     0   :  { %vm204_vm0 = vcmask 261120   ;;  %s550_s1 = inlined_call_operand.vmem [shape: bf16[288,128], index: 1, kind: input, shape index: {}]   ;;  %s551_s0 = inlined_call_operand.vmem [shape: bf16[32,288], index: 0, kind: input, shape index: {}]   ;;  %s552_s2 = inlined_call_operand.vmem [shape: f32[1,128], index: 2, kind: input, shape index: {}]   ;;  %s553_s3 = inlined_call_operand.vmem [shape: bf16[32,128], index: 3, kind: output, shape index: {}]  }
   0x1   :  { %v423_v0 = vld [vmem:[%s550_s1 + $0x40] sm:$0xff]   ;;  %v425_v2 = vld [vmem:[%s550_s1 + $0x48] sm:$0xff]   ;;  %v427_v4 = vld [vmem:[%s550_s1 + $0x50] sm:$0xff]  }
   0x2   :  { %v424_v1 = vld [vmem:[%s550_s1] sm:$0xff]   ;;  %383 = vmatprep.subr.bf16.mxu0 %v423_v0  ;;  %v426_v3 = vld [vmem:[%s550_s1 + $0x8] sm:$0xff]   ;;  %v428_v5 = vld [vmem:[%s550_s1 + $0x10] sm:$0xff]  }
   0x3   :  { %384 = vmatpush3.bf16.msra.mxu0 %v424_v1  ;;  %v429_v6 = vld [vmem:[%s550_s1 + $0x58] sm:$0xff]   ;;  %v431_v8 = vld [vmem:[%s550_s1 + $0x60] sm:$0xff]   ;;  %v433_v11 = vld [vmem:[%s550_s1 + $0x68] sm:$0xff]  }
   0x4   :  { %385 = vmatprep.subr.bf16.mxu0 %v425_v2  ;;  %v430_v7 = vld [vmem:[%s550_s1 + $0x18] sm:$0xff]   ;;  %v432_v9 = vld [vmem:[%s550_s1 + $0x20] sm:$0xff]   ;;  %v434_v12 = vld [vmem:[%s550_s1 + $0x28] sm:$0xff]  }
   0x5   :  { %v438_v10 = vld [vmem:[%s550_s1 + $0x80] sm:$0xff]   ;;  %v435_v13 = vld [vmem:[%s550_s1 + $0x70] sm:$0xff]   ;;  %v443_v15 = vld [vmem:[%s550_s1 + $0x88] sm:$0xff]  }
   0x6   :  { %415 = vmatprep.subr.bf16.mxu1 %v438_v10  ;;  %v442_v14 = vld [vmem:[%s551_s0 + $0x4] ss:$12 sps:$4 sm:$0xff]   ;;  %v444_v16 = vld [vmem:[%s551_s0 + $0x8] ss:$12 sps:$4 sm:$0xff]   ;;  %v445_v17 = vld [vmem:[%s551_s0 + $0x20] ss:$12 sps:$4 sm:$0xff]  }
   0x7   :  { %386 = vmatpush3.bf16.msra.mxu0 %v426_v3  ;;  %416 = vmatpush3.bf16.msra.mxu1 %v438_v10  ;;  %v436_v18 = vld [vmem:[%s550_s1 + $0x30] sm:$0xff]   ;;  %v437_v19 = vld [vmem:[%s550_s1 + $0x78] sm:$0xff]   ;;  %v440_v21 = vld [vmem:[%s551_s0] ss:$12 sps:$4 sm:$0xff]  }
   0x8   :  { %387 = vmatprep.subr.bf16.mxu0 %v427_v4  ;;  %243 = vmatprep.mubr.bf16.mxu0 %v442_v14  ;;  %v439_v20 = vld [vmem:[%s550_s1 + $0x38] sm:$0xff]   ;;  %v337_v30 = vld [vmem:[%s552_s2] ss:$0 sm:$0xff] }
   0x9   :  { %417 = vmatprep.subr.bf16.mxu1 %v443_v15  ;;  %419 = vmatprep.mubr.msk.bf16.mxu1 %vm204_vm0, %v444_v16  ;;  %v446_v22 = vld [vmem:[%s551_s0 + $0x1c] ss:$12 sps:$4 sm:$0xff]   ;;  %v448_v23 = vld [vmem:[%s551_s0 + $0x18] ss:$12 sps:$4 sm:$0xff]  }
   0xb   :  { %388 = vmatpush3.bf16.msra.mxu0 %v428_v5  ;;  %418 = vmatpush3.bf16.msra.mxu1 %v443_v15 }
   0xc   :  { %389 = vmatprep.subr.bf16.mxu0 %v429_v6 }
   0xe   :  { %420 = vmatmul.mubr.msk.bf16.vlgmr.msra.gmra.mrb[0].mxu1 %vm204_vm0, %v445_v17 }
   0xf   :  { %390 = vmatpush3.bf16.msra.mxu0 %v430_v7 }
  0x10   :  { %391 = vmatprep.subr.bf16.mxu0 %v431_v8 }
  0x13   :  { %392 = vmatpush3.bf16.msra.mxu0 %v432_v9 }
  0x14   :  { %393 = vmatprep.subr.bf16.mxu0 %v433_v11 }
  0x17   :  { %394 = vmatpush3.bf16.msra.mxu0 %v434_v12 }
  0x18   :  { %395 = vmatprep.subr.bf16.mxu0 %v435_v13 }
  0x1b   :  { %396 = vmatpush3.bf16.msra.mxu0 %v436_v18 }
  0x1c   :  { %397 = vmatprep.subr.bf16.mxu0 %v437_v19 }
  0x1f   :  { %398 = vmatpush3.bf16.msra.mxu0 %v439_v20 }
  0x22   :  { %244 = vmatmul.mubr.bf16.vlgmr.msra.gmra.mrb[0].mxu0 %v440_v21 }
  0x23   :  { %251 = vmatprep.mubr.bf16.mxu0 %v446_v22 }
  0x2a   :  { %252 = vmatmul.mubr.bf16.gmra.mrb[4].mxu0 %v448_v23 }
  0xe1   :  { %v421_v24 = vpop.f32.mrb[0].mxu1 }
  0xe2   :  { %v294_v25 = vpop.f32.mrb[1].mxu1 }
  0xe3   :  { %v422_v26 = vpop.f32.mrb[2].mxu1 }
  0xe4   :  { %v297_v27 = vpop.f32.mrb[3].mxu1 }
  0xf5   :  { %v399_v28 = vpop.f32.mrb[0].mxu0 }
  0xf6   :  { %v400_v29 = vpop.f32.mrb[1].mxu0 }
  0xf7   :  { %v401_v31 = vadd.f32 %v400_v29, %v399_v28  ;;  %v402_v32 = vpop.f32.mrb[2].mxu0 }
  0xf8   :  { %v403_v33 = vpop.f32.mrb[3].mxu0 }
  0xf9   :  { %v404_v34 = vadd.f32 %v403_v33, %v402_v32  ;;  %v246_v35 = vadd.f32 %v401_v31, %v337_v30 }
  0xfb   :  { %v295_v36 = vadd.f32 %v294_v25, %v246_v35  ;;  %v249_v37 = vadd.f32 %v404_v34, %v337_v30 }
  0xfd   :  { %v298_v38 = vadd.f32 %v297_v27, %v249_v37  ;;  %v405_v39 = vpop.f32.mrb[4].mxu0  ;;  %v309_v41 = vmax.f32 %v295_v36, 0.0 }
  0xfe   :  { %v406_v40 = vpop.f32.mrb[5].mxu0 }
  0xff   :  { %v310_v42 = vmax.f32 %v298_v38, 0.0  ;;  %v407_v43 = vadd.f32 %v406_v40, %v405_v39  ;;  %v408_v44 = vpop.f32.mrb[6].mxu0 }
 0x100   :  { %v409_v45 = vpop.f32.mrb[7].mxu0 }
 0x101   :  { %v375_v46 = vpack.c.bf16 %v310_v42, %v309_v41  ;;  %v254_v47 = vadd.f32 %v407_v43, %v337_v30  ;;  %v410_v48 = vadd.f32 %v409_v45, %v408_v44 }
 0x103   :  { %376 = vst [vmem:[%s553_s3] sm:$0xff] %v375_v46   ;;  %v303_v49 = vadd.f32 %v421_v24, %v254_v47  ;;  %v257_v50 = vadd.f32 %v410_v48, %v337_v30 }
 0x105   :  { %v306_v51 = vadd.f32 %v422_v26, %v257_v50  ;;  %v311_v52 = vmax.f32 %v303_v49, 0.0 }
 0x107   :  { %v312_v53 = vmax.f32 %v306_v51, 0.0 }
 0x109   :  { %v380_v54 = vpack.c.bf16 %v312_v53, %v311_v52 }
 0x10b   :  { %382 = vst [vmem:[%s553_s3 + $0x8] sm:$0xff] %v380_v54  }

// kernel: closed_call.80
= control target key start
LH: loop header
LB: loop body
LE: loop exit
PB: predicated region body
PF: predicated region fallthrough
CT: control target
= control target key end

     0   :  { %vm250_vm0 = vcmask 261120   ;;  %s989_s23 = smov 32   ;;  %vm744_vm1 = vcmask 523264   ;;  %s1228_s3 = inlined_call_operand.vmem [shape: bf16[288,128], index: 3, kind: input, shape index: {}]   ;;  %s1229_s1 = inlined_call_operand.vmem [shape: bf16[288,128], index: 1, kind: input, shape index: {}]   ;;  %s1230_s2 = inlined_call_operand.vmem [shape: bf16[32,288], index: 2, kind: input, shape index: {}]   ;;  %s1231_s0 = inlined_call_operand.vmem [shape: bf16[32,288], index: 0, kind: input, shape index: {}]   ;;  %s1232_s4 = inlined_call_operand.vmem [shape: f32[1,128], index: 4, kind: input, shape index: {}]   ;;  %s1233_s5 = inlined_call_operand.vmem [shape: f32[32,32], index: 5, kind: input, shape index: {}]   ;;  %s1234_s6 = inlined_call_operand.vmem [shape: f32[32,128], index: 6, kind: output, shape index: {}]  }
   0x1   :  { %v904_v0 = vld [vmem:[%s1228_s3 + $0x40] sm:$0xff]   ;;  %v908_v4 = vld [vmem:[%s1228_s3 + $0x48] sm:$0xff]   ;;  %v912_v8 = vld [vmem:[%s1228_s3 + $0x50] sm:$0xff]  }
   0x2   :  { %v905_v1 = vld [vmem:[%s1228_s3] sm:$0xff]   ;;  %810 = vmatprep.subr.bf16.mxu0 %v904_v0  ;;  %v909_v5 = vld [vmem:[%s1228_s3 + $0x8] sm:$0xff]   ;;  %v913_v9 = vld [vmem:[%s1228_s3 + $0x10] sm:$0xff]  }
   0x3   :  { %v906_v2 = vld [vmem:[%s1229_s1 + $0x40] sm:$0xff]   ;;  %811 = vmatpush3.bf16.msra.mxu0 %v905_v1  ;;  %v910_v6 = vld [vmem:[%s1229_s1 + $0x48] sm:$0xff]   ;;  %v914_v10 = vld [vmem:[%s1229_s1 + $0x50] sm:$0xff]  }
   0x4   :  { %v907_v3 = vld [vmem:[%s1229_s1] sm:$0xff]   ;;  %842 = vmatprep.subr.bf16.mxu1 %v906_v2  ;;  %812 = vmatprep.subr.bf16.mxu0 %v908_v4  ;;  %v911_v7 = vld [vmem:[%s1229_s1 + $0x8] sm:$0xff]   ;;  %v915_v11 = vld [vmem:[%s1229_s1 + $0x10] sm:$0xff]  }
   0x5   :  { %843 = vmatpush3.bf16.msra.mxu1 %v907_v3  ;;  %v916_v12 = vld [vmem:[%s1228_s3 + $0x58] sm:$0xff]   ;;  %v920_v16 = vld [vmem:[%s1228_s3 + $0x60] sm:$0xff]   ;;  %v924_v20 = vld [vmem:[%s1228_s3 + $0x68] sm:$0xff]  }
   0x6   :  { %844 = vmatprep.subr.bf16.mxu1 %v910_v6  ;;  %v917_v13 = vld [vmem:[%s1228_s3 + $0x18] sm:$0xff]   ;;  %v921_v17 = vld [vmem:[%s1228_s3 + $0x20] sm:$0xff]   ;;  %v925_v21 = vld [vmem:[%s1228_s3 + $0x28] sm:$0xff]  }
   0x7   :  { %813 = vmatpush3.bf16.msra.mxu0 %v909_v5  ;;  %v918_v14 = vld [vmem:[%s1229_s1 + $0x58] sm:$0xff]   ;;  %v922_v18 = vld [vmem:[%s1229_s1 + $0x60] sm:$0xff]   ;;  %v926_v22 = vld [vmem:[%s1229_s1 + $0x68] sm:$0xff]  }
   0x8   :  { %814 = vmatprep.subr.bf16.mxu0 %v912_v8  ;;  %v919_v15 = vld [vmem:[%s1229_s1 + $0x18] sm:$0xff]   ;;  %v923_v19 = vld [vmem:[%s1229_s1 + $0x20] sm:$0xff]   ;;  %v927_v23 = vld [vmem:[%s1229_s1 + $0x28] sm:$0xff]  }
   0x9   :  { %845 = vmatpush3.bf16.msra.mxu1 %v911_v7  ;;  %v928_v24 = vld [vmem:[%s1228_s3 + $0x70] sm:$0xff]   ;;  %v932_v28 = vld [vmem:[%s1228_s3 + $0x78] sm:$0xff]   ;;  %v935_v31 = vld [vmem:[%s1230_s2] ss:$12 sps:$4 sm:$0xff]  }
   0xa   :  { %846 = vmatprep.subr.bf16.mxu1 %v914_v10  ;;  %v929_v25 = vld [vmem:[%s1228_s3 + $0x30] sm:$0xff]   ;;  %v933_v29 = vld [vmem:[%s1228_s3 + $0x38] sm:$0xff]   ;;  %v939_v34 = vld [vmem:[%s1228_s3 + $0x80] sm:$0xff]  }
   0xb   :  { %815 = vmatpush3.bf16.msra.mxu0 %v913_v9  ;;  %v930_v26 = vld [vmem:[%s1229_s1 + $0x70] sm:$0xff]   ;;  %v934_v30 = vld [vmem:[%s1229_s1 + $0x78] sm:$0xff]   ;;  %v940_v35 = vld [vmem:[%s1231_s0] ss:$12 sps:$4 sm:$0xff]  }
   0xc   :  { %816 = vmatprep.subr.bf16.mxu0 %v916_v12  ;;  %v931_v27 = vld [vmem:[%s1229_s1 + $0x30] sm:$0xff]   ;;  %v938_v33 = vld [vmem:[%s1229_s1 + $0x38] sm:$0xff]   ;;  %v943_v37 = vld [vmem:[%s1229_s1 + $0x80] sm:$0xff]  }
   0xd   :  { %847 = vmatpush3.bf16.msra.mxu1 %v915_v11  ;;  %v937_v32 = vld [vmem:[%s1230_s2 + $0x4] ss:$12 sps:$4 sm:$0xff]   ;;  %v944_v38 = vld [vmem:[%s1230_s2 + $0x1c] ss:$12 sps:$4 sm:$0xff]   ;;  %v953_v46 = vld [vmem:[%s1230_s2 + $0x20] ss:$12 sps:$4 sm:$0xff]  }
   0xe   :  { %848 = vmatprep.subr.bf16.mxu1 %v918_v14  ;;  %289 = vmatprep.mubr.bf16.mxu0 %v937_v32  ;;  %v942_v36 = vld [vmem:[%s1231_s0 + $0x4] ss:$12 sps:$4 sm:$0xff]   ;;  %v947_v40 = vld [vmem:[%s1228_s3 + $0x88] sm:$0xff]  }
   0xf   :  { %817 = vmatpush3.bf16.msra.mxu0 %v917_v13  ;;  %531 = vmatprep.mubr.bf16.mxu1 %v942_v36  ;;  %v946_v39 = vld [vmem:[%s1230_s2 + $0x18] ss:$12 sps:$4 sm:$0xff]   ;;  %v948_v41 = vld [vmem:[%s1231_s0 + $0x1c] ss:$12 sps:$4 sm:$0xff]   ;;  %v955_v47 = vld [vmem:[%s1231_s0 + $0x20] ss:$12 sps:$4 sm:$0xff]  }
  0x10   :  { %818 = vmatprep.subr.bf16.mxu0 %v920_v16  ;;  %v950_v42 = vld [vmem:[%s1231_s0 + $0x18] ss:$12 sps:$4 sm:$0xff]   ;;  %v951_v43 = vld [vmem:[%s1229_s1 + $0x88] sm:$0xff]  }
  0x11   :  { %849 = vmatpush3.bf16.msra.mxu1 %v919_v15  ;;  %v952_v44 = vld [vmem:[%s1230_s2 + $0x8] ss:$12 sps:$4 sm:$0xff]  }
  0x12   :  { %850 = vmatprep.subr.bf16.mxu1 %v922_v18  ;;  %v954_v45 = vld [vmem:[%s1231_s0 + $0x8] ss:$12 sps:$4 sm:$0xff]  }
  0x13   :  { %819 = vmatpush3.bf16.msra.mxu0 %v921_v17  ;;  %v809_v17 = vld [vmem:[%s1232_s4] ss:$0 sm:$0xff]  ;;  %s988_s4 = smov 64  }
  0x14   :  { %820 = vmatprep.subr.bf16.mxu0 %v924_v20 }
  0x15   :  { %851 = vmatpush3.bf16.msra.mxu1 %v923_v19 }
  0x16   :  { %852 = vmatprep.subr.bf16.mxu1 %v926_v22 }
  0x17   :  { %821 = vmatpush3.bf16.msra.mxu0 %v925_v21 }
  0x18   :  { %822 = vmatprep.subr.bf16.mxu0 %v928_v24 }
  0x19   :  { %853 = vmatpush3.bf16.msra.mxu1 %v927_v23 }
  0x1a   :  { %854 = vmatprep.subr.bf16.mxu1 %v930_v26 }
  0x1b   :  { %823 = vmatpush3.bf16.msra.mxu0 %v929_v25 }
  0x1c   :  { %824 = vmatprep.subr.bf16.mxu0 %v932_v28 }
  0x1d   :  { %855 = vmatpush3.bf16.msra.mxu1 %v931_v27 }
  0x1e   :  { %856 = vmatprep.subr.bf16.mxu1 %v934_v30 }
  0x1f   :  { %825 = vmatpush3.bf16.msra.mxu0 %v933_v29 }
  0x20   :  { %874 = vmatprep.subr.bf16.mxu0 %v939_v34 }
  0x21   :  { %857 = vmatpush3.bf16.msra.mxu1 %v938_v33 }
  0x22   :  { %290 = vmatmul.mubr.bf16.vlgmr.msra.gmra.mrb[0].mxu0 %v935_v31  ;;  %882 = vmatprep.subr.bf16.mxu1 %v943_v37 }
  0x23   :  { %875 = vmatpush3.bf16.msra.mxu0 %v939_v34  ;;  %297 = vmatprep.mubr.bf16.mxu0 %v944_v38  ;;  %v636_v38 = vld [vmem:[%s1233_s5] sm:$0xff] }
  0x24   :  { %532 = vmatmul.mubr.bf16.vlgmr.msra.gmra.mrb[0].mxu1 %v940_v35  ;;  %876 = vmatprep.subr.bf16.mxu0 %v947_v40 }
  0x25   :  { %883 = vmatpush3.bf16.msra.mxu1 %v943_v37  ;;  %539 = vmatprep.mubr.bf16.mxu1 %v948_v41  ;;  %v637_v37 = vld [vmem:[%s1233_s5 + $0x8] sm:$0xff] }
  0x26   :  { %884 = vmatprep.subr.bf16.mxu1 %v951_v43 }
  0x27   :  { %877 = vmatpush3.bf16.msra.mxu0 %v947_v40  ;;  %v638_v40 = vld [vmem:[%s1233_s5 + $0x10] sm:$0xff] }
  0x29   :  { %885 = vmatpush3.bf16.msra.mxu1 %v951_v43 }
  0x2a   :  { %298 = vmatmul.mubr.bf16.gmra.mrb[4].mxu0 %v946_v39  ;;  %v639_v39 = vld [vmem:[%s1233_s5 + $0x18] sm:$0xff] }
  0x2b   :  { %878 = vmatprep.mubr.msk.bf16.mxu0 %vm250_vm0, %v952_v44 }
  0x2c   :  { %540 = vmatmul.mubr.bf16.gmra.mrb[4].mxu1 %v950_v42 }
  0x2d   :  { %886 = vmatprep.mubr.msk.bf16.mxu1 %vm250_vm0, %v954_v45 }
  0x32   :  { %879 = vmatmul.mubr.msk.bf16.vlgmr.msra.gmra.mrb[8].mxu0 %vm250_vm0, %v953_v46 }
  0x34   :  { %887 = vmatmul.mubr.msk.bf16.vlgmr.msra.gmra.mrb[8].mxu1 %vm250_vm0, %v955_v47 }
  0xf5   :  { %v826_v48 = vpop.f32.mrb[0].mxu0 }
  0xf6   :  { %v827_v49 = vpop.f32.mrb[1].mxu0 }
  0xf7   :  { %v828_v50 = vadd.f32 %v827_v49, %v826_v48  ;;  %v829_v51 = vpop.f32.mrb[2].mxu0  ;;  %v858_v52 = vpop.f32.mrb[0].mxu1 }
  0xf8   :  { %v830_v53 = vpop.f32.mrb[3].mxu0  ;;  %v859_v55 = vpop.f32.mrb[1].mxu1 }
  0xf9   :  { %v831_v54 = vadd.f32 %v830_v53, %v829_v51  ;;  %v860_v56 = vadd.f32 %v859_v55, %v858_v52  ;;  %v861_v57 = vpop.f32.mrb[2].mxu1 }
  0xfa   :  { %v862_v58 = vpop.f32.mrb[3].mxu1 }
  0xfb   :  { %v863_v59 = vadd.f32 %v862_v58, %v861_v57 }
  0xfd   :  { %v832_v60 = vpop.f32.mrb[4].mxu0 }
  0xfe   :  { %v833_v61 = vpop.f32.mrb[5].mxu0 }
  0xff   :  { %v834_v62 = vadd.f32 %v833_v61, %v832_v60  ;;  %v835_v63 = vpop.f32.mrb[6].mxu0  ;;  %v864_v0 = vpop.f32.mrb[4].mxu1 }
 0x100   :  { %v836_v1 = vpop.f32.mrb[7].mxu0  ;;  %v865_v3 = vpop.f32.mrb[5].mxu1 }
 0x101   :  { %v837_v2 = vadd.f32 %v836_v1, %v835_v63  ;;  %v866_v4 = vadd.f32 %v865_v3, %v864_v0  ;;  %v867_v5 = vpop.f32.mrb[6].mxu1 }
 0x102   :  { %v868_v6 = vpop.f32.mrb[7].mxu1 }
 0x103   :  { %v869_v7 = vadd.f32 %v868_v6, %v867_v5 }
 0x105   :  { %v880_v8 = vpop.f32.mrb[8].mxu0 }
 0x106   :  { %v349_v9 = vadd.f32 %v880_v8, %v834_v62  ;;  %v340_v10 = vpop.f32.mrb[9].mxu0 }
 0x107   :  { %v341_v11 = vadd.f32 %v828_v50, %v340_v10  ;;  %v881_v12 = vpop.f32.mrb[10].mxu0  ;;  %v888_v15 = vpop.f32.mrb[8].mxu1 }
 0x108   :  { %v352_v13 = vadd.f32 %v881_v12, %v837_v2  ;;  %v542_v14 = vadd.f32 %v866_v4, %v349_v9  ;;  %v343_v16 = vpop.f32.mrb[11].mxu0  ;;  %v582_v20 = vpop.f32.mrb[9].mxu1 }
 0x109   :  { %v344_v18 = vadd.f32 %v831_v54, %v343_v16  ;;  %v534_v19 = vadd.f32 %v860_v56, %v341_v11  ;;  %v889_v23 = vpop.f32.mrb[10].mxu1 }
 0x10a   :  { %v591_v21 = vadd.f32 %v888_v15, %v542_v14  ;;  %v545_v22 = vadd.f32 %v869_v7, %v352_v13  ;;  %v585_v26 = vpop.f32.mrb[11].mxu1 }
 0x10b   :  { %v583_v24 = vadd.f32 %v582_v20, %v534_v19  ;;  %v537_v25 = vadd.f32 %v863_v59, %v344_v18 }
 0x10c   :  { %v606_v27 = vadd.f32 %v809_v17, %v591_v21  ;;  %v594_v28 = vadd.f32 %v889_v23, %v545_v22 }
 0x10d   :  { %v604_v29 = vadd.f32 %v809_v17, %v583_v24  ;;  %v586_v30 = vadd.f32 %v585_v26, %v537_v25 }
 0x10e   :  { %956 = vtanh.f32 %v606_v27  ;;  %v607_v31 = vadd.f32 %v809_v17, %v594_v28  ;;  %v610_v42 = vsub.f32 0.0, %v606_v27 }
 0x10f   :  { %958 = vtanh.f32 %v604_v29  ;;  %v605_v32 = vadd.f32 %v809_v17, %v586_v30  ;;  %v608_v41 = vsub.f32 0.0, %v604_v29 }
 0x110   :  { %960 = vtanh.f32 %v607_v31  ;;  %v616_v45 = vmul.f32 1.442695, %v610_v42  ;;  %v611_v46 = vsub.f32 0.0, %v607_v31 }
 0x111   :  { %962 = vtanh.f32 %v605_v32  ;;  %v612_v43 = vmul.f32 1.442695, %v608_v41  ;;  %v609_v44 = vsub.f32 0.0, %v605_v32 }
 0x112   :  { %v618_v48 = vmul.f32 1.442695, %v611_v46 }
 0x113   :  { %964 = vpow2.f32 %v612_v43  ;;  %v614_v47 = vmul.f32 1.442695, %v609_v44 }
 0x114   :  { %966 = vpow2.f32 %v616_v45 }
 0x115   :  { %968 = vpow2.f32 %v614_v47 }
 0x116   :  { %970 = vpow2.f32 %v618_v48 }
 0x118   :  { %v957_v33 = vpop.eup %956 }
 0x119   :  { %v959_v34 = vpop.eup %958  ;;  %668 = vrot.lane.b32.xlu1 %v957_v33, %s988_s4 }
 0x11a   :  { %664 = vrot.lane.b32.xlu0 %v959_v34, %s988_s4  ;;  %v961_v35 = vpop.eup %960 }
 0x11b   :  { %v963_v36 = vpop.eup %962 }
 0x11d   :  { %670 = vrot.lane.b32.xlu1 %v961_v35, %s988_s4  ;;  %v965_v49 = vpop.eup %964 }
 0x11e   :  { %666 = vrot.lane.b32.xlu0 %v963_v36, %s988_s4  ;;  %v967_v50 = vpop.eup %966  ;;  %v620_v51 = vadd.f32 1.0, %v965_v49 }
 0x11f   :  { %v969_v52 = vpop.eup %968  ;;  %v622_v53 = vadd.f32 1.0, %v967_v50 }
 0x120   :  { %972 = vrcp.f32 %v620_v51  ;;  %v621_v54 = vadd.f32 1.0, %v969_v52  ;;  %v971_v55 = vpop.eup %970 }
 0x121   :  { %646 = vrot.lane.b32.xlu1 %v637_v37, %s989_s23  ;;  %974 = vrcp.f32 %v622_v53  ;;  %v623_v56 = vadd.f32 1.0, %v971_v55 }
 0x122   :  { %644 = vrot.lane.b32.xlu0 %v636_v38, %s989_s23  ;;  %976 = vrcp.f32 %v621_v54 }
 0x123   :  { %978 = vrcp.f32 %v623_v56 }
 0x125   :  { %650 = vrot.lane.b32.xlu1 %v639_v39, %s989_s23 }
 0x126   :  { %648 = vrot.lane.b32.xlu0 %v638_v40, %s989_s23 }
 0x12a   :  { %v973_v57 = vpop.eup %972 }
 0x12b   :  { %v975_v61 = vpop.eup %974 }
 0x12c   :  { %v977_v62 = vpop.eup %976 }
 0x12d   :  { %v979_v3 = vpop.eup %978 }
 0x18b   :  { %v669_v58 = vpop.permute.xlu1 %668 }
 0x18c   :  { %v665_v59 = vpop.permute.xlu0 %664  ;;  %v678_v0 = vmul.f32 %v975_v61, %v669_v58 }
 0x18d   :  { %v676_v60 = vmul.f32 %v973_v57, %v665_v59 }
 0x18f   :  { %684 = vrot.lane.b32.xlu0 %v676_v60, %s989_s23  ;;  %v671_v2 = vpop.permute.xlu1 %670 }
 0x190   :  { %v667_v63 = vpop.permute.xlu0 %666  ;;  %v679_v4 = vmul.f32 %v979_v3, %v671_v2 }
 0x191   :  { %v677_v1 = vmul.f32 %v977_v62, %v667_v63 }
 0x193   :  { %686 = vrot.lane.b32.xlu1 %v677_v1, %s989_s23  ;;  %688 = vrot.lane.b32.xlu0 %v678_v0, %s989_s23  ;;  %v647_v6 = vpop.permute.xlu1 %646 }
 0x194   :  { %v645_v5 = vpop.permute.xlu0 %644  ;;  %v657_v12 = vmul.f32 %v977_v62, %v647_v6 }
 0x195   :  { %v656_v8 = vmul.f32 %v973_v57, %v645_v5 }
 0x197   :  { %690 = vrot.lane.b32.xlu1 %v679_v4, %s989_s23  ;;  %v651_v9 = vpop.permute.xlu1 %650 }
 0x198   :  { %v649_v7 = vpop.permute.xlu0 %648  ;;  %v659_v18 = vmul.f32 %v979_v3, %v651_v9 }
 0x199   :  { %v658_v13 = vmul.f32 %v975_v61, %v649_v7 }
 0x201   :  { %v685_v10 = vpop.permute.xlu0 %684 }
 0x202   :  { %v696_v11 = vadd.f32 %v685_v10, %v656_v8 }
 0x204   :  { %980 = vtanh.f32 %v696_v11 }
 0x205   :  { %v687_v14 = vpop.permute.xlu1 %686  ;;  %v689_v15 = vpop.permute.xlu0 %688 }
 0x206   :  { %v697_v16 = vadd.f32 %v687_v14, %v657_v12  ;;  %v698_v17 = vadd.f32 %v689_v15, %v658_v13 }
 0x208   :  { %982 = vtanh.f32 %v697_v16 }
 0x209   :  { %984 = vtanh.f32 %v698_v17  ;;  %v691_v19 = vpop.permute.xlu1 %690 }
 0x20a   :  { %v699_v20 = vadd.f32 %v691_v19, %v659_v18 }
 0x20c   :  { %986 = vtanh.f32 %v699_v20 }
 0x20e   :  { %v981_v21 = vpop.eup %980 }
 0x20f   :  { %708 = vrot.lane.b32.xlu0 %v981_v21, %s988_s4 }
 0x212   :  { %v983_v22 = vpop.eup %982 }
 0x213   :  { %v985_v23 = vpop.eup %984  ;;  %710 = vrot.lane.b32.xlu1 %v983_v22, %s988_s4 }
 0x214   :  { %712 = vrot.lane.b32.xlu0 %v985_v23, %s988_s4 }
 0x216   :  { %v987_v24 = vpop.eup %986 }
 0x217   :  { %714 = vrot.lane.b32.xlu1 %v987_v24, %s988_s4 }
 0x281   :  { %v709_v25 = vpop.permute.xlu0 %708 }
 0x282   :  { %v720_v26 = vmul.f32 %v973_v57, %v709_v25 }
 0x284   :  { %728 = vrot.lane.b32.xlu0 %v720_v26, %s989_s23 }
 0x285   :  { %v711_v27 = vpop.permute.xlu1 %710 }
 0x286   :  { %v721_v28 = vmul.f32 %v977_v62, %v711_v27  ;;  %v713_v29 = vpop.permute.xlu0 %712 }
 0x287   :  { %v722_v30 = vmul.f32 %v975_v61, %v713_v29 }
 0x288   :  { %730 = vrot.lane.b32.xlu1 %v721_v28, %s989_s23 }
 0x289   :  { %732 = vrot.lane.b32.xlu0 %v722_v30, %s989_s23  ;;  %v715_v31 = vpop.permute.xlu1 %714 }
 0x28a   :  { %v723_v32 = vmul.f32 %v979_v3, %v715_v31 }
 0x28c   :  { %734 = vrot.lane.b32.xlu1 %v723_v32, %s989_s23 }
 0x2f6   :  { %v729_v33 = vpop.permute.xlu0 %728 }
 0x2f7   :  { %v740_v34 = vsel %vm250_vm0, %v729_v33, %v696_v11 }
 0x2f8   :  { %v745_v35 = vsel %vm744_vm1, %v740_v34, 0.0 }
 0x2f9   :  { %749 = vst [vmem:[%s1234_s6] sm:$0xff] %v745_v35 }
 0x2fa   :  { %v731_v36 = vpop.permute.xlu1 %730 }
 0x2fb   :  { %v741_v37 = vsel %vm250_vm0, %v731_v36, %v697_v16  ;;  %v733_v38 = vpop.permute.xlu0 %732 }
 0x2fc   :  { %v746_v39 = vsel %vm744_vm1, %v741_v37, 0.0  ;;  %v742_v40 = vsel %vm250_vm0, %v733_v38, %v698_v17 }
 0x2fd   :  { %750 = vst [vmem:[%s1234_s6 + $0x8] sm:$0xff] %v746_v39  ;;  %v747_v41 = vsel %vm744_vm1, %v742_v40, 0.0 }
 0x2fe   :  { %751 = vst [vmem:[%s1234_s6 + $0x10] sm:$0xff] %v747_v41  ;;  %v735_v42 = vpop.permute.xlu1 %734 }
 0x2ff   :  { %v743_v43 = vsel %vm250_vm0, %v735_v42, %v699_v20 }
 0x300   :  { %v748_v44 = vsel %vm744_vm1, %v743_v43, 0.0 }
 0x301   :  { %752 = vst [vmem:[%s1234_s6 + $0x18] sm:$0xff] %v748_v44 }

// kernel: closed_call.81
= control target key start
LH: loop header
LB: loop body
LE: loop exit
PB: predicated region body
PF: predicated region fallthrough
CT: control target
= control target key end

     0   :  { %v348_v1 = vmov 0.0   ;;  %vm349_vm0 = vmmov 0   ;;  %vm178_vm1 = vcmask 261120   ;;  %s436_s1 = inlined_call_operand.vmem [shape: bf16[288,128], index: 1, kind: input, shape index: {}]   ;;  %s437_s0 = inlined_call_operand.vmem [shape: bf16[8,288], index: 0, kind: input, shape index: {}]   ;;  %s438_s2 = inlined_call_operand.vmem [shape: f32[1,128], index: 2, kind: input, shape index: {}]   ;;  %s439_s3 = inlined_call_operand.vmem [shape: bf16[8,128], index: 3, kind: output, shape index: {}]  }
   0x1   :  { %v327_v0 = vld [vmem:[%s436_s1 + $0x40] sm:$0xff]   ;;  %317 = vmatprep.subr.bf16.mxu1 %v348_v1  ;;  %321 = vmatprep.mubr.msk.bf16.mxu1 %vm349_vm0, %v348_v1  ;;  %v329_v3 = vld [vmem:[%s436_s1 + $0x48] sm:$0xff]   ;;  %v331_v5 = vld [vmem:[%s436_s1 + $0x50] sm:$0xff]  }
   0x2   :  { %v328_v2 = vld [vmem:[%s436_s1] sm:$0xff]   ;;  %292 = vmatprep.subr.bf16.mxu0 %v327_v0  ;;  %v330_v4 = vld [vmem:[%s436_s1 + $0x8] sm:$0xff]   ;;  %v332_v6 = vld [vmem:[%s436_s1 + $0x10] sm:$0xff]  }
   0x3   :  { %293 = vmatpush3.bf16.msra.mxu0 %v328_v2  ;;  %v333_v7 = vld [vmem:[%s436_s1 + $0x58] sm:$0xff]   ;;  %v335_v9 = vld [vmem:[%s436_s1 + $0x60] sm:$0xff]   ;;  %v337_v12 = vld [vmem:[%s436_s1 + $0x68] sm:$0xff]  }
   0x4   :  { %294 = vmatprep.subr.bf16.mxu0 %v329_v3  ;;  %v334_v8 = vld [vmem:[%s436_s1 + $0x18] sm:$0xff]   ;;  %v341_v10 = vld [vmem:[%s436_s1 + $0x80] sm:$0xff]   ;;  %v347_v15 = vld [vmem:[%s436_s1 + $0x88] sm:$0xff]  }
   0x5   :  { %v336_v11 = vld [vmem:[%s436_s1 + $0x20] sm:$0xff]   ;;  %318 = vmatpush3.bf16.msra.mxu1 %v341_v10  ;;  %v338_v16 = vld [vmem:[%s436_s1 + $0x28] sm:$0xff]   ;;  %v339_v17 = vld [vmem:[%s436_s1 + $0x70] sm:$0xff]  }
   0x6   :  { %319 = vmatprep.subr.bf16.mxu1 %v348_v1  ;;  %v15_v13 = vld [vmem:[%s437_s0] sm:$0xff]  ;;  %v346_v18 = vld [vmem:[%s437_s0 + $0x8] ss:$0 sps:$4 sm:$0xff]   ;;  %v340_v19 = vld [vmem:[%s436_s1 + $0x30] sm:$0xff]  }
   0x7   :  { %295 = vmatpush3.bf16.msra.mxu0 %v330_v4  ;;  %v271_v14 = vcombine.high %v15_v13, %v15_v13  ;;  %v342_v20 = vld [vmem:[%s436_s1 + $0x78] sm:$0xff]   ;;  %v270_v22 = vcombine.low %v15_v13, %v15_v13  ;;  %v269_v29 = vld [vmem:[%s438_s2] ss:$0 sm:$0xff] }
   0x8   :  { %296 = vmatprep.subr.bf16.mxu0 %v331_v5  ;;  %v343_v21 = vld [vmem:[%s436_s1 + $0x38] sm:$0xff]  }
   0x9   :  { %214 = vmatprep.mubr.bf16.mxu0 %v271_v14  ;;  %320 = vmatpush3.bf16.msra.mxu1 %v347_v15 }
   0xb   :  { %297 = vmatpush3.bf16.msra.mxu0 %v332_v6 }
   0xc   :  { %298 = vmatprep.subr.bf16.mxu0 %v333_v7  ;;  %322 = vmatmul.mubr.msk.bf16.vlgmr.msra.gmra.mrb[0].mxu1 %vm178_vm1, %v346_v18 }
   0xf   :  { %299 = vmatpush3.bf16.msra.mxu0 %v334_v8 }
  0x10   :  { %300 = vmatprep.subr.bf16.mxu0 %v335_v9 }
  0x13   :  { %301 = vmatpush3.bf16.msra.mxu0 %v336_v11 }
  0x14   :  { %302 = vmatprep.subr.bf16.mxu0 %v337_v12 }
  0x17   :  { %303 = vmatpush3.bf16.msra.mxu0 %v338_v16 }
  0x18   :  { %304 = vmatprep.subr.bf16.mxu0 %v339_v17 }
  0x1b   :  { %305 = vmatpush3.bf16.msra.mxu0 %v340_v19 }
  0x1c   :  { %306 = vmatprep.subr.bf16.mxu0 %v342_v20 }
  0x1f   :  { %307 = vmatpush3.bf16.msra.mxu0 %v343_v21 }
  0x22   :  { %215 = vmatmul.mubr.bf16.vlgmr.msra.gmra.mrb[0].mxu0 %v270_v22 }
  0xdf   :  { %v256_v23 = vpop.f32.mrb[0].mxu1 }
  0xe0   :  { %v323_v24 = vpop.f32.mrb[1].mxu1 }
  0xe1   :  { %v259_v25 = vpop.f32.mrb[2].mxu1 }
  0xe2   :  { %v324_v26 = vpop.f32.mrb[3].mxu1 }
  0xf5   :  { %v308_v27 = vpop.f32.mrb[0].mxu0 }
  0xf6   :  { %v309_v28 = vpop.f32.mrb[1].mxu0 }
  0xf7   :  { %v310_v30 = vadd.f32 %v309_v28, %v308_v27  ;;  %v311_v31 = vpop.f32.mrb[2].mxu0 }
  0xf8   :  { %v312_v32 = vpop.f32.mrb[3].mxu0 }
  0xf9   :  { %v217_v33 = vadd.f32 %v310_v30, %v269_v29 }
  0xfb   :  { %v257_v34 = vadd.f32 %v256_v23, %v217_v33 }
  0xfd   :  { %v262_v35 = vmax.f32 %v257_v34, 0.0 }
  0xff   :  { %v263_v36 = vpack.c.bf16 %v262_v35, %v262_v35 }
 0x101   :  { %264 = vst [vmem:[%s439_s3] sm:$0xf] %v263_v36 }

// kernel: closed_call.82
= control target key start
LH: loop header
LB: loop body
LE: loop exit
PB: predicated region body
PF: predicated region fallthrough
CT: control target
= control target key end

     0   :  { %v717_v0 = vmov 0.0   ;;  %vm718_vm0 = vmmov 0   ;;  %vm218_vm1 = vcmask 261120   ;;  %s719_s27 = smov 64   ;;  %s720_s30 = smov 32   ;;  %vm545_vm2 = vcmask 523264   ;;  %s896_s3 = inlined_call_operand.vmem [shape: bf16[288,128], index: 3, kind: input, shape index: {}]   ;;  %s897_s2 = inlined_call_operand.vmem [shape: bf16[8,288], index: 2, kind: input, shape index: {}]   ;;  %s898_s1 = inlined_call_operand.vmem [shape: bf16[288,128], index: 1, kind: input, shape index: {}]   ;;  %s899_s0 = inlined_call_operand.vmem [shape: bf16[8,288], index: 0, kind: input, shape index: {}]   ;;  %s900_s4 = inlined_call_operand.vmem [shape: f32[1,128], index: 4, kind: input, shape index: {}]   ;;  %s901_s5 = inlined_call_operand.vmem [shape: f32[8,32], index: 5, kind: input, shape index: {}]   ;;  %s902_s6 = inlined_call_operand.vmem [shape: f32[8,128], index: 6, kind: output, shape index: {}]  }
   0x1   :  { %647 = vmatprep.subr.bf16.mxu1 %v717_v0  ;;  %v667_v1 = vld [vmem:[%s896_s3 + $0x40] sm:$0xff]   ;;  %651 = vmatprep.mubr.msk.bf16.mxu1 %vm718_vm0, %v717_v0  ;;  %v670_v4 = vld [vmem:[%s896_s3 + $0x48] sm:$0xff]   ;;  %v675_v9 = vld [vmem:[%s896_s3 + $0x50] sm:$0xff]  }
   0x2   :  { %v668_v2 = vld [vmem:[%s896_s3 + $0x80] sm:$0xff]   ;;  %597 = vmatprep.subr.bf16.mxu0 %v667_v1  ;;  %v671_v5 = vld [vmem:[%s896_s3 + $0x88] sm:$0xff]   ;;  %v677_v11 = vld [vmem:[%s896_s3 + $0x10] sm:$0xff]  }
   0x3   :  { %v669_v3 = vld [vmem:[%s896_s3] sm:$0xff]   ;;  %648 = vmatpush3.bf16.msra.mxu1 %v668_v2  ;;  %v672_v6 = vld [vmem:[%s896_s3 + $0x8] sm:$0xff]   ;;  %v679_v13 = vld [vmem:[%s896_s3 + $0x58] sm:$0xff]  }
   0x4   :  { %598 = vmatpush3.bf16.msra.mxu0 %v669_v3  ;;  %649 = vmatprep.subr.bf16.mxu1 %v717_v0  ;;  %v673_v7 = vld [vmem:[%s897_s2 + $0x8] ss:$0 sps:$4 sm:$0xff]   ;;  %v674_v8 = vld [vmem:[%s898_s1 + $0x40] sm:$0xff]   ;;  %v681_v15 = vld [vmem:[%s896_s3 + $0x18] sm:$0xff]  }
   0x5   :  { %599 = vmatprep.subr.bf16.mxu0 %v670_v4  ;;  %v676_v10 = vld [vmem:[%s898_s1] sm:$0xff]   ;;  %v678_v12 = vld [vmem:[%s898_s1 + $0x48] sm:$0xff]   ;;  %v682_v16 = vld [vmem:[%s898_s1 + $0x50] sm:$0xff]  }
   0x6   :  { %v680_v14 = vld [vmem:[%s898_s1 + $0x8] sm:$0xff]   ;;  %v683_v17 = vld [vmem:[%s896_s3 + $0x60] sm:$0xff]   ;;  %v684_v18 = vld [vmem:[%s898_s1 + $0x10] sm:$0xff]  }
   0x7   :  { %650 = vmatpush3.bf16.msra.mxu1 %v671_v5  ;;  %v685_v19 = vld [vmem:[%s896_s3 + $0x20] sm:$0xff]   ;;  %v686_v20 = vld [vmem:[%s898_s1 + $0x58] sm:$0xff]   ;;  %v687_v21 = vld [vmem:[%s896_s3 + $0x68] sm:$0xff]  }
   0x8   :  { %600 = vmatpush3.bf16.msra.mxu0 %v672_v6  ;;  %622 = vmatprep.subr.bf16.mxu1 %v674_v8  ;;  %v688_v22 = vld [vmem:[%s898_s1 + $0x18] sm:$0xff]   ;;  %v689_v23 = vld [vmem:[%s896_s3 + $0x28] sm:$0xff]   ;;  %v690_v24 = vld [vmem:[%s898_s1 + $0x60] sm:$0xff]  }
   0x9   :  { %601 = vmatprep.subr.bf16.mxu0 %v675_v9  ;;  %v691_v25 = vld [vmem:[%s896_s3 + $0x70] sm:$0xff]   ;;  %v692_v26 = vld [vmem:[%s898_s1 + $0x20] sm:$0xff]   ;;  %v694_v28 = vld [vmem:[%s898_s1 + $0x68] sm:$0xff]  }
   0xa   :  { %652 = vmatmul.mubr.msk.bf16.vlgmr.msra.gmra.mrb[0].mxu1 %vm218_vm1, %v673_v7  ;;  %v693_v27 = vld [vmem:[%s896_s3 + $0x30] sm:$0xff]   ;;  %v695_v29 = vld [vmem:[%s896_s3 + $0x78] sm:$0xff]   ;;  %v696_v30 = vld [vmem:[%s898_s1 + $0x28] sm:$0xff]  }
   0xb   :  { %623 = vmatpush3.bf16.msra.mxu1 %v676_v10  ;;  %v697_v31 = vld [vmem:[%s896_s3 + $0x38] sm:$0xff]   ;;  %v62_v32 = vld [vmem:[%s897_s2] sm:$0xff]  ;;  %v700_v35 = vld [vmem:[%s898_s1 + $0x70] sm:$0xff]  }
   0xc   :  { %602 = vmatpush3.bf16.msra.mxu0 %v677_v11  ;;  %624 = vmatprep.subr.bf16.mxu1 %v678_v12  ;;  %v552_v33 = vcombine.low %v62_v32, %v62_v32  ;;  %v553_v34 = vcombine.high %v62_v32, %v62_v32  ;;  %v701_v36 = vld [vmem:[%s898_s1 + $0x30] sm:$0xff]   ;;  %v702_v37 = vld [vmem:[%s898_s1 + $0x80] sm:$0xff]   ;;  %v703_v38 = vld [vmem:[%s898_s1 + $0x78] sm:$0xff]  }
   0xd   :  { %603 = vmatprep.subr.bf16.mxu0 %v679_v13  ;;  %v704_v39 = vld [vmem:[%s898_s1 + $0x38] sm:$0xff]   ;;  %v24_v40 = vld [vmem:[%s899_s0] sm:$0xff]  ;;  %v708_v42 = vld [vmem:[%s898_s1 + $0x88] sm:$0xff]  }
   0xe   :  { %254 = vmatprep.mubr.bf16.mxu0 %v553_v34  ;;  %v575_v41 = vcombine.high %v24_v40, %v24_v40  ;;  %v574_v43 = vcombine.low %v24_v40, %v24_v40  ;;  %v707_v44 = vld [vmem:[%s899_s0 + $0x8] ss:$0 sps:$4 sm:$0xff]   ;;  %v596_v1 = vld [vmem:[%s900_s4] ss:$0 sm:$0xff] }
   0xf   :  { %625 = vmatpush3.bf16.msra.mxu1 %v680_v14  ;;  %v518_v5 = vld [vmem:[%s901_s5] sm:$0xff] }
  0x10   :  { %604 = vmatpush3.bf16.msra.mxu0 %v681_v15  ;;  %626 = vmatprep.subr.bf16.mxu1 %v682_v16 }
  0x11   :  { %605 = vmatprep.subr.bf16.mxu0 %v683_v17  ;;  %455 = vmatprep.mubr.bf16.mxu1 %v575_v41 }
  0x13   :  { %627 = vmatpush3.bf16.msra.mxu1 %v684_v18 }
  0x14   :  { %606 = vmatpush3.bf16.msra.mxu0 %v685_v19  ;;  %628 = vmatprep.subr.bf16.mxu1 %v686_v20 }
  0x15   :  { %607 = vmatprep.subr.bf16.mxu0 %v687_v21 }
  0x17   :  { %629 = vmatpush3.bf16.msra.mxu1 %v688_v22 }
  0x18   :  { %608 = vmatpush3.bf16.msra.mxu0 %v689_v23  ;;  %630 = vmatprep.subr.bf16.mxu1 %v690_v24 }
  0x19   :  { %609 = vmatprep.subr.bf16.mxu0 %v691_v25 }
  0x1b   :  { %631 = vmatpush3.bf16.msra.mxu1 %v692_v26 }
  0x1c   :  { %610 = vmatpush3.bf16.msra.mxu0 %v693_v27  ;;  %632 = vmatprep.subr.bf16.mxu1 %v694_v28 }
  0x1d   :  { %611 = vmatprep.subr.bf16.mxu0 %v695_v29 }
  0x1f   :  { %633 = vmatpush3.bf16.msra.mxu1 %v696_v30 }
  0x20   :  { %612 = vmatpush3.bf16.msra.mxu0 %v697_v31  ;;  %634 = vmatprep.subr.bf16.mxu1 %v700_v35 }
  0x21   :  { %655 = vmatprep.subr.bf16.mxu0 %v717_v0 }
  0x23   :  { %255 = vmatmul.mubr.bf16.vlgmr.msra.gmra.mrb[0].mxu0 %v552_v33  ;;  %635 = vmatpush3.bf16.msra.mxu1 %v701_v36 }
  0x24   :  { %656 = vmatpush3.bf16.msra.mxu0 %v702_v37  ;;  %636 = vmatprep.subr.bf16.mxu1 %v703_v38 }
  0x25   :  { %657 = vmatprep.subr.bf16.mxu0 %v717_v0  ;;  %659 = vmatprep.mubr.msk.bf16.mxu0 %vm718_vm0, %v717_v0 }
  0x27   :  { %637 = vmatpush3.bf16.msra.mxu1 %v704_v39 }
  0x28   :  { %658 = vmatpush3.bf16.msra.mxu0 %v708_v42 }
  0x2a   :  { %456 = vmatmul.mubr.bf16.vlgmr.msra.gmra.mrb[4].mxu1 %v574_v43 }
  0x2b   :  { %660 = vmatmul.mubr.msk.bf16.vlgmr.msra.gmra.mrb[4].mxu0 %vm218_vm1, %v707_v44 }
  0xdd   :  { %v296_v45 = vpop.f32.mrb[0].mxu1 }
  0xde   :  { %v653_v46 = vpop.f32.mrb[1].mxu1 }
  0xdf   :  { %v299_v47 = vpop.f32.mrb[2].mxu1 }
  0xe0   :  { %v654_v48 = vpop.f32.mrb[3].mxu1 }
  0xf6   :  { %v613_v49 = vpop.f32.mrb[0].mxu0 }
  0xf7   :  { %v614_v50 = vpop.f32.mrb[1].mxu0 }
  0xf8   :  { %v615_v51 = vadd.f32 %v614_v50, %v613_v49  ;;  %v616_v52 = vpop.f32.mrb[2].mxu0 }
  0xf9   :  { %v617_v53 = vpop.f32.mrb[3].mxu0 }
  0xfa   :  { %v297_v54 = vadd.f32 %v615_v51, %v296_v45 }
  0xfd   :  { %v638_v55 = vpop.f32.mrb[4].mxu1 }
  0xfe   :  { %v639_v56 = vpop.f32.mrb[5].mxu1  ;;  %v497_v57 = vpop.f32.mrb[4].mxu0 }
  0xff   :  { %v640_v58 = vadd.f32 %v639_v56, %v638_v55  ;;  %v641_v59 = vpop.f32.mrb[6].mxu1  ;;  %v661_v60 = vpop.f32.mrb[5].mxu0 }
 0x100   :  { %v642_v61 = vpop.f32.mrb[7].mxu1  ;;  %v500_v62 = vpop.f32.mrb[6].mxu0 }
 0x101   :  { %v458_v63 = vadd.f32 %v640_v58, %v297_v54  ;;  %v662_v0 = vpop.f32.mrb[7].mxu0 }
 0x103   :  { %v498_v2 = vadd.f32 %v497_v57, %v458_v63 }
 0x105   :  { %v510_v3 = vadd.f32 %v596_v1, %v498_v2 }
 0x107   :  { %709 = vtanh.f32 %v510_v3  ;;  %v511_v6 = vsub.f32 0.0, %v510_v3 }
 0x109   :  { %v512_v7 = vmul.f32 1.442695, %v511_v6 }
 0x10b   :  { %711 = vpow2.f32 %v512_v7 }
 0x111   :  { %v710_v4 = vpop.eup %709 }
 0x112   :  { %525 = vrot.lane.b32.xlu0 %v710_v4, %s719_s27 }
 0x115   :  { %v712_v8 = vpop.eup %711 }
 0x116   :  { %520 = vrot.lane.b32.xlu0 %v518_v5, %s720_s30  ;;  %v514_v9 = vadd.f32 1.0, %v712_v8 }
 0x118   :  { %713 = vrcp.f32 %v514_v9 }
 0x122   :  { %v714_v10 = vpop.eup %713 }
 0x184   :  { %v526_v11 = vpop.permute.xlu0 %525 }
 0x185   :  { %v528_v12 = vmul.f32 %v714_v10, %v526_v11 }
 0x187   :  { %530 = vrot.lane.b32.xlu1 %v528_v12, %s720_s30 }
 0x188   :  { %v521_v13 = vpop.permute.xlu0 %520 }
 0x189   :  { %v523_v14 = vmul.f32 %v714_v10, %v521_v13 }
 0x1f9   :  { %v531_v15 = vpop.permute.xlu1 %530 }
 0x1fa   :  { %v533_v16 = vadd.f32 %v531_v15, %v523_v14 }
 0x1fc   :  { %715 = vtanh.f32 %v533_v16 }
 0x206   :  { %v716_v17 = vpop.eup %715 }
 0x207   :  { %536 = vrot.lane.b32.xlu1 %v716_v17, %s719_s27 }
 0x279   :  { %v537_v18 = vpop.permute.xlu1 %536 }
 0x27a   :  { %v539_v19 = vmul.f32 %v714_v10, %v537_v18 }
 0x27c   :  { %541 = vrot.lane.b32.xlu0 %v539_v19, %s720_s30 }
 0x2ee   :  { %v542_v20 = vpop.permute.xlu0 %541 }
 0x2ef   :  { %v544_v21 = vsel %vm218_vm1, %v542_v20, %v533_v16 }
 0x2f0   :  { %v546_v22 = vsel %vm545_vm2, %v544_v21, 0.0 }
 0x2f1   :  { %547 = vst [vmem:[%s902_s6] sm:$0xff] %v546_v22 }

</bundles_post_ra>
